<compile_context>
chip_gen: v7x
topology: tpu7x:2x2x1
jax: 0.10.0
libtpu: 0.0.40
codegen_flags: <defaults>
</compile_context>

<pallas_src>
import jax
import jax.numpy as jnp
import numpy as np
from jax import lax
from jax.experimental import pallas as pl
from jax.experimental.pallas import tpu as pltpu

EPS = 1e-5
C = 288                 # real channels
CP = 384                # channels padded to 3 * 128 lanes
GROUPS = 18
CG = C // GROUPS        # 16 channels per group
H = W = 14              # spatial size of the module's input
WP = 16                 # padded row width (multiple of 8 sublanes)
N = 1                   # batch size
MP = H * WP             # 224 rows in the padded-row flattening
PAD_TOP = 24            # zero rows above the interior of the conv slab
SLAB_ROWS = PAD_TOP + MP + 24   # 272
NVALID = H * W          # 196 valid pixels for the BN statistics
HIGH = jax.lax.Precision.HIGHEST    # used only by the pure-JAX reference


def fused_kernel(x_ref, w1_ref, g1_ref, b1_ref, w2_ref, g2_ref, b2_ref,
                 o_ref, slab_ref):
    # validity mask: within each 16-wide padded row, columns 14,15 are junk
    row_ids = lax.broadcasted_iota(jnp.int32, (MP, 1), 0)
    valid = (row_ids & (WP - 1)) < W                     # (224, 1) bool
    inv_n = 1.0 / NVALID

    # ---- stage 1: ReLU -> 1x1 conv -> BN(train) -> ReLU (fused, one pass) --
    x = jnp.maximum(x_ref[...], 0.0).astype(jnp.bfloat16)          # (224, 288)
    y = jnp.dot(x, w1_ref[...], preferred_element_type=jnp.float32)  # (224, 384)
    # junk rows of x are zero, so plain sums over 224 rows == sums over the
    # 196 valid pixels
    mean1 = jnp.sum(y, axis=0, keepdims=True) * inv_n
    msq1 = jnp.sum(y * y, axis=0, keepdims=True) * inv_n
    var1 = msq1 - mean1 * mean1
    scale1 = g1_ref[...] * lax.rsqrt(var1 + EPS)
    bias1 = b1_ref[...] - mean1 * scale1
    z = jnp.where(valid, jnp.maximum(y * scale1 + bias1, 0.0), 0.0)  # (224, 384)

    # ---- build the zero-bordered conv slab (rows stride 16 == image rows) --
    slab_ref[0:PAD_TOP, :] = jnp.zeros((PAD_TOP, CP), jnp.float32)
    slab_ref[PAD_TOP + MP:SLAB_ROWS, :] = jnp.zeros(
        (SLAB_ROWS - PAD_TOP - MP, CP), jnp.float32)
    slab_ref[PAD_TOP:PAD_TOP + MP, :] = z                 # aligned copy

    # ---- stage 2: 3x3 grouped conv as 9 shifted slices x 3 lane blocks ----
    accs = [jnp.zeros((MP, 128), jnp.float32) for _ in range(3)]
    for dy in range(3):
        for dx in range(3):
            start = PAD_TOP + (dy - 1) * WP + (dx - 1)    # static offset
            xs = slab_ref[start:start + MP, :].astype(jnp.bfloat16)
            t = dy * 3 + dx
            for b in range(3):
                accs[b] = accs[b] + jnp.dot(
                    xs[:, b * 128:(b + 1) * 128], w2_ref[t, b],
                    preferred_element_type=jnp.float32)
    acc = jnp.concatenate(accs, axis=1)                   # (224, 384)

    # ---- stage-2 BN(train), one pass, masking the junk columns ------------
    acc_m = jnp.where(valid, acc, 0.0)
    mean2 = jnp.sum(acc_m, axis=0, keepdims=True) * inv_n
    msq2 = jnp.sum(acc_m * acc_m, axis=0, keepdims=True) * inv_n
    var2 = msq2 - mean2 * mean2
    scale2 = g2_ref[...] * lax.rsqrt(var2 + EPS)
    bias2 = b2_ref[...] - mean2 * scale2
    o_ref[...] = acc * scale2 + bias2


def model_forward(x_nchw, params):
    """x_nchw: (1, 288, 14, 14) float32 -> (1, 288, 14, 14) float32."""
    w1, g1, b1, w2, g2, b2 = params
    n, c, h, w = x_nchw.shape
    assert (n, c, h, w) == (N, C, H, W)

    vmem = pl.BlockSpec(memory_space=pltpu.MemorySpace.VMEM)

    # NCHW -> NHWC -> pad W 14->16 with zeros -> (224, 288) rows (cheap glue)
    x_nhwc = jnp.transpose(x_nchw, (0, 2, 3, 1))
    x_rows = jnp.pad(x_nhwc, ((0, 0), (0, 0), (0, WP - W), (0, 0))) \
                .reshape(h * WP, c)

    out = pl.pallas_call(
        fused_kernel,
        out_shape=jax.ShapeDtypeStruct((MP, CP), jnp.float32),
        in_specs=[vmem] * 7,
        out_specs=vmem,
        scratch_shapes=[pltpu.VMEM((SLAB_ROWS, CP), jnp.float32)],
    )(x_rows, w1, g1, b1, w2, g2, b2)

    # (224, 384) -> (14, 14, 288) -> NCHW
    y = out.reshape(h, WP, CP)[:, :W, :C]
    return jnp.transpose(y, (2, 0, 1))[jnp.newaxis]


def make_params(key):
    k1, k2, kg1, kb1, kg2, kb2 = jax.random.split(key, 6)
    # 1x1 conv weight, torch layout (Cout, Cin, 1, 1) -> kept as (Cout, Cin)
    w1_oi = jax.random.normal(k1, (C, C), jnp.float32) * 0.05
    # grouped 3x3 conv weight, torch layout (Cout, Cin/groups, 3, 3)
    w2_oihw = jax.random.normal(k2, (C, CG, 3, 3), jnp.float32) * 0.05
    gamma1 = 1.0 + 0.1 * jax.random.normal(kg1, (C,), jnp.float32)
    beta1 = 0.1 * jax.random.normal(kb1, (C,), jnp.float32)
    gamma2 = 1.0 + 0.1 * jax.random.normal(kg2, (C,), jnp.float32)
    beta2 = 0.1 * jax.random.normal(kb2, (C,), jnp.float32)

    # 1x1 conv as a (Cin, Cout_padded) bf16 matmul weight
    w1 = np.zeros((C, CP), np.float32)
    w1[:, :C] = np.asarray(w1_oi).T

    # grouped 3x3 conv: per tap, 3 lane-blocks of (128,128); 16-channel groups
    # sit block-diagonally inside each 128 block (channels are already ordered
    # group-major, so no reordering is needed).
    w2_np = np.asarray(w2_oihw)
    w2 = np.zeros((9, 3, 128, 128), np.float32)
    for g in range(GROUPS):
        blk, lo = divmod(g * CG, 128)
        for dy in range(3):
            for dx in range(3):
                t = dy * 3 + dx
                # torch block (co_local, ci_local) -> transpose to (ci, co)
                w2[t, blk, lo:lo + CG, lo:lo + CG] = \
                    w2_np[g * CG:(g + 1) * CG, :, dy, dx].T

    def pad_c(v):
        out = np.zeros((1, CP), np.float32)
        out[0, :C] = np.asarray(v)
        return jnp.asarray(out)

    params = (jnp.asarray(w1, jnp.bfloat16), pad_c(gamma1), pad_c(beta1),
              jnp.asarray(w2, jnp.bfloat16), pad_c(gamma2), pad_c(beta2))
    raw = (w1_oi.reshape(C, C, 1, 1), w2_oihw, gamma1, beta1, gamma2, beta2)
    return params, raw


def reference(x_nchw, raw_params):
    """Pure-JAX reference matching the PyTorch forward (training-mode BN)."""
    w1_oihw, w2_oihw, g1, b1, g2, b2 = raw_params
    dn = ('NCHW', 'OIHW', 'NCHW')

    def bn(x, gamma, beta):
        mean = x.mean(axis=(0, 2, 3), keepdims=True)
        var = ((x - mean) ** 2).mean(axis=(0, 2, 3), keepdims=True)
        return ((x - mean) / jnp.sqrt(var + EPS)
                * gamma.reshape(1, C, 1, 1) + beta.reshape(1, C, 1, 1))

    x89 = jnp.maximum(x_nchw, 0.0)
    x90 = lax.conv_general_dilated(x89, w1_oihw, (1, 1), 'VALID',
                                   dimension_numbers=dn, precision=HIGH)
    x91 = bn(x90, g1, b1)
    x92 = jnp.maximum(x91, 0.0)
    x93 = lax.conv_general_dilated(x92, w2_oihw, (1, 1), ((1, 1), (1, 1)),
                                   dimension_numbers=dn,
                                   feature_group_count=GROUPS, precision=HIGH)
    return bn(x93, g2, b2)


if __name__ == "__main__":
    key = jax.random.PRNGKey(0)
    kx, kp = jax.random.split(key)
    x = jax.random.normal(kx, (N, C, H, W), jnp.float32)
    params, raw_params = make_params(kp)

    out = jax.block_until_ready(jax.jit(model_forward)(x, params))
    assert out.shape == (N, C, H, W), out.shape

    ref = jax.block_until_ready(reference(x, raw_params))
    np.testing.assert_allclose(np.asarray(out), np.asarray(ref),
                               rtol=5e-2, atol=5e-2)
    print("KERNEL_OK")
</pallas_src>

<mosaic_0001>
module attributes {stable_mosaic.version = 11 : i64} {
  func.func @fused_kernel(%arg0: memref<224x288xf32, #tpu.memory_space<vmem>>, %arg1: memref<288x384xbf16, #tpu.memory_space<vmem>>, %arg2: memref<1x384xf32, #tpu.memory_space<vmem>>, %arg3: memref<1x384xf32, #tpu.memory_space<vmem>>, %arg4: memref<9x3x128x128xbf16, #tpu.memory_space<vmem>>, %arg5: memref<1x384xf32, #tpu.memory_space<vmem>>, %arg6: memref<1x384xf32, #tpu.memory_space<vmem>>, %arg7: memref<224x384xf32, #tpu.memory_space<vmem>>, %arg8: memref<272x384xf32, #tpu.memory_space<vmem>>) attributes {dimension_semantics = [], scalar_prefetch = 0 : i64, scratch_operands = 1 : i64, tpu.core_type = #tpu.core_type<tc>} {
    %0 = tpu.iota {dimensions = array<i32: 0>} : vector<224x1xi32>
    %c15_i32 = arith.constant 15 : i32
    %1 = vector.broadcast %c15_i32 : i32 to vector<224x1xi32>
    %2 = arith.andi %0, %1 : vector<224x1xi32>
    %c14_i32 = arith.constant 14 : i32
    %3 = vector.broadcast %c14_i32 : i32 to vector<224x1xi32>
    %4 = arith.cmpi slt, %2, %3 : vector<224x1xi32>
    %c0 = arith.constant 0 : index
    %c0_0 = arith.constant 0 : index
    %5 = vector.load %arg0[%c0, %c0_0] : memref<224x288xf32, #tpu.memory_space<vmem>>, vector<224x288xf32>
    %cst = arith.constant 0.000000e+00 : f32
    %6 = vector.broadcast %cst : f32 to vector<224x288xf32>
    %7 = arith.maximumf %5, %6 : vector<224x288xf32>
    %8 = arith.truncf %7 : vector<224x288xf32> to vector<224x288xbf16>
    %c0_1 = arith.constant 0 : index
    %c0_2 = arith.constant 0 : index
    %9 = vector.load %arg1[%c0_1, %c0_2] : memref<288x384xbf16, #tpu.memory_space<vmem>>, vector<288x384xbf16>
    %cst_3 = arith.constant dense<0.000000e+00> : vector<224x384xf32>
    %10 = tpu.matmul %8, %9, %cst_3 {dimension_numbers = #tpu.dot_dimension_numbers<[1], [0], [0], [1], [0, 0, 1, 1], [], []>} : vector<224x288xbf16>, vector<288x384xbf16>, vector<224x384xf32> -> vector<224x384xf32>
    %cst_4 = arith.constant dense<0.000000e+00> : vector<384xf32>
    %11 = vector.multi_reduction <add>, %10, %cst_4 [0] : vector<224x384xf32> to vector<384xf32>
    %12 = vector.shape_cast %11 : vector<384xf32> to vector<1x384xf32>
    %cst_5 = arith.constant 0.00510204071 : f32
    %13 = vector.broadcast %cst_5 : f32 to vector<1x384xf32>
    %14 = arith.mulf %12, %13 : vector<1x384xf32>
    %15 = arith.mulf %10, %10 : vector<224x384xf32>
    %cst_6 = arith.constant dense<0.000000e+00> : vector<384xf32>
    %16 = vector.multi_reduction <add>, %15, %cst_6 [0] : vector<224x384xf32> to vector<384xf32>
    %17 = vector.shape_cast %16 : vector<384xf32> to vector<1x384xf32>
    %cst_7 = arith.constant 0.00510204071 : f32
    %18 = vector.broadcast %cst_7 : f32 to vector<1x384xf32>
    %19 = arith.mulf %17, %18 : vector<1x384xf32>
    %20 = arith.mulf %14, %14 : vector<1x384xf32>
    %21 = arith.subf %19, %20 : vector<1x384xf32>
    %c0_8 = arith.constant 0 : index
    %c0_9 = arith.constant 0 : index
    %22 = vector.load %arg2[%c0_8, %c0_9] : memref<1x384xf32, #tpu.memory_space<vmem>>, vector<1x384xf32>
    %cst_10 = arith.constant 9.99999974E-6 : f32
    %23 = vector.broadcast %cst_10 : f32 to vector<1x384xf32>
    %24 = arith.addf %21, %23 : vector<1x384xf32>
    %25 = math.rsqrt %24 : vector<1x384xf32>
    %26 = arith.mulf %22, %25 : vector<1x384xf32>
    %c0_11 = arith.constant 0 : index
    %c0_12 = arith.constant 0 : index
    %27 = vector.load %arg3[%c0_11, %c0_12] : memref<1x384xf32, #tpu.memory_space<vmem>>, vector<1x384xf32>
    %28 = arith.mulf %14, %26 : vector<1x384xf32>
    %29 = arith.subf %27, %28 : vector<1x384xf32>
    %30 = vector.broadcast %26 : vector<1x384xf32> to vector<224x384xf32>
    %31 = arith.mulf %10, %30 : vector<224x384xf32>
    %32 = vector.broadcast %29 : vector<1x384xf32> to vector<224x384xf32>
    %33 = arith.addf %31, %32 : vector<224x384xf32>
    %cst_13 = arith.constant 0.000000e+00 : f32
    %34 = vector.broadcast %cst_13 : f32 to vector<224x384xf32>
    %35 = arith.maximumf %33, %34 : vector<224x384xf32>
    %cst_14 = arith.constant 0.000000e+00 : f32
    %36 = vector.shape_cast %4 : vector<224x1xi1> to vector<224x1xi1>
    %37 = vector.broadcast %36 : vector<224x1xi1> to vector<224x384xi1>
    %38 = vector.broadcast %cst_14 : f32 to vector<224x384xf32>
    %39 = arith.select %37, %35, %38 : vector<224x384xi1>, vector<224x384xf32>
    %cst_15 = arith.constant 0.000000e+00 : f32
    %40 = vector.broadcast %cst_15 : f32 to vector<24x384xf32>
    %c0_16 = arith.constant 0 : index
    %c0_17 = arith.constant 0 : index
    %41 = vector.load %arg8[%c0_16, %c0_17] : memref<272x384xf32, #tpu.memory_space<vmem>>, vector<24x384xf32>
    tpu.vector_store %arg8[%c0_16, %c0_17], %40 {strides = array<i32>} : memref<272x384xf32, #tpu.memory_space<vmem>>, vector<24x384xf32>,
    %cst_18 = arith.constant 0.000000e+00 : f32
    %42 = vector.broadcast %cst_18 : f32 to vector<24x384xf32>
    %c248 = arith.constant 248 : index
    %c0_19 = arith.constant 0 : index
    %43 = vector.load %arg8[%c248, %c0_19] : memref<272x384xf32, #tpu.memory_space<vmem>>, vector<24x384xf32>
    tpu.vector_store %arg8[%c248, %c0_19], %42 {strides = array<i32>} : memref<272x384xf32, #tpu.memory_space<vmem>>, vector<24x384xf32>,
    %c24 = arith.constant 24 : index
    %c0_20 = arith.constant 0 : index
    %44 = vector.load %arg8[%c24, %c0_20] : memref<272x384xf32, #tpu.memory_space<vmem>>, vector<224x384xf32>
    tpu.vector_store %arg8[%c24, %c0_20], %39 {strides = array<i32>} : memref<272x384xf32, #tpu.memory_space<vmem>>, vector<224x384xf32>,
    %cst_21 = arith.constant 0.000000e+00 : f32
    %45 = vector.broadcast %cst_21 : f32 to vector<224x128xf32>
    %cst_22 = arith.constant 0.000000e+00 : f32
    %46 = vector.broadcast %cst_22 : f32 to vector<224x128xf32>
    %cst_23 = arith.constant 0.000000e+00 : f32
    %47 = vector.broadcast %cst_23 : f32 to vector<224x128xf32>
    %c7 = arith.constant 7 : index
    %c0_24 = arith.constant 0 : index
    %48 = vector.load %arg8[%c7, %c0_24] : memref<272x384xf32, #tpu.memory_space<vmem>>, vector<224x384xf32>
    %49 = arith.truncf %48 : vector<224x384xf32> to vector<224x384xbf16>
    %50 = vector.extract_strided_slice %49 {offsets = [0, 0], sizes = [224, 128], strides = [1, 1]} : vector<224x384xbf16> to vector<224x128xbf16>
    %c0_25 = arith.constant 0 : index
    %c0_26 = arith.constant 0 : index
    %c0_27 = arith.constant 0 : index
    %c0_28 = arith.constant 0 : index
    %51 = vector.load %arg4[%c0_25, %c0_26, %c0_27, %c0_28] : memref<9x3x128x128xbf16, #tpu.memory_space<vmem>>, vector<1x1x128x128xbf16>
    %52 = vector.shape_cast %51 : vector<1x1x128x128xbf16> to vector<128x128xbf16>
    %cst_29 = arith.constant dense<0.000000e+00> : vector<224x128xf32>
    %53 = tpu.matmul %50, %52, %cst_29 {dimension_numbers = #tpu.dot_dimension_numbers<[1], [0], [0], [1], [0, 0, 1, 1], [], []>} : vector<224x128xbf16>, vector<128x128xbf16>, vector<224x128xf32> -> vector<224x128xf32>
    %54 = arith.addf %45, %53 : vector<224x128xf32>
    %55 = vector.extract_strided_slice %49 {offsets = [0, 128], sizes = [224, 128], strides = [1, 1]} : vector<224x384xbf16> to vector<224x128xbf16>
    %c0_30 = arith.constant 0 : index
    %c1 = arith.constant 1 : index
    %c0_31 = arith.constant 0 : index
    %c0_32 = arith.constant 0 : index
    %56 = vector.load %arg4[%c0_30, %c1, %c0_31, %c0_32] : memref<9x3x128x128xbf16, #tpu.memory_space<vmem>>, vector<1x1x128x128xbf16>
    %57 = vector.shape_cast %56 : vector<1x1x128x128xbf16> to vector<128x128xbf16>
    %cst_33 = arith.constant dense<0.000000e+00> : vector<224x128xf32>
    %58 = tpu.matmul %55, %57, %cst_33 {dimension_numbers = #tpu.dot_dimension_numbers<[1], [0], [0], [1], [0, 0, 1, 1], [], []>} : vector<224x128xbf16>, vector<128x128xbf16>, vector<224x128xf32> -> vector<224x128xf32>
    %59 = arith.addf %46, %58 : vector<224x128xf32>
    %60 = vector.extract_strided_slice %49 {offsets = [0, 256], sizes = [224, 128], strides = [1, 1]} : vector<224x384xbf16> to vector<224x128xbf16>
    %c0_34 = arith.constant 0 : index
    %c2 = arith.constant 2 : index
    %c0_35 = arith.constant 0 : index
    %c0_36 = arith.constant 0 : index
    %61 = vector.load %arg4[%c0_34, %c2, %c0_35, %c0_36] : memref<9x3x128x128xbf16, #tpu.memory_space<vmem>>, vector<1x1x128x128xbf16>
    %62 = vector.shape_cast %61 : vector<1x1x128x128xbf16> to vector<128x128xbf16>
    %cst_37 = arith.constant dense<0.000000e+00> : vector<224x128xf32>
    %63 = tpu.matmul %60, %62, %cst_37 {dimension_numbers = #tpu.dot_dimension_numbers<[1], [0], [0], [1], [0, 0, 1, 1], [], []>} : vector<224x128xbf16>, vector<128x128xbf16>, vector<224x128xf32> -> vector<224x128xf32>
    %64 = arith.addf %47, %63 : vector<224x128xf32>
    %c8 = arith.constant 8 : index
    %c0_38 = arith.constant 0 : index
    %65 = vector.load %arg8[%c8, %c0_38] : memref<272x384xf32, #tpu.memory_space<vmem>>, vector<224x384xf32>
    %66 = arith.truncf %65 : vector<224x384xf32> to vector<224x384xbf16>
    %67 = vector.extract_strided_slice %66 {offsets = [0, 0], sizes = [224, 128], strides = [1, 1]} : vector<224x384xbf16> to vector<224x128xbf16>
    %c1_39 = arith.constant 1 : index
    %c0_40 = arith.constant 0 : index
    %c0_41 = arith.constant 0 : index
    %c0_42 = arith.constant 0 : index
    %68 = vector.load %arg4[%c1_39, %c0_40, %c0_41, %c0_42] : memref<9x3x128x128xbf16, #tpu.memory_space<vmem>>, vector<1x1x128x128xbf16>
    %69 = vector.shape_cast %68 : vector<1x1x128x128xbf16> to vector<128x128xbf16>
    %cst_43 = arith.constant dense<0.000000e+00> : vector<224x128xf32>
    %70 = tpu.matmul %67, %69, %cst_43 {dimension_numbers = #tpu.dot_dimension_numbers<[1], [0], [0], [1], [0, 0, 1, 1], [], []>} : vector<224x128xbf16>, vector<128x128xbf16>, vector<224x128xf32> -> vector<224x128xf32>
    %71 = arith.addf %54, %70 : vector<224x128xf32>
    %72 = vector.extract_strided_slice %66 {offsets = [0, 128], sizes = [224, 128], strides = [1, 1]} : vector<224x384xbf16> to vector<224x128xbf16>
    %c1_44 = arith.constant 1 : index
    %c1_45 = arith.constant 1 : index
    %c0_46 = arith.constant 0 : index
    %c0_47 = arith.constant 0 : index
    %73 = vector.load %arg4[%c1_44, %c1_45, %c0_46, %c0_47] : memref<9x3x128x128xbf16, #tpu.memory_space<vmem>>, vector<1x1x128x128xbf16>
    %74 = vector.shape_cast %73 : vector<1x1x128x128xbf16> to vector<128x128xbf16>
    %cst_48 = arith.constant dense<0.000000e+00> : vector<224x128xf32>
    %75 = tpu.matmul %72, %74, %cst_48 {dimension_numbers = #tpu.dot_dimension_numbers<[1], [0], [0], [1], [0, 0, 1, 1], [], []>} : vector<224x128xbf16>, vector<128x128xbf16>, vector<224x128xf32> -> vector<224x128xf32>
    %76 = arith.addf %59, %75 : vector<224x128xf32>
    %77 = vector.extract_strided_slice %66 {offsets = [0, 256], sizes = [224, 128], strides = [1, 1]} : vector<224x384xbf16> to vector<224x128xbf16>
    %c1_49 = arith.constant 1 : index
    %c2_50 = arith.constant 2 : index
    %c0_51 = arith.constant 0 : index
    %c0_52 = arith.constant 0 : index
    %78 = vector.load %arg4[%c1_49, %c2_50, %c0_51, %c0_52] : memref<9x3x128x128xbf16, #tpu.memory_space<vmem>>, vector<1x1x128x128xbf16>
    %79 = vector.shape_cast %78 : vector<1x1x128x128xbf16> to vector<128x128xbf16>
    %cst_53 = arith.constant dense<0.000000e+00> : vector<224x128xf32>
    %80 = tpu.matmul %77, %79, %cst_53 {dimension_numbers = #tpu.dot_dimension_numbers<[1], [0], [0], [1], [0, 0, 1, 1], [], []>} : vector<224x128xbf16>, vector<128x128xbf16>, vector<224x128xf32> -> vector<224x128xf32>
    %81 = arith.addf %64, %80 : vector<224x128xf32>
    %c9 = arith.constant 9 : index
    %c0_54 = arith.constant 0 : index
    %82 = vector.load %arg8[%c9, %c0_54] : memref<272x384xf32, #tpu.memory_space<vmem>>, vector<224x384xf32>
    %83 = arith.truncf %82 : vector<224x384xf32> to vector<224x384xbf16>
    %84 = vector.extract_strided_slice %83 {offsets = [0, 0], sizes = [224, 128], strides = [1, 1]} : vector<224x384xbf16> to vector<224x128xbf16>
    %c2_55 = arith.constant 2 : index
    %c0_56 = arith.constant 0 : index
    %c0_57 = arith.constant 0 : index
    %c0_58 = arith.constant 0 : index
    %85 = vector.load %arg4[%c2_55, %c0_56, %c0_57, %c0_58] : memref<9x3x128x128xbf16, #tpu.memory_space<vmem>>, vector<1x1x128x128xbf16>
    %86 = vector.shape_cast %85 : vector<1x1x128x128xbf16> to vector<128x128xbf16>
    %cst_59 = arith.constant dense<0.000000e+00> : vector<224x128xf32>
    %87 = tpu.matmul %84, %86, %cst_59 {dimension_numbers = #tpu.dot_dimension_numbers<[1], [0], [0], [1], [0, 0, 1, 1], [], []>} : vector<224x128xbf16>, vector<128x128xbf16>, vector<224x128xf32> -> vector<224x128xf32>
    %88 = arith.addf %71, %87 : vector<224x128xf32>
    %89 = vector.extract_strided_slice %83 {offsets = [0, 128], sizes = [224, 128], strides = [1, 1]} : vector<224x384xbf16> to vector<224x128xbf16>
    %c2_60 = arith.constant 2 : index
    %c1_61 = arith.constant 1 : index
    %c0_62 = arith.constant 0 : index
    %c0_63 = arith.constant 0 : index
    %90 = vector.load %arg4[%c2_60, %c1_61, %c0_62, %c0_63] : memref<9x3x128x128xbf16, #tpu.memory_space<vmem>>, vector<1x1x128x128xbf16>
    %91 = vector.shape_cast %90 : vector<1x1x128x128xbf16> to vector<128x128xbf16>
    %cst_64 = arith.constant dense<0.000000e+00> : vector<224x128xf32>
    %92 = tpu.matmul %89, %91, %cst_64 {dimension_numbers = #tpu.dot_dimension_numbers<[1], [0], [0], [1], [0, 0, 1, 1], [], []>} : vector<224x128xbf16>, vector<128x128xbf16>, vector<224x128xf32> -> vector<224x128xf32>
    %93 = arith.addf %76, %92 : vector<224x128xf32>
    %94 = vector.extract_strided_slice %83 {offsets = [0, 256], sizes = [224, 128], strides = [1, 1]} : vector<224x384xbf16> to vector<224x128xbf16>
    %c2_65 = arith.constant 2 : index
    %c2_66 = arith.constant 2 : index
    %c0_67 = arith.constant 0 : index
    %c0_68 = arith.constant 0 : index
    %95 = vector.load %arg4[%c2_65, %c2_66, %c0_67, %c0_68] : memref<9x3x128x128xbf16, #tpu.memory_space<vmem>>, vector<1x1x128x128xbf16>
    %96 = vector.shape_cast %95 : vector<1x1x128x128xbf16> to vector<128x128xbf16>
    %cst_69 = arith.constant dense<0.000000e+00> : vector<224x128xf32>
    %97 = tpu.matmul %94, %96, %cst_69 {dimension_numbers = #tpu.dot_dimension_numbers<[1], [0], [0], [1], [0, 0, 1, 1], [], []>} : vector<224x128xbf16>, vector<128x128xbf16>, vector<224x128xf32> -> vector<224x128xf32>
    %98 = arith.addf %81, %97 : vector<224x128xf32>
    %c23 = arith.constant 23 : index
    %c0_70 = arith.constant 0 : index
    %99 = vector.load %arg8[%c23, %c0_70] : memref<272x384xf32, #tpu.memory_space<vmem>>, vector<224x384xf32>
    %100 = arith.truncf %99 : vector<224x384xf32> to vector<224x384xbf16>
    %101 = vector.extract_strided_slice %100 {offsets = [0, 0], sizes = [224, 128], strides = [1, 1]} : vector<224x384xbf16> to vector<224x128xbf16>
    %c3 = arith.constant 3 : index
    %c0_71 = arith.constant 0 : index
    %c0_72 = arith.constant 0 : index
    %c0_73 = arith.constant 0 : index
    %102 = vector.load %arg4[%c3, %c0_71, %c0_72, %c0_73] : memref<9x3x128x128xbf16, #tpu.memory_space<vmem>>, vector<1x1x128x128xbf16>
    %103 = vector.shape_cast %102 : vector<1x1x128x128xbf16> to vector<128x128xbf16>
    %cst_74 = arith.constant dense<0.000000e+00> : vector<224x128xf32>
    %104 = tpu.matmul %101, %103, %cst_74 {dimension_numbers = #tpu.dot_dimension_numbers<[1], [0], [0], [1], [0, 0, 1, 1], [], []>} : vector<224x128xbf16>, vector<128x128xbf16>, vector<224x128xf32> -> vector<224x128xf32>
    %105 = arith.addf %88, %104 : vector<224x128xf32>
    %106 = vector.extract_strided_slice %100 {offsets = [0, 128], sizes = [224, 128], strides = [1, 1]} : vector<224x384xbf16> to vector<224x128xbf16>
    %c3_75 = arith.constant 3 : index
    %c1_76 = arith.constant 1 : index
    %c0_77 = arith.constant 0 : index
    %c0_78 = arith.constant 0 : index
    %107 = vector.load %arg4[%c3_75, %c1_76, %c0_77, %c0_78] : memref<9x3x128x128xbf16, #tpu.memory_space<vmem>>, vector<1x1x128x128xbf16>
    %108 = vector.shape_cast %107 : vector<1x1x128x128xbf16> to vector<128x128xbf16>
    %cst_79 = arith.constant dense<0.000000e+00> : vector<224x128xf32>
    %109 = tpu.matmul %106, %108, %cst_79 {dimension_numbers = #tpu.dot_dimension_numbers<[1], [0], [0], [1], [0, 0, 1, 1], [], []>} : vector<224x128xbf16>, vector<128x128xbf16>, vector<224x128xf32> -> vector<224x128xf32>
    %110 = arith.addf %93, %109 : vector<224x128xf32>
    %111 = vector.extract_strided_slice %100 {offsets = [0, 256], sizes = [224, 128], strides = [1, 1]} : vector<224x384xbf16> to vector<224x128xbf16>
    %c3_80 = arith.constant 3 : index
    %c2_81 = arith.constant 2 : index
    %c0_82 = arith.constant 0 : index
    %c0_83 = arith.constant 0 : index
    %112 = vector.load %arg4[%c3_80, %c2_81, %c0_82, %c0_83] : memref<9x3x128x128xbf16, #tpu.memory_space<vmem>>, vector<1x1x128x128xbf16>
    %113 = vector.shape_cast %112 : vector<1x1x128x128xbf16> to vector<128x128xbf16>
    %cst_84 = arith.constant dense<0.000000e+00> : vector<224x128xf32>
    %114 = tpu.matmul %111, %113, %cst_84 {dimension_numbers = #tpu.dot_dimension_numbers<[1], [0], [0], [1], [0, 0, 1, 1], [], []>} : vector<224x128xbf16>, vector<128x128xbf16>, vector<224x128xf32> -> vector<224x128xf32>
    %115 = arith.addf %98, %114 : vector<224x128xf32>
    %c24_85 = arith.constant 24 : index
    %c0_86 = arith.constant 0 : index
    %116 = vector.load %arg8[%c24_85, %c0_86] : memref<272x384xf32, #tpu.memory_space<vmem>>, vector<224x384xf32>
    %117 = arith.truncf %116 : vector<224x384xf32> to vector<224x384xbf16>
    %118 = vector.extract_strided_slice %117 {offsets = [0, 0], sizes = [224, 128], strides = [1, 1]} : vector<224x384xbf16> to vector<224x128xbf16>
    %c4 = arith.constant 4 : index
    %c0_87 = arith.constant 0 : index
    %c0_88 = arith.constant 0 : index
    %c0_89 = arith.constant 0 : index
    %119 = vector.load %arg4[%c4, %c0_87, %c0_88, %c0_89] : memref<9x3x128x128xbf16, #tpu.memory_space<vmem>>, vector<1x1x128x128xbf16>
    %120 = vector.shape_cast %119 : vector<1x1x128x128xbf16> to vector<128x128xbf16>
    %cst_90 = arith.constant dense<0.000000e+00> : vector<224x128xf32>
    %121 = tpu.matmul %118, %120, %cst_90 {dimension_numbers = #tpu.dot_dimension_numbers<[1], [0], [0], [1], [0, 0, 1, 1], [], []>} : vector<224x128xbf16>, vector<128x128xbf16>, vector<224x128xf32> -> vector<224x128xf32>
    %122 = arith.addf %105, %121 : vector<224x128xf32>
    %123 = vector.extract_strided_slice %117 {offsets = [0, 128], sizes = [224, 128], strides = [1, 1]} : vector<224x384xbf16> to vector<224x128xbf16>
    %c4_91 = arith.constant 4 : index
    %c1_92 = arith.constant 1 : index
    %c0_93 = arith.constant 0 : index
    %c0_94 = arith.constant 0 : index
    %124 = vector.load %arg4[%c4_91, %c1_92, %c0_93, %c0_94] : memref<9x3x128x128xbf16, #tpu.memory_space<vmem>>, vector<1x1x128x128xbf16>
    %125 = vector.shape_cast %124 : vector<1x1x128x128xbf16> to vector<128x128xbf16>
    %cst_95 = arith.constant dense<0.000000e+00> : vector<224x128xf32>
    %126 = tpu.matmul %123, %125, %cst_95 {dimension_numbers = #tpu.dot_dimension_numbers<[1], [0], [0], [1], [0, 0, 1, 1], [], []>} : vector<224x128xbf16>, vector<128x128xbf16>, vector<224x128xf32> -> vector<224x128xf32>
    %127 = arith.addf %110, %126 : vector<224x128xf32>
    %128 = vector.extract_strided_slice %117 {offsets = [0, 256], sizes = [224, 128], strides = [1, 1]} : vector<224x384xbf16> to vector<224x128xbf16>
    %c4_96 = arith.constant 4 : index
    %c2_97 = arith.constant 2 : index
    %c0_98 = arith.constant 0 : index
    %c0_99 = arith.constant 0 : index
    %129 = vector.load %arg4[%c4_96, %c2_97, %c0_98, %c0_99] : memref<9x3x128x128xbf16, #tpu.memory_space<vmem>>, vector<1x1x128x128xbf16>
    %130 = vector.shape_cast %129 : vector<1x1x128x128xbf16> to vector<128x128xbf16>
    %cst_100 = arith.constant dense<0.000000e+00> : vector<224x128xf32>
    %131 = tpu.matmul %128, %130, %cst_100 {dimension_numbers = #tpu.dot_dimension_numbers<[1], [0], [0], [1], [0, 0, 1, 1], [], []>} : vector<224x128xbf16>, vector<128x128xbf16>, vector<224x128xf32> -> vector<224x128xf32>
    %132 = arith.addf %115, %131 : vector<224x128xf32>
    %c25 = arith.constant 25 : index
    %c0_101 = arith.constant 0 : index
    %133 = vector.load %arg8[%c25, %c0_101] : memref<272x384xf32, #tpu.memory_space<vmem>>, vector<224x384xf32>
    %134 = arith.truncf %133 : vector<224x384xf32> to vector<224x384xbf16>
    %135 = vector.extract_strided_slice %134 {offsets = [0, 0], sizes = [224, 128], strides = [1, 1]} : vector<224x384xbf16> to vector<224x128xbf16>
    %c5 = arith.constant 5 : index
    %c0_102 = arith.constant 0 : index
    %c0_103 = arith.constant 0 : index
    %c0_104 = arith.constant 0 : index
    %136 = vector.load %arg4[%c5, %c0_102, %c0_103, %c0_104] : memref<9x3x128x128xbf16, #tpu.memory_space<vmem>>, vector<1x1x128x128xbf16>
    %137 = vector.shape_cast %136 : vector<1x1x128x128xbf16> to vector<128x128xbf16>
    %cst_105 = arith.constant dense<0.000000e+00> : vector<224x128xf32>
    %138 = tpu.matmul %135, %137, %cst_105 {dimension_numbers = #tpu.dot_dimension_numbers<[1], [0], [0], [1], [0, 0, 1, 1], [], []>} : vector<224x128xbf16>, vector<128x128xbf16>, vector<224x128xf32> -> vector<224x128xf32>
    %139 = arith.addf %122, %138 : vector<224x128xf32>
    %140 = vector.extract_strided_slice %134 {offsets = [0, 128], sizes = [224, 128], strides = [1, 1]} : vector<224x384xbf16> to vector<224x128xbf16>
    %c5_106 = arith.constant 5 : index
    %c1_107 = arith.constant 1 : index
    %c0_108 = arith.constant 0 : index
    %c0_109 = arith.constant 0 : index
    %141 = vector.load %arg4[%c5_106, %c1_107, %c0_108, %c0_109] : memref<9x3x128x128xbf16, #tpu.memory_space<vmem>>, vector<1x1x128x128xbf16>
    %142 = vector.shape_cast %141 : vector<1x1x128x128xbf16> to vector<128x128xbf16>
    %cst_110 = arith.constant dense<0.000000e+00> : vector<224x128xf32>
    %143 = tpu.matmul %140, %142, %cst_110 {dimension_numbers = #tpu.dot_dimension_numbers<[1], [0], [0], [1], [0, 0, 1, 1], [], []>} : vector<224x128xbf16>, vector<128x128xbf16>, vector<224x128xf32> -> vector<224x128xf32>
    %144 = arith.addf %127, %143 : vector<224x128xf32>
    %145 = vector.extract_strided_slice %134 {offsets = [0, 256], sizes = [224, 128], strides = [1, 1]} : vector<224x384xbf16> to vector<224x128xbf16>
    %c5_111 = arith.constant 5 : index
    %c2_112 = arith.constant 2 : index
    %c0_113 = arith.constant 0 : index
    %c0_114 = arith.constant 0 : index
    %146 = vector.load %arg4[%c5_111, %c2_112, %c0_113, %c0_114] : memref<9x3x128x128xbf16, #tpu.memory_space<vmem>>, vector<1x1x128x128xbf16>
    %147 = vector.shape_cast %146 : vector<1x1x128x128xbf16> to vector<128x128xbf16>
    %cst_115 = arith.constant dense<0.000000e+00> : vector<224x128xf32>
    %148 = tpu.matmul %145, %147, %cst_115 {dimension_numbers = #tpu.dot_dimension_numbers<[1], [0], [0], [1], [0, 0, 1, 1], [], []>} : vector<224x128xbf16>, vector<128x128xbf16>, vector<224x128xf32> -> vector<224x128xf32>
    %149 = arith.addf %132, %148 : vector<224x128xf32>
    %c39 = arith.constant 39 : index
    %c0_116 = arith.constant 0 : index
    %150 = vector.load %arg8[%c39, %c0_116] : memref<272x384xf32, #tpu.memory_space<vmem>>, vector<224x384xf32>
    %151 = arith.truncf %150 : vector<224x384xf32> to vector<224x384xbf16>
    %152 = vector.extract_strided_slice %151 {offsets = [0, 0], sizes = [224, 128], strides = [1, 1]} : vector<224x384xbf16> to vector<224x128xbf16>
    %c6 = arith.constant 6 : index
    %c0_117 = arith.constant 0 : index
    %c0_118 = arith.constant 0 : index
    %c0_119 = arith.constant 0 : index
    %153 = vector.load %arg4[%c6, %c0_117, %c0_118, %c0_119] : memref<9x3x128x128xbf16, #tpu.memory_space<vmem>>, vector<1x1x128x128xbf16>
    %154 = vector.shape_cast %153 : vector<1x1x128x128xbf16> to vector<128x128xbf16>
    %cst_120 = arith.constant dense<0.000000e+00> : vector<224x128xf32>
    %155 = tpu.matmul %152, %154, %cst_120 {dimension_numbers = #tpu.dot_dimension_numbers<[1], [0], [0], [1], [0, 0, 1, 1], [], []>} : vector<224x128xbf16>, vector<128x128xbf16>, vector<224x128xf32> -> vector<224x128xf32>
    %156 = arith.addf %139, %155 : vector<224x128xf32>
    %157 = vector.extract_strided_slice %151 {offsets = [0, 128], sizes = [224, 128], strides = [1, 1]} : vector<224x384xbf16> to vector<224x128xbf16>
    %c6_121 = arith.constant 6 : index
    %c1_122 = arith.constant 1 : index
    %c0_123 = arith.constant 0 : index
    %c0_124 = arith.constant 0 : index
    %158 = vector.load %arg4[%c6_121, %c1_122, %c0_123, %c0_124] : memref<9x3x128x128xbf16, #tpu.memory_space<vmem>>, vector<1x1x128x128xbf16>
    %159 = vector.shape_cast %158 : vector<1x1x128x128xbf16> to vector<128x128xbf16>
    %cst_125 = arith.constant dense<0.000000e+00> : vector<224x128xf32>
    %160 = tpu.matmul %157, %159, %cst_125 {dimension_numbers = #tpu.dot_dimension_numbers<[1], [0], [0], [1], [0, 0, 1, 1], [], []>} : vector<224x128xbf16>, vector<128x128xbf16>, vector<224x128xf32> -> vector<224x128xf32>
    %161 = arith.addf %144, %160 : vector<224x128xf32>
    %162 = vector.extract_strided_slice %151 {offsets = [0, 256], sizes = [224, 128], strides = [1, 1]} : vector<224x384xbf16> to vector<224x128xbf16>
    %c6_126 = arith.constant 6 : index
    %c2_127 = arith.constant 2 : index
    %c0_128 = arith.constant 0 : index
    %c0_129 = arith.constant 0 : index
    %163 = vector.load %arg4[%c6_126, %c2_127, %c0_128, %c0_129] : memref<9x3x128x128xbf16, #tpu.memory_space<vmem>>, vector<1x1x128x128xbf16>
    %164 = vector.shape_cast %163 : vector<1x1x128x128xbf16> to vector<128x128xbf16>
    %cst_130 = arith.constant dense<0.000000e+00> : vector<224x128xf32>
    %165 = tpu.matmul %162, %164, %cst_130 {dimension_numbers = #tpu.dot_dimension_numbers<[1], [0], [0], [1], [0, 0, 1, 1], [], []>} : vector<224x128xbf16>, vector<128x128xbf16>, vector<224x128xf32> -> vector<224x128xf32>
    %166 = arith.addf %149, %165 : vector<224x128xf32>
    %c40 = arith.constant 40 : index
    %c0_131 = arith.constant 0 : index
    %167 = vector.load %arg8[%c40, %c0_131] : memref<272x384xf32, #tpu.memory_space<vmem>>, vector<224x384xf32>
    %168 = arith.truncf %167 : vector<224x384xf32> to vector<224x384xbf16>
    %169 = vector.extract_strided_slice %168 {offsets = [0, 0], sizes = [224, 128], strides = [1, 1]} : vector<224x384xbf16> to vector<224x128xbf16>
    %c7_132 = arith.constant 7 : index
    %c0_133 = arith.constant 0 : index
    %c0_134 = arith.constant 0 : index
    %c0_135 = arith.constant 0 : index
    %170 = vector.load %arg4[%c7_132, %c0_133, %c0_134, %c0_135] : memref<9x3x128x128xbf16, #tpu.memory_space<vmem>>, vector<1x1x128x128xbf16>
    %171 = vector.shape_cast %170 : vector<1x1x128x128xbf16> to vector<128x128xbf16>
    %cst_136 = arith.constant dense<0.000000e+00> : vector<224x128xf32>
    %172 = tpu.matmul %169, %171, %cst_136 {dimension_numbers = #tpu.dot_dimension_numbers<[1], [0], [0], [1], [0, 0, 1, 1], [], []>} : vector<224x128xbf16>, vector<128x128xbf16>, vector<224x128xf32> -> vector<224x128xf32>
    %173 = arith.addf %156, %172 : vector<224x128xf32>
    %174 = vector.extract_strided_slice %168 {offsets = [0, 128], sizes = [224, 128], strides = [1, 1]} : vector<224x384xbf16> to vector<224x128xbf16>
    %c7_137 = arith.constant 7 : index
    %c1_138 = arith.constant 1 : index
    %c0_139 = arith.constant 0 : index
    %c0_140 = arith.constant 0 : index
    %175 = vector.load %arg4[%c7_137, %c1_138, %c0_139, %c0_140] : memref<9x3x128x128xbf16, #tpu.memory_space<vmem>>, vector<1x1x128x128xbf16>
    %176 = vector.shape_cast %175 : vector<1x1x128x128xbf16> to vector<128x128xbf16>
    %cst_141 = arith.constant dense<0.000000e+00> : vector<224x128xf32>
    %177 = tpu.matmul %174, %176, %cst_141 {dimension_numbers = #tpu.dot_dimension_numbers<[1], [0], [0], [1], [0, 0, 1, 1], [], []>} : vector<224x128xbf16>, vector<128x128xbf16>, vector<224x128xf32> -> vector<224x128xf32>
    %178 = arith.addf %161, %177 : vector<224x128xf32>
    %179 = vector.extract_strided_slice %168 {offsets = [0, 256], sizes = [224, 128], strides = [1, 1]} : vector<224x384xbf16> to vector<224x128xbf16>
    %c7_142 = arith.constant 7 : index
    %c2_143 = arith.constant 2 : index
    %c0_144 = arith.constant 0 : index
    %c0_145 = arith.constant 0 : index
    %180 = vector.load %arg4[%c7_142, %c2_143, %c0_144, %c0_145] : memref<9x3x128x128xbf16, #tpu.memory_space<vmem>>, vector<1x1x128x128xbf16>
    %181 = vector.shape_cast %180 : vector<1x1x128x128xbf16> to vector<128x128xbf16>
    %cst_146 = arith.constant dense<0.000000e+00> : vector<224x128xf32>
    %182 = tpu.matmul %179, %181, %cst_146 {dimension_numbers = #tpu.dot_dimension_numbers<[1], [0], [0], [1], [0, 0, 1, 1], [], []>} : vector<224x128xbf16>, vector<128x128xbf16>, vector<224x128xf32> -> vector<224x128xf32>
    %183 = arith.addf %166, %182 : vector<224x128xf32>
    %c41 = arith.constant 41 : index
    %c0_147 = arith.constant 0 : index
    %184 = vector.load %arg8[%c41, %c0_147] : memref<272x384xf32, #tpu.memory_space<vmem>>, vector<224x384xf32>
    %185 = arith.truncf %184 : vector<224x384xf32> to vector<224x384xbf16>
    %186 = vector.extract_strided_slice %185 {offsets = [0, 0], sizes = [224, 128], strides = [1, 1]} : vector<224x384xbf16> to vector<224x128xbf16>
    %c8_148 = arith.constant 8 : index
    %c0_149 = arith.constant 0 : index
    %c0_150 = arith.constant 0 : index
    %c0_151 = arith.constant 0 : index
    %187 = vector.load %arg4[%c8_148, %c0_149, %c0_150, %c0_151] : memref<9x3x128x128xbf16, #tpu.memory_space<vmem>>, vector<1x1x128x128xbf16>
    %188 = vector.shape_cast %187 : vector<1x1x128x128xbf16> to vector<128x128xbf16>
    %cst_152 = arith.constant dense<0.000000e+00> : vector<224x128xf32>
    %189 = tpu.matmul %186, %188, %cst_152 {dimension_numbers = #tpu.dot_dimension_numbers<[1], [0], [0], [1], [0, 0, 1, 1], [], []>} : vector<224x128xbf16>, vector<128x128xbf16>, vector<224x128xf32> -> vector<224x128xf32>
    %190 = arith.addf %173, %189 : vector<224x128xf32>
    %191 = vector.extract_strided_slice %185 {offsets = [0, 128], sizes = [224, 128], strides = [1, 1]} : vector<224x384xbf16> to vector<224x128xbf16>
    %c8_153 = arith.constant 8 : index
    %c1_154 = arith.constant 1 : index
    %c0_155 = arith.constant 0 : index
    %c0_156 = arith.constant 0 : index
    %192 = vector.load %arg4[%c8_153, %c1_154, %c0_155, %c0_156] : memref<9x3x128x128xbf16, #tpu.memory_space<vmem>>, vector<1x1x128x128xbf16>
    %193 = vector.shape_cast %192 : vector<1x1x128x128xbf16> to vector<128x128xbf16>
    %cst_157 = arith.constant dense<0.000000e+00> : vector<224x128xf32>
    %194 = tpu.matmul %191, %193, %cst_157 {dimension_numbers = #tpu.dot_dimension_numbers<[1], [0], [0], [1], [0, 0, 1, 1], [], []>} : vector<224x128xbf16>, vector<128x128xbf16>, vector<224x128xf32> -> vector<224x128xf32>
    %195 = arith.addf %178, %194 : vector<224x128xf32>
    %196 = vector.extract_strided_slice %185 {offsets = [0, 256], sizes = [224, 128], strides = [1, 1]} : vector<224x384xbf16> to vector<224x128xbf16>
    %c8_158 = arith.constant 8 : index
    %c2_159 = arith.constant 2 : index
    %c0_160 = arith.constant 0 : index
    %c0_161 = arith.constant 0 : index
    %197 = vector.load %arg4[%c8_158, %c2_159, %c0_160, %c0_161] : memref<9x3x128x128xbf16, #tpu.memory_space<vmem>>, vector<1x1x128x128xbf16>
    %198 = vector.shape_cast %197 : vector<1x1x128x128xbf16> to vector<128x128xbf16>
    %cst_162 = arith.constant dense<0.000000e+00> : vector<224x128xf32>
    %199 = tpu.matmul %196, %198, %cst_162 {dimension_numbers = #tpu.dot_dimension_numbers<[1], [0], [0], [1], [0, 0, 1, 1], [], []>} : vector<224x128xbf16>, vector<128x128xbf16>, vector<224x128xf32> -> vector<224x128xf32>
    %200 = arith.addf %183, %199 : vector<224x128xf32>
    %201 = tpu.concatenate %190, %195, %200 in 1 : vector<224x128xf32>, vector<224x128xf32>, vector<224x128xf32> -> vector<224x384xf32>
    %cst_163 = arith.constant 0.000000e+00 : f32
    %202 = vector.shape_cast %4 : vector<224x1xi1> to vector<224x1xi1>
    %203 = vector.broadcast %202 : vector<224x1xi1> to vector<224x384xi1>
    %204 = vector.broadcast %cst_163 : f32 to vector<224x384xf32>
    %205 = arith.select %203, %201, %204 : vector<224x384xi1>, vector<224x384xf32>
    %cst_164 = arith.constant dense<0.000000e+00> : vector<384xf32>
    %206 = vector.multi_reduction <add>, %205, %cst_164 [0] : vector<224x384xf32> to vector<384xf32>
    %207 = vector.shape_cast %206 : vector<384xf32> to vector<1x384xf32>
    %cst_165 = arith.constant 0.00510204071 : f32
    %208 = vector.broadcast %cst_165 : f32 to vector<1x384xf32>
    %209 = arith.mulf %207, %208 : vector<1x384xf32>
    %210 = arith.mulf %205, %205 : vector<224x384xf32>
    %cst_166 = arith.constant dense<0.000000e+00> : vector<384xf32>
    %211 = vector.multi_reduction <add>, %210, %cst_166 [0] : vector<224x384xf32> to vector<384xf32>
    %212 = vector.shape_cast %211 : vector<384xf32> to vector<1x384xf32>
    %cst_167 = arith.constant 0.00510204071 : f32
    %213 = vector.broadcast %cst_167 : f32 to vector<1x384xf32>
    %214 = arith.mulf %212, %213 : vector<1x384xf32>
    %215 = arith.mulf %209, %209 : vector<1x384xf32>
    %216 = arith.subf %214, %215 : vector<1x384xf32>
    %c0_168 = arith.constant 0 : index
    %c0_169 = arith.constant 0 : index
    %217 = vector.load %arg5[%c0_168, %c0_169] : memref<1x384xf32, #tpu.memory_space<vmem>>, vector<1x384xf32>
    %cst_170 = arith.constant 9.99999974E-6 : f32
    %218 = vector.broadcast %cst_170 : f32 to vector<1x384xf32>
    %219 = arith.addf %216, %218 : vector<1x384xf32>
    %220 = math.rsqrt %219 : vector<1x384xf32>
    %221 = arith.mulf %217, %220 : vector<1x384xf32>
    %c0_171 = arith.constant 0 : index
    %c0_172 = arith.constant 0 : index
    %222 = vector.load %arg6[%c0_171, %c0_172] : memref<1x384xf32, #tpu.memory_space<vmem>>, vector<1x384xf32>
    %223 = arith.mulf %209, %221 : vector<1x384xf32>
    %224 = arith.subf %222, %223 : vector<1x384xf32>
    %225 = vector.broadcast %221 : vector<1x384xf32> to vector<224x384xf32>
    %226 = arith.mulf %201, %225 : vector<224x384xf32>
    %227 = vector.broadcast %224 : vector<1x384xf32> to vector<224x384xf32>
    %228 = arith.addf %226, %227 : vector<224x384xf32>
    %c0_173 = arith.constant 0 : index
    %c0_174 = arith.constant 0 : index
    %229 = vector.load %arg7[%c0_173, %c0_174] : memref<224x384xf32, #tpu.memory_space<vmem>>, vector<224x384xf32>
    tpu.vector_store %arg7[%c0_173, %c0_174], %228 {strides = array<i32>} : memref<224x384xf32, #tpu.memory_space<vmem>>, vector<224x384xf32>,
    return
  }
}

</mosaic_0001>

<bundles_post_ra>
// kernel: model_forward.1
= control target key start
LH: loop header
LB: loop body
LE: loop exit
PB: predicated region body
PF: predicated region fallthrough
CT: control target
= control target key end

     0   :  { %vm682_vm0 = vcmask 261120   ;;  %vm22394_vm5 = vsmask.f32 4352  ;;  %vm22388_vm8 = vmmov 1   ;;  %s22285_s1 = inlined_call_operand.vmem [shape: bf16[288,384], index: 1, kind: input, shape index: {}]   ;;  %s22286_s0 = inlined_call_operand.vmem [shape: f32[224,288], index: 0, kind: input, shape index: {}]   ;;  %s22287_s4 = inlined_call_operand.vmem [shape: bf16[9,3,128,128], index: 4, kind: input, shape index: {}]   ;;  %s22288_s2 = inlined_call_operand.vmem [shape: f32[1,384], index: 2, kind: input, shape index: {}]   ;;  %s22289_s3 = inlined_call_operand.vmem [shape: f32[1,384], index: 3, kind: input, shape index: {}]   ;;  %s22290_s5 = inlined_call_operand.vmem [shape: f32[1,384], index: 5, kind: input, shape index: {}]   ;;  %s22291_s6 = inlined_call_operand.vmem [shape: f32[1,384], index: 6, kind: input, shape index: {}]   ;;  %s22292_s7 = inlined_call_operand.vmem [shape: f32[224,384], index: 7, kind: output, shape index: {}]  }
   0x1   :  { %v16048_v0 = vld [vmem:[%s22285_s1 + $0x4] ss:$12 sps:$4 sm:$0xff]   ;;  %v16050_v1 = vld [vmem:[%s22285_s1] ss:$12 sps:$4 sm:$0xff]   ;;  %v16051_v2 = vld [vmem:[%s22285_s1 + $0x1c] ss:$12 sps:$4 sm:$0xff]  }
   0x2   :  { %725 = vmatprep.subr.bf16.mxu0 %v16048_v0  ;;  %v16053_v3 = vld [vmem:[%s22285_s1 + $0x18] ss:$12 sps:$4 sm:$0xff]   ;;  %v16054_v4 = vld [vmem:[%s22285_s1 + $0x34] ss:$12 sps:$4 sm:$0xff]   ;;  %v16056_v5 = vld [vmem:[%s22285_s1 + $0x30] ss:$12 sps:$4 sm:$0xff]  }
   0x3   :  { %726 = vmatpush1.bf16.msra.mxu0 %v16050_v1  ;;  %v16057_v6 = vld [vmem:[%s22285_s1 + $0x4c] ss:$12 sps:$4 sm:$0xff]   ;;  %v16059_v7 = vld [vmem:[%s22285_s1 + $0x48] ss:$12 sps:$4 sm:$0xff]   ;;  %v16060_v8 = vld [vmem:[%s22285_s1 + $0x64] ss:$12 sps:$4 sm:$0xff]  }
   0x4   :  { %727 = vmatprep.subr.bf16.mxu0 %v16051_v2  ;;  %v16062_v9 = vld [vmem:[%s22285_s1 + $0x60] ss:$12 sps:$4 sm:$0xff]   ;;  %v16063_v10 = vld [vmem:[%s22285_s1 + $0x7c] ss:$12 sps:$4 sm:$0xff]   ;;  %v16065_v11 = vld [vmem:[%s22285_s1 + $0x78] ss:$12 sps:$4 sm:$0xff]  }
   0x5   :  { %v16066_v12 = vld [vmem:[%s22285_s1 + $0x94] ss:$12 sps:$4 sm:$0xff]   ;;  %v113_v13 = vld [vmem:[%s22286_s0 + $0x8] sm:$0xff]  ;;  %v16068_v17 = vld [vmem:[%s22285_s1 + $0x90] ss:$12 sps:$4 sm:$0xff]  }
   0x6   :  { %v116_v14 = vld [vmem:[%s22286_s0 + $0x20] sm:$0xff]  ;;  %v197_v15 = vmax.f32 %v113_v13, 0.0  ;;  %v16069_v18 = vld [vmem:[%s22285_s1 + $0xac] ss:$12 sps:$4 sm:$0xff]   ;;  %v16071_v20 = vld [vmem:[%s22285_s1 + $0xa8] ss:$12 sps:$4 sm:$0xff]  }
   0x7   :  { %728 = vmatpush1.bf16.msra.mxu0 %v16053_v3  ;;  %v200_v16 = vmax.f32 %v116_v14, 0.0  ;;  %v16072_v21 = vld [vmem:[%s22285_s1 + $0xc4] ss:$12 sps:$4 sm:$0xff]   ;;  %v16074_v22 = vld [vmem:[%s22285_s1 + $0xc0] ss:$12 sps:$4 sm:$0xff]   ;;  %v115_v36 = vld [vmem:[%s22286_s0 + $0x18] sm:$0xff] }
   0x8   :  { %729 = vmatprep.subr.bf16.mxu0 %v16054_v4  ;;  %v16075_v23 = vld [vmem:[%s22285_s1 + $0xdc] ss:$12 sps:$4 sm:$0xff]   ;;  %v16077_v24 = vld [vmem:[%s22285_s1 + $0xd8] ss:$12 sps:$4 sm:$0xff]   ;;  %v16078_v25 = vld [vmem:[%s22285_s1 + $0xf4] ss:$12 sps:$4 sm:$0xff]  }
   0x9   :  { %v16691_v19 = vpack.c.bf16 %v200_v16, %v197_v15  ;;  %v16080_v26 = vld [vmem:[%s22285_s1 + $0xf0] ss:$12 sps:$4 sm:$0xff]   ;;  %v16081_v27 = vld [vmem:[%s22285_s1 + $0x10c] ss:$12 sps:$4 sm:$0xff]   ;;  %v16083_v28 = vld [vmem:[%s22285_s1 + $0x108] ss:$12 sps:$4 sm:$0xff]  }
   0xa   :  { %v16084_v29 = vld [vmem:[%s22285_s1 + $0x124] ss:$12 sps:$4 sm:$0xff]   ;;  %v16086_v30 = vld [vmem:[%s22285_s1 + $0x120] ss:$12 sps:$4 sm:$0xff]   ;;  %v16087_v31 = vld [vmem:[%s22285_s1 + $0x13c] ss:$12 sps:$4 sm:$0xff]  }
   0xb   :  { %730 = vmatpush1.bf16.msra.mxu0 %v16056_v5  ;;  %757 = vmatprep.mubr.bf16.mxu0 %v16691_v19  ;;  %v16089_v32 = vld [vmem:[%s22285_s1 + $0x138] ss:$12 sps:$4 sm:$0xff]   ;;  %v16090_v33 = vld [vmem:[%s22285_s1 + $0x154] ss:$12 sps:$4 sm:$0xff]   ;;  %v16092_v34 = vld [vmem:[%s22285_s1 + $0x150] ss:$12 sps:$4 sm:$0xff]  }
   0xc   :  { %731 = vmatprep.subr.bf16.mxu0 %v16057_v6  ;;  %v112_v35 = vld [vmem:[%s22286_s0] sm:$0xff]  ;;  %v16093_v37 = vld [vmem:[%s22285_s1 + $0x16c] ss:$12 sps:$4 sm:$0xff]   ;;  %v122_v39 = vld [vmem:[%s22286_s0 + $0x50] sm:$0xff]  ;;  %v199_v41 = vmax.f32 %v115_v36, 0.0 }
   0xd   :  { %v119_v38 = vld [vmem:[%s22286_s0 + $0x38] sm:$0xff]  ;;  %v196_v40 = vmax.f32 %v112_v35, 0.0  ;;  %v16095_v42 = vld [vmem:[%s22285_s1 + $0x168] ss:$12 sps:$4 sm:$0xff]   ;;  %v206_v44 = vmax.f32 %v122_v39, 0.0  ;;  %v128_v52 = vld [vmem:[%s22286_s0 + $0x80] sm:$0xff] }
   0xe   :  { %v203_v43 = vmax.f32 %v119_v38, 0.0  ;;  %v16098_v45 = vld [vmem:[%s22285_s1 + $0x184] ss:$12 sps:$4 sm:$0xff]   ;;  %v16096_v47 = vld [vmem:[%s22285_s1 + $0x180] ss:$12 sps:$4 sm:$0xff]   ;;  %v212_v57 = vmax.f32 %v128_v52, 0.0 }
   0xf   :  { %732 = vmatpush1.bf16.msra.mxu0 %v16059_v7  ;;  %v16760_v46 = vpack.c.bf16 %v199_v41, %v196_v40  ;;  %v118_v49 = vld [vmem:[%s22286_s0 + $0x30] sm:$0xff]  ;;  %v121_v50 = vld [vmem:[%s22286_s0 + $0x48] sm:$0xff]  ;;  %v16099_v58 = vld [vmem:[%s22285_s1 + $0x198] ss:$12 sps:$4 sm:$0xff]  }
  0x10   :  { %733 = vmatprep.subr.bf16.mxu0 %v16060_v8  ;;  %v16765_v48 = vpack.c.bf16 %v206_v44, %v203_v43  ;;  %v125_v51 = vld [vmem:[%s22286_s0 + $0x68] sm:$0xff]  ;;  %v202_v54 = vmax.f32 %v118_v49, 0.0  ;;  %v205_v55 = vmax.f32 %v121_v50, 0.0  ;;  %v124_v62 = vld [vmem:[%s22286_s0 + $0x60] sm:$0xff]  ;;  %v127_v63 = vld [vmem:[%s22286_s0 + $0x78] sm:$0xff] }
  0x11   :  { %v16101_v53 = vld [vmem:[%s22285_s1 + $0x19c] ss:$12 sps:$4 sm:$0xff]   ;;  %v209_v56 = vmax.f32 %v125_v51, 0.0  ;;  %v134_v1 = vld [vmem:[%s22286_s0 + $0xb0] sm:$0xff]  ;;  %v208_v2 = vmax.f32 %v124_v62, 0.0  ;;  %v211_v3 = vmax.f32 %v127_v63, 0.0 }
  0x12   :  { %v16102_v59 = vld [vmem:[%s22285_s1 + $0xc8] ss:$12 sps:$4 sm:$0xff]   ;;  %v16790_v60 = vpack.c.bf16 %v205_v55, %v202_v54  ;;  %v131_v0 = vld [vmem:[%s22286_s0 + $0x98] sm:$0xff]  ;;  %v218_v5 = vmax.f32 %v134_v1, 0.0  ;;  %v148_v44 = vld [vmem:[%s22286_s0 + $0x120] sm:$0xff] }
  0x13   :  { %734 = vmatpush1.bf16.msra.mxu0 %v16062_v9  ;;  %v16792_v61 = vpack.c.bf16 %v212_v57, %v209_v56  ;;  %v215_v4 = vmax.f32 %v131_v0, 0.0  ;;  %v16808_v6 = vpack.c.bf16 %v211_v3, %v208_v2  ;;  %v130_v8 = vld [vmem:[%s22286_s0 + $0x90] sm:$0xff]  ;;  %v133_v9 = vld [vmem:[%s22286_s0 + $0xa8] sm:$0xff]  ;;  %v232_v50 = vmax.f32 %v148_v44, 0.0 }
  0x14   :  { %735 = vmatprep.subr.bf16.mxu0 %v16063_v10  ;;  %v137_v10 = vld [vmem:[%s22286_s0 + $0xc8] sm:$0xff]  ;;  %v217_v13 = vmax.f32 %v133_v9, 0.0  ;;  %v158_v49 = vld [vmem:[%s22286_s0 + $0x170] sm:$0xff] }
  0x15   :  { %v16810_v7 = vpack.c.bf16 %v218_v5, %v215_v4  ;;  %v221_v14 = vmax.f32 %v137_v10, 0.0  ;;  %v145_v35 = vld [vmem:[%s22286_s0 + $0x108] sm:$0xff]  ;;  %v154_v56 = vld [vmem:[%s22286_s0 + $0x150] sm:$0xff]  ;;  %v160_v4 = vld [vmem:[%s22286_s0 + $0x180] sm:$0xff] }
  0x16   :  { %v149_v36 = vld [vmem:[%s22286_s0 + $0x128] sm:$0xff]  ;;  %v229_v39 = vmax.f32 %v145_v35, 0.0  ;;  %v238_v62 = vmax.f32 %v154_v56, 0.0  ;;  %v163_v5 = vld [vmem:[%s22286_s0 + $0x198] sm:$0xff]  ;;  %v170_v9 = vld [vmem:[%s22286_s0 + $0x1d0] sm:$0xff]  ;;  %v244_v10 = vmax.f32 %v160_v4, 0.0 }
  0x17   :  { %736 = vmatpush1.bf16.msra.mxu0 %v16065_v11  ;;  %v140_v11 = vld [vmem:[%s22286_s0 + $0xe0] sm:$0xff]  ;;  %v233_v40 = vmax.f32 %v149_v36, 0.0  ;;  %v157_v57 = vld [vmem:[%s22286_s0 + $0x168] sm:$0xff]  ;;  %v182_v35 = vld [vmem:[%s22286_s0 + $0x230] sm:$0xff] }
  0x18   :  { %737 = vmatprep.subr.bf16.mxu0 %v16066_v12  ;;  %v214_v12 = vmax.f32 %v130_v8, 0.0  ;;  %v224_v15 = vmax.f32 %v140_v11, 0.0  ;;  %v241_v63 = vmax.f32 %v157_v57, 0.0  ;;  %v167_v8 = vld [vmem:[%s22286_s0 + $0x1b8] sm:$0xff]  ;;  %v247_v11 = vmax.f32 %v163_v5, 0.0  ;;  %v178_v44 = vld [vmem:[%s22286_s0 + $0x210] sm:$0xff] }
  0x1a   :  { %v16826_v16 = vpack.c.bf16 %v217_v13, %v214_v12  ;;  %v16908_v2 = vpack.c.bf16 %v241_v63, %v238_v62  ;;  %v251_v12 = vmax.f32 %v167_v8, 0.0  ;;  %v254_v13 = vmax.f32 %v170_v9, 0.0  ;;  %v191_v62 = vld [vmem:[%s22286_s0 + $0x278] sm:$0xff]  ;;  %v194_v63 = vld [vmem:[%s22286_s0 + $0x290] sm:$0xff] }
  0x1b   :  { %738 = vmatpush1.bf16.msra.mxu0 %v16068_v17  ;;  %v16828_v17 = vpack.c.bf16 %v224_v15, %v221_v14  ;;  %v16926_v14 = vpack.c.bf16 %v247_v11, %v244_v10  ;;  %v275_v4 = vmax.f32 %v191_v62, 0.0  ;;  %v278_v5 = vmax.f32 %v194_v63, 0.0  ;;  %v190_v10 = vld [vmem:[%s22286_s0 + $0x270] sm:$0xff]  ;;  %v193_v11 = vld [vmem:[%s22286_s0 + $0x288] sm:$0xff]  ;;  %v132_v62 = vld [vmem:[%s22286_s0 + $0xa0] sm:$0xff] }
  0x1c   :  { %739 = vmatprep.subr.bf16.mxu0 %v16069_v18  ;;  %v136_v18 = vld [vmem:[%s22286_s0 + $0xc0] sm:$0xff]  ;;  %v16928_v15 = vpack.c.bf16 %v254_v13, %v251_v12  ;;  %v274_v12 = vmax.f32 %v190_v10, 0.0  ;;  %v277_v13 = vmax.f32 %v193_v11, 0.0  ;;  %v135_v63 = vld [vmem:[%s22286_s0 + $0xb8] sm:$0xff] }
  0x1d   :  { %v17000_v9 = vpack.c.bf16 %v278_v5, %v275_v4  ;;  %v216_v4 = vmax.f32 %v132_v62, 0.0  ;;  %v219_v5 = vmax.f32 %v135_v63, 0.0  ;;  %v16113_v10 = vld [vmem:[%s22285_s1 + $0x80] ss:$12 sps:$4 sm:$0xff]   ;;  %v16114_v11 = vld [vmem:[%s22285_s1 + $0x158] ss:$12 sps:$4 sm:$0xff]  }
  0x1e   :  { %v168_v62 = vld [vmem:[%s22286_s0 + $0x1c0] sm:$0xff]  ;;  %v171_v63 = vld [vmem:[%s22286_s0 + $0x1d8] sm:$0xff] }
  0x1f   :  { %740 = vmatpush1.bf16.msra.mxu0 %v16071_v20  ;;  %v139_v20 = vld [vmem:[%s22286_s0 + $0xd8] sm:$0xff] }
  0x20   :  { %741 = vmatprep.subr.bf16.mxu0 %v16072_v21  ;;  %v143_v21 = vld [vmem:[%s22286_s0 + $0xf8] sm:$0xff] }
  0x23   :  { %742 = vmatpush1.bf16.msra.mxu0 %v16074_v22  ;;  %v146_v22 = vld [vmem:[%s22286_s0 + $0x110] sm:$0xff] }
  0x24   :  { %743 = vmatprep.subr.bf16.mxu0 %v16075_v23  ;;  %v220_v23 = vmax.f32 %v136_v18, 0.0  ;;  %v166_v18 = vld [vmem:[%s22286_s0 + $0x1b0] sm:$0xff] }
  0x27   :  { %744 = vmatpush1.bf16.msra.mxu0 %v16077_v24  ;;  %v223_v24 = vmax.f32 %v139_v20, 0.0  ;;  %v169_v20 = vld [vmem:[%s22286_s0 + $0x1c8] sm:$0xff] }
  0x28   :  { %745 = vmatprep.subr.bf16.mxu0 %v16078_v25  ;;  %v227_v25 = vmax.f32 %v143_v21, 0.0  ;;  %v173_v21 = vld [vmem:[%s22286_s0 + $0x1e8] sm:$0xff] }
  0x2b   :  { %746 = vmatpush1.bf16.msra.mxu0 %v16080_v26  ;;  %v230_v26 = vmax.f32 %v146_v22, 0.0  ;;  %v176_v22 = vld [vmem:[%s22286_s0 + $0x200] sm:$0xff] }
  0x2c   :  { %747 = vmatprep.subr.bf16.mxu0 %v16081_v27  ;;  %v150_v27 = vld [vmem:[%s22286_s0 + $0x130] sm:$0xff] }
  0x2f   :  { %748 = vmatpush1.bf16.msra.mxu0 %v16083_v28  ;;  %v153_v28 = vld [vmem:[%s22286_s0 + $0x148] sm:$0xff] }
  0x30   :  { %749 = vmatprep.subr.bf16.mxu0 %v16084_v29  ;;  %v234_v29 = vmax.f32 %v150_v27, 0.0 }
  0x33   :  { %750 = vmatpush1.bf16.msra.mxu0 %v16086_v30  ;;  %v237_v30 = vmax.f32 %v153_v28, 0.0 }
  0x34   :  { %751 = vmatprep.subr.bf16.mxu0 %v16087_v31  ;;  %v16850_v31 = vpack.c.bf16 %v223_v24, %v220_v23  ;;  %v250_v23 = vmax.f32 %v166_v18, 0.0  ;;  %v253_v24 = vmax.f32 %v169_v20, 0.0  ;;  %v17012_v18 = vld [vmem:[%s22285_s1 + $0x188] ss:$12 sps:$4 sm:$0xff]   ;;  %v17017_v20 = vpack.c.bf16 %v277_v13, %v274_v12 }
  0x35   :  { %15313 = vmatprep.subr.bf16.mxu1 %v17012_v18  ;;  %v17096_v12 = vpack.c.bf16 %v219_v5, %v216_v4  ;;  %v138_v13 = vld [vmem:[%s22286_s0 + $0xd0] sm:$0xff] }
  0x36   :  { %v16944_v27 = vpack.c.bf16 %v253_v24, %v250_v23  ;;  %15315 = vmatpush3.bf16.msra.mxu1 %v17012_v18 }
  0x37   :  { %752 = vmatpush1.bf16.msra.mxu0 %v16089_v32  ;;  %v16852_v32 = vpack.c.bf16 %v237_v30, %v234_v29  ;;  %v172_v29 = vld [vmem:[%s22286_s0 + $0x1e0] sm:$0xff]  ;;  %v175_v30 = vld [vmem:[%s22286_s0 + $0x1f8] sm:$0xff] }
  0x38   :  { %753 = vmatprep.subr.bf16.mxu0 %v16090_v33  ;;  %v16854_v33 = vpack.c.bf16 %v230_v26, %v227_v25  ;;  %v257_v25 = vmax.f32 %v173_v21, 0.0  ;;  %v260_v26 = vmax.f32 %v176_v22, 0.0  ;;  %v256_v36 = vmax.f32 %v172_v29, 0.0  ;;  %v114_v21 = vld [vmem:[%s22286_s0 + $0x10] sm:$0xff]  ;;  %v117_v22 = vld [vmem:[%s22286_s0 + $0x28] sm:$0xff] }
  0x39   :  { %14109 = vmatprep.mubr.msk.bf16.mxu1 %vm682_vm0, %v16852_v32  ;;  %v198_v23 = vmax.f32 %v114_v21, 0.0  ;;  %v201_v24 = vmax.f32 %v117_v22, 0.0  ;;  %v16103_v29 = vld [vmem:[%s22285_s1 + $0x8] ss:$12 sps:$4 sm:$0xff]   ;;  %v156_v22 = vld [vmem:[%s22286_s0 + $0x160] sm:$0xff] }
  0x3a   :  { %v16946_v28 = vpack.c.bf16 %v260_v26, %v257_v25  ;;  %v16595_v25 = vmov 0   ;;  %v141_v21 = vld [vmem:[%s22286_s0 + $0xe8] sm:$0xff] }
  0x3b   :  { %754 = vmatpush1.bf16.msra.mxu0 %v16092_v34  ;;  %v142_v34 = vld [vmem:[%s22286_s0 + $0xf0] sm:$0xff]  ;;  %v17027_v26 = vpack.c.bf16 %v201_v24, %v198_v23  ;;  %v159_v23 = vld [vmem:[%s22286_s0 + $0x178] sm:$0xff] }
  0x3c   :  { %755 = vmatprep.subr.bf16.mxu0 %v16093_v37  ;;  %v152_v37 = vld [vmem:[%s22286_s0 + $0x140] sm:$0xff]  ;;  %v226_v38 = vmax.f32 %v142_v34, 0.0  ;;  %v179_v34 = vld [vmem:[%s22286_s0 + $0x218] sm:$0xff] }
  0x3d   :  { %v236_v41 = vmax.f32 %v152_v37, 0.0  ;;  %v259_v37 = vmax.f32 %v175_v30, 0.0  ;;  %v120_v30 = vld [vmem:[%s22286_s0 + $0x40] sm:$0xff] }
  0x3e   :  { %v16115_v24 = vld [vmem:[%s22285_s1 + $0x98] ss:$12 sps:$4 sm:$0xff]  }
  0x3f   :  { %756 = vmatpush1.bf16.msra.mxu0 %v16095_v42  ;;  %v16872_v42 = vpack.c.bf16 %v229_v39, %v226_v38  ;;  %v16874_v43 = vpack.c.bf16 %v236_v41, %v233_v40  ;;  %v263_v38 = vmax.f32 %v179_v34, 0.0  ;;  %v266_v39 = vmax.f32 %v182_v35, 0.0  ;;  %v123_v34 = vld [vmem:[%s22286_s0 + $0x58] sm:$0xff]  ;;  %v16104_v35 = vld [vmem:[%s22285_s1 + $0xe0] ss:$12 sps:$4 sm:$0xff]  }
  0x40   :  { %898 = vmatprep.subr.bf16.mxu0 %v16098_v45  ;;  %v151_v45 = vld [vmem:[%s22286_s0 + $0x138] sm:$0xff]  ;;  %v16962_v40 = vpack.c.bf16 %v259_v37, %v256_v36  ;;  %v204_v36 = vmax.f32 %v120_v30, 0.0  ;;  %v207_v37 = vmax.f32 %v123_v34, 0.0  ;;  %v165_v30 = vld [vmem:[%s22286_s0 + $0x1a8] sm:$0xff] }
  0x41   :  { %v235_v51 = vmax.f32 %v151_v45, 0.0  ;;  %v16964_v41 = vpack.c.bf16 %v266_v39, %v263_v38  ;;  %v181_v45 = vld [vmem:[%s22286_s0 + $0x228] sm:$0xff]  ;;  %v16106_v39 = vld [vmem:[%s22285_s1 + $0xf8] ss:$12 sps:$4 sm:$0xff]   ;;  %v16116_v34 = vld [vmem:[%s22285_s1 + $0x170] ss:$12 sps:$4 sm:$0xff]  }
  0x42   :  { %758 = vmatmul.mubr.bf16.vlgmr.msra.gmra.mrb[0].mxu0 %v16760_v46  ;;  %v16105_v38 = vld [vmem:[%s22285_s1 + $0x20] ss:$12 sps:$4 sm:$0xff]  }
  0x43   :  { %899 = vmatpush1.bf16.msra.mxu0 %v16096_v47  ;;  %767 = vmatprep.mubr.bf16.mxu0 %v16765_v48  ;;  %v155_v47 = vld [vmem:[%s22286_s0 + $0x158] sm:$0xff]  ;;  %v16890_v54 = vpack.c.bf16 %v235_v51, %v232_v50  ;;  %v262_v50 = vmax.f32 %v178_v44, 0.0  ;;  %v265_v51 = vmax.f32 %v181_v45, 0.0  ;;  %v17050_v44 = vpack.c.bf16 %v207_v37, %v204_v36  ;;  %v126_v45 = vld [vmem:[%s22286_s0 + $0x70] sm:$0xff] }
  0x44   :  { %900 = vmatprep.subr.bf16.mxu0 %v16101_v53  ;;  %v239_v52 = vmax.f32 %v155_v47, 0.0  ;;  %v242_v53 = vmax.f32 %v158_v49, 0.0  ;;  %v185_v47 = vld [vmem:[%s22286_s0 + $0x248] sm:$0xff]  ;;  %v188_v49 = vld [vmem:[%s22286_s0 + $0x260] sm:$0xff]  ;;  %v225_v36 = vmax.f32 %v141_v21, 0.0  ;;  %v240_v37 = vmax.f32 %v156_v22, 0.0 }
  0x45   :  { %v16980_v56 = vpack.c.bf16 %v265_v51, %v262_v50  ;;  %v16108_v50 = vld [vmem:[%s22285_s1 + $0x110] ss:$12 sps:$4 sm:$0xff]   ;;  %v210_v51 = vmax.f32 %v126_v45, 0.0 }
  0x46   :  { %v16892_v55 = vpack.c.bf16 %v242_v53, %v239_v52  ;;  %v269_v52 = vmax.f32 %v185_v47, 0.0  ;;  %v272_v53 = vmax.f32 %v188_v49, 0.0  ;;  %v129_v47 = vld [vmem:[%s22286_s0 + $0x88] sm:$0xff]  ;;  %v16107_v49 = vld [vmem:[%s22285_s1 + $0x38] ss:$12 sps:$4 sm:$0xff]  }
  0x47   :  { %901 = vmatpush1.bf16.msra.mxu0 %v16099_v58  ;;  %v161_v58 = vld [vmem:[%s22286_s0 + $0x188] sm:$0xff] }
  0x48   :  { %13383 = vmatprep.subr.bf16.mxu0 %v16102_v59  ;;  %v164_v59 = vld [vmem:[%s22286_s0 + $0x1a0] sm:$0xff]  ;;  %v245_v0 = vmax.f32 %v161_v58, 0.0  ;;  %v16982_v57 = vpack.c.bf16 %v272_v53, %v269_v52  ;;  %v213_v52 = vmax.f32 %v129_v47, 0.0  ;;  %v16109_v53 = vld [vmem:[%s22285_s1 + $0x50] ss:$12 sps:$4 sm:$0xff]   ;;  %v249_v47 = vmax.f32 %v165_v30, 0.0 }
  0x49   :  { %v248_v1 = vmax.f32 %v164_v59, 0.0  ;;  %v184_v58 = vld [vmem:[%s22286_s0 + $0x240] sm:$0xff]  ;;  %v187_v59 = vld [vmem:[%s22286_s0 + $0x258] sm:$0xff] }
  0x4a   :  { %768 = vmatmul.mubr.bf16.gmra.mrb[4].mxu0 %v16790_v60  ;;  %v183_v30 = vld [vmem:[%s22286_s0 + $0x238] sm:$0xff] }
  0x4b   :  { %777 = vmatprep.mubr.bf16.mxu0 %v16792_v61  ;;  %v16910_v3 = vpack.c.bf16 %v248_v1, %v245_v0  ;;  %v268_v0 = vmax.f32 %v184_v58, 0.0  ;;  %v271_v1 = vmax.f32 %v187_v59, 0.0  ;;  %v16110_v58 = vld [vmem:[%s22285_s1 + $0x128] ss:$12 sps:$4 sm:$0xff]   ;;  %v17073_v59 = vpack.c.bf16 %v213_v52, %v210_v51  ;;  %v144_v51 = vld [vmem:[%s22286_s0 + $0x100] sm:$0xff] }
  0x4c   :  { %v228_v4 = vmax.f32 %v144_v51, 0.0  ;;  %v192_v51 = vld [vmem:[%s22286_s0 + $0x280] sm:$0xff] }
  0x4d   :  { %v16998_v8 = vpack.c.bf16 %v271_v1, %v268_v0  ;;  %v16111_v0 = vld [vmem:[%s22285_s1 + $0x68] ss:$12 sps:$4 sm:$0xff]   ;;  %v16112_v1 = vld [vmem:[%s22285_s1 + $0x140] ss:$12 sps:$4 sm:$0xff]  }
  0x52   :  { %778 = vmatmul.mubr.bf16.gmra.mrb[8].mxu0 %v16808_v6 }
  0x53   :  { %787 = vmatprep.mubr.bf16.mxu0 %v16810_v7 }
  0x5a   :  { %788 = vmatmul.mubr.bf16.gmra.mrb[12].mxu0 %v16826_v16 }
  0x5b   :  { %797 = vmatprep.mubr.bf16.mxu0 %v16828_v17 }
  0x62   :  { %798 = vmatmul.mubr.bf16.gmra.mrb[16].mxu0 %v16850_v31 }
  0x63   :  { %807 = vmatprep.mubr.bf16.mxu0 %v16854_v33 }
  0x6a   :  { %808 = vmatmul.mubr.bf16.gmra.mrb[20].mxu0 %v16872_v42 }
  0x6b   :  { %817 = vmatprep.mubr.bf16.mxu0 %v16874_v43 }
  0x72   :  { %818 = vmatmul.mubr.bf16.gmra.mrb[24].mxu0 %v16890_v54 }
  0x73   :  { %827 = vmatprep.mubr.bf16.mxu0 %v16892_v55 }
  0x7a   :  { %828 = vmatmul.mubr.bf16.gmra.mrb[28].mxu0 %v16908_v2 }
  0x7b   :  { %837 = vmatprep.mubr.bf16.mxu0 %v16910_v3 }
  0x82   :  { %838 = vmatmul.mubr.bf16.gmra.mrb[32].mxu0 %v16926_v14 }
  0x83   :  { %847 = vmatprep.mubr.bf16.mxu0 %v16928_v15 }
  0x8a   :  { %848 = vmatmul.mubr.bf16.gmra.mrb[36].mxu0 %v16944_v27 }
  0x8b   :  { %857 = vmatprep.mubr.bf16.mxu0 %v16946_v28 }
  0x92   :  { %858 = vmatmul.mubr.bf16.gmra.mrb[40].mxu0 %v16962_v40 }
  0x93   :  { %867 = vmatprep.mubr.bf16.mxu0 %v16964_v41 }
  0x9a   :  { %868 = vmatmul.mubr.bf16.gmra.mrb[44].mxu0 %v16980_v56 }
  0x9b   :  { %877 = vmatprep.mubr.bf16.mxu0 %v16982_v57 }
  0xa2   :  { %878 = vmatmul.mubr.bf16.gmra.mrb[48].mxu0 %v16998_v8 }
  0xa3   :  { %887 = vmatprep.mubr.bf16.mxu0 %v17000_v9 }
  0xaa   :  { %888 = vmatmul.mubr.bf16.gmra.mrb[52].mxu0 %v17017_v20 }
  0xab   :  { %930 = vmatprep.mubr.bf16.mxu0 %v16595_v25 }
  0xb2   :  { %12723 = vmatmul.mubr.msk.bf16.vlgmr.msra.gmra.mrb[0].mxu0 %vm682_vm0, %v17027_v26 }
  0xb3   :  { %13384 = vmatpush3.bf16.msra.mxu0 %v16103_v29  ;;  %940 = vmatprep.mubr.bf16.mxu0 %v16595_v25  ;;  %v162_v29 = vld [vmem:[%s22286_s0 + $0x190] sm:$0xff] }
  0xb4   :  { %13385 = vmatprep.subr.bf16.mxu0 %v16104_v35  ;;  %v222_v35 = vmax.f32 %v138_v13, 0.0  ;;  %v246_v45 = vmax.f32 %v162_v29, 0.0  ;;  %v180_v29 = vld [vmem:[%s22286_s0 + $0x220] sm:$0xff] }
  0xb7   :  { %13386 = vmatpush3.bf16.msra.mxu0 %v16105_v38  ;;  %v243_v38 = vmax.f32 %v159_v23, 0.0 }
  0xb8   :  { %13387 = vmatprep.subr.bf16.mxu0 %v16106_v39  ;;  %v17127_v39 = vld [vmem:[%s22285_s1 + $0x1a0] ss:$12 sps:$4 sm:$0xff]  }
  0xb9   :  { %15314 = vmatprep.subr.bf16.mxu1 %v17127_v39  ;;  %v303_v52 = vpack.c.bf16 %v243_v38, %v240_v37  ;;  %v267_v37 = vmax.f32 %v183_v30, 0.0 }
  0xba   :  { %12724 = vmatmul.mubr.msk.bf16.gmra.mrb[4].mxu0 %vm682_vm0, %v17050_v44  ;;  %15316 = vmatpush3.bf16.msra.mxu1 %v17127_v39 }
  0xbb   :  { %950 = vmatprep.mubr.bf16.mxu0 %v16595_v25  ;;  %13388 = vmatpush3.bf16.msra.mxu0 %v16107_v49  ;;  %v16117_v49 = vld [vmem:[%s22285_s1 + $0xb0] ss:$12 sps:$4 sm:$0xff]  }
  0xbc   :  { %13389 = vmatprep.subr.bf16.mxu0 %v16108_v50  ;;  %v17135_v50 = vpack.c.bf16 %v225_v36, %v222_v35  ;;  %v189_v35 = vld [vmem:[%s22286_s0 + $0x268] sm:$0xff]  ;;  %v264_v36 = vmax.f32 %v180_v29, 0.0 }
  0xbd   :  { %14110 = vmatmul.mubr.msk.bf16.vlgmr.msra.gmra.mrb[0].mxu1 %vm682_vm0, %v303_v52 }
  0xbf   :  { %13390 = vmatpush3.bf16.msra.mxu0 %v16109_v53  ;;  %v147_v53 = vld [vmem:[%s22286_s0 + $0x118] sm:$0xff] }
  0xc0   :  { %13391 = vmatprep.subr.bf16.mxu0 %v16110_v58  ;;  %v306_v58 = vpack.c.bf16 %v249_v47, %v246_v45  ;;  %v231_v5 = vmax.f32 %v147_v53, 0.0  ;;  %v273_v45 = vmax.f32 %v189_v35, 0.0  ;;  %v315_v47 = vpack.c.bf16 %v267_v37, %v264_v36  ;;  %v195_v53 = vld [vmem:[%s22286_s0 + $0x298] sm:$0xff] }
  0xc2   :  { %12725 = vmatmul.mubr.msk.bf16.gmra.mrb[8].mxu0 %vm682_vm0, %v17073_v59  ;;  %14113 = vmatprep.mubr.msk.bf16.mxu1 %vm682_vm0, %v306_v58  ;;  %v17161_v22 = vpack.c.bf16 %v231_v5, %v228_v4 }
  0xc3   :  { %960 = vmatprep.mubr.bf16.mxu0 %v16595_v25  ;;  %13392 = vmatpush3.bf16.msra.mxu0 %v16111_v0  ;;  %v174_v0 = vld [vmem:[%s22286_s0 + $0x1f0] sm:$0xff] }
  0xc4   :  { %13393 = vmatprep.subr.bf16.mxu0 %v16112_v1  ;;  %v177_v1 = vld [vmem:[%s22286_s0 + $0x208] sm:$0xff]  ;;  %v258_v13 = vmax.f32 %v174_v0, 0.0 }
  0xc5   :  { %v261_v21 = vmax.f32 %v177_v1, 0.0 }
  0xc7   :  { %13394 = vmatpush3.bf16.msra.mxu0 %v16113_v10  ;;  %v252_v10 = vmax.f32 %v168_v62, 0.0  ;;  %v276_v62 = vmax.f32 %v192_v51, 0.0 }
  0xc8   :  { %13395 = vmatprep.subr.bf16.mxu0 %v16114_v11  ;;  %v255_v11 = vmax.f32 %v171_v63, 0.0  ;;  %v279_v63 = vmax.f32 %v195_v53, 0.0 }
  0xca   :  { %12726 = vmatmul.mubr.msk.bf16.gmra.mrb[12].mxu0 %vm682_vm0, %v17096_v12  ;;  %v309_v23 = vpack.c.bf16 %v255_v11, %v252_v10  ;;  %v321_v0 = vpack.c.bf16 %v279_v63, %v276_v62 }
  0xcb   :  { %970 = vmatprep.mubr.bf16.mxu0 %v16595_v25  ;;  %13396 = vmatpush3.bf16.msra.mxu0 %v16115_v24  ;;  %v312_v24 = vpack.c.bf16 %v261_v21, %v258_v13 }
  0xcc   :  { %13397 = vmatprep.subr.bf16.mxu0 %v16116_v34  ;;  %v186_v34 = vld [vmem:[%s22286_s0 + $0x250] sm:$0xff]  ;;  %14114 = vmatmul.mubr.msk.bf16.gmra.mrb[4].mxu1 %vm682_vm0, %v309_v23 }
  0xcd   :  { %14117 = vmatprep.mubr.msk.bf16.mxu1 %vm682_vm0, %v312_v24  ;;  %v270_v38 = vmax.f32 %v186_v34, 0.0 }
  0xcf   :  { %13398 = vmatpush3.bf16.msra.mxu0 %v16117_v49  ;;  %v318_v49 = vpack.c.bf16 %v273_v45, %v270_v38 }
  0xd0   :  { %14093 = vmatprep.subr.bf16.mxu0 %v17012_v18 }
  0xd2   :  { %12727 = vmatmul.mubr.msk.bf16.gmra.mrb[16].mxu0 %vm682_vm0, %v17135_v50 }
  0xd3   :  { %980 = vmatprep.mubr.bf16.mxu0 %v16595_v25 }
  0xd4   :  { %14118 = vmatmul.mubr.msk.bf16.gmra.mrb[8].mxu1 %vm682_vm0, %v315_v47 }
  0xd5   :  { %14121 = vmatprep.mubr.msk.bf16.mxu1 %vm682_vm0, %v318_v49 }
  0xda   :  { %12728 = vmatmul.mubr.msk.bf16.gmra.mrb[20].mxu0 %vm682_vm0, %v17161_v22 }
  0xdb   :  { %990 = vmatprep.mubr.bf16.mxu0 %v16595_v25 }
  0xdc   :  { %14122 = vmatmul.mubr.msk.bf16.gmra.mrb[12].mxu1 %vm682_vm0, %v321_v0 }
  0xe2   :  { %12729 = vmatmul.mubr.msk.bf16.gmra.mrb[24].mxu0 %vm682_vm0, %v16852_v32 }
  0xe3   :  { %1000 = vmatprep.mubr.bf16.mxu0 %v16595_v25 }
  0xea   :  { %12730 = vmatmul.mubr.msk.bf16.gmra.mrb[28].mxu0 %vm682_vm0, %v303_v52 }
  0xeb   :  { %1010 = vmatprep.mubr.bf16.mxu0 %v16595_v25 }
  0xf2   :  { %12731 = vmatmul.mubr.msk.bf16.gmra.mrb[32].mxu0 %vm682_vm0, %v306_v58 }
  0xf3   :  { %1020 = vmatprep.mubr.bf16.mxu0 %v16595_v25 }
  0xfa   :  { %12732 = vmatmul.mubr.msk.bf16.gmra.mrb[36].mxu0 %vm682_vm0, %v309_v23 }
  0xfb   :  { %1030 = vmatprep.mubr.bf16.mxu0 %v16595_v25 }
 0x102   :  { %12733 = vmatmul.mubr.msk.bf16.gmra.mrb[40].mxu0 %vm682_vm0, %v312_v24 }
 0x103   :  { %1040 = vmatprep.mubr.bf16.mxu0 %v16595_v25 }
 0x10a   :  { %12734 = vmatmul.mubr.msk.bf16.gmra.mrb[44].mxu0 %vm682_vm0, %v315_v47 }
 0x10b   :  { %1050 = vmatprep.mubr.bf16.mxu0 %v16595_v25 }
 0x112   :  { %12735 = vmatmul.mubr.msk.bf16.gmra.mrb[48].mxu0 %vm682_vm0, %v318_v49 }
 0x113   :  { %1060 = vmatprep.mubr.bf16.mxu0 %v16595_v25 }
 0x11a   :  { %12736 = vmatmul.mubr.msk.bf16.gmra.mrb[52].mxu0 %vm682_vm0, %v321_v0 }
 0x11b   :  { %1103 = vmatprep.mubr.bf16.mxu0 %v16691_v19 }
 0x122   :  { %1104 = vmatmul.mubr.bf16.vlgmr.msra.gmra.mrb[56].mxu0 %v16760_v46 }
 0x123   :  { %14094 = vmatpush3.bf16.msra.mxu0 %v17012_v18  ;;  %1111 = vmatprep.mubr.bf16.mxu0 %v16765_v48 }
 0x124   :  { %14095 = vmatprep.subr.bf16.mxu0 %v17127_v39 }
 0x127   :  { %14096 = vmatpush3.bf16.msra.mxu0 %v17127_v39 }
 0x12a   :  { %1112 = vmatmul.mubr.bf16.gmra.mrb[60].mxu0 %v16790_v60 }
 0x12b   :  { %1119 = vmatprep.mubr.bf16.mxu0 %v16792_v61 }
 0x132   :  { %1120 = vmatmul.mubr.bf16.gmra.mrb[64].mxu0 %v16808_v6 }
 0x133   :  { %1127 = vmatprep.mubr.bf16.mxu0 %v16810_v7 }
 0x13a   :  { %1128 = vmatmul.mubr.bf16.gmra.mrb[68].mxu0 %v16826_v16 }
 0x13b   :  { %1135 = vmatprep.mubr.bf16.mxu0 %v16828_v17 }
 0x142   :  { %1136 = vmatmul.mubr.bf16.gmra.mrb[72].mxu0 %v16850_v31 }
 0x143   :  { %1143 = vmatprep.mubr.bf16.mxu0 %v16854_v33 }
 0x14a   :  { %1144 = vmatmul.mubr.bf16.gmra.mrb[76].mxu0 %v16872_v42 }
 0x14b   :  { %1151 = vmatprep.mubr.bf16.mxu0 %v16874_v43 }
 0x152   :  { %1152 = vmatmul.mubr.bf16.gmra.mrb[80].mxu0 %v16890_v54 }
 0x153   :  { %1159 = vmatprep.mubr.bf16.mxu0 %v16892_v55 }
 0x15a   :  { %1160 = vmatmul.mubr.bf16.gmra.mrb[84].mxu0 %v16908_v2 }
 0x15b   :  { %1167 = vmatprep.mubr.bf16.mxu0 %v16910_v3 }
 0x162   :  { %1168 = vmatmul.mubr.bf16.gmra.mrb[88].mxu0 %v16926_v14 }
 0x163   :  { %1175 = vmatprep.mubr.bf16.mxu0 %v16928_v15 }
 0x16a   :  { %1176 = vmatmul.mubr.bf16.gmra.mrb[92].mxu0 %v16944_v27 }
 0x16b   :  { %1183 = vmatprep.mubr.bf16.mxu0 %v16946_v28 }
 0x172   :  { %1184 = vmatmul.mubr.bf16.gmra.mrb[96].mxu0 %v16962_v40 }
 0x173   :  { %1191 = vmatprep.mubr.bf16.mxu0 %v16964_v41 }
 0x17a   :  { %1192 = vmatmul.mubr.bf16.gmra.mrb[100].mxu0 %v16980_v56 }
 0x17b   :  { %1199 = vmatprep.mubr.bf16.mxu0 %v16982_v57 }
 0x182   :  { %1200 = vmatmul.mubr.bf16.gmra.mrb[104].mxu0 %v16998_v8 }
 0x183   :  { %1207 = vmatprep.mubr.bf16.mxu0 %v17000_v9 }
 0x185   :  { %v17235_v19 = vpop.f32.mrb[0].mxu0 }
 0x186   :  { %v17237_v46 = vpop.f32.mrb[1].mxu0  ;;  %v1463_v60 = vmul.f32 %v17235_v19, %v17235_v19 }
 0x187   :  { %22558 = vst [vmem:[#allocation3_spill] sm:$0xff] %v17237_v46  ;;  %v17239_v48 = vpop.f32.mrb[2].mxu0  ;;  %v1464_v16 = vmul.f32 %v17237_v46, %v17237_v46 }
 0x188   :  { %v1361_v61 = vadd.f32 %v17239_v48, %v17235_v19  ;;  %v1466_v6 = vmul.f32 %v17239_v48, %v17239_v48  ;;  %v17247_v7 = vpop.f32.mrb[3].mxu0 }
 0x189   :  { %22559 = vst [vmem:[#allocation4_spill] sm:$0xff] %v17247_v7  ;;  %v1394_v17 = vadd.f32 %v17247_v7, %v17237_v46  ;;  %v1467_v31 = vmul.f32 %v17247_v7, %v17247_v7 }
 0x18a   :  { %v1547_v32 = vadd.f32 %v1466_v6, %v1463_v60  ;;  %1208 = vmatmul.mubr.bf16.gmra.mrb[108].mxu0 %v17017_v20 }
 0x18b   :  { %v1580_v33 = vadd.f32 %v1467_v31, %v1464_v16  ;;  %14097 = vmatprep.mubr.msk.bf16.mxu0 %vm682_vm0, %v17027_v26 }
 0x18d   :  { %v17258_v42 = vpop.f32.mrb[4].mxu0 }
 0x18e   :  { %v1362_v43 = vadd.f32 %v1361_v61, %v17258_v42  ;;  %v1469_v54 = vmul.f32 %v17258_v42, %v17258_v42  ;;  %v17263_v55 = vpop.f32.mrb[5].mxu0 }
 0x18f   :  { %22560 = vst [vmem:[#allocation5_spill] sm:$0xff] %v17263_v55  ;;  %v1395_v2 = vadd.f32 %v1394_v17, %v17263_v55  ;;  %v1470_v3 = vmul.f32 %v17263_v55, %v17263_v55  ;;  %v17268_v14 = vpop.f32.mrb[6].mxu0 }
 0x190   :  { %v1548_v15 = vadd.f32 %v1547_v32, %v1469_v54  ;;  %v1363_v27 = vadd.f32 %v1362_v43, %v17268_v14  ;;  %v1472_v28 = vmul.f32 %v17268_v14, %v17268_v14  ;;  %v17273_v40 = vpop.f32.mrb[7].mxu0  ;;  %v17340_v17 = vpop.f32.mrb[0].mxu1 }
 0x191   :  { %22561 = vst [vmem:[#allocation6_spill] sm:$0xff] %v17273_v40  ;;  %v1581_v41 = vadd.f32 %v1580_v33, %v1470_v3  ;;  %v1396_v56 = vadd.f32 %v1395_v2, %v17273_v40  ;;  %v1473_v57 = vmul.f32 %v17273_v40, %v17273_v40  ;;  %v17347_v43 = vpop.f32.mrb[1].mxu1 }
 0x192   :  { %v1549_v8 = vadd.f32 %v1548_v15, %v1472_v28  ;;  %14098 = vmatmul.mubr.msk.bf16.vlgmr.msra.gmra.mrb[112].mxu0 %vm682_vm0, %v17050_v44  ;;  %v17352_v15 = vpop.f32.mrb[2].mxu1 }
 0x193   :  { %v1582_v9 = vadd.f32 %v1581_v41, %v1473_v57  ;;  %14101 = vmatprep.mubr.msk.bf16.mxu0 %vm682_vm0, %v17073_v59  ;;  %v17354_v28 = vpop.f32.mrb[3].mxu1 }
 0x195   :  { %v17282_v18 = vpop.f32.mrb[8].mxu0 }
 0x196   :  { %v1364_v20 = vadd.f32 %v1363_v27, %v17282_v18  ;;  %v1475_v25 = vmul.f32 %v17282_v18, %v17282_v18  ;;  %v17287_v26 = vpop.f32.mrb[9].mxu0 }
 0x197   :  { %22562 = vst [vmem:[#allocation7_spill] sm:$0xff] %v17287_v26  ;;  %v1397_v39 = vadd.f32 %v1396_v56, %v17287_v26  ;;  %v1476_v52 = vmul.f32 %v17287_v26, %v17287_v26  ;;  %v17292_v58 = vpop.f32.mrb[10].mxu0 }
 0x198   :  { %v1550_v44 = vadd.f32 %v1549_v8, %v1475_v25  ;;  %v1365_v1 = vadd.f32 %v1364_v20, %v17292_v58  ;;  %v1478_v59 = vmul.f32 %v17292_v58, %v17292_v58  ;;  %v17297_v4 = vpop.f32.mrb[11].mxu0 }
 0x199   :  { %22563 = vst [vmem:[#allocation8_spill] sm:$0xff] %v17297_v4  ;;  %v1583_v5 = vadd.f32 %v1582_v9, %v1476_v52  ;;  %v1398_v10 = vadd.f32 %v1397_v39, %v17297_v4  ;;  %v1479_v11 = vmul.f32 %v17297_v4, %v17297_v4 }
 0x19a   :  { %v1551_v13 = vadd.f32 %v1550_v44, %v1478_v59  ;;  %14102 = vmatmul.mubr.msk.bf16.gmra.mrb[116].mxu0 %vm682_vm0, %v17096_v12 }
 0x19b   :  { %v1584_v21 = vadd.f32 %v1583_v5, %v1479_v11  ;;  %14105 = vmatprep.mubr.msk.bf16.mxu0 %vm682_vm0, %v17135_v50 }
 0x19d   :  { %v17306_v23 = vpop.f32.mrb[12].mxu0 }
 0x19e   :  { %v1366_v24 = vadd.f32 %v1365_v1, %v17306_v23  ;;  %v1481_v29 = vmul.f32 %v17306_v23, %v17306_v23  ;;  %v17311_v30 = vpop.f32.mrb[13].mxu0 }
 0x19f   :  { %22564 = vst [vmem:[#allocation9_spill] sm:$0xff] %v17311_v30  ;;  %v1399_v34 = vadd.f32 %v1398_v10, %v17311_v30  ;;  %v1482_v35 = vmul.f32 %v17311_v30, %v17311_v30  ;;  %v17316_v36 = vpop.f32.mrb[14].mxu0 }
 0x1a0   :  { %v1552_v12 = vadd.f32 %v1551_v13, %v1481_v29  ;;  %v1367_v37 = vadd.f32 %v1366_v24, %v17316_v36  ;;  %v1484_v50 = vmul.f32 %v17316_v36, %v17316_v36  ;;  %v17321_v38 = vpop.f32.mrb[15].mxu0 }
 0x1a1   :  { %22565 = vst [vmem:[#allocation10_spill] sm:$0xff] %v17321_v38  ;;  %v1585_v45 = vadd.f32 %v1584_v21, %v1482_v35  ;;  %v1400_v47 = vadd.f32 %v1399_v34, %v17321_v38  ;;  %v1485_v49 = vmul.f32 %v17321_v38, %v17321_v38 }
 0x1a2   :  { %v1553_v51 = vadd.f32 %v1552_v12, %v1484_v50  ;;  %14106 = vmatmul.mubr.msk.bf16.gmra.mrb[120].mxu0 %vm682_vm0, %v17161_v22 }
 0x1a3   :  { %v1586_v53 = vadd.f32 %v1585_v45, %v1485_v49  ;;  %v17388_v45 = vpop.f32.mrb[4].mxu1 }
 0x1a5   :  { %v17328_v62 = vpop.f32.mrb[16].mxu0 }
 0x1a6   :  { %v1368_v63 = vadd.f32 %v1367_v37, %v17328_v62  ;;  %v1487_v0 = vmul.f32 %v17328_v62, %v17328_v62  ;;  %v17333_v60 = vpop.f32.mrb[17].mxu0 }
 0x1a7   :  { %22566 = vst [vmem:[#allocation11_spill] sm:$0xff] %v17333_v60  ;;  %v1401_v61 = vadd.f32 %v1400_v47, %v17333_v60  ;;  %v1488_v6 = vmul.f32 %v17333_v60, %v17333_v60  ;;  %v17338_v16 = vpop.f32.mrb[18].mxu0 }
 0x1a8   :  { %v1554_v22 = vadd.f32 %v1553_v51, %v1487_v0  ;;  %v1369_v31 = vadd.f32 %v1368_v63, %v17338_v16  ;;  %v1490_v32 = vmul.f32 %v17338_v16, %v17338_v16  ;;  %v17345_v33 = vpop.f32.mrb[19].mxu0  ;;  %v17395_v63 = vpop.f32.mrb[5].mxu1 }
 0x1a9   :  { %v1587_v54 = vadd.f32 %v1586_v53, %v1488_v6  ;;  %v1402_v2 = vadd.f32 %v1401_v61, %v17345_v33  ;;  %v1491_v3 = vmul.f32 %v17345_v33, %v17345_v33 }
 0x1aa   :  { %v1555_v27 = vadd.f32 %v1554_v22, %v1490_v32  ;;  %v17400_v22 = vpop.f32.mrb[6].mxu1 }
 0x1ab   :  { %v1588_v41 = vadd.f32 %v1587_v54, %v1491_v3  ;;  %v17402_v32 = vpop.f32.mrb[7].mxu1 }
 0x1ad   :  { %v17356_v56 = vpop.f32.mrb[20].mxu0 }
 0x1ae   :  { %v1370_v57 = vadd.f32 %v1369_v31, %v17356_v56  ;;  %v1493_v8 = vmul.f32 %v17356_v56, %v17356_v56  ;;  %v17361_v9 = vpop.f32.mrb[21].mxu0 }
 0x1af   :  { %22567 = vst [vmem:[#allocation12_spill] sm:$0xff] %v17361_v9  ;;  %v1403_v20 = vadd.f32 %v1402_v2, %v17361_v9  ;;  %v1494_v25 = vmul.f32 %v17361_v9, %v17361_v9  ;;  %v17366_v39 = vpop.f32.mrb[22].mxu0 }
 0x1b0   :  { %v1556_v52 = vadd.f32 %v1555_v27, %v1493_v8  ;;  %v1371_v44 = vadd.f32 %v1370_v57, %v17366_v39  ;;  %v1496_v1 = vmul.f32 %v17366_v39, %v17366_v39  ;;  %v17371_v59 = vpop.f32.mrb[23].mxu0 }
 0x1b1   :  { %22568 = vst [vmem:[#allocation13_spill] sm:$0xff] %v17371_v59  ;;  %v1589_v5 = vadd.f32 %v1588_v41, %v1494_v25  ;;  %v1404_v10 = vadd.f32 %v1403_v20, %v17371_v59  ;;  %v1497_v11 = vmul.f32 %v17371_v59, %v17371_v59 }
 0x1b2   :  { %v1557_v13 = vadd.f32 %v1556_v52, %v1496_v1 }
 0x1b3   :  { %v1590_v21 = vadd.f32 %v1589_v5, %v1497_v11 }
 0x1b5   :  { %v17376_v24 = vpop.f32.mrb[24].mxu0 }
 0x1b6   :  { %v1372_v29 = vadd.f32 %v1371_v44, %v17376_v24  ;;  %v1499_v34 = vmul.f32 %v17376_v24, %v17376_v24  ;;  %v17381_v35 = vpop.f32.mrb[25].mxu0 }
 0x1b7   :  { %22569 = vst [vmem:[#allocation14_spill] sm:$0xff] %v17381_v35  ;;  %v1405_v12 = vadd.f32 %v1404_v10, %v17381_v35  ;;  %v1500_v37 = vmul.f32 %v17381_v35, %v17381_v35  ;;  %v17386_v50 = vpop.f32.mrb[26].mxu0 }
 0x1b8   :  { %v1558_v47 = vadd.f32 %v1557_v13, %v1499_v34  ;;  %v1373_v49 = vadd.f32 %v1372_v29, %v17386_v50  ;;  %v1502_v51 = vmul.f32 %v17386_v50, %v17386_v50  ;;  %v17393_v53 = vpop.f32.mrb[27].mxu0 }
 0x1b9   :  { %22570 = vst [vmem:[#allocation15_spill] sm:$0xff] %v17393_v53  ;;  %v1591_v0 = vadd.f32 %v1590_v21, %v1500_v37  ;;  %v1406_v61 = vadd.f32 %v1405_v12, %v17393_v53  ;;  %v1503_v6 = vmul.f32 %v17393_v53, %v17393_v53 }
 0x1ba   :  { %v1559_v31 = vadd.f32 %v1558_v47, %v1502_v51 }
 0x1bb   :  { %v1592_v54 = vadd.f32 %v1591_v0, %v1503_v6  ;;  %v17436_v0 = vpop.f32.mrb[8].mxu1 }
 0x1bd   :  { %v17404_v2 = vpop.f32.mrb[28].mxu0 }
 0x1be   :  { %v1374_v3 = vadd.f32 %v1373_v49, %v17404_v2  ;;  %v1505_v27 = vmul.f32 %v17404_v2, %v17404_v2  ;;  %v17409_v41 = vpop.f32.mrb[29].mxu0 }
 0x1bf   :  { %22571 = vst [vmem:[#allocation16_spill] sm:$0xff] %v17409_v41  ;;  %v1407_v57 = vadd.f32 %v1406_v61, %v17409_v41  ;;  %v1506_v8 = vmul.f32 %v17409_v41, %v17409_v41  ;;  %v17414_v20 = vpop.f32.mrb[30].mxu0 }
 0x1c0   :  { %22572 = vst [vmem:[#allocation17_spill] sm:$0xff] %v17414_v20  ;;  %v1560_v25 = vadd.f32 %v1559_v31, %v1505_v27  ;;  %v1375_v52 = vadd.f32 %v1374_v3, %v17414_v20  ;;  %v1508_v44 = vmul.f32 %v17414_v20, %v17414_v20  ;;  %v17419_v1 = vpop.f32.mrb[31].mxu0  ;;  %v17443_v3 = vpop.f32.mrb[9].mxu1 }
 0x1c1   :  { %22573 = vst [vmem:[#allocation18_spill] sm:$0xff] %v17419_v1  ;;  %v1593_v5 = vadd.f32 %v1592_v54, %v1506_v8  ;;  %v1408_v10 = vadd.f32 %v1407_v57, %v17419_v1  ;;  %v1509_v11 = vmul.f32 %v17419_v1, %v17419_v1 }
 0x1c2   :  { %v1561_v13 = vadd.f32 %v1560_v25, %v1508_v44  ;;  %v17448_v25 = vpop.f32.mrb[10].mxu1 }
 0x1c3   :  { %v1594_v21 = vadd.f32 %v1593_v5, %v1509_v11  ;;  %v17450_v44 = vpop.f32.mrb[11].mxu1 }
 0x1c5   :  { %v17424_v29 = vpop.f32.mrb[32].mxu0 }
 0x1c6   :  { %22574 = vst [vmem:[#allocation19_spill] sm:$0xff] %v17424_v29  ;;  %v1376_v34 = vadd.f32 %v1375_v52, %v17424_v29  ;;  %v1511_v12 = vmul.f32 %v17424_v29, %v17424_v29  ;;  %v17429_v37 = vpop.f32.mrb[33].mxu0 }
 0x1c7   :  { %22575 = vst [vmem:[#allocation20_spill] sm:$0xff] %v17429_v37  ;;  %v1409_v47 = vadd.f32 %v1408_v10, %v17429_v37  ;;  %v1512_v49 = vmul.f32 %v17429_v37, %v17429_v37  ;;  %v17434_v51 = vpop.f32.mrb[34].mxu0 }
 0x1c8   :  { %22576 = vst [vmem:[#allocation21_spill] sm:$0xff] %v17434_v51  ;;  %v1562_v61 = vadd.f32 %v1561_v13, %v1511_v12  ;;  %v1377_v6 = vadd.f32 %v1376_v34, %v17434_v51  ;;  %v1514_v31 = vmul.f32 %v17434_v51, %v17434_v51  ;;  %v17441_v54 = vpop.f32.mrb[35].mxu0 }
 0x1c9   :  { %22577 = vst [vmem:[#allocation22_spill] sm:$0xff] %v17441_v54  ;;  %v1595_v27 = vadd.f32 %v1594_v21, %v1512_v49  ;;  %v1410_v57 = vadd.f32 %v1409_v47, %v17441_v54  ;;  %v1515_v8 = vmul.f32 %v17441_v54, %v17441_v54 }
 0x1ca   :  { %v1563_v52 = vadd.f32 %v1562_v61, %v1514_v31 }
 0x1cb   :  { %v1596_v5 = vadd.f32 %v1595_v27, %v1515_v8 }
 0x1cd   :  { %v17452_v10 = vpop.f32.mrb[36].mxu0 }
 0x1ce   :  { %22578 = vst [vmem:[#allocation23_spill] sm:$0xff] %v17452_v10  ;;  %v1378_v11 = vadd.f32 %v1377_v6, %v17452_v10  ;;  %v1517_v13 = vmul.f32 %v17452_v10, %v17452_v10  ;;  %v17457_v34 = vpop.f32.mrb[37].mxu0 }
 0x1cf   :  { %22579 = vst [vmem:[#allocation24_spill] sm:$0xff] %v17457_v34  ;;  %v1411_v21 = vadd.f32 %v1410_v57, %v17457_v34  ;;  %v1518_v12 = vmul.f32 %v17457_v34, %v17457_v34  ;;  %v17462_v47 = vpop.f32.mrb[38].mxu0 }
 0x1d0   :  { %22580 = vst [vmem:[#allocation25_spill] sm:$0xff] %v17462_v47  ;;  %v1564_v49 = vadd.f32 %v1563_v52, %v1517_v13  ;;  %v1379_v61 = vadd.f32 %v1378_v11, %v17462_v47  ;;  %v1520_v31 = vmul.f32 %v17462_v47, %v17462_v47  ;;  %v17467_v27 = vpop.f32.mrb[39].mxu0 }
 0x1d1   :  { %22581 = vst [vmem:[#allocation26_spill] sm:$0xff] %v17467_v27  ;;  %v1597_v6 = vadd.f32 %v1596_v5, %v1518_v12  ;;  %v1412_v8 = vadd.f32 %v1411_v21, %v17467_v27  ;;  %v1521_v54 = vmul.f32 %v17467_v27, %v17467_v27  ;;  %v17484_v12 = vpop.f32.mrb[12].mxu1 }
 0x1d2   :  { %v1565_v57 = vadd.f32 %v1564_v49, %v1520_v31 }
 0x1d3   :  { %v1598_v37 = vadd.f32 %v1597_v6, %v1521_v54  ;;  %v17491_v6 = vpop.f32.mrb[13].mxu1 }
 0x1d4   :  { %v17496_v41 = vpop.f32.mrb[14].mxu1 }
 0x1d5   :  { %v17472_v1 = vpop.f32.mrb[40].mxu0  ;;  %v17498_v35 = vpop.f32.mrb[15].mxu1 }
 0x1d6   :  { %22582 = vst [vmem:[#allocation27_spill] sm:$0xff] %v17472_v1  ;;  %v1380_v34 = vadd.f32 %v1379_v61, %v17472_v1  ;;  %v1523_v52 = vmul.f32 %v17472_v1, %v17472_v1  ;;  %v17477_v11 = vpop.f32.mrb[41].mxu0 }
 0x1d7   :  { %22583 = vst [vmem:[#allocation28_spill] sm:$0xff] %v17477_v11  ;;  %v1413_v13 = vadd.f32 %v1412_v8, %v17477_v11  ;;  %v1524_v5 = vmul.f32 %v17477_v11, %v17477_v11  ;;  %v17482_v21 = vpop.f32.mrb[42].mxu0 }
 0x1d8   :  { %22584 = vst [vmem:[#allocation29_spill] sm:$0xff] %v17482_v21  ;;  %v1566_v49 = vadd.f32 %v1565_v57, %v1523_v52  ;;  %v1381_v54 = vadd.f32 %v1380_v34, %v17482_v21  ;;  %v1526_v61 = vmul.f32 %v17482_v21, %v17482_v21  ;;  %v17489_v31 = vpop.f32.mrb[43].mxu0 }
 0x1d9   :  { %22585 = vst [vmem:[#allocation30_spill] sm:$0xff] %v17489_v31  ;;  %v1599_v27 = vadd.f32 %v1598_v37, %v1524_v5  ;;  %v1414_v8 = vadd.f32 %v1413_v13, %v17489_v31  ;;  %v1527_v11 = vmul.f32 %v17489_v31, %v17489_v31 }
 0x1da   :  { %v1567_v53 = vadd.f32 %v1566_v49, %v1526_v61 }
 0x1db   :  { %v1600_v57 = vadd.f32 %v1599_v27, %v1527_v11 }
 0x1dd   :  { %v17500_v34 = vpop.f32.mrb[44].mxu0 }
 0x1de   :  { %22586 = vst [vmem:[#allocation31_spill] sm:$0xff] %v17500_v34  ;;  %v1382_v52 = vadd.f32 %v1381_v54, %v17500_v34  ;;  %v1529_v59 = vmul.f32 %v17500_v34, %v17500_v34  ;;  %v17505_v9 = vpop.f32.mrb[45].mxu0 }
 0x1df   :  { %22587 = vst [vmem:[#allocation32_spill] sm:$0xff] %v17505_v9  ;;  %v1415_v37 = vadd.f32 %v1414_v8, %v17505_v9  ;;  %v1530_v13 = vmul.f32 %v17505_v9, %v17505_v9  ;;  %v17510_v5 = vpop.f32.mrb[46].mxu0 }
 0x1e0   :  { %22588 = vst [vmem:[#allocation33_spill] sm:$0xff] %v17510_v5  ;;  %v1568_v49 = vadd.f32 %v1567_v53, %v1529_v59  ;;  %v1383_v61 = vadd.f32 %v1382_v52, %v17510_v5  ;;  %v1532_v27 = vmul.f32 %v17510_v5, %v17510_v5  ;;  %v17515_v11 = vpop.f32.mrb[47].mxu0 }
 0x1e1   :  { %22589 = vst [vmem:[#allocation34_spill] sm:$0xff] %v17515_v11  ;;  %v1601_v54 = vadd.f32 %v1600_v57, %v1530_v13  ;;  %v1416_v31 = vadd.f32 %v1415_v37, %v17515_v11  ;;  %v1533_v60 = vmul.f32 %v17515_v11, %v17515_v11 }
 0x1e2   :  { %v1569_v8 = vadd.f32 %v1568_v49, %v1532_v27 }
 0x1e3   :  { %v1602_v38 = vadd.f32 %v1601_v54, %v1533_v60 }
 0x1e5   :  { %v17520_v30 = vpop.f32.mrb[48].mxu0 }
 0x1e6   :  { %22590 = vst [vmem:[#allocation35_spill] sm:$0xff] %v17520_v30  ;;  %v1384_v9 = vadd.f32 %v1383_v61, %v17520_v30  ;;  %v1535_v59 = vmul.f32 %v17520_v30, %v17520_v30  ;;  %v17525_v53 = vpop.f32.mrb[49].mxu0 }
 0x1e7   :  { %22591 = vst [vmem:[#allocation36_spill] sm:$0xff] %v17525_v53  ;;  %v1417_v52 = vadd.f32 %v1416_v31, %v17525_v53  ;;  %v1536_v57 = vmul.f32 %v17525_v53, %v17525_v53  ;;  %v17530_v37 = vpop.f32.mrb[50].mxu0 }
 0x1e8   :  { %22592 = vst [vmem:[#allocation37_spill] sm:$0xff] %v17530_v37  ;;  %v1570_v13 = vadd.f32 %v1569_v8, %v1535_v59  ;;  %v1385_v49 = vadd.f32 %v1384_v9, %v17530_v37  ;;  %v1538_v60 = vmul.f32 %v17530_v37, %v17530_v37  ;;  %v17535_v27 = vpop.f32.mrb[51].mxu0 }
 0x1e9   :  { %22593 = vst [vmem:[#allocation38_spill] sm:$0xff] %v17535_v27  ;;  %v1603_v61 = vadd.f32 %v1602_v38, %v1536_v57  ;;  %v1418_v54 = vadd.f32 %v1417_v52, %v17535_v27  ;;  %v1539_v11 = vmul.f32 %v17535_v27, %v17535_v27 }
 0x1ea   :  { %v1571_v31 = vadd.f32 %v1570_v13, %v1538_v60 }
 0x1eb   :  { %v1604_v4 = vadd.f32 %v1603_v61, %v1539_v11 }
 0x1ed   :  { %v17540_v26 = vpop.f32.mrb[52].mxu0 }
 0x1ee   :  { %22594 = vst [vmem:[#allocation39_spill] sm:$0xff] %v17540_v26  ;;  %v1386_v53 = vadd.f32 %v1385_v49, %v17540_v26  ;;  %v1541_v9 = vmul.f32 %v17540_v26, %v17540_v26  ;;  %v17545_v8 = vpop.f32.mrb[53].mxu0 }
 0x1ef   :  { %22595 = vst [vmem:[#allocation40_spill] sm:$0xff] %v17545_v8  ;;  %v1419_v59 = vadd.f32 %v1418_v54, %v17545_v8  ;;  %v1542_v38 = vmul.f32 %v17545_v8, %v17545_v8  ;;  %v17550_v52 = vpop.f32.mrb[54].mxu0 }
 0x1f0   :  { %22596 = vst [vmem:[#allocation41_spill] sm:$0xff] %v17550_v52  ;;  %v1572_v57 = vadd.f32 %v1571_v31, %v1541_v9  ;;  %v1387_v13 = vadd.f32 %v1386_v53, %v17550_v52  ;;  %v1544_v11 = vmul.f32 %v17550_v52, %v17550_v52  ;;  %v17555_v60 = vpop.f32.mrb[55].mxu0 }
 0x1f1   :  { %22597 = vst [vmem:[#allocation42_spill] sm:$0xff] %v17555_v60  ;;  %v1605_v49 = vadd.f32 %v1604_v4, %v1542_v38  ;;  %v1420_v61 = vadd.f32 %v1419_v59, %v17555_v60  ;;  %v1545_v26 = vmul.f32 %v17555_v60, %v17555_v60 }
 0x1f2   :  { %v1388_v54 = vrot.slane %v1387_v13, 4  ;;  %v1573_v27 = vadd.f32 %v1572_v57, %v1544_v11 }
 0x1f3   :  { %v1421_v40 = vrot.slane %v1420_v61, 4  ;;  %v1606_v8 = vadd.f32 %v1605_v49, %v1545_v26 }
 0x1f4   :  { %v1389_v55 = vadd.f32 %v1388_v54, %v1387_v13  ;;  %v1574_v7 = vrot.slane %v1573_v27, 4 }
 0x1f5   :  { %v1422_v31 = vadd.f32 %v1421_v40, %v1420_v61  ;;  %v1607_v9 = vrot.slane %v1606_v8, 4  ;;  %v13399_v53 = vpop.f32.mrb[56].mxu0 }
 0x1f6   :  { %v1390_v46 = vrot.slane %v1389_v55, 2  ;;  %v1575_v37 = vadd.f32 %v1574_v7, %v1573_v27  ;;  %v13400_v52 = vpop.f32.mrb[57].mxu0 }
 0x1f7   :  { %v1423_v30 = vrot.slane %v1422_v31, 2  ;;  %v1608_v5 = vadd.f32 %v1607_v9, %v1606_v8  ;;  %v17560_v4 = vadd.f32 %v13400_v52, %v13399_v53  ;;  %v13402_v59 = vpop.f32.mrb[58].mxu0 }
 0x1f8   :  { %v1391_v38 = vadd.f32 %v1390_v46, %v1389_v55  ;;  %v1576_v34 = vrot.slane %v1575_v37, 2  ;;  %v13403_v60 = vpop.f32.mrb[59].mxu0 }
 0x1f9   :  { %v1424_v21 = vadd.f32 %v1423_v30, %v1422_v31  ;;  %v1609_v57 = vrot.slane %v1608_v5, 2  ;;  %v17562_v11 = vadd.f32 %v13403_v60, %v13402_v59 }
 0x1fa   :  { %v1392_v26 = vrot.slane %v1391_v38, 1  ;;  %v1577_v13 = vadd.f32 %v1576_v34, %v1575_v37 }
 0x1fb   :  { %v1425_v40 = vrot.slane %v1424_v21, 1  ;;  %v1610_v49 = vadd.f32 %v1609_v57, %v1608_v5 }
 0x1fc   :  { %v1393_v61 = vadd.f32 %v1392_v26, %v1391_v38  ;;  %v1578_v54 = vrot.slane %v1577_v13, 1 }
 0x1fd   :  { %v1426_v7 = vadd.f32 %v1425_v40, %v1424_v21  ;;  %v1611_v27 = vrot.slane %v1610_v49, 1  ;;  %v13405_v1 = vpop.f32.mrb[60].mxu0 }
 0x1fe   :  { %v17564_v8 = vmul.f32 0.0051020407, %v1393_v61  ;;  %v1579_v52 = vadd.f32 %v1578_v54, %v1577_v13  ;;  %v13406_v9 = vpop.f32.mrb[61].mxu0 }
 0x1ff   :  { %v17566_v46 = vmul.f32 0.0051020407, %v1426_v7  ;;  %v1612_v55 = vadd.f32 %v1611_v27, %v1610_v49  ;;  %v17568_v30 = vadd.f32 %v13406_v9, %v13405_v1  ;;  %v13408_v60 = vpop.f32.mrb[62].mxu0 }
 0x200   :  { %v1646_v31 = vmul.f32 0.0051020407, %v1579_v52  ;;  %v1649_v34 = vmul.f32 %v17564_v8, %v17564_v8  ;;  %v13409_v5 = vpop.f32.mrb[63].mxu0 }
 0x201   :  { %v1647_v37 = vmul.f32 0.0051020407, %v1612_v55  ;;  %v1650_v21 = vmul.f32 %v17566_v46, %v17566_v46  ;;  %v17574_v53 = vadd.f32 %v13409_v5, %v13408_v60 }
 0x202   :  { %v1652_v59 = vsub.f32 %v1646_v31, %v1649_v34 }
 0x203   :  { %v1653_v38 = vsub.f32 %v1647_v37, %v1650_v21 }
 0x204   :  { %v1656_v57 = vadd.f32 1e-05, %v1652_v59 }
 0x205   :  { %v1657_v26 = vadd.f32 1e-05, %v1653_v38  ;;  %v13411_v13 = vpop.f32.mrb[64].mxu0 }
 0x206   :  { %16336 = vrsqrt.f32 %v1656_v57  ;;  %v13412_v1 = vpop.f32.mrb[65].mxu0 }
 0x207   :  { %16338 = vrsqrt.f32 %v1657_v26  ;;  %v17576_v40 = vadd.f32 %v13412_v1, %v13411_v13  ;;  %v13414_v49 = vpop.f32.mrb[66].mxu0 }
 0x208   :  { %v13415_v61 = vpop.f32.mrb[67].mxu0 }
 0x209   :  { %v17578_v54 = vadd.f32 %v13415_v61, %v13414_v49 }
 0x20d   :  { %v13417_v7 = vpop.f32.mrb[68].mxu0 }
 0x20e   :  { %v13418_v27 = vpop.f32.mrb[69].mxu0 }
 0x20f   :  { %v17580_v52 = vadd.f32 %v13418_v27, %v13417_v7  ;;  %v13420_v9 = vpop.f32.mrb[70].mxu0 }
 0x210   :  { %v17582_v55 = vpop.eup %16336  ;;  %v13421_v60 = vpop.f32.mrb[71].mxu0 }
 0x211   :  { %v17584_v31 = vpop.eup %16338  ;;  %v17586_v34 = vadd.f32 %v13421_v60, %v13420_v9 }
 0x215   :  { %v13423_v37 = vpop.f32.mrb[72].mxu0 }
 0x216   :  { %v13424_v21 = vpop.f32.mrb[73].mxu0 }
 0x217   :  { %v17590_v59 = vadd.f32 %v13424_v21, %v13423_v37  ;;  %v13426_v38 = vpop.f32.mrb[74].mxu0 }
 0x218   :  { %v13427_v57 = vpop.f32.mrb[75].mxu0 }
 0x219   :  { %v17592_v26 = vadd.f32 %v13427_v57, %v13426_v38 }
 0x21d   :  { %v13429_v13 = vpop.f32.mrb[76].mxu0 }
 0x21e   :  { %v13430_v1 = vpop.f32.mrb[77].mxu0 }
 0x21f   :  { %v17594_v49 = vadd.f32 %v13430_v1, %v13429_v13  ;;  %v13432_v61 = vpop.f32.mrb[78].mxu0 }
 0x220   :  { %v13433_v7 = vpop.f32.mrb[79].mxu0 }
 0x221   :  { %v17596_v27 = vadd.f32 %v13433_v7, %v13432_v61 }
 0x225   :  { %v13435_v9 = vpop.f32.mrb[80].mxu0 }
 0x226   :  { %v13436_v60 = vpop.f32.mrb[81].mxu0 }
 0x227   :  { %v13437_v47 = vadd.f32 %v13436_v60, %v13435_v9  ;;  %v13438_v5 = vpop.f32.mrb[82].mxu0 }
 0x228   :  { %v13439_v10 = vpop.f32.mrb[83].mxu0 }
 0x229   :  { %v13440_v51 = vadd.f32 %v13439_v10, %v13438_v5  ;;  %v17599_v37 = vadd.f32 %v13437_v47, %v17347_v43 }
 0x22b   :  { %22598 = vst [vmem:[#allocation43_spill] sm:$0xff] %v17599_v37  ;;  %v17602_v21 = vadd.f32 %v13440_v51, %v17354_v28 }
 0x22d   :  { %22599 = vst [vmem:[#allocation44_spill] sm:$0xff] %v17602_v21  ;;  %v13441_v38 = vpop.f32.mrb[84].mxu0 }
 0x22e   :  { %v13442_v57 = vpop.f32.mrb[85].mxu0 }
 0x22f   :  { %v13443_v13 = vadd.f32 %v13442_v57, %v13441_v38  ;;  %v13444_v1 = vpop.f32.mrb[86].mxu0 }
 0x230   :  { %v13445_v29 = vpop.f32.mrb[87].mxu0 }
 0x231   :  { %v17605_v61 = vadd.f32 %v17340_v17, %v13443_v13  ;;  %v13446_v7 = vadd.f32 %v13445_v29, %v13444_v1  ;;  %v16120_v17 = vld [vmem:[%s22287_s4 + $0xc0] sm:$0xff]  }
 0x232   :  { %14125 = vmatprep.subr.bf16.mxu0 %v16120_v17 }
 0x233   :  { %22600 = vst [vmem:[#allocation45_spill] sm:$0xff] %v17605_v61  ;;  %v17608_v9 = vadd.f32 %v17352_v15, %v13446_v7  ;;  %14126 = vmatpush3.bf16.msra.mxu0 %v16120_v17  ;;  %v16125_v17 = vld [vmem:[%s22287_s4 + $0xd8] sm:$0xff]  }
 0x235   :  { %22601 = vst [vmem:[#allocation46_spill] sm:$0xff] %v17608_v9  ;;  %v13447_v60 = vpop.f32.mrb[88].mxu0 }
 0x236   :  { %v13448_v10 = vpop.f32.mrb[89].mxu0 }
 0x237   :  { %v13449_v5 = vadd.f32 %v13448_v10, %v13447_v60  ;;  %v13450_v43 = vpop.f32.mrb[90].mxu0  ;;  %v16122_v60 = vld [vmem:[%s22287_s4] sm:$0xff]  }
 0x238   :  { %v13451_v47 = vpop.f32.mrb[91].mxu0  ;;  %14169 = vmatprep.subr.bf16.mxu1 %v16122_v60 }
 0x239   :  { %v13452_v20 = vadd.f32 %v13451_v47, %v13450_v43  ;;  %v17611_v28 = vadd.f32 %v13449_v5, %v17395_v63  ;;  %v16121_v63 = vld [vmem:[%s22287_s4 + $0xc8] sm:$0xff]   ;;  %14170 = vmatpush3.bf16.msra.mxu1 %v16122_v60 }
 0x23a   :  { %14127 = vmatprep.subr.bf16.mxu0 %v16121_v63 }
 0x23b   :  { %22602 = vst [vmem:[#allocation47_spill] sm:$0xff] %v17611_v28  ;;  %v17614_v51 = vadd.f32 %v13452_v20, %v17402_v32  ;;  %14128 = vmatpush3.bf16.msra.mxu0 %v16121_v63 }
 0x23d   :  { %22603 = vst [vmem:[#allocation48_spill] sm:$0xff] %v17614_v51  ;;  %v13453_v38 = vpop.f32.mrb[92].mxu0 }
 0x23e   :  { %v13454_v57 = vpop.f32.mrb[93].mxu0 }
 0x23f   :  { %v13455_v15 = vadd.f32 %v13454_v57, %v13453_v38  ;;  %v13456_v29 = vpop.f32.mrb[94].mxu0  ;;  %v16124_v57 = vld [vmem:[%s22287_s4 + $0x8] sm:$0xff]  }
 0x240   :  { %v13457_v13 = vpop.f32.mrb[95].mxu0  ;;  %14171 = vmatprep.subr.bf16.mxu1 %v16124_v57 }
 0x241   :  { %v17620_v1 = vadd.f32 %v17388_v45, %v13455_v15  ;;  %v13458_v7 = vadd.f32 %v13457_v13, %v13456_v29  ;;  %v16123_v45 = vld [vmem:[%s22287_s4 + $0xd0] sm:$0xff]   ;;  %14172 = vmatpush3.bf16.msra.mxu1 %v16124_v57 }
 0x242   :  { %14129 = vmatprep.subr.bf16.mxu0 %v16123_v45  ;;  %v16131_v57 = vld [vmem:[%s22287_s4 + $0xf0] sm:$0xff]  }
 0x243   :  { %22604 = vst [vmem:[#allocation49_spill] sm:$0xff] %v17620_v1  ;;  %v17626_v32 = vadd.f32 %v17400_v22, %v13458_v7  ;;  %14130 = vmatpush3.bf16.msra.mxu0 %v16123_v45  ;;  %v16127_v7 = vld [vmem:[%s22287_s4 + $0xe0] sm:$0xff]   ;;  %v16128_v45 = vld [vmem:[%s22287_s4 + $0x18] sm:$0xff]  }
 0x244   :  { %14131 = vmatprep.subr.bf16.mxu0 %v16125_v17 }
 0x245   :  { %22605 = vst [vmem:[#allocation50_spill] sm:$0xff] %v17626_v32  ;;  %v13459_v20 = vpop.f32.mrb[96].mxu0 }
 0x246   :  { %v13460_v10 = vpop.f32.mrb[97].mxu0 }
 0x247   :  { %v13461_v5 = vadd.f32 %v13460_v10, %v13459_v20  ;;  %v13462_v43 = vpop.f32.mrb[98].mxu0  ;;  %14132 = vmatpush3.bf16.msra.mxu0 %v16125_v17 }
 0x248   :  { %v13463_v47 = vpop.f32.mrb[99].mxu0  ;;  %14133 = vmatprep.subr.bf16.mxu0 %v16127_v7 }
 0x249   :  { %v13464_v22 = vadd.f32 %v13463_v47, %v13462_v43  ;;  %v17635_v38 = vadd.f32 %v13461_v5, %v17443_v3  ;;  %v16126_v3 = vld [vmem:[%s22287_s4 + $0x10] sm:$0xff]   ;;  %v16129_v5 = vld [vmem:[%s22287_s4 + $0xe8] sm:$0xff]  }
 0x24a   :  { %14173 = vmatprep.subr.bf16.mxu1 %v16126_v3 }
 0x24b   :  { %22606 = vst [vmem:[#allocation51_spill] sm:$0xff] %v17635_v38  ;;  %v17644_v15 = vadd.f32 %v13464_v22, %v17450_v44  ;;  %14174 = vmatpush3.bf16.msra.mxu1 %v16126_v3  ;;  %14134 = vmatpush3.bf16.msra.mxu0 %v16127_v7  ;;  %v22335_v22 = vmov 0.0  }
 0x24c   :  { %14175 = vmatprep.subr.bf16.mxu1 %v16128_v45  ;;  %14135 = vmatprep.subr.bf16.mxu0 %v16129_v5  ;;  %2146 = vst [vmem:[#allocation2] sm:$0xff] %v22335_v22  ;;  %2149 = vst [vmem:[#allocation2 + $0x18] sm:$0xff] %v22335_v22 }
 0x24d   :  { %22607 = vst [vmem:[#allocation52_spill] sm:$0xff] %v17644_v15  ;;  %v13465_v29 = vpop.f32.mrb[100].mxu0  ;;  %2152 = vst [vmem:[#allocation2 + $0x30] sm:$0xff] %v22335_v22 }
 0x24e   :  { %v13466_v13 = vpop.f32.mrb[101].mxu0  ;;  %2147 = vst [vmem:[#allocation2 + $0x8] sm:$0xff] %v22335_v22  ;;  %2148 = vst [vmem:[#allocation2 + $0x10] sm:$0xff] %v22335_v22 }
 0x24f   :  { %v13467_v63 = vadd.f32 %v13466_v13, %v13465_v29  ;;  %v13468_v20 = vpop.f32.mrb[102].mxu0  ;;  %14176 = vmatpush3.bf16.msra.mxu1 %v16128_v45  ;;  %14136 = vmatpush3.bf16.msra.mxu0 %v16129_v5  ;;  %2150 = vst [vmem:[#allocation2 + $0x20] sm:$0xff] %v22335_v22  ;;  %2151 = vst [vmem:[#allocation2 + $0x28] sm:$0xff] %v22335_v22 }
 0x250   :  { %v13469_v60 = vpop.f32.mrb[103].mxu0  ;;  %2153 = vst [vmem:[#allocation2 + $0x38] sm:$0xff] %v22335_v22  ;;  %2154 = vst [vmem:[#allocation2 + $0x40] sm:$0xff] %v22335_v22  ;;  %14137 = vmatprep.subr.bf16.mxu0 %v16131_v57 }
 0x251   :  { %v17653_v44 = vadd.f32 %v17436_v0, %v13467_v63  ;;  %v13470_v10 = vadd.f32 %v13469_v60, %v13468_v20  ;;  %v16130_v0 = vld [vmem:[%s22287_s4 + $0x20] sm:$0xff]   ;;  %2155 = vst [vmem:[#allocation2 + $0x2e8] sm:$0xff] %v22335_v22  ;;  %2156 = vst [vmem:[#allocation2 + $0x2f0] sm:$0xff] %v22335_v22  ;;  %v16132_v63 = vld [vmem:[%s22287_s4 + $0x28] sm:$0xff]  }
 0x252   :  { %2157 = vst [vmem:[#allocation2 + $0x2f8] sm:$0xff] %v22335_v22  ;;  %2158 = vst [vmem:[#allocation2 + $0x300] sm:$0xff] %v22335_v22  ;;  %14177 = vmatprep.subr.bf16.mxu1 %v16130_v0  ;;  %v16133_v20 = vld [vmem:[%s22287_s4 + $0xf8] sm:$0xff]  }
 0x253   :  { %22608 = vst [vmem:[#allocation53_spill] sm:$0xff] %v17653_v44  ;;  %v17662_v43 = vadd.f32 %v17448_v25, %v13470_v10  ;;  %2159 = vst [vmem:[#allocation2 + $0x308] sm:$0xff] %v22335_v22  ;;  %14178 = vmatpush3.bf16.msra.mxu1 %v16130_v0  ;;  %14138 = vmatpush3.bf16.msra.mxu0 %v16131_v57  ;;  %v22333_v0 = vmov 0.0|0.0  }
 0x254   :  { %2160 = vst [vmem:[#allocation2 + $0x310] sm:$0xff] %v22335_v22  ;;  %2161 = vst [vmem:[#allocation2 + $0x318] sm:$0xff] %v22335_v22  ;;  %14179 = vmatprep.subr.bf16.mxu1 %v16132_v63  ;;  %14139 = vmatprep.subr.bf16.mxu0 %v16133_v20 }
 0x255   :  { %22609 = vst [vmem:[#allocation54_spill] sm:$0xff] %v17662_v43  ;;  %v13471_v47 = vpop.f32.mrb[104].mxu0  ;;  %2162 = vst [vmem:[#allocation2 + $0x320] sm:$0xff] %v22335_v22  ;;  %14141 = vmatprep.mubr.bf16.mxu0 %v22333_v0 }
 0x256   :  { %2163 = vst [vmem:[#allocation2 + $0x328] sm:$0xff] %v22335_v22  ;;  %v13472_v25 = vpop.f32.mrb[105].mxu0 }
 0x257   :  { %v13473_v17 = vadd.f32 %v13472_v25, %v13471_v47  ;;  %v13474_v29 = vpop.f32.mrb[106].mxu0  ;;  %14180 = vmatpush3.bf16.msra.mxu1 %v16132_v63  ;;  %14140 = vmatpush3.bf16.msra.mxu0 %v16133_v20 }
 0x258   :  { %v13475_v3 = vpop.f32.mrb[107].mxu0 }
 0x259   :  { %v13476_v13 = vadd.f32 %v13475_v3, %v13474_v29  ;;  %v17689_v7 = vadd.f32 %v13473_v17, %v17491_v6  ;;  %v16134_v6 = vld [vmem:[%s22287_s4 + $0x30] sm:$0xff]   ;;  %v16135_v17 = vld [vmem:[%s22287_s4 + $0x38] sm:$0xff]  }
 0x25a   :  { %14181 = vmatprep.subr.bf16.mxu1 %v16134_v6 }
 0x25b   :  { %22610 = vst [vmem:[#allocation55_spill] sm:$0xff] %v17689_v7  ;;  %v17698_v60 = vadd.f32 %v13476_v13, %v17498_v35  ;;  %14182 = vmatpush3.bf16.msra.mxu1 %v16134_v6 }
 0x25c   :  { %14183 = vmatprep.subr.bf16.mxu1 %v16135_v17 }
 0x25d   :  { %22611 = vst [vmem:[#allocation56_spill] sm:$0xff] %v17698_v60  ;;  %v13477_v10 = vpop.f32.mrb[108].mxu0 }
 0x25e   :  { %v13478_v45 = vpop.f32.mrb[109].mxu0 }
 0x25f   :  { %v13479_v5 = vadd.f32 %v13478_v45, %v13477_v10  ;;  %v13480_v47 = vpop.f32.mrb[110].mxu0  ;;  %14184 = vmatpush3.bf16.msra.mxu1 %v16135_v17  ;;  %v16136_v10 = vld [vmem:[%s22287_s4 + $0x140] sm:$0xff]  }
 0x260   :  { %v13481_v25 = vpop.f32.mrb[111].mxu0  ;;  %14301 = vmatprep.subr.bf16.mxu1 %v16136_v10 }
 0x261   :  { %v17705_v35 = vadd.f32 %v17484_v12, %v13479_v5  ;;  %v13482_v57 = vadd.f32 %v13481_v25, %v13480_v47 }
 0x263   :  { %22612 = vst [vmem:[#allocation57_spill] sm:$0xff] %v17705_v35  ;;  %v17711_v29 = vadd.f32 %v17496_v41, %v13482_v57 }
 0x265   :  { %22613 = vst [vmem:[#allocation58_spill] sm:$0xff] %v17711_v29  ;;  %v14099_v3 = vpop.f32.mrb[112].mxu0 }
 0x266   :  { %v17714_v13 = vadd.f32 %v14099_v3, %v17568_v30  ;;  %v1250_v63 = vpop.f32.mrb[113].mxu0 }
 0x267   :  { %v17717_v20 = vadd.f32 %v17560_v4, %v1250_v63  ;;  %v14100_v12 = vpop.f32.mrb[114].mxu0 }
 0x268   :  { %22614 = vst [vmem:[#allocation59_spill] sm:$0xff] %v17714_v13  ;;  %v17723_v6 = vadd.f32 %v14100_v12, %v17574_v53  ;;  %v1253_v41 = vpop.f32.mrb[115].mxu0  ;;  %v1471_v47 = vmul.f32 %v17714_v13, %v17714_v13 }
 0x269   :  { %v17726_v45 = vadd.f32 %v17562_v11, %v1253_v41  ;;  %v1465_v30 = vmul.f32 %v17717_v20, %v17717_v20 }
 0x26a   :  { %22615 = vst [vmem:[#allocation60_spill] sm:$0xff] %v17723_v6  ;;  %v1474_v3 = vmul.f32 %v17723_v6, %v17723_v6 }
 0x26b   :  { %v1427_v4 = vadd.f32 %v17726_v45, %v17717_v20  ;;  %v1468_v5 = vmul.f32 %v17726_v45, %v17726_v45 }
 0x26d   :  { %v1428_v53 = vadd.f32 %v1427_v4, %v17714_v13  ;;  %v1613_v25 = vadd.f32 %v1468_v5, %v1465_v30  ;;  %v14103_v57 = vpop.f32.mrb[116].mxu0 }
 0x26e   :  { %v17738_v11 = vadd.f32 %v14103_v57, %v17580_v52  ;;  %v1266_v17 = vpop.f32.mrb[117].mxu0 }
 0x26f   :  { %v1614_v63 = vadd.f32 %v1613_v25, %v1471_v47  ;;  %v17743_v12 = vadd.f32 %v17576_v40, %v1266_v17  ;;  %v1429_v10 = vadd.f32 %v1428_v53, %v17723_v6  ;;  %v14104_v41 = vpop.f32.mrb[118].mxu0 }
 0x270   :  { %22616 = vst [vmem:[#allocation61_spill] sm:$0xff] %v17738_v11  ;;  %v17747_v0 = vadd.f32 %v14104_v41, %v17586_v34  ;;  %v1269_v4 = vpop.f32.mrb[119].mxu0  ;;  %v1483_v34 = vmul.f32 %v17738_v11, %v17738_v11 }
 0x271   :  { %22617 = vst [vmem:[#allocation62_spill] sm:$0xff] %v17743_v12  ;;  %v1430_v30 = vadd.f32 %v1429_v10, %v17743_v12  ;;  %v1477_v52 = vmul.f32 %v17743_v12, %v17743_v12  ;;  %v1615_v5 = vadd.f32 %v1614_v63, %v1474_v3  ;;  %v17753_v57 = vadd.f32 %v17578_v54, %v1269_v4  ;;  %v22663_v12 = vld [vmem:[#allocation5_spill] sm:$0xff] }
 0x272   :  { %22618 = vst [vmem:[#allocation63_spill] sm:$0xff] %v17747_v0  ;;  %v1486_v54 = vmul.f32 %v17747_v0, %v17747_v0 }
 0x273   :  { %22619 = vst [vmem:[#allocation64_spill] sm:$0xff] %v17753_v57  ;;  %v1616_v47 = vadd.f32 %v1615_v5, %v1477_v52  ;;  %v1431_v40 = vadd.f32 %v1430_v30, %v17753_v57  ;;  %v1480_v53 = vmul.f32 %v17753_v57, %v17753_v57  ;;  %v22662_v57 = vld [vmem:[#allocation4_spill] sm:$0xff] }
 0x275   :  { %v1432_v25 = vadd.f32 %v1431_v40, %v17738_v11  ;;  %v1617_v17 = vadd.f32 %v1616_v47, %v1480_v53  ;;  %v14107_v10 = vpop.f32.mrb[120].mxu0  ;;  %v22661_v11 = vld [vmem:[#allocation3_spill] sm:$0xff] }
 0x276   :  { %v17762_v41 = vadd.f32 %v14107_v10, %v17594_v49  ;;  %v1282_v3 = vpop.f32.mrb[121].mxu0  ;;  %v17776_v49 = vld [vmem:[%s22287_s4 + $0x100] sm:$0xff]  }
 0x277   :  { %v1618_v63 = vadd.f32 %v1617_v17, %v1483_v34  ;;  %v17767_v4 = vadd.f32 %v17590_v59, %v1282_v3  ;;  %v1433_v30 = vadd.f32 %v1432_v25, %v17747_v0  ;;  %v14108_v52 = vpop.f32.mrb[122].mxu0  ;;  %14213 = vmatprep.subr.bf16.mxu0 %v17776_v49 }
 0x278   :  { %22620 = vst [vmem:[#allocation65_spill] sm:$0xff] %v17762_v41  ;;  %v17771_v5 = vadd.f32 %v14108_v52, %v17596_v27  ;;  %v1285_v40 = vpop.f32.mrb[123].mxu0  ;;  %v1495_v10 = vmul.f32 %v17762_v41, %v17762_v41  ;;  %v1501_v52 = vmul.f32 %v17599_v37, %v17599_v37 }
 0x279   :  { %22621 = vst [vmem:[#allocation66_spill] sm:$0xff] %v17767_v4  ;;  %v1434_v47 = vadd.f32 %v1433_v30, %v17767_v4  ;;  %v1489_v53 = vmul.f32 %v17767_v4, %v17767_v4  ;;  %v1619_v34 = vadd.f32 %v1618_v63, %v1486_v54  ;;  %v17782_v59 = vadd.f32 %v17592_v26, %v1285_v40  ;;  %v22658_v4 = vld [vmem:[#allocation37_spill] sm:$0xff] }
 0x27a   :  { %22622 = vst [vmem:[#allocation67_spill] sm:$0xff] %v17771_v5  ;;  %v1498_v54 = vmul.f32 %v17771_v5, %v17771_v5 }
 0x27b   :  { %v1620_v25 = vadd.f32 %v1619_v34, %v1489_v53  ;;  %v1435_v27 = vadd.f32 %v1434_v47, %v17782_v59  ;;  %v1492_v17 = vmul.f32 %v17782_v59, %v17782_v59  ;;  %v1504_v53 = vmul.f32 %v17602_v21, %v17602_v21 }
 0x27d   :  { %v1436_v3 = vadd.f32 %v1435_v27, %v17762_v41  ;;  %v1621_v30 = vadd.f32 %v1620_v25, %v1492_v17  ;;  %v1507_v25 = vmul.f32 %v17605_v61, %v17605_v61 }
 0x27f   :  { %v1437_v26 = vadd.f32 %v1436_v3, %v17771_v5  ;;  %v1622_v63 = vadd.f32 %v1621_v30, %v1495_v10  ;;  %v1510_v10 = vmul.f32 %v17608_v9, %v17608_v9 }
 0x281   :  { %v1438_v40 = vadd.f32 %v1437_v26, %v17599_v37  ;;  %v1623_v47 = vadd.f32 %v1622_v63, %v1498_v54  ;;  %v27_v26 = vlaneseq  ;;  %v1513_v54 = vmul.f32 %v17611_v28, %v17611_v28 }
 0x283   :  { %v1439_v34 = vadd.f32 %v1438_v40, %v17602_v21  ;;  %v1624_v22 = vadd.f32 %v1623_v47, %v1501_v52  ;;  %v1516_v52 = vmul.f32 %v17614_v51, %v17614_v51 }
 0x285   :  { %v1440_v27 = vadd.f32 %v1439_v34, %v17605_v61  ;;  %v1625_v17 = vadd.f32 %v1624_v22, %v1504_v53  ;;  %v17812_v22 = vshrl.u32 %v27_v26, 7  ;;  %v1519_v53 = vmul.f32 %v17620_v1, %v17620_v1 }
 0x287   :  { %v1441_v3 = vadd.f32 %v1440_v27, %v17608_v9  ;;  %v1626_v30 = vadd.f32 %v1625_v17, %v1507_v25  ;;  %22623 = vst [vmem:[#allocation68_spill] sm:$0xff] %v17812_v22  ;;  %v1522_v17 = vmul.f32 %v17626_v32, %v17626_v32  ;;  %v17827_v26 = vadd.s32 72, %v17812_v22 }
 0x289   :  { %v1442_v63 = vadd.f32 %v1441_v3, %v17611_v28  ;;  %v1627_v40 = vadd.f32 %v1626_v30, %v1510_v10  ;;  %v17821_v30 = vsub.s32 0, %v17812_v22 }
 0x28b   :  { %v1443_v47 = vadd.f32 %v1442_v63, %v17614_v51  ;;  %v1628_v34 = vadd.f32 %v1627_v40, %v1513_v54  ;;  %22624 = vst [vmem:[#allocation69_spill] sm:$0xff] %v17821_v30  ;;  %v17824_v63 = vsub.s32 1, %v17812_v22  ;;  %v1525_v54 = vmul.f32 %v17635_v38, %v17635_v38 }
 0x28d   :  { %v1444_v25 = vadd.f32 %v1443_v47, %v17620_v1  ;;  %v1629_v27 = vadd.f32 %v1628_v34, %v1516_v52  ;;  %22625 = vst [vmem:[#allocation70_spill] sm:$0xff] %v17824_v63  ;;  %v1528_v47 = vmul.f32 %v17644_v15, %v17644_v15  ;;  %v1534_v1 = vmul.f32 %v17662_v43, %v17662_v43 }
 0x28f   :  { %v1445_v3 = vadd.f32 %v1444_v25, %v17626_v32  ;;  %v1630_v10 = vadd.f32 %v1629_v27, %v1519_v53  ;;  %v1531_v25 = vmul.f32 %v17653_v44, %v17653_v44 }
 0x291   :  { %v1446_v40 = vadd.f32 %v1445_v3, %v17635_v38  ;;  %v1631_v52 = vadd.f32 %v1630_v10, %v1522_v17  ;;  %v17843_v3 = vsub.s32 2, %v17812_v22  ;;  %v1537_v10 = vmul.f32 %v17689_v7, %v17689_v7 }
 0x293   :  { %v1447_v34 = vadd.f32 %v1446_v40, %v17644_v15  ;;  %v1632_v53 = vadd.f32 %v1631_v52, %v1525_v54  ;;  %22626 = vst [vmem:[#allocation71_spill] sm:$0xff] %v17843_v3  ;;  %v1540_v52 = vmul.f32 %v17698_v60, %v17698_v60 }
 0x295   :  { %v1448_v27 = vadd.f32 %v1447_v34, %v17653_v44  ;;  %v1633_v32 = vadd.f32 %v1632_v53, %v1528_v47 }
 0x297   :  { %v1449_v51 = vadd.f32 %v1448_v27, %v17662_v43  ;;  %v1634_v28 = vadd.f32 %v1633_v32, %v1531_v25  ;;  %v1543_v32 = vmul.f32 %v17705_v35, %v17705_v35  ;;  %v1546_v27 = vmul.f32 %v17711_v29, %v17711_v29 }
 0x299   :  { %v1450_v54 = vadd.f32 %v1449_v51, %v17689_v7  ;;  %v1635_v40 = vadd.f32 %v1634_v28, %v1534_v1  ;;  %v17858_v28 = vadd.s32 8, %v17812_v22 }
 0x29b   :  { %v1451_v47 = vadd.f32 %v1450_v54, %v17698_v60  ;;  %v1636_v34 = vadd.f32 %v1635_v40, %v1537_v10  ;;  %v17861_v54 = vadd.s32 24, %v17812_v22  ;;  %v17864_v60 = vadd.s32 40, %v17812_v22 }
 0x29d   :  { %v1452_v53 = vadd.f32 %v1451_v47, %v17705_v35  ;;  %v1637_v25 = vadd.f32 %v1636_v34, %v1540_v52 }
 0x29f   :  { %v1453_v17 = vadd.f32 %v1452_v53, %v17711_v29  ;;  %v1638_v43 = vadd.f32 %v1637_v25, %v1543_v32  ;;  %v2248_v32 = vld [vmem:[#allocation2] sm:$0x80]  ;;  %v17874_v25 = vadd.s32 88, %v17812_v22 }
 0x2a1   :  { %v1454_v51 = vrot.slane %v1453_v17, 4  ;;  %v1639_v1 = vadd.f32 %v1638_v43, %v1546_v27 }
 0x2a3   :  { %v1455_v10 = vadd.f32 %v1454_v51, %v1453_v17  ;;  %v1640_v40 = vrot.slane %v1639_v1, 4  ;;  %v17870_v17 = vadd.s32 56, %v17812_v22  ;;  %v22627_v51 = vmov 0.0  }
 0x2a4   :  { %v2335_v15 = vpack.c.bf16 %v22627_v51, %v2248_v32  ;;  %v17908_v51 = vadd.s32 168, %v17812_v22 }
 0x2a5   :  { %v1456_v52 = vrot.slane %v1455_v10, 2  ;;  %v1641_v47 = vadd.f32 %v1640_v40, %v1639_v1 }
 0x2a7   :  { %v1457_v35 = vadd.f32 %v1456_v52, %v1455_v10  ;;  %v1642_v53 = vrot.slane %v1641_v47, 2  ;;  %v2687_v10 = vshrl.u32 %v2335_v15, 16  ;;  %v2690_v52 = vshll.u32 %v2335_v15, 16 }
 0x2a9   :  { %v1458_v29 = vrot.slane %v1457_v35, 1  ;;  %v1643_v7 = vadd.f32 %v1642_v53, %v1641_v47  ;;  %v17877_v47 = vadd.s32 104, %v17812_v22  ;;  %v16598_v53 = vmov 1966171168  }
 0x2aa   :  { %v1667_v43 = vunpack.c.l.s4 %v16598_v53  ;;  %v17885_v15 = vrot.slane %v2690_v52, 4  ;;  %v17899_v52 = vadd.s32 136, %v17812_v22  ;;  %v1655_v53 = vld [vmem:[%s22288_s2] sm:$0x7] }
 0x2ab   :  { %v1459_v27 = vadd.f32 %v1458_v29, %v1457_v35  ;;  %v1644_v44 = vrot.slane %v1643_v7, 1  ;;  %v17880_v35 = vadd.s32 120, %v17812_v22 }
 0x2ac   :  { %v1668_v32 = vunpack.c.0.s8 %v1667_v43  ;;  %v22629_v43 = vcombine.low %v17582_v55, %v17584_v31  ;;  %v17914_v55 = vadd.s32 200, %v17812_v22 }
 0x2ad   :  { %v1462_v38 = vmul.f32 0.0051020407, %v1459_v27  ;;  %v1645_v1 = vadd.f32 %v1644_v44, %v1643_v7  ;;  %v17882_v44 = vrot.slane %v2687_v10, 3  ;;  %v17911_v27 = vadd.s32 184, %v17812_v22 }
 0x2af   :  { %v1648_v40 = vmul.f32 0.0051020407, %v1645_v1  ;;  %v1651_v34 = vmul.f32 %v1462_v38, %v1462_v38  ;;  %v17891_v1 = vsub.s32 %v1668_v32, %v17812_v22 }
 0x2b1   :  { %v1654_v9 = vsub.f32 %v1648_v40, %v1651_v34  ;;  %22628 = vst [vmem:[#allocation72_spill] sm:$0xff] %v17891_v1  ;;  %v1672_v40 = vrot.slane %v22629_v43, %v17891_v1 }
 0x2b3   :  { %v1658_v29 = vadd.f32 1e-05, %v1654_v9 }
 0x2b5   :  { %16340 = vrsqrt.f32 %v1658_v29  ;;  %v17902_v29 = vadd.s32 152, %v17812_v22 }
 0x2bf   :  { %v16341_v9 = vpop.eup %16340 }
 0x2c0   :  { %v1679_v10 = vrot.slane %v16341_v9, %v17891_v1 }
 0x2c2   :  { %v1680_v32 = vcombine.low %v1672_v40, %v1679_v10 }
 0x2c4   :  { %v1687_v31 = vrot.slane %v1680_v32, %v17891_v1 }
 0x2c6   :  { %v1689_v9 = vmul.f32 %v1687_v31, %v1655_v53 }
 0x2c8   :  { %v17918_v43 = vrot.slane %v1689_v9, %v17821_v30  ;;  %v17921_v34 = vrot.slane %v1689_v9, %v17824_v63  ;;  %v17924_v40 = vrot.slane %v1689_v9, %v17843_v3 }
 0x2ca   :  { %22630 = vst [vmem:[#allocation73_spill] sm:$0xff] %v17918_v43  ;;  %22631 = vst [vmem:[#allocation74_spill] sm:$0xff] %v17921_v34  ;;  %v1707_v53 = vmul.f32 %v17918_v43, %v17564_v8  ;;  %v1708_v31 = vmul.f32 %v17921_v34, %v17566_v46  ;;  %v1709_v21 = vmul.f32 %v17924_v40, %v1462_v38 }
 0x2cb   :  { %v1765_v10 = vmul.f32 %v17918_v43, %v17338_v16  ;;  %v1766_v32 = vmul.f32 %v17921_v34, %v17345_v33  ;;  %v1767_v8 = vmul.f32 %v17924_v40, %v17782_v59  ;;  %v1738_v46 = vmul.f32 %v17918_v43, %v17235_v19 }
 0x2cc   :  { %v1713_v9 = vcombine.low %v1707_v53, %v1708_v31  ;;  %v1727_v22 = vrot.slane %v1709_v21, %v17891_v1  ;;  %v1741_v38 = vmul.f32 %v17918_v43, %v17239_v48  ;;  %v1744_v16 = vmul.f32 %v17918_v43, %v17258_v42  ;;  %v1690_v21 = vld [vmem:[%s22289_s3] sm:$0x7] }
 0x2cd   :  { %v1747_v53 = vmul.f32 %v17918_v43, %v17268_v14  ;;  %v1750_v59 = vmul.f32 %v17918_v43, %v17282_v18  ;;  %v1753_v19 = vmul.f32 %v17918_v43, %v17292_v58  ;;  %v17963_v48 = vmul.f32 %v17918_v43, %v17306_v23 }
 0x2ce   :  { %v1720_v61 = vrot.slane %v1713_v9, %v17891_v1  ;;  %v22632_v42 = vand.u32 15, %v17827_v26  ;;  %v22633_v31 = vmov 0  ;;  %v17973_v14 = vmul.f32 %v17918_v43, %v17316_v36  ;;  %v22644_v9 = vld [vmem:[#allocation17_spill] sm:$0xff] }
 0x2cf   :  { %v17977_v18 = vmul.f32 %v17918_v43, %v17328_v62  ;;  %v17981_v58 = vmul.f32 %v17918_v43, %v17356_v56  ;;  %v17985_v23 = vmul.f32 %v17918_v43, %v17366_v39  ;;  %v22637_v26 = vmov 0 }
 0x2d0   :  { %v1728_v33 = vcombine.low %v1720_v61, %v1727_v22  ;;  %vm17967_vm1 = vcmp.lt.s32.totalorder %v22632_v42, 14  ;;  %v22636_v22 = vand.u32 15, %v17858_v28  ;;  %v22640_v36 = vand.u32 15, %v17861_v54  ;;  %v22645_v54 = vld [vmem:[#allocation19_spill] sm:$0xff] }
 0x2d1   :  { %v22634_v31 = vsel %vm17967_vm1, 4294967295, %v22633_v31  ;;  %v22641_v62 = vmov 0  ;;  %v18002_v56 = vmul.f32 %v17918_v43, %v17376_v24  ;;  %v18006_v39 = vmul.f32 %v17918_v43, %v17386_v50 }
 0x2d2   :  { %22635 = vst [vmem:[#allocation75_spill] sm:$0xff] %v22634_v31  ;;  %v1735_v61 = vrot.slane %v1728_v33, %v17891_v1  ;;  %vm17990_vm2 = vcmp.lt.s32.totalorder %v22636_v22, 14  ;;  %vm17996_vm3 = vcmp.lt.s32.totalorder %v22640_v36, 14  ;;  %v18010_v28 = vmul.f32 %v17918_v43, %v17404_v2  ;;  %v22646_v22 = vld [vmem:[#allocation21_spill] sm:$0xff]  ;;  %v22647_v36 = vld [vmem:[#allocation23_spill] sm:$0xff] }
 0x2d3   :  { %v22638_v26 = vsel %vm17990_vm2, 4294967295, %v22637_v26  ;;  %v22642_v62 = vsel %vm17996_vm3, 4294967295, %v22641_v62  ;;  %v18014_v33 = vmul.f32 %v17918_v43, %v22644_v9  ;;  %v18018_v42 = vmul.f32 %v17918_v43, %v22645_v54  ;;  %v22652_v9 = vld [vmem:[#allocation25_spill] sm:$0xff]  ;;  %v22653_v54 = vld [vmem:[#allocation27_spill] sm:$0xff]  ;;  %vm18152_vm9 = vmpackc.low %vm17990_vm2, %vm22388_vm8 }
 0x2d4   :  { %22639 = vst [vmem:[#allocation76_spill] sm:$0xff] %v22638_v26  ;;  %22643 = vst [vmem:[#allocation77_spill] sm:$0xff] %v22642_v62  ;;  %v18022_v24 = vmul.f32 %v17918_v43, %v22646_v22  ;;  %v18026_v50 = vmul.f32 %v17918_v43, %v22647_v36  ;;  %v1737_v7 = vsub.f32 %v1690_v21, %v1735_v61  ;;  %v22648_v2 = vand.u32 15, %v17864_v60  ;;  %v22654_v22 = vld [vmem:[#allocation29_spill] sm:$0xff]  ;;  %v22655_v36 = vld [vmem:[#allocation31_spill] sm:$0xff] }
 0x2d5   :  { %v22649_v1 = vmov 0  ;;  %v18036_v37 = vmul.f32 %v17918_v43, %v22652_v9  ;;  %v18040_v5 = vmul.f32 %v17918_v43, %v22653_v54  ;;  %v18044_v41 = vmul.f32 %v17918_v43, %v22654_v22  ;;  %v22656_v60 = vld [vmem:[#allocation33_spill] sm:$0xff]  ;;  %vm18161_vm10 = vmpackc.low %vm17996_vm3, %vm22388_vm8  ;;  %v16142_v62 = vld [vmem:[%s22287_s4 + $0x110] sm:$0xff]  }
 0x2d6   :  { %vm18030_vm4 = vcmp.lt.s32.totalorder %v22648_v2, 14  ;;  %v18048_v21 = vmul.f32 %v17918_v43, %v22655_v36  ;;  %v18052_v61 = vmul.f32 %v17918_v43, %v22656_v60  ;;  %v22657_v2 = vld [vmem:[#allocation35_spill] sm:$0xff]  ;;  %v18060_v54 = vmul.f32 %v17918_v43, %v22658_v4 }
 0x2d7   :  { %v22650_v1 = vsel %vm18030_vm4, 4294967295, %v22649_v1  ;;  %v18056_v9 = vmul.f32 %v17918_v43, %v22657_v2  ;;  %v18063_v0 = vrot.slane %v1737_v7, %v17821_v30  ;;  %v18066_v22 = vrot.slane %v1737_v7, %v17824_v63  ;;  %v22664_v30 = vld [vmem:[#allocation6_spill] sm:$0xff]  ;;  %vm18216_vm13 = vmpackc.low %vm18030_vm4, %vm22388_vm8 }
 0x2d8   :  { %22651 = vst [vmem:[#allocation17_spill] sm:$0xff] %v22650_v1  ;;  %v18069_v36 = vrot.slane %v1737_v7, %v17843_v3  ;;  %v18073_v60 = vmul.f32 %v17921_v34, %v22661_v11  ;;  %v18077_v2 = vmul.f32 %v17921_v34, %v22662_v57  ;;  %v18081_v4 = vmul.f32 %v17921_v34, %v22663_v12 }
 0x2d9   :  { %22659 = vst [vmem:[#allocation19_spill] sm:$0xff] %v18063_v0  ;;  %v18085_v43 = vmul.f32 %v17921_v34, %v22664_v30  ;;  %v18089_v7 = vmul.f32 %v17924_v40, %v17717_v20  ;;  %v18092_v3 = vadd.f32 %v18063_v0, %v1765_v10  ;;  %v1866_v11 = vadd.f32 %v18066_v22, %v1766_v32 }
 0x2da   :  { %22660 = vst [vmem:[#allocation21_spill] sm:$0xff] %v18069_v36  ;;  %v1867_v57 = vadd.f32 %v18069_v36, %v1767_v8  ;;  %v1838_v63 = vadd.f32 %v18063_v0, %v1738_v46  ;;  %v1841_v12 = vadd.f32 %v18063_v0, %v1741_v38  ;;  %v1844_v6 = vadd.f32 %v18063_v0, %v1744_v16 }
 0x2db   :  { %22665 = vst [vmem:[#allocation23_spill] sm:$0xff] %v18089_v7  ;;  %v1847_v30 = vadd.f32 %v18063_v0, %v1747_v53  ;;  %v1850_v13 = vadd.f32 %v18063_v0, %v1750_v59  ;;  %v22376_v20 = vmax.f32 %v18092_v3, 0.0  ;;  %v1950_v7 = vmax.f32 %v1866_v11, 0.0  ;;  %v18121_v59 = vld [vmem:[#allocation2] sm:$0xff] }
 0x2dc   :  { %v1951_v10 = vmax.f32 %v1867_v57, 0.0  ;;  %v1922_v34 = vmax.f32 %v1838_v63, 0.0  ;;  %v22666_v32 = vand.u32 15, %v17870_v17  ;;  %v22667_v8 = vmov 0  ;;  %22670 = vst [vmem:[#allocation27_spill] sm:$0xff] %v18121_v59 }
 0x2dd   :  { %v1925_v46 = vmax.f32 %v1841_v12, 0.0  ;;  %v1928_v38 = vmax.f32 %v1844_v6, 0.0  ;;  %v1931_v36 = vmax.f32 %v1847_v30, 0.0  ;;  %v18109_v16 = vadd.f32 %v18063_v0, %v1753_v19  ;;  %v16140_v19 = vld [vmem:[%s22287_s4 + $0x108] sm:$0xff]  }
 0x2de   :  { %vm18104_vm6 = vcmp.lt.s32.totalorder %v22666_v32, 14  ;;  %v18115_v53 = vsel %vm17967_vm1, %v22376_v20, 0.0  ;;  %v2090_v63 = vsel %vm17967_vm1, %v1950_v7, 0.0  ;;  %v2091_v17 = vsel %vm17967_vm1, %v1951_v10, 0.0  ;;  %2164 = vst [vmem:[#allocation2 + $0x48] sm:$0xff] %v1922_v34 }
 0x2df   :  { %v22668_v8 = vsel %vm18104_vm6, 4294967295, %v22667_v8  ;;  %v2338_v6 = vpack.c.bf16 %v1922_v34, %v18121_v59  ;;  %2191 = vst [vmem:[#allocation2 + $0x120] sm:$0xff] %v18115_v53  ;;  %2192 = vst [vmem:[#allocation2 + $0x128] sm:$0xff] %v2090_v63  ;;  %v2065_v11 = vsel %vm17990_vm2, %v1925_v46, 0.0  ;;  %v2071_v7 = vsel %vm17996_vm3, %v1931_v36, 0.0 }
 0x2e0   :  { %22669 = vst [vmem:[#allocation25_spill] sm:$0xff] %v22668_v8  ;;  %2193 = vst [vmem:[#allocation2 + $0x130] sm:$0xff] %v2091_v17  ;;  %v18132_v57 = vmax.f32 %v1850_v13, 0.0  ;;  %v22379_v12 = vmax.f32 %v18109_v16, 0.0  ;;  %v2341_v32 = vpack.c.bf16 %v1928_v38, %v2065_v11  ;;  %v1856_v13 = vadd.f32 %v18063_v0, %v17963_v48 }
 0x2e1   :  { %2170 = vst [vmem:[#allocation2 + $0x78] sm:$0xff] %v1928_v38  ;;  %2167 = vst [vmem:[#allocation2 + $0x60] sm:$0xff] %v2065_v11  ;;  %v2695_v30 = vshrl.u32 %v2338_v6, 16  ;;  %v2698_v10 = vshll.u32 %v2338_v6, 16  ;;  %v22671_v20 = vand.u32 15, %v17874_v25  ;;  %v22672_v59 = vmov 0 }
 0x2e2   :  { %2173 = vst [vmem:[#allocation2 + $0x90] sm:$0xff] %v2071_v7  ;;  %v2077_v63 = vsel %vm18030_vm4, %v22379_v12, 0.0  ;;  %2176 = vst [vmem:[#allocation2 + $0xa8] sm:$0xff] %v18132_v57  ;;  %v2344_v17 = vpack.c.bf16 %v18132_v57, %v2071_v7  ;;  %v22675_v6 = vmov 0  ;;  %v16479_v11 = vpack.c.bf16 %v1925_v46, %v1922_v34 }
 0x2e3   :  { %vm18145_vm7 = vcmp.lt.s32.totalorder %v22671_v20, 14  ;;  %v22676_v6 = vsel %vm18152_vm9, 4294967295, %v22675_v6  ;;  %v2704_v7 = vshrl.u32 %v2341_v32, 16  ;;  %v2707_v48 = vshll.u32 %v2341_v32, 16  ;;  %2179 = vst [vmem:[#allocation2 + $0xc0] sm:$0xff] %v2077_v63  ;;  %vm18234_vm14 = vmpackc.low %vm18104_vm6, %vm22388_vm8 }
 0x2e4   :  { %v22673_v59 = vsel %vm18145_vm7, 4294967295, %v22672_v59  ;;  %22677 = vst [vmem:[#allocation31_spill] sm:$0xff] %v22676_v6  ;;  %16480 = vmatmul.mubr.msk.bf16.vlgmr.msra.gmra.mrb[124].mxu0 %vm18152_vm9, %v16479_v11  ;;  %v2697_v12 = vrot.slane %v2695_v30, 3  ;;  %v2700_v25 = vrot.slane %v2698_v10, 4  ;;  %v22678_v20 = vmov 0 }
 0x2e5   :  { %22674 = vst [vmem:[#allocation29_spill] sm:$0xff] %v22673_v59  ;;  %v22679_v20 = vsel %vm18161_vm10, 4294967295, %v22678_v20  ;;  %v16482_v26 = vpack.c.bf16 %v1931_v36, %v1928_v38  ;;  %v2713_v34 = vshrl.u32 %v2344_v17, 16  ;;  %v2716_v46 = vshll.u32 %v2344_v17, 16  ;;  %14214 = vmatpush3.bf16.msra.mxu0 %v17776_v49 }
 0x2e6   :  { %22680 = vst [vmem:[#allocation33_spill] sm:$0xff] %v22679_v20  ;;  %v1859_v11 = vadd.f32 %v18063_v0, %v17973_v14  ;;  %v2706_v30 = vrot.slane %v2704_v7, 3  ;;  %v2709_v10 = vrot.slane %v2707_v48, 4  ;;  %v2701_v32 = vor.u32 %v2700_v25, %v2697_v12  ;;  %14215 = vmatprep.subr.bf16.mxu0 %v16140_v19 }
 0x2e7   :  { %16483 = vmatprep.mubr.msk.bf16.mxu0 %vm18161_vm10, %v16482_v26  ;;  %v1940_v6 = vmax.f32 %v1856_v13, 0.0  ;;  %v2715_v36 = vrot.slane %v2713_v34, 3  ;;  %v2718_v38 = vrot.slane %v2716_v46, 4  ;;  %v1862_v26 = vadd.f32 %v18063_v0, %v17977_v18  ;;  %v16137_v18 = vld [vmem:[%s22287_s4 + $0x148] sm:$0xff]  }
 0x2e8   :  { %v1943_v20 = vmax.f32 %v1859_v11, 0.0  ;;  %v22681_v17 = vand.u32 15, %v17877_v47  ;;  %v22682_v14 = vmov 0  ;;  %v22685_v49 = vor.u32 %v17885_v15, %v17882_v44 }
 0x2e9   :  { %v2710_v13 = vor.u32 %v2709_v10, %v2706_v30  ;;  %2182 = vst [vmem:[#allocation2 + $0xd8] sm:$0xff] %v1940_v6  ;;  %v2347_v7 = vpack.c.bf16 %v1940_v6, %v2077_v63  ;;  %v1868_v48 = vadd.f32 %v18063_v0, %v17981_v58  ;;  %v2719_v25 = vor.u32 %v2718_v38, %v2715_v36  ;;  %v16144_v10 = vld [vmem:[%s22287_s4 + $0x118] sm:$0xff]  }
 0x2ea   :  { %vm18177_vm11 = vcmp.lt.s32.totalorder %v22681_v17, 14  ;;  %v2702_v12 = vsel %vm22394_vm5, %v22685_v49, %v2701_v32  ;;  %v2083_v47 = vsel %vm18104_vm6, %v1943_v20, 0.0  ;;  %v18192_v34 = vmax.f32 %v1862_v26, 0.0  ;;  %14216 = vmatpush3.bf16.msra.mxu0 %v16140_v19 }
 0x2eb   :  { %v22683_v14 = vsel %vm18177_vm11, 4294967295, %v22682_v14  ;;  %14185 = vmatprep.mubr.bf16.mxu1 %v2702_v12  ;;  %v18196_v44 = vadd.f32 %v18063_v0, %v17985_v23  ;;  %v2711_v15 = vsel %vm22394_vm5, %v2701_v32, %v2710_v13  ;;  %2185 = vst [vmem:[#allocation2 + $0xf0] sm:$0xff] %v2083_v47  ;;  %v2722_v58 = vshrl.u32 %v2347_v7, 16  ;;  %14217 = vmatprep.subr.bf16.mxu0 %v16142_v62  ;;  %v16349_v12 = vld [vmem:[%s22287_s4 + $0x140] sm:$0xff]  }
 0x2ec   :  { %22684 = vst [vmem:[#allocation35_spill] sm:$0xff] %v22683_v14  ;;  %v2725_v63 = vshll.u32 %v2347_v7, 16  ;;  %v22686_v46 = vand.u32 15, %v17880_v35  ;;  %v22687_v11 = vmov 0  ;;  %14186 = vmatmul.mubr.bf16.vlgmr.msra.gmra.mrb[16].mxu1 %v2711_v15  ;;  %v2720_v30 = vsel %vm22394_vm5, %v2710_v13, %v2719_v25  ;;  %2188 = vst [vmem:[#allocation2 + $0x108] sm:$0xff] %v18192_v34 }
 0x2ed   :  { %v2350_v23 = vpack.c.bf16 %v18192_v34, %v2083_v47  ;;  %v18208_v19 = vmax.f32 %v1868_v48, 0.0  ;;  %v22690_v35 = vmov 0  ;;  %v22692_v32 = vmax.f32 %v18109_v16, 0.0  ;;  %14189 = vmatprep.mubr.bf16.mxu1 %v2720_v30  ;;  %14302 = vmatpush3.bf16.msra.mxu1 %v16349_v12  ;;  %v16145_v30 = vld [vmem:[%s22287_s4 + $0x120] sm:$0xff]  }
 0x2ee   :  { %vm18201_vm12 = vcmp.lt.s32.totalorder %v22686_v46, 14  ;;  %v22691_v35 = vsel %vm18216_vm13, 4294967295, %v22690_v35  ;;  %v2724_v38 = vrot.slane %v2722_v58, 3  ;;  %v2727_v26 = vrot.slane %v2725_v63, 4  ;;  %14303 = vmatprep.subr.bf16.mxu1 %v16137_v18  ;;  %14218 = vmatpush3.bf16.msra.mxu0 %v16142_v62 }
 0x2ef   :  { %v22688_v11 = vsel %vm18201_vm12, 4294967295, %v22687_v11  ;;  %v16485_v36 = vpack.c.bf16 %v22692_v32, %v18132_v57  ;;  %v1955_v17 = vmax.f32 %v18196_v44, 0.0  ;;  %v1874_v49 = vadd.f32 %v18063_v0, %v18002_v56  ;;  %2194 = vst [vmem:[#allocation2 + $0x138] sm:$0xff] %v18208_v19  ;;  %14219 = vmatprep.subr.bf16.mxu0 %v16144_v10 }
 0x2f0   :  { %22689 = vst [vmem:[#allocation37_spill] sm:$0xff] %v22688_v11  ;;  %v22693_v16 = vmov 0  ;;  %v16488_v57 = vpack.c.bf16 %v1943_v20, %v1940_v6  ;;  %v2731_v13 = vshrl.u32 %v2350_v23, 16  ;;  %v2734_v7 = vshll.u32 %v2350_v23, 16  ;;  %v16138_v6 = vld [vmem:[%s22287_s4 + $0x150] sm:$0xff]  }
 0x2f1   :  { %16486 = vmatmul.mubr.msk.bf16.gmra.mrb[128].mxu0 %vm18216_vm13, %v16485_v36  ;;  %v22694_v16 = vsel %vm18234_vm14, 4294967295, %v22693_v16  ;;  %v2353_v56 = vpack.c.bf16 %v18208_v19, %v18115_v53  ;;  %v18245_v48 = vadd.f32 %v18063_v0, %v18006_v39  ;;  %v2728_v47 = vor.u32 %v2727_v26, %v2724_v38  ;;  %14304 = vmatpush3.bf16.msra.mxu1 %v16137_v18 }
 0x2f2   :  { %16489 = vmatprep.mubr.msk.bf16.mxu0 %vm18234_vm14, %v16488_v57  ;;  %v2095_v44 = vsel %vm18145_vm7, %v1955_v17, 0.0  ;;  %v18252_v20 = vmax.f32 %v1874_v49, 0.0  ;;  %v1880_v15 = vadd.f32 %v18063_v0, %v18010_v28  ;;  %v22695_v53 = vand.u32 15, %v17899_v52  ;;  %14305 = vmatprep.subr.bf16.mxu1 %v16138_v6 }
 0x2f3   :  { %v22696_v58 = vmov 0  ;;  %v2733_v39 = vrot.slane %v2731_v13, 3  ;;  %v2736_v63 = vrot.slane %v2734_v7, 4  ;;  %2197 = vst [vmem:[#allocation2 + $0x150] sm:$0xff] %v2095_v44  ;;  %v2740_v46 = vshrl.u32 %v2353_v56, 16  ;;  %14220 = vmatpush3.bf16.msra.mxu0 %v16144_v10  ;;  %v16147_v10 = vld [vmem:[%s22287_s4 + $0x128] sm:$0xff]  }
 0x2f4   :  { %vm18258_vm15 = vcmp.lt.s32.totalorder %v22695_v53, 14  ;;  %v2729_v23 = vsel %vm22394_vm5, %v2719_v25, %v2728_v47  ;;  %v2743_v32 = vshll.u32 %v2353_v56, 16  ;;  %v1961_v28 = vmax.f32 %v18245_v48, 0.0  ;;  %2200 = vst [vmem:[#allocation2 + $0x168] sm:$0xff] %v18252_v20  ;;  %14221 = vmatprep.subr.bf16.mxu0 %v16145_v30 }
 0x2f5   :  { %v22697_v58 = vsel %vm18258_vm15, 4294967295, %v22696_v58  ;;  %v2356_v52 = vpack.c.bf16 %v18252_v20, %v2095_v44  ;;  %v2737_v62 = vor.u32 %v2736_v63, %v2733_v39  ;;  %v2742_v36 = vrot.slane %v2740_v46, 3  ;;  %14190 = vmatmul.mubr.bf16.gmra.mrb[20].mxu1 %v2729_v23 }
 0x2f6   :  { %22698 = vst [vmem:[#allocation3_spill] sm:$0xff] %v22697_v58  ;;  %v18271_v38 = vadd.f32 %v18063_v0, %v18014_v33  ;;  %v18273_v26 = vmax.f32 %v1880_v15, 0.0  ;;  %v22699_v49 = vand.u32 15, %v17902_v29  ;;  %v22700_v25 = vmov 0  ;;  %v16141_v33 = vld [vmem:[%s22287_s4 + $0x158] sm:$0xff]   ;;  %14306 = vmatpush3.bf16.msra.mxu1 %v16138_v6 }
 0x2f7   :  { %v2745_v12 = vrot.slane %v2743_v32, 4  ;;  %v2101_v18 = vsel %vm18177_vm11, %v1961_v28, 0.0  ;;  %v2749_v57 = vshrl.u32 %v2356_v52, 16  ;;  %v2752_v13 = vshll.u32 %v2356_v52, 16  ;;  %14307 = vmatprep.subr.bf16.mxu1 %v16141_v33  ;;  %14222 = vmatpush3.bf16.msra.mxu0 %v16145_v30 }
 0x2f8   :  { %vm18277_vm0 = vcmp.lt.s32.totalorder %v22699_v49, 14  ;;  %v22703_v29 = vand.u32 15, %v17908_v51  ;;  %v22704_v7 = vmov 0  ;;  %v2738_v56 = vsel %vm22394_vm5, %v2728_v47, %v2737_v62  ;;  %2203 = vst [vmem:[#allocation2 + $0x180] sm:$0xff] %v2101_v18  ;;  %2206 = vst [vmem:[#allocation2 + $0x198] sm:$0xff] %v18273_v26  ;;  %14223 = vmatprep.subr.bf16.mxu0 %v16147_v10 }
 0x2f9   :  { %v22701_v25 = vsel %vm18277_vm0, 4294967295, %v22700_v25  ;;  %v1967_v44 = vmax.f32 %v18271_v38, 0.0  ;;  %v2359_v15 = vpack.c.bf16 %v18273_v26, %v2101_v18  ;;  %vm22707_vm14 = vmmov 1   ;;  %14193 = vmatprep.mubr.bf16.mxu1 %v2738_v56 }
 0x2fa   :  { %22702 = vst [vmem:[#allocation4_spill] sm:$0xff] %v22701_v25  ;;  %vm18290_vm8 = vcmp.lt.s32.totalorder %v22703_v29, 14  ;;  %vm16490_vm13 = vmpackc.low %vm17967_vm1, %vm22707_vm14  ;;  %v22708_v51 = vmax.f32 %v18092_v3, 0.0  ;;  %v2746_v53 = vor.u32 %v2745_v12, %v2742_v36  ;;  %v2751_v39 = vrot.slane %v2749_v57, 3  ;;  %14308 = vmatpush3.bf16.msra.mxu1 %v16141_v33 }
 0x2fb   :  { %v22705_v7 = vsel %vm18290_vm8, 4294967295, %v22704_v7  ;;  %v2754_v63 = vrot.slane %v2752_v13, 4  ;;  %v1886_v46 = vadd.f32 %v18063_v0, %v18018_v42  ;;  %vm18312_vm5 = vmpackc.low %vm18145_vm7, %vm22707_vm14  ;;  %v22709_v23 = vmov 0  ;;  %v16148_v13 = vld [vmem:[%s22287_s4 + $0x130] sm:$0xff]   ;;  %14224 = vmatpush3.bf16.msra.mxu0 %v16147_v10 }
 0x2fc   :  { %22706 = vst [vmem:[#allocation5_spill] sm:$0xff] %v22705_v7  ;;  %v16491_v47 = vpack.c.bf16 %v22708_v51, %v18192_v34  ;;  %v22710_v23 = vsel %vm18312_vm5, 4294967295, %v22709_v23  ;;  %v16494_v32 = vpack.c.bf16 %v1955_v17, %v18208_v19  ;;  %v2107_v3 = vsel %vm18201_vm12, %v1967_v44, 0.0  ;;  %v16143_v17 = vld [vmem:[%s22287_s4 + $0x160] sm:$0xff]   ;;  %14225 = vmatprep.subr.bf16.mxu0 %v16148_v13  ;;  %vm18383_vm7 = vmpackc.low %vm18177_vm11, %vm22707_vm14 }
 0x2fd   :  { %v2758_v34 = vshrl.u32 %v2359_v15, 16  ;;  %v2761_v42 = vshll.u32 %v2359_v15, 16  ;;  %v18325_v52 = vadd.f32 %v18063_v0, %v18022_v24  ;;  %v2755_v49 = vor.u32 %v2754_v63, %v2751_v39  ;;  %2209 = vst [vmem:[#allocation2 + $0x1b0] sm:$0xff] %v2107_v3  ;;  %14309 = vmatprep.subr.bf16.mxu1 %v16143_v17 }
 0x2fe   :  { %16492 = vmatmul.mubr.msk.bf16.gmra.mrb[132].mxu0 %vm16490_vm13, %v16491_v47  ;;  %vm22711_vm13 = vsmask.f32 4352  ;;  %v18328_v19 = vmax.f32 %v1886_v46, 0.0  ;;  %v1892_v24 = vadd.f32 %v18063_v0, %v18026_v50  ;;  %v22712_v57 = vand.u32 15, %v17911_v27  ;;  %14310 = vmatpush3.bf16.msra.mxu1 %v16143_v17 }
 0x2ff   :  { %16495 = vmatprep.mubr.msk.bf16.mxu0 %vm18312_vm5, %v16494_v32  ;;  %v2747_v36 = vsel %vm22711_vm13, %v2737_v62, %v2746_v53  ;;  %v2760_v6 = vrot.slane %v2758_v34, 3  ;;  %v2763_v12 = vrot.slane %v2761_v42, 4  ;;  %v1973_v18 = vmax.f32 %v18325_v52, 0.0  ;;  %14226 = vmatpush3.bf16.msra.mxu0 %v16148_v13 }
 0x300   :  { %vm18338_vm13 = vcmp.lt.s32.totalorder %v22712_v57, 14  ;;  %v22713_v62 = vmov 0  ;;  %vm22716_vm1 = vsmask.f32 4352  ;;  %2212 = vst [vmem:[#allocation2 + $0x1c8] sm:$0xff] %v18328_v19  ;;  %v2362_v29 = vpack.c.bf16 %v18328_v19, %v2107_v3  ;;  %14194 = vmatmul.mubr.bf16.gmra.mrb[24].mxu1 %v2747_v36 }
 0x301   :  { %v22714_v62 = vsel %vm18338_vm13, 4294967295, %v22713_v62  ;;  %v2756_v30 = vsel %vm22716_vm1, %v2746_v53, %v2755_v49  ;;  %v18350_v50 = vadd.f32 %v18063_v0, %v18036_v37  ;;  %v1898_v27 = vadd.f32 %v18063_v0, %v18040_v5  ;;  %v16146_v5 = vld [vmem:[%s22287_s4 + $0x168] sm:$0xff]  }
 0x302   :  { %22715 = vst [vmem:[#allocation6_spill] sm:$0xff] %v22714_v62  ;;  %v2764_v56 = vor.u32 %v2763_v12, %v2760_v6  ;;  %v2113_v15 = vsel %vm18258_vm15, %v1973_v18, 0.0  ;;  %v18358_v51 = vmax.f32 %v1892_v24, 0.0  ;;  %v18362_v47 = vadd.f32 %v18063_v0, %v18044_v41  ;;  %14197 = vmatprep.mubr.bf16.mxu1 %v2756_v30  ;;  %v16150_v6 = vld [vmem:[%s22287_s4 + $0x138] sm:$0xff]   ;;  %14311 = vmatprep.subr.bf16.mxu1 %v16146_v5 }
 0x303   :  { %2215 = vst [vmem:[#allocation2 + $0x1e0] sm:$0xff] %v2113_v15  ;;  %v2767_v53 = vshrl.u32 %v2362_v29, 16  ;;  %v2770_v37 = vshll.u32 %v2362_v29, 16  ;;  %v1979_v39 = vmax.f32 %v18350_v50, 0.0  ;;  %v18371_v41 = vmax.f32 %v1898_v27, 0.0  ;;  %14227 = vmatprep.subr.bf16.mxu0 %v16150_v6  ;;  %14312 = vmatpush3.bf16.msra.mxu1 %v16146_v5 }
 0x304   :  { %v2765_v33 = vsel %vm22716_vm1, %v2755_v49, %v2764_v56  ;;  %2218 = vst [vmem:[#allocation2 + $0x1f8] sm:$0xff] %v18358_v51  ;;  %v2365_v63 = vpack.c.bf16 %v18358_v51, %v2113_v15  ;;  %v1985_v46 = vmax.f32 %v18362_v47, 0.0  ;;  %v22717_v32 = vand.u32 15, %v17914_v55  ;;  %vm18404_vm1 = vmpackc.low %vm18201_vm12, %vm22707_vm14  ;;  %14228 = vmatpush3.bf16.msra.mxu0 %v16150_v6 }
 0x305   :  { %v22718_v3 = vmov 0  ;;  %v22721_v10 = vmov 0  ;;  %v16497_v34 = vpack.c.bf16 %v1961_v28, %v18252_v20  ;;  %v2769_v55 = vrot.slane %v2767_v53, 3  ;;  %2224 = vst [vmem:[#allocation2 + $0x228] sm:$0xff] %v18371_v41 }
 0x306   :  { %vm18376_vm5 = vcmp.lt.s32.totalorder %v22717_v32, 14  ;;  %v22722_v10 = vsel %vm18383_vm7, 4294967295, %v22721_v10  ;;  %v2772_v42 = vrot.slane %v2770_v37, 4  ;;  %v2119_v36 = vsel %vm18277_vm0, %v1979_v39, 0.0 }
 0x307   :  { %v22719_v3 = vsel %vm18376_vm5, 4294967295, %v22718_v3  ;;  %16498 = vmatmul.mubr.msk.bf16.gmra.mrb[136].mxu0 %vm18383_vm7, %v16497_v34  ;;  %v1904_v49 = vadd.f32 %v18063_v0, %v18048_v21  ;;  %v22723_v48 = vmov 0  ;;  %v16500_v20 = vpack.c.bf16 %v1967_v44, %v18273_v26  ;;  %2221 = vst [vmem:[#allocation2 + $0x210] sm:$0xff] %v2119_v36  ;;  %v16149_v26 = vld [vmem:[%s22287_s4 + $0x170] sm:$0xff]   ;;  %vm18459_vm7 = vmpackc.low %vm18258_vm15, %vm22707_vm14 }
 0x308   :  { %22720 = vst [vmem:[#allocation78_spill] sm:$0xff] %v22719_v3  ;;  %v22724_v48 = vsel %vm18404_vm1, 4294967295, %v22723_v48  ;;  %v2776_v21 = vshrl.u32 %v2365_v63, 16  ;;  %v2779_v28 = vshll.u32 %v2365_v63, 16  ;;  %v2125_v12 = vsel %vm18290_vm8, %v1985_v46, 0.0  ;;  %14313 = vmatprep.subr.bf16.mxu1 %v16149_v26  ;;  %14198 = vmatmul.mubr.bf16.gmra.mrb[28].mxu1 %v2765_v33 }
 0x309   :  { %16501 = vmatprep.mubr.msk.bf16.mxu0 %vm18404_vm1, %v16500_v20  ;;  %v2773_v24 = vor.u32 %v2772_v42, %v2769_v55  ;;  %2227 = vst [vmem:[#allocation2 + $0x240] sm:$0xff] %v2125_v12  ;;  %v2368_v57 = vpack.c.bf16 %v18371_v41, %v2119_v36  ;;  %v18421_v38 = vadd.f32 %v18063_v0, %v18052_v61  ;;  %v18426_v30 = vmax.f32 %v1904_v49, 0.0 }
 0x30a   :  { %v2778_v44 = vrot.slane %v2776_v21, 3  ;;  %v2781_v17 = vrot.slane %v2779_v28, 4  ;;  %v1910_v29 = vadd.f32 %v18063_v0, %v18056_v9  ;;  %vm22725_vm1 = vsmask.f32 4352  ;;  %v16151_v9 = vld [vmem:[%s22287_s4 + $0x178] sm:$0xff]   ;;  %14314 = vmatpush3.bf16.msra.mxu1 %v16149_v26 }
 0x30b   :  { %v2774_v27 = vsel %vm22725_vm1, %v2764_v56, %v2773_v24  ;;  %v2785_v15 = vshrl.u32 %v2368_v57, 16  ;;  %v2788_v53 = vshll.u32 %v2368_v57, 16  ;;  %v1991_v61 = vmax.f32 %v18421_v38, 0.0  ;;  %2230 = vst [vmem:[#allocation2 + $0x258] sm:$0xff] %v18426_v30  ;;  %14315 = vmatprep.subr.bf16.mxu1 %v16151_v9 }
 0x30c   :  { %v2782_v37 = vor.u32 %v2781_v17, %v2778_v44  ;;  %v2371_v63 = vpack.c.bf16 %v18426_v30, %v2125_v12  ;;  %v18436_v32 = vadd.f32 %v18063_v0, %v18060_v54  ;;  %v18438_v34 = vmax.f32 %v1910_v29, 0.0  ;;  %v18452_v54 = vld [vmem:[%s22287_s4 + $0x40] sm:$0xff]   ;;  %14201 = vmatprep.mubr.bf16.mxu1 %v2774_v27 }
 0x30d   :  { %v2787_v13 = vrot.slane %v2785_v15, 3  ;;  %v2790_v56 = vrot.slane %v2788_v53, 4  ;;  %v2131_v55 = vsel %vm18338_vm13, %v1991_v61, 0.0  ;;  %v1839_v5 = vadd.f32 %v18066_v22, %v18073_v60  ;;  %14257 = vmatprep.subr.bf16.mxu0 %v18452_v54 }
 0x30e   :  { %v2783_v42 = vsel %vm22725_vm1, %v2773_v24, %v2782_v37  ;;  %2233 = vst [vmem:[#allocation2 + $0x270] sm:$0xff] %v2131_v55  ;;  %v2794_v36 = vshrl.u32 %v2371_v63, 16  ;;  %v2797_v49 = vshll.u32 %v2371_v63, 16  ;;  %2236 = vst [vmem:[#allocation2 + $0x288] sm:$0xff] %v18438_v34  ;;  %v22726_v20 = vmov 0  ;;  %14316 = vmatpush3.bf16.msra.mxu1 %v16151_v9  ;;  %v22735_v9 = vld [vmem:[#allocation23_spill] sm:$0xff] }
 0x30f   :  { %v22727_v20 = vsel %vm18459_vm7, 4294967295, %v22726_v20  ;;  %v16503_v60 = vpack.c.bf16 %v1973_v18, %v18328_v19  ;;  %v2791_v33 = vor.u32 %v2790_v56, %v2787_v13  ;;  %v1997_v21 = vmax.f32 %v18436_v32, 0.0  ;;  %vm18477_vm1 = vmpackc.low %vm18277_vm0, %vm22707_vm14  ;;  %v22732_v56 = vld [vmem:[#allocation7_spill] sm:$0xff]  ;;  %v22764_v63 = vld [vmem:[#allocation66_spill] sm:$0xff] }
 0x310   :  { %v2374_v6 = vpack.c.bf16 %v18438_v34, %v2131_v55  ;;  %v18472_v28 = vadd.f32 %v18066_v22, %v18077_v2  ;;  %v22728_v12 = vmov 0  ;;  %v16506_v52 = vpack.c.bf16 %v1979_v39, %v18358_v51  ;;  %v18498_v39 = vld [vmem:[%s22287_s4 + $0x80] sm:$0xff]   ;;  %v22733_v55 = vld [vmem:[#allocation74_spill] sm:$0xff]  ;;  %14202 = vmatmul.mubr.bf16.gmra.mrb[32].mxu1 %v2783_v42 }
 0x311   :  { %16504 = vmatmul.mubr.msk.bf16.gmra.mrb[140].mxu0 %vm18459_vm7, %v16503_v60  ;;  %v22729_v12 = vsel %vm18477_vm1, 4294967295, %v22728_v12  ;;  %v2796_v19 = vrot.slane %v2794_v36, 3  ;;  %v2799_v18 = vrot.slane %v2797_v49, 4  ;;  %v18486_v24 = vmax.f32 %v1839_v5, 0.0  ;;  %14345 = vmatprep.subr.bf16.mxu1 %v18498_v39 }
 0x312   :  { %16507 = vmatprep.mubr.msk.bf16.mxu0 %vm18477_vm1, %v16506_v52  ;;  %v1845_v2 = vadd.f32 %v18066_v22, %v18081_v4  ;;  %vm22730_vm7 = vsmask.f32 4352  ;;  %v2137_v44 = vsel %vm18376_vm5, %v1997_v21, 0.0  ;;  %v2803_v50 = vshrl.u32 %v2374_v6, 16 }
 0x313   :  { %v2792_v57 = vsel %vm22730_vm7, %v2782_v37, %v2791_v33  ;;  %v2806_v51 = vshll.u32 %v2374_v6, 16  ;;  %v2800_v26 = vor.u32 %v2799_v18, %v2796_v19  ;;  %2239 = vst [vmem:[#allocation2 + $0x2a0] sm:$0xff] %v2137_v44  ;;  %v22419_v4 = vmax.f32 %v18472_v28, 0.0  ;;  %2165 = vst [vmem:[#allocation2 + $0x50] sm:$0xff] %v18486_v24 }
 0x314   :  { %v1743_v17 = vmul.f32 %v17924_v40, %v17726_v45  ;;  %v2805_v29 = vrot.slane %v2803_v50, 3  ;;  %v18507_v15 = vadd.f32 %v18066_v22, %v18085_v43  ;;  %v18509_v53 = vmax.f32 %v1845_v2, 0.0  ;;  %v22734_v45 = vld [vmem:[#allocation8_spill] sm:$0xff]  ;;  %14205 = vmatprep.mubr.bf16.mxu1 %v2792_v57  ;;  %v22763_v50 = vld [vmem:[#allocation13_spill] sm:$0xff] }
 0x315   :  { %v2808_v27 = vrot.slane %v2806_v51, 4  ;;  %v2801_v37 = vsel %vm22730_vm7, %v2791_v33, %v2800_v26  ;;  %v2066_v13 = vsel %vm17990_vm2, %v22419_v4, 0.0  ;;  %v1751_v5 = vmul.f32 %v22733_v55, %v22732_v56  ;;  %v22736_v33 = vld [vmem:[#allocation21_spill] sm:$0xff]  ;;  %vm18540_vm7 = vmpackc.low %vm18290_vm8, %vm22707_vm14  ;;  %v22745_v56 = vld [vmem:[#allocation60_spill] sm:$0xff] }
 0x316   :  { %v1754_v36 = vmul.f32 %v22733_v55, %v22734_v45  ;;  %2168 = vst [vmem:[#allocation2 + $0x68] sm:$0xff] %v2066_v13  ;;  %v22413_v43 = vmax.f32 %v18507_v15, 0.0  ;;  %2171 = vst [vmem:[#allocation2 + $0x80] sm:$0xff] %v18509_v53  ;;  %v18525_v60 = vpack.c.bf16 %v18509_v53, %v2066_v13  ;;  %v1840_v6 = vadd.f32 %v22736_v33, %v22735_v9  ;;  %v22758_v4 = vld [vmem:[#allocation27_spill] sm:$0xff] }
 0x317   :  { %v18520_v49 = vor.u32 %v2808_v27, %v2805_v29  ;;  %v18531_v52 = vadd.f32 %v22736_v33, %v1743_v17  ;;  %v1851_v19 = vadd.f32 %v18066_v22, %v1751_v5  ;;  %v16509_v42 = vpack.c.bf16 %v1985_v46, %v18371_v41  ;;  %v22741_v17 = vld [vmem:[#allocation59_spill] sm:$0xff]  ;;  %vm18560_vm8 = vmpackc.low %vm18338_vm13, %vm22707_vm14 }
 0x318   :  { %v18535_v18 = vadd.f32 %v18066_v22, %v1754_v36  ;;  %vm22739_vm1 = vsmask.f32 4352  ;;  %v2072_v51 = vsel %vm17996_vm3, %v22413_v43, 0.0  ;;  %v1746_v29 = vmul.f32 %v17924_v40, %v22741_v17  ;;  %v22746_v17 = vld [vmem:[#allocation9_spill] sm:$0xff]  ;;  %14206 = vmatmul.mubr.bf16.gmra.mrb[36].mxu1 %v2801_v37 }
 0x319   :  { %16510 = vmatmul.mubr.msk.bf16.gmra.mrb[144].mxu0 %vm18540_vm7, %v16509_v42  ;;  %v2810_v44 = vsel %vm22739_vm1, %v2800_v26, %v18520_v49  ;;  %v22742_v47 = vmov 0  ;;  %v16512_v41 = vpack.c.bf16 %v1991_v61, %v18426_v30  ;;  %2174 = vst [vmem:[#allocation2 + $0x98] sm:$0xff] %v2072_v51  ;;  %v18569_v46 = vmax.f32 %v1840_v6, 0.0  ;;  %vm18613_vm1 = vmpackc.low %vm18376_vm5, %vm22707_vm14 }
 0x31a   :  { %v22743_v47 = vsel %vm18560_vm8, 4294967295, %v22742_v47  ;;  %v22412_v57 = vmax.f32 %v18531_v52, 0.0  ;;  %v18572_v26 = vmax.f32 %v1851_v19, 0.0  ;;  %v2332_v27 = vld [vmem:[#allocation2 + $0x2a0] sm:$0x7f]  ;;  %v22411_v13 = vmax.f32 %v18535_v18, 0.0  ;;  %14209 = vmatprep.mubr.bf16.mxu1 %v2810_v44 }
 0x31b   :  { %22744 = vst [vmem:[#allocation7_spill] sm:$0xff] %v22743_v47  ;;  %16513 = vmatprep.mubr.msk.bf16.mxu0 %vm18560_vm8, %v16512_v41  ;;  %v1749_v5 = vmul.f32 %v17924_v40, %v22745_v56  ;;  %v1846_v45 = vadd.f32 %v22736_v33, %v1746_v29  ;;  %v2377_v38 = vpack.c.bf16 %v2332_v27, %v2332_v27  ;;  %2166 = vst [vmem:[#allocation2 + $0x58] sm:$0xff] %v18569_v46  ;;  %v22747_v41 = vld [vmem:[#allocation10_spill] sm:$0xff] }
 0x31c   :  { %v2067_v30 = vsel %vm17990_vm2, %v22412_v57, 0.0  ;;  %2177 = vst [vmem:[#allocation2 + $0xb0] sm:$0xff] %v18572_v26  ;;  %v18585_v61 = vpack.c.bf16 %v18572_v26, %v2072_v51  ;;  %v2078_v36 = vsel %vm18030_vm4, %v22411_v13, 0.0  ;;  %v1757_v29 = vmul.f32 %v22733_v55, %v22746_v17  ;;  %v22748_v56 = vld [vmem:[#allocation62_spill] sm:$0xff] }
 0x31d   :  { %2169 = vst [vmem:[#allocation2 + $0x70] sm:$0xff] %v2067_v30  ;;  %v18592_v9 = vadd.f32 %v22736_v33, %v1749_v5  ;;  %v18594_v6 = vmax.f32 %v1846_v45, 0.0  ;;  %v2812_v19 = vshrl.u32 %v2377_v38, 16  ;;  %v2815_v42 = vshll.u32 %v2377_v38, 16  ;;  %2180 = vst [vmem:[#allocation2 + $0xc8] sm:$0xff] %v2078_v36  ;;  %v22749_v5 = vld [vmem:[#allocation64_spill] sm:$0xff] }
 0x31e   :  { %v1760_v51 = vmul.f32 %v22733_v55, %v22747_v41  ;;  %v1752_v13 = vmul.f32 %v17924_v40, %v22748_v56  ;;  %v1755_v45 = vmul.f32 %v17924_v40, %v22749_v5  ;;  %v1857_v17 = vadd.f32 %v18066_v22, %v1757_v29 }
 0x31f   :  { %v22417_v27 = vmax.f32 %v18592_v9, 0.0  ;;  %2172 = vst [vmem:[#allocation2 + $0x88] sm:$0xff] %v18594_v6  ;;  %v2814_v57 = vrot.slane %v2812_v19, 3  ;;  %v2817_v38 = vrot.slane %v2815_v42, 4  ;;  %v18607_v43 = vpack.c.bf16 %v18594_v6, %v2067_v30 }
 0x320   :  { %v22750_v41 = vmov 0  ;;  %v16515_v56 = vpack.c.bf16 %v1997_v21, %v18438_v34  ;;  %v18629_v30 = vadd.f32 %v18066_v22, %v1760_v51  ;;  %v1852_v19 = vadd.f32 %v22736_v33, %v1752_v13  ;;  %v22754_v21 = vld [vmem:[#allocation11_spill] sm:$0xff] }
 0x321   :  { %v22751_v41 = vsel %vm18613_vm1, 4294967295, %v22750_v41  ;;  %v18626_v37 = vsel %vm17996_vm3, %v22417_v27, 0.0  ;;  %v18633_v42 = vadd.f32 %v22736_v33, %v1755_v45  ;;  %v2818_v32 = vor.u32 %v2817_v38, %v2814_v57  ;;  %v2249_v45 = vld [vmem:[#allocation2 + $0x8] sm:$0x80] }
 0x322   :  { %22752 = vst [vmem:[#allocation74_spill] sm:$0xff] %v22751_v41  ;;  %16516 = vmatmul.mubr.msk.bf16.gmra.mrb[148].mxu0 %vm18613_vm1, %v16515_v56  ;;  %v22753_v34 = vmov 0.0|0.0   ;;  %2175 = vst [vmem:[#allocation2 + $0xa0] sm:$0xff] %v18626_v37  ;;  %v1763_v44 = vmul.f32 %v22733_v55, %v22754_v21  ;;  %v18639_v29 = vmax.f32 %v1857_v17, 0.0  ;;  %v22414_v5 = vmax.f32 %v18629_v30, 0.0  ;;  %v22755_v21 = vld [vmem:[#allocation61_spill] sm:$0xff] }
 0x323   :  { %14229 = vmatprep.mubr.bf16.mxu0 %v22753_v34  ;;  %v18642_v56 = vmax.f32 %v1852_v19, 0.0  ;;  %v22418_v51 = vmax.f32 %v18633_v42, 0.0  ;;  %vm22757_vm3 = vsmask.f32 4352  ;;  %v18674_v31 = vpack.c.bf16 %v22758_v4, %v2249_v45 }
 0x324   :  { %v1863_v13 = vadd.f32 %v18066_v22, %v1763_v44  ;;  %v2084_v57 = vsel %vm18104_vm6, %v22414_v5, 0.0  ;;  %2183 = vst [vmem:[#allocation2 + $0xe0] sm:$0xff] %v18639_v29  ;;  %v18652_v38 = vpack.c.bf16 %v18639_v29, %v2078_v36  ;;  %v1758_v44 = vmul.f32 %v17924_v40, %v22755_v21  ;;  %v22756_v5 = vld [vmem:[#allocation63_spill] sm:$0xff] }
 0x325   :  { %v18658_v17 = vsel %vm18030_vm4, %v22418_v51, 0.0  ;;  %2178 = vst [vmem:[#allocation2 + $0xb8] sm:$0xff] %v18642_v56  ;;  %2186 = vst [vmem:[#allocation2 + $0xf8] sm:$0xff] %v2084_v57  ;;  %v1761_v36 = vmul.f32 %v17924_v40, %v22756_v5  ;;  %v2819_v27 = vsel %vm22757_vm3, %v18520_v49, %v2818_v32  ;;  %v16156_v51 = vld [vmem:[%s22287_s4 + $0x48] sm:$0xff]   ;;  %v22760_v49 = vmax.f32 %v18472_v28, 0.0 }
 0x326   :  { %2181 = vst [vmem:[#allocation2 + $0xd0] sm:$0xff] %v18658_v17  ;;  %v18662_v19 = vmax.f32 %v1863_v13, 0.0  ;;  %14210 = vmatmul.mubr.bf16.gmra.mrb[40].mxu1 %v2819_v27  ;;  %v1858_v21 = vadd.f32 %v22736_v33, %v1758_v44  ;;  %v22762_v27 = vld [vmem:[#allocation12_spill] sm:$0xff]  ;;  %v1764_v44 = vmul.f32 %v17924_v40, %v22764_v63  ;;  %vm22770_vm3 = vnez %v22673_v59 }
 0x327   :  { %v18682_v5 = vadd.f32 %v22736_v33, %v1761_v36  ;;  %v16518_v32 = vpack.c.bf16 %v22760_v49, %v18486_v24  ;;  %14317 = vmatprep.mubr.bf16.mxu1 %v22753_v34  ;;  %v1769_v45 = vmul.f32 %v22733_v55, %v22762_v27  ;;  %v22765_v36 = vmax.f32 %v18507_v15, 0.0  ;;  %v2250_v49 = vld [vmem:[#allocation2 + $0x10] sm:$0x80] }
 0x328   :  { %2189 = vst [vmem:[#allocation2 + $0x110] sm:$0xff] %v18662_v19  ;;  %v18678_v13 = vpack.c.bf16 %v18662_v19, %v2084_v57  ;;  %v1772_v57 = vmul.f32 %v22733_v55, %v22763_v50  ;;  %v1864_v63 = vadd.f32 %v22736_v33, %v1764_v44  ;;  %v16158_v15 = vld [vmem:[%s22287_s4 + $0x50] sm:$0xff]   ;;  %v18726_v44 = vpack.c.bf16 %v22758_v4, %v2250_v49 }
 0x329   :  { %v16521_v0 = vpack.c.bf16 %v22765_v36, %v18509_v53  ;;  %v22432_v34 = vmax.f32 %v18682_v5, 0.0  ;;  %v1869_v27 = vadd.f32 %v18066_v22, %v1769_v45  ;;  %v22769_v45 = vld [vmem:[#allocation15_spill] sm:$0xff]  ;;  %v22776_v1 = vmax.f32 %v18592_v9, 0.0 }
 0x32a   :  { %22759 = vst [vmem:[#allocation8_spill] sm:$0xff] %v18678_v13  ;;  %16519 = vmatmul.mubr.msk.bf16.vlgmr.msra.gmra.mrb[152].mxu0 %vm18152_vm9, %v16518_v32  ;;  %v18701_v32 = vmax.f32 %v1858_v21, 0.0  ;;  %v18707_v50 = vadd.f32 %v18066_v22, %v1772_v57  ;;  %v1778_v57 = vmul.f32 %v22733_v55, %v22769_v45  ;;  %v18732_v8 = vmax.f32 %v1864_v63, 0.0 }
 0x32b   :  { %16522 = vmatprep.mubr.msk.bf16.mxu0 %vm18161_vm10, %v16521_v0  ;;  %14258 = vmatpush3.bf16.msra.mxu0 %v18452_v54  ;;  %v3238_v0 = vshrl.u32 %v18674_v31, 16  ;;  %v18718_v53 = vsel %vm18104_vm6, %v22432_v34, 0.0  ;;  %v22768_v54 = vld [vmem:[#allocation14_spill] sm:$0xff]  ;;  %v18729_v36 = vmax.f32 %v1869_v27, 0.0  ;;  %v22771_v27 = vld [vmem:[#allocation65_spill] sm:$0xff]  ;;  %vm22778_vm6 = vnez %v22694_v16 }
 0x32c   :  { %14259 = vmatprep.subr.bf16.mxu0 %v16156_v51  ;;  %22767 = vst [vmem:[#allocation23_spill] sm:$0xff] %v18718_v53  ;;  %2184 = vst [vmem:[#allocation2 + $0xe8] sm:$0xff] %v18701_v32  ;;  %v1775_v21 = vmul.f32 %v22733_v55, %v22768_v54  ;;  %v22435_v41 = vmax.f32 %v18707_v50, 0.0  ;;  %v18736_v47 = vadd.f32 %v18066_v22, %v1778_v57  ;;  %v16153_v54 = vld [vmem:[%s22287_s4 + $0x88] sm:$0xff]  }
 0x32d   :  { %2187 = vst [vmem:[#allocation2 + $0x100] sm:$0xff] %v18718_v53  ;;  %2195 = vst [vmem:[#allocation2 + $0x140] sm:$0xff] %v18729_v36  ;;  %v1770_v63 = vmul.f32 %v17924_v40, %v22771_v27  ;;  %v18876_v16 = vld [vmem:[%s22287_s4 + $0x68] sm:$0xff]  }
 0x32e   :  { %v1875_v34 = vadd.f32 %v18066_v22, %v1775_v21  ;;  %v2096_v49 = vsel %vm22770_vm3, %v22435_v41, 0.0  ;;  %2190 = vst [vmem:[#allocation2 + $0x118] sm:$0xff] %v18732_v8  ;;  %v22443_v57 = vmax.f32 %v18736_v47, 0.0  ;;  %v22773_v41 = vld [vmem:[#allocation67_spill] sm:$0xff] }
 0x32f   :  { %14260 = vmatpush3.bf16.msra.mxu0 %v16156_v51  ;;  %v22772_v51 = vmax.f32 %v18531_v52, 0.0  ;;  %2198 = vst [vmem:[#allocation2 + $0x158] sm:$0xff] %v2096_v49  ;;  %v1773_v53 = vmul.f32 %v17924_v40, %v22773_v41  ;;  %v22774_v52 = vmax.f32 %v18535_v18, 0.0  ;;  %v16160_v41 = vld [vmem:[%s22287_s4 + $0x58] sm:$0xff]   ;;  %v22777_v18 = vmax.f32 %v18629_v30, 0.0  ;;  %v18795_v30 = vld [vmem:[#allocation2 + $0x128] sm:$0xff] }
 0x330   :  { %14261 = vmatprep.subr.bf16.mxu0 %v16158_v15  ;;  %v18754_v45 = vmax.f32 %v1875_v34, 0.0  ;;  %v16530_v34 = vpack.c.bf16 %v22776_v1, %v18594_v6  ;;  %v2102_v9 = vsel %vm18177_vm11, %v22443_v57, 0.0  ;;  %v1870_v28 = vadd.f32 %v22736_v33, %v1770_v63  ;;  %v22781_v1 = vld [vmem:[#allocation43_spill] sm:$0xff] }
 0x331   :  { %v16524_v21 = vpack.c.bf16 %v22772_v51, %v18569_v46  ;;  %v16527_v51 = vpack.c.bf16 %v22774_v52, %v18572_v26  ;;  %v16533_v26 = vpack.c.bf16 %v22777_v18, %v18639_v29  ;;  %v16154_v29 = vld [vmem:[%s22287_s4 + $0x90] sm:$0xff]   ;;  %2204 = vst [vmem:[#allocation2 + $0x188] sm:$0xff] %v2102_v9  ;;  %v1776_v63 = vmul.f32 %v17924_v40, %v22781_v1  ;;  %v22785_v1 = vld [vmem:[#allocation22_spill] sm:$0xff] }
 0x332   :  { %2201 = vst [vmem:[#allocation2 + $0x170] sm:$0xff] %v18754_v45  ;;  %v18789_v6 = vpack.c.bf16 %v18754_v45, %v2096_v49 }
 0x333   :  { %16525 = vmatmul.mubr.msk.bf16.vlgmr.msra.gmra.mrb[44].mxu1 %vm18152_vm9, %v16524_v21  ;;  %vm22775_vm9 = vnez %v22691_v35  ;;  %v18775_v21 = vrot.slane %v3238_v0, 3  ;;  %v22779_v0 = vld [vmem:[#allocation16_spill] sm:$0xff]  ;;  %14262 = vmatpush3.bf16.msra.mxu0 %v16158_v15  ;;  %v1876_v27 = vadd.f32 %v22736_v33, %v1776_v63  ;;  %v1790_v63 = vmul.f32 %v22733_v55, %v22785_v1 }
 0x334   :  { %16528 = vmatmul.mubr.msk.bf16.gmra.mrb[156].mxu0 %vm22775_vm9, %v16527_v51  ;;  %16531 = vmatprep.mubr.msk.bf16.mxu1 %vm18161_vm10, %v16530_v34  ;;  %v1781_v52 = vmul.f32 %v22733_v55, %v22779_v0  ;;  %v22780_v51 = vld [vmem:[#allocation18_spill] sm:$0xff]  ;;  %v18810_v34 = vmax.f32 %v1870_v28, 0.0  ;;  %v22782_v0 = vld [vmem:[#allocation44_spill] sm:$0xff]  ;;  %v22787_v1 = vmax.f32 %v18682_v5, 0.0  ;;  %vm22805_vm10 = vnez %v22722_v10 }
 0x335   :  { %14346 = vmatpush3.bf16.msra.mxu1 %v18498_v39  ;;  %16534 = vmatprep.mubr.msk.bf16.mxu0 %vm22778_vm6, %v16533_v26  ;;  %v18793_v39 = vadd.f32 %v22736_v33, %v1773_v53  ;;  %v1784_v49 = vmul.f32 %v22733_v55, %v22780_v51  ;;  %v18808_v53 = vpack.c.bf16 %v18486_v24, %v22758_v4  ;;  %v22784_v15 = vld [vmem:[#allocation20_spill] sm:$0xff] }
 0x336   :  { %14347 = vmatprep.subr.bf16.mxu1 %v16153_v54  ;;  %v1881_v26 = vadd.f32 %v18066_v22, %v1781_v52  ;;  %v1779_v51 = vmul.f32 %v17924_v40, %v22782_v0  ;;  %14263 = vmatprep.subr.bf16.mxu0 %v16160_v41  ;;  %v2449_v24 = vpack.c.bf16 %v18795_v30, %v18662_v19  ;;  %v16157_v19 = vld [vmem:[%s22287_s4 + $0x98] sm:$0xff]   ;;  %v16161_v0 = vld [vmem:[%s22287_s4 + $0x60] sm:$0xff]  }
 0x337   :  { %v22442_v18 = vmax.f32 %v18793_v39, 0.0  ;;  %v18815_v13 = vadd.f32 %v18066_v22, %v1784_v49  ;;  %2196 = vst [vmem:[#allocation2 + $0x148] sm:$0xff] %v18810_v34  ;;  %v1787_v28 = vmul.f32 %v22733_v55, %v22784_v15  ;;  %v3255_v15 = vshrl.u32 %v18525_v60, 16  ;;  %14264 = vmatpush3.bf16.msra.mxu0 %v16160_v41 }
 0x338   :  { %v18832_v52 = vmax.f32 %v1881_v26, 0.0  ;;  %v18839_v49 = vadd.f32 %v22736_v33, %v1779_v51  ;;  %v3258_v26 = vshll.u32 %v18525_v60, 16  ;;  %v18853_v51 = vmax.f32 %v1876_v27, 0.0  ;;  %14265 = vmatprep.subr.bf16.mxu0 %v16161_v0 }
 0x339   :  { %14348 = vmatpush3.bf16.msra.mxu1 %v16153_v54  ;;  %v18826_v4 = vsel %vm22770_vm3, %v22442_v18, 0.0  ;;  %v22786_v18 = vmax.f32 %v18633_v42, 0.0  ;;  %v1887_v3 = vadd.f32 %v18066_v22, %v1787_v28  ;;  %v16539_v54 = vpack.c.bf16 %v22787_v1, %v18701_v32  ;;  %v22794_v1 = vld [vmem:[#allocation45_spill] sm:$0xff] }
 0x33a   :  { %22783 = vst [vmem:[#allocation21_spill] sm:$0xff] %v18826_v4  ;;  %14349 = vmatprep.subr.bf16.mxu1 %v16154_v29  ;;  %2199 = vst [vmem:[#allocation2 + $0x160] sm:$0xff] %v18826_v4  ;;  %v22788_v60 = vmax.f32 %v18815_v13, 0.0  ;;  %v18867_v35 = vpack.c.bf16 %v18832_v52, %v2102_v9  ;;  %v18871_v27 = vadd.f32 %v18066_v22, %v1790_v63  ;;  %v22790_v41 = vmax.f32 %v18707_v50, 0.0  ;;  %v18892_v63 = vld [vmem:[#allocation2 + $0x130] sm:$0xff]  ;;  %v22803_v4 = vld [vmem:[#allocation30_spill] sm:$0xff] }
 0x33b   :  { %v16536_v57 = vpack.c.bf16 %v22786_v18, %v18642_v56  ;;  %2207 = vst [vmem:[#allocation2 + $0x1a0] sm:$0xff] %v18832_v52  ;;  %2202 = vst [vmem:[#allocation2 + $0x178] sm:$0xff] %v18853_v51  ;;  %v18885_v9 = vmax.f32 %v1887_v3, 0.0  ;;  %v1782_v3 = vmul.f32 %v17924_v40, %v22794_v1  ;;  %14266 = vmatpush3.bf16.msra.mxu0 %v16161_v0  ;;  %v22799_v0 = vld [vmem:[#allocation26_spill] sm:$0xff] }
 0x33c   :  { %14238 = vmatmul.mubr.bf16.gmra.mrb[160].mxu0 %v2449_v24  ;;  %v2108_v42 = vsel %vm18201_vm12, %v22788_v60, 0.0  ;;  %22789 = vst [vmem:[#allocation59_spill] sm:$0xff] %v18867_v35  ;;  %v16542_v18 = vpack.c.bf16 %v22790_v41, %v18729_v36  ;;  %v22792_v24 = vshll.u32 %v18674_v31, 16  ;;  %v16159_v31 = vld [vmem:[%s22287_s4 + $0xa0] sm:$0xff]   ;;  %v18906_v60 = vrot.slane %v3255_v15, 3  ;;  %14267 = vmatprep.subr.bf16.mxu0 %v18876_v16 }
 0x33d   :  { %16537 = vmatmul.mubr.msk.bf16.gmra.mrb[48].mxu1 %vm22775_vm9, %v16536_v57  ;;  %v22444_v57 = vmax.f32 %v18839_v49, 0.0  ;;  %2210 = vst [vmem:[#allocation2 + $0x1b8] sm:$0xff] %v2108_v42  ;;  %v18908_v41 = vrot.slane %v3258_v26, 4  ;;  %2213 = vst [vmem:[#allocation2 + $0x1d0] sm:$0xff] %v18885_v9  ;;  %v18919_v1 = vpack.c.bf16 %v18885_v9, %v2108_v42  ;;  %v22797_v26 = vld [vmem:[#allocation46_spill] sm:$0xff]  ;;  %v1882_v5 = vadd.f32 %v22736_v33, %v1782_v3 }
 0x33e   :  { %16540 = vmatprep.mubr.msk.bf16.mxu1 %vm22778_vm6, %v16539_v54  ;;  %vm22791_vm6 = vnez %v22710_v23  ;;  %14350 = vmatpush3.bf16.msra.mxu1 %v16154_v29  ;;  %v18889_v28 = vrot.slane %v22792_v24, 4  ;;  %v22447_v29 = vmax.f32 %v18871_v27, 0.0  ;;  %v1785_v54 = vmul.f32 %v17924_v40, %v22797_v26  ;;  %v22800_v26 = vld [vmem:[#allocation47_spill] sm:$0xff] }
 0x33f   :  { %16543 = vmatprep.mubr.msk.bf16.mxu0 %vm22791_vm6, %v16542_v18  ;;  %14351 = vmatprep.subr.bf16.mxu1 %v16157_v19  ;;  %v18898_v50 = vsel %vm18177_vm11, %v22444_v57, 0.0  ;;  %v18910_v18 = vld [vmem:[#allocation2] sm:$0xff]  ;;  %22796 = vst [vmem:[#allocation10_spill] sm:$0xff] %v18919_v1  ;;  %v2450_v42 = vpack.c.bf16 %v18892_v63, %v18732_v8  ;;  %v1796_v14 = vmul.f32 %v22733_v55, %v22799_v0  ;;  %v18938_v59 = vmax.f32 %v1882_v5, 0.0  ;;  %v22801_v0 = vld [vmem:[#allocation48_spill] sm:$0xff] }
 0x340   :  { %22793 = vst [vmem:[#allocation60_spill] sm:$0xff] %v18898_v50  ;;  %22795 = vst [vmem:[#allocation9_spill] sm:$0xff] %v18910_v18  ;;  %v18914_v24 = vpack.c.bf16 %v18569_v46, %v18910_v18  ;;  %v2114_v15 = vsel %vm18258_vm15, %v22447_v29, 0.0  ;;  %v22798_v46 = vld [vmem:[#allocation24_spill] sm:$0xff]  ;;  %v18936_v29 = vadd.f32 %v22736_v33, %v1785_v54  ;;  %v16162_v18 = vld [vmem:[%s22287_s4 + $0xa8] sm:$0xff]   ;;  %v1791_v54 = vmul.f32 %v17924_v40, %v22801_v0 }
 0x341   :  { %2205 = vst [vmem:[#allocation2 + $0x190] sm:$0xff] %v18898_v50  ;;  %v1793_v57 = vmul.f32 %v22733_v55, %v22798_v46  ;;  %2216 = vst [vmem:[#allocation2 + $0x1e8] sm:$0xff] %v2114_v15  ;;  %v1788_v46 = vmul.f32 %v17924_v40, %v22800_v26  ;;  %v22802_v50 = vld [vmem:[#allocation28_spill] sm:$0xff]  ;;  %v16164_v26 = vld [vmem:[%s22287_s4 + $0x70] sm:$0xff]   ;;  %v22806_v0 = vmax.f32 %v18793_v39, 0.0  ;;  %vm22808_vm9 = vnez %v22724_v48  ;;  %14268 = vmatpush3.bf16.msra.mxu0 %v18876_v16 }
 0x342   :  { %14352 = vmatpush3.bf16.msra.mxu1 %v16157_v19  ;;  %v18947_v19 = vadd.f32 %v18066_v22, %v1796_v14  ;;  %v1799_v5 = vmul.f32 %v22733_v55, %v22802_v50  ;;  %2208 = vst [vmem:[#allocation2 + $0x1a8] sm:$0xff] %v18938_v59  ;;  %v18979_v23 = vadd.f32 %v22736_v33, %v1791_v54  ;;  %v22814_v10 = vmax.f32 %v18871_v27, 0.0 }
 0x343   :  { %v1893_v3 = vadd.f32 %v18066_v22, %v1793_v57  ;;  %14353 = vmatprep.subr.bf16.mxu1 %v16159_v31  ;;  %v1802_v57 = vmul.f32 %v22733_v55, %v22803_v4  ;;  %v16548_v50 = vpack.c.bf16 %v22806_v0, %v18810_v34  ;;  %v1969_v4 = vmax.f32 %v18936_v29, 0.0  ;;  %14269 = vmatprep.subr.bf16.mxu0 %v16164_v26  ;;  %v22809_v0 = vld [vmem:[#allocation49_spill] sm:$0xff] }
 0x344   :  { %v1888_v1 = vadd.f32 %v22736_v33, %v1788_v46  ;;  %v1980_v39 = vmax.f32 %v18947_v19, 0.0  ;;  %v1899_v29 = vadd.f32 %v18066_v22, %v1799_v5  ;;  %v3806_v46 = vshrl.u32 %v18607_v43, 16 }
 0x345   :  { %14326 = vmatmul.mubr.bf16.gmra.mrb[52].mxu1 %v2450_v42  ;;  %v22804_v42 = vmax.f32 %v18736_v47, 0.0  ;;  %v1977_v35 = vmax.f32 %v1893_v3, 0.0  ;;  %v22807_v47 = vmax.f32 %v18815_v13, 0.0  ;;  %v18989_v13 = vsel %vm18201_vm12, %v1969_v4, 0.0  ;;  %14270 = vmatpush3.bf16.msra.mxu0 %v16164_v26 }
 0x346   :  { %16549 = vmatprep.mubr.msk.bf16.mxu1 %vm22791_vm6, %v16548_v50  ;;  %14354 = vmatpush3.bf16.msra.mxu1 %v16159_v31  ;;  %v3809_v31 = vshll.u32 %v18607_v43, 16  ;;  %2211 = vst [vmem:[#allocation2 + $0x1c0] sm:$0xff] %v18989_v13  ;;  %v2120_v19 = vsel %vm18277_vm0, %v1980_v39, 0.0  ;;  %v18998_v54 = vmax.f32 %v1888_v1, 0.0  ;;  %v22456_v5 = vmax.f32 %v18979_v23, 0.0 }
 0x347   :  { %v16545_v14 = vpack.c.bf16 %v22804_v42, %v18754_v45  ;;  %v16551_v45 = vpack.c.bf16 %v22807_v47, %v18832_v52  ;;  %v18983_v42 = vadd.f32 %v18066_v22, %v1802_v57  ;;  %2219 = vst [vmem:[#allocation2 + $0x200] sm:$0xff] %v1977_v35  ;;  %v18991_v52 = vpack.c.bf16 %v1977_v35, %v2114_v15  ;;  %v16165_v15 = vld [vmem:[%s22287_s4 + $0xb0] sm:$0xff]   ;;  %v16166_v57 = vld [vmem:[%s22287_s4 + $0x78] sm:$0xff]  }
 0x348   :  { %14355 = vmatprep.subr.bf16.mxu1 %v16162_v18  ;;  %2222 = vst [vmem:[#allocation2 + $0x218] sm:$0xff] %v2120_v19  ;;  %v19006_v43 = vmax.f32 %v1899_v29, 0.0  ;;  %v19012_v1 = vsel %vm18258_vm15, %v22456_v5, 0.0  ;;  %2214 = vst [vmem:[#allocation2 + $0x1d8] sm:$0xff] %v18998_v54  ;;  %v1794_v50 = vmul.f32 %v17924_v40, %v22809_v0  ;;  %v19018_v47 = vrot.slane %v3806_v46, 3  ;;  %v22810_v29 = vld [vmem:[#allocation50_spill] sm:$0xff]  ;;  %14271 = vmatprep.subr.bf16.mxu0 %v16166_v57 }
 0x349   :  { %16546 = vmatmul.mubr.msk.bf16.gmra.mrb[164].mxu0 %vm22805_vm10, %v16545_v14  ;;  %v1986_v14 = vmax.f32 %v18983_v42, 0.0  ;;  %2217 = vst [vmem:[#allocation2 + $0x1f0] sm:$0xff] %v19012_v1  ;;  %v1797_v16 = vmul.f32 %v17924_v40, %v22810_v29  ;;  %v19033_v46 = vrot.slane %v3809_v31, 4  ;;  %v22811_v0 = vmax.f32 %v18839_v49, 0.0  ;;  %v22813_v29 = vld [vmem:[#allocation32_spill] sm:$0xff]  ;;  %v22824_v42 = vld [vmem:[#allocation54_spill] sm:$0xff] }
 0x34a   :  { %16552 = vmatprep.mubr.msk.bf16.mxu0 %vm22808_vm9, %v16551_v45  ;;  %14356 = vmatpush3.bf16.msra.mxu1 %v16162_v18  ;;  %2225 = vst [vmem:[#allocation2 + $0x230] sm:$0xff] %v19006_v43  ;;  %v19023_v45 = vpack.c.bf16 %v19006_v43, %v2120_v19  ;;  %v16167_v18 = vld [vmem:[%s22287_s4 + $0xb8] sm:$0xff]   ;;  %vm22812_vm6 = vnez %v22705_v7  ;;  %v1894_v19 = vadd.f32 %v22736_v33, %v1794_v50  ;;  %v22831_v7 = vld [vmem:[#allocation23_spill] sm:$0xff] }
 0x34b   :  { %v16554_v3 = vpack.c.bf16 %v22811_v0, %v18853_v51  ;;  %v2126_v26 = vsel %vm22812_vm6, %v1986_v14, 0.0  ;;  %v1805_v5 = vmul.f32 %v22733_v55, %v22813_v29  ;;  %14357 = vmatprep.subr.bf16.mxu1 %v16165_v15  ;;  %v19050_v49 = vpack.c.bf16 %v18642_v56, %v18626_v37  ;;  %v19064_v37 = vld [vmem:[%s22287_s4 + $0x1c0] sm:$0xff]   ;;  %v22818_v29 = vld [vmem:[#allocation51_spill] sm:$0xff]  ;;  %v22820_v31 = vld [vmem:[#allocation36_spill] sm:$0xff]  ;;  %14272 = vmatpush3.bf16.msra.mxu0 %v16166_v57 }
 0x34c   :  { %v16560_v0 = vpack.c.bf16 %v1969_v4, %v18938_v59  ;;  %2228 = vst [vmem:[#allocation2 + $0x248] sm:$0xff] %v2126_v26  ;;  %v1897_v50 = vadd.f32 %v22736_v33, %v1797_v16  ;;  %v16563_v56 = vpack.c.bf16 %v1980_v39, %v1977_v35  ;;  %vm22816_vm15 = vnez %v22729_v12  ;;  %v22821_v39 = vld [vmem:[#allocation38_spill] sm:$0xff] }
 0x34d   :  { %16555 = vmatmul.mubr.msk.bf16.gmra.mrb[56].mxu1 %vm22805_vm10, %v16554_v3  ;;  %v16557_v3 = vpack.c.bf16 %v22814_v10, %v18885_v9  ;;  %vm22815_vm10 = vnez %v22727_v20  ;;  %v19068_v27 = vmax.f32 %v1894_v19, 0.0  ;;  %v22817_v9 = vld [vmem:[#allocation34_spill] sm:$0xff]  ;;  %v1905_v48 = vadd.f32 %v18066_v22, %v1805_v5  ;;  %v19084_v5 = vld [vmem:[%s22287_s4 + $0x180] sm:$0xff]   ;;  %14433 = vmatprep.subr.bf16.mxu0 %v19064_v37 }
 0x34e   :  { %16561 = vmatprep.mubr.msk.bf16.mxu1 %vm22808_vm9, %v16560_v0  ;;  %v1808_v4 = vmul.f32 %v22733_v55, %v22817_v9  ;;  %v1800_v10 = vmul.f32 %v17924_v40, %v22818_v29  ;;  %14358 = vmatpush3.bf16.msra.mxu1 %v16165_v15  ;;  %v1981_v16 = vmax.f32 %v1897_v50, 0.0  ;;  %v1811_v35 = vmul.f32 %v22733_v55, %v22820_v31 }
 0x34f   :  { %v1814_v19 = vmul.f32 %v22733_v55, %v22821_v39  ;;  %14359 = vmatprep.subr.bf16.mxu1 %v16167_v18  ;;  %2220 = vst [vmem:[#allocation2 + $0x208] sm:$0xff] %v19068_v27  ;;  %v1989_v50 = vmax.f32 %v1905_v48, 0.0 }
 0x350   :  { %v1908_v15 = vadd.f32 %v18066_v22, %v1808_v4  ;;  %v1900_v9 = vadd.f32 %v22736_v33, %v1800_v10  ;;  %v19092_v31 = vsel %vm18277_vm0, %v1981_v16, 0.0 }
 0x351   :  { %16558 = vmatmul.mubr.msk.bf16.gmra.mrb[168].mxu0 %vm22815_vm10, %v16557_v3  ;;  %v22819_v3 = vld [vmem:[#allocation52_spill] sm:$0xff]  ;;  %v19097_v39 = vadd.f32 %v18066_v22, %v1814_v19  ;;  %2223 = vst [vmem:[#allocation2 + $0x220] sm:$0xff] %v19092_v31  ;;  %2231 = vst [vmem:[#allocation2 + $0x260] sm:$0xff] %v1989_v50  ;;  %v19102_v57 = vpack.c.bf16 %v1989_v50, %v2126_v26  ;;  %v19110_v19 = vpack.c.bf16 %v18701_v32, %v18658_v17  ;;  %v22823_v32 = vld [vmem:[#allocation53_spill] sm:$0xff] }
 0x352   :  { %16564 = vmatprep.mubr.msk.bf16.mxu0 %vm22816_vm15, %v16563_v56  ;;  %v1803_v0 = vmul.f32 %v17924_v40, %v22819_v3  ;;  %v1911_v3 = vadd.f32 %v18066_v22, %v1811_v35  ;;  %v1992_v4 = vmax.f32 %v1908_v15, 0.0  ;;  %14360 = vmatpush3.bf16.msra.mxu1 %v16167_v18  ;;  %v19104_v48 = vmax.f32 %v1900_v9, 0.0 }
 0x353   :  { %14389 = vmatprep.subr.bf16.mxu1 %v19084_v5  ;;  %v22822_v56 = vmax.f32 %v18979_v23, 0.0  ;;  %v1998_v26 = vmax.f32 %v19097_v39, 0.0  ;;  %v16569_v9 = vpack.c.bf16 %v1986_v14, %v19006_v43  ;;  %v16572_v17 = vpack.c.bf16 %v1981_v16, %v19068_v27  ;;  %v22825_v14 = vld [vmem:[#allocation8_spill] sm:$0xff] }
 0x354   :  { %v1903_v29 = vadd.f32 %v22736_v33, %v1803_v0  ;;  %v1995_v0 = vmax.f32 %v1911_v3, 0.0  ;;  %v2132_v18 = vsel %vm18338_vm13, %v1992_v4, 0.0  ;;  %2226 = vst [vmem:[#allocation2 + $0x238] sm:$0xff] %v19104_v48  ;;  %v1806_v23 = vmul.f32 %v17924_v40, %v22823_v32 }
 0x355   :  { %v16566_v15 = vpack.c.bf16 %v22822_v56, %v18998_v54  ;;  %2234 = vst [vmem:[#allocation2 + $0x278] sm:$0xff] %v2132_v18  ;;  %v1809_v43 = vmul.f32 %v17924_v40, %v22824_v42  ;;  %v2138_v16 = vsel %vm18376_vm5, %v1998_v26, 0.0  ;;  %v22827_v3 = vshrl.u32 %v18808_v53, 16  ;;  %v22832_v56 = vld [vmem:[#allocation56_spill] sm:$0xff] }
 0x356   :  { %v1987_v10 = vmax.f32 %v1903_v29, 0.0  ;;  %2237 = vst [vmem:[#allocation2 + $0x290] sm:$0xff] %v1995_v0  ;;  %v19141_v29 = vpack.c.bf16 %v1995_v0, %v2132_v18  ;;  %2240 = vst [vmem:[#allocation2 + $0x2a8] sm:$0xff] %v2138_v16  ;;  %v1906_v32 = vadd.f32 %v22736_v33, %v1806_v23  ;;  %v19154_v18 = vpack.c.bf16 %v18729_v36, %v18795_v30  ;;  %v22830_v23 = vld [vmem:[#allocation55_spill] sm:$0xff] }
 0x357   :  { %16567 = vmatmul.mubr.msk.bf16.gmra.mrb[60].mxu1 %vm22815_vm10, %v16566_v15  ;;  %v3248_v39 = vrot.slane %v22827_v3, 3  ;;  %v3285_v15 = vshll.u32 %v22825_v14, 16  ;;  %v1909_v42 = vadd.f32 %v22736_v33, %v1809_v43  ;;  %v3244_v3 = vor.u32 %v18889_v28, %v18775_v21 }
 0x358   :  { %16573 = vmatprep.mubr.msk.bf16.mxu1 %vm22816_vm15, %v16572_v17  ;;  %v19130_v20 = vsel %vm22812_vm6, %v1987_v10, 0.0  ;;  %v22829_v16 = vshll.u32 %v18808_v53, 16  ;;  %v1812_v43 = vmul.f32 %v17924_v40, %v22830_v23  ;;  %v19166_v35 = vpack.c.bf16 %v18732_v8, %v22831_v7 }
 0x359   :  { %16570 = vmatmul.mubr.msk.bf16.gmra.mrb[172].mxu0 %vm18540_vm7, %v16569_v9  ;;  %2229 = vst [vmem:[#allocation2 + $0x250] sm:$0xff] %v19130_v20  ;;  %v16575_v9 = vpack.c.bf16 %v1992_v4, %v1989_v50  ;;  %v19158_v50 = vmax.f32 %v1906_v32, 0.0  ;;  %v1993_v4 = vmax.f32 %v1909_v42, 0.0  ;;  %v1815_v36 = vmul.f32 %v17924_v40, %v22832_v56 }
 0x35a   :  { %v3261_v30 = vor.u32 %v18908_v41, %v18906_v60  ;;  %v1912_v28 = vadd.f32 %v22736_v33, %v1812_v43  ;;  %v22833_v32 = vshrl.u32 %v18726_v44, 16  ;;  %v16578_v8 = vpack.c.bf16 %v1987_v10, %v19104_v48 }
 0x35b   :  { %16576 = vmatprep.mubr.msk.bf16.mxu0 %vm18560_vm8, %v16575_v9  ;;  %v3251_v9 = vrot.slane %v22829_v16, 4  ;;  %v19174_v21 = vsel %vm18338_vm13, %v1993_v4, 0.0  ;;  %2232 = vst [vmem:[#allocation2 + $0x268] sm:$0xff] %v19158_v50  ;;  %v1915_v7 = vadd.f32 %v22736_v33, %v1815_v36  ;;  %v22834_v60 = vshll.u32 %v18726_v44, 16 }
 0x35c   :  { %v3791_v42 = vrot.slane %v22833_v32, 3  ;;  %2235 = vst [vmem:[#allocation2 + $0x280] sm:$0xff] %v19174_v21  ;;  %v22835_v56 = vshrl.u32 %v18914_v24, 16  ;;  %v3291_v16 = vshrl.u32 %v19154_v18, 16  ;;  %v16581_v10 = vpack.c.bf16 %v1998_v26, %v1995_v0 }
 0x35d   :  { %v3252_v53 = vor.u32 %v3251_v9, %v3248_v39  ;;  %v3794_v41 = vrot.slane %v22834_v60, 4  ;;  %v19192_v9 = vpack.c.bf16 %v18810_v34, %v18892_v63  ;;  %vm22837_vm15 = vsmask.f32 4352 }
 0x35e   :  { %v3799_v39 = vrot.slane %v22835_v56, 3  ;;  %v19197_v43 = vmax.f32 %v1912_v28, 0.0  ;;  %v16584_v44 = vpack.c.bf16 %v1993_v4, %v19158_v50  ;;  %v1999_v36 = vmax.f32 %v1915_v7, 0.0 }
 0x35f   :  { %16579 = vmatmul.mubr.msk.bf16.gmra.mrb[64].mxu1 %vm18540_vm7, %v16578_v8  ;;  %v3253_v2 = vsel %vm22837_vm15, %v3244_v3, %v3252_v53  ;;  %vm22838_vm7 = vmmov %vm22837_vm15  ;;  %v22839_v34 = vshll.u32 %v18914_v24, 16  ;;  %v22840_v0 = vshrl.u32 %v18585_v61, 16  ;;  %v3294_v8 = vshll.u32 %v19154_v18, 16 }
 0x360   :  { %16585 = vmatprep.mubr.msk.bf16.mxu1 %vm18560_vm8, %v16584_v44  ;;  %v3262_v32 = vsel %vm22838_vm7, %v3252_v53, %v3261_v30  ;;  %v3833_v3 = vshrl.u32 %v19166_v35, 16  ;;  %2238 = vst [vmem:[#allocation2 + $0x298] sm:$0xff] %v19197_v43  ;;  %v22841_v4 = vshll.u32 %v18585_v61, 16  ;;  %v22842_v28 = vshrl.u32 %v18652_v38, 16  ;;  %vm22845_vm8 = vmmov %vm22838_vm7 }
 0x361   :  { %16582 = vmatmul.mubr.msk.bf16.gmra.mrb[176].mxu0 %vm18613_vm1, %v16581_v10  ;;  %v3802_v63 = vrot.slane %v22839_v34, 4  ;;  %v3266_v26 = vrot.slane %v22840_v0, 3  ;;  %v2139_v53 = vsel %vm18376_vm5, %v1999_v36, 0.0  ;;  %v3795_v24 = vor.u32 %v3794_v41, %v3791_v42  ;;  %v22844_v0 = vld [vmem:[#allocation59_spill] sm:$0xff]  ;;  %vm22848_vm9 = vmmov %vm22838_vm7 }
 0x362   :  { %14273 = vmatprep.mubr.bf16.mxu0 %v3253_v2  ;;  %v3269_v17 = vrot.slane %v22841_v4, 4  ;;  %v3275_v7 = vrot.slane %v22842_v28, 3  ;;  %v22843_v56 = vshll.u32 %v18652_v38, 16  ;;  %v3836_v18 = vshll.u32 %v19166_v35, 16  ;;  %2241 = vst [vmem:[#allocation2 + $0x2b0] sm:$0xff] %v2139_v53  ;;  %vm22849_vm10 = vmmov %vm22838_vm7 }
 0x363   :  { %v3803_v60 = vor.u32 %v3802_v63, %v3799_v39  ;;  %v3300_v2 = vshrl.u32 %v18789_v6, 16  ;;  %v3303_v44 = vshll.u32 %v18789_v6, 16  ;;  %v3842_v34 = vshrl.u32 %v19192_v9, 16  ;;  %v16173_v6 = vld [vmem:[%s22287_s4 + $0x1c8] sm:$0xff]  }
 0x364   :  { %v3278_v10 = vrot.slane %v22843_v56, 4  ;;  %v3270_v61 = vor.u32 %v3269_v17, %v3266_v26  ;;  %v3309_v4 = vshrl.u32 %v22844_v0, 16  ;;  %v22846_v42 = vshrl.u32 %v19050_v49, 16 }
 0x365   :  { %v22847_v38 = vshrl.u32 %v22825_v14, 16  ;;  %v3287_v35 = vrot.slane %v3285_v15, 4  ;;  %v16587_v63 = vpack.c.bf16 %v1999_v36, %v19197_v43  ;;  %v3804_v26 = vsel %vm22848_vm9, %v3795_v24, %v3803_v60  ;;  %v22851_v15 = vld [vmem:[#allocation10_spill] sm:$0xff] }
 0x366   :  { %v3279_v28 = vor.u32 %v3278_v10, %v3275_v7  ;;  %v3271_v12 = vsel %vm22845_vm8, %v3261_v30, %v3270_v61  ;;  %v3817_v41 = vrot.slane %v22846_v42, 3  ;;  %v22850_v17 = vshll.u32 %v19050_v49, 16 }
 0x367   :  { %v3284_v39 = vrot.slane %v22847_v38, 3  ;;  %16588 = vmatmul.mubr.msk.bf16.gmra.mrb[68].mxu1 %vm18613_vm1, %v16587_v63  ;;  %v3293_v53 = vrot.slane %v3291_v16, 3  ;;  %v3312_v14 = vshll.u32 %v22844_v0, 16  ;;  %v3318_v56 = vshrl.u32 %v22851_v15, 16  ;;  %vm22852_vm1 = vmmov %vm22838_vm7 }
 0x368   :  { %v3280_v30 = vsel %vm22849_vm10, %v3270_v61, %v3279_v28  ;;  %v3820_v7 = vrot.slane %v22850_v17, 4  ;;  %14361 = vmatprep.mubr.bf16.mxu1 %v3804_v26  ;;  %v3296_v42 = vrot.slane %v3294_v8, 4  ;;  %v3321_v36 = vshll.u32 %v22851_v15, 16  ;;  %v16174_v8 = vld [vmem:[%s22287_s4 + $0x1d0] sm:$0xff]   ;;  %vm22853_vm15 = vmmov %vm22852_vm1 }
 0x369   :  { %14274 = vmatmul.mubr.bf16.vlgmr.msra.gmra.mrb[152].mxu0 %v3262_v32  ;;  %v3288_v10 = vor.u32 %v3287_v35, %v3284_v39  ;;  %v3812_v23 = vor.u32 %v19033_v46, %v19018_v47  ;;  %v3302_v24 = vrot.slane %v3300_v2, 3  ;;  %v3305_v61 = vrot.slane %v3303_v44, 4  ;;  %vm22854_vm7 = vmmov %vm22852_vm1 }
 0x36a   :  { %14277 = vmatprep.mubr.bf16.mxu0 %v3271_v12  ;;  %14434 = vmatpush3.bf16.msra.mxu0 %v19064_v37  ;;  %v3327_v49 = vshrl.u32 %v18991_v52, 16  ;;  %v3330_v16 = vshll.u32 %v18991_v52, 16  ;;  %v3297_v32 = vor.u32 %v3296_v42, %v3293_v53  ;;  %v3336_v12 = vshrl.u32 %v19023_v45, 16  ;;  %vm22856_vm8 = vmmov %vm22852_vm1 }
 0x36b   :  { %v3289_v0 = vsel %vm22852_vm1, %v3279_v28, %v3288_v10  ;;  %14435 = vmatprep.subr.bf16.mxu0 %v16173_v6  ;;  %v3821_v38 = vor.u32 %v3820_v7, %v3817_v41  ;;  %v3306_v47 = vor.u32 %v3305_v61, %v3302_v24  ;;  %v3311_v46 = vrot.slane %v3309_v4, 3  ;;  %vm22858_vm9 = vmmov %vm22852_vm1 }
 0x36c   :  { %v3339_v2 = vshll.u32 %v19023_v45, 16  ;;  %v3345_v37 = vshrl.u32 %v19102_v57, 16  ;;  %v19254_v44 = vsel %vm22853_vm15, %v3288_v10, %v3297_v32  ;;  %v3314_v52 = vrot.slane %v3312_v14, 4  ;;  %v16169_v45 = vld [vmem:[%s22287_s4 + $0x188] sm:$0xff]   ;;  %vm22860_vm10 = vmmov %vm22852_vm1 }
 0x36d   :  { %v3813_v28 = vsel %vm22854_vm7, %v3803_v60, %v3812_v23  ;;  %v22855_v39 = vshrl.u32 %v19110_v19, 16  ;;  %v19260_v63 = vsel %vm22856_vm8, %v3297_v32, %v3306_v47  ;;  %v3320_v26 = vrot.slane %v3318_v56, 3  ;;  %v22859_v56 = vld [vmem:[#allocation21_spill] sm:$0xff]  ;;  %vm22861_vm15 = vmmov %vm22852_vm1 }
 0x36e   :  { %14436 = vmatpush3.bf16.msra.mxu0 %v16173_v6  ;;  %v22857_v4 = vshll.u32 %v19110_v19, 16  ;;  %v3835_v17 = vrot.slane %v3833_v3, 3  ;;  %v3315_v7 = vor.u32 %v3314_v52, %v3311_v46  ;;  %v3323_v53 = vrot.slane %v3321_v36, 4  ;;  %v16176_v6 = vld [vmem:[%s22287_s4 + $0x1d8] sm:$0xff]   ;;  %vm22863_vm7 = vmmov %vm22852_vm1 }
 0x36f   :  { %v3826_v35 = vrot.slane %v22855_v39, 3  ;;  %14437 = vmatprep.subr.bf16.mxu0 %v16174_v8  ;;  %14362 = vmatmul.mubr.bf16.vlgmr.msra.gmra.mrb[44].mxu1 %v3813_v28  ;;  %v3822_v60 = vsel %vm22858_vm9, %v3812_v23, %v3821_v38  ;;  %v3838_v14 = vrot.slane %v3836_v18, 4  ;;  %v3329_v15 = vrot.slane %v3327_v49, 3  ;;  %v22862_v28 = vld [vmem:[#allocation60_spill] sm:$0xff]  ;;  %vm22864_vm8 = vmmov %vm22852_vm1 }
 0x370   :  { %v3829_v41 = vrot.slane %v22857_v4, 4  ;;  %v3332_v10 = vrot.slane %v3330_v16, 4  ;;  %v2358_v42 = vpack.c.bf16 %v18853_v51, %v22859_v56  ;;  %v3348_v19 = vshll.u32 %v19102_v57, 16  ;;  %14365 = vmatprep.mubr.bf16.mxu1 %v3822_v60  ;;  %14390 = vmatpush3.bf16.msra.mxu1 %v19084_v5  ;;  %v16170_v57 = vld [vmem:[%s22287_s4 + $0x190] sm:$0xff]   ;;  %v16172_v4 = vld [vmem:[%s22287_s4 + $0x198] sm:$0xff]   ;;  %vm22865_vm9 = vmmov %vm22852_vm1 }
 0x371   :  { %14278 = vmatmul.mubr.bf16.gmra.mrb[156].mxu0 %v3280_v30  ;;  %v19275_v3 = vsel %vm22860_vm10, %v3306_v47, %v3315_v7  ;;  %v3324_v36 = vor.u32 %v3323_v53, %v3320_v26  ;;  %v3354_v23 = vshrl.u32 %v19141_v29, 16  ;;  %v3357_v18 = vshll.u32 %v19141_v29, 16  ;;  %14391 = vmatprep.subr.bf16.mxu1 %v16169_v45  ;;  %vm22866_vm10 = vmmov %vm22852_vm1 }
 0x372   :  { %14281 = vmatprep.mubr.bf16.mxu0 %v3289_v0  ;;  %v3333_v24 = vor.u32 %v3332_v10, %v3329_v15  ;;  %v3338_v61 = vrot.slane %v3336_v12, 3  ;;  %v3845_v49 = vshll.u32 %v19192_v9, 16  ;;  %v3830_v51 = vor.u32 %v3829_v41, %v3826_v35  ;;  %14438 = vmatpush3.bf16.msra.mxu0 %v16174_v8  ;;  %v16177_v0 = vld [vmem:[%s22287_s4 + $0x1e0] sm:$0xff]  }
 0x373   :  { %v19285_v30 = vsel %vm22852_vm1, %v3315_v7, %v3324_v36  ;;  %v3341_v16 = vrot.slane %v3339_v2, 4  ;;  %v3839_v32 = vor.u32 %v3838_v14, %v3835_v17  ;;  %14439 = vmatprep.subr.bf16.mxu0 %v16176_v6  ;;  %v3347_v5 = vrot.slane %v3345_v37, 3 }
 0x374   :  { %v19288_v29 = vsel %vm22861_vm15, %v3324_v36, %v3333_v24  ;;  %v3851_v12 = vshrl.u32 %v2358_v42, 16  ;;  %v3854_v47 = vshll.u32 %v2358_v42, 16  ;;  %v3350_v52 = vrot.slane %v3348_v19, 4  ;;  %14392 = vmatpush3.bf16.msra.mxu1 %v16169_v45  ;;  %vm22867_vm15 = vmmov %vm22852_vm1 }
 0x375   :  { %v3342_v46 = vor.u32 %v3341_v16, %v3338_v61  ;;  %v2361_v39 = vpack.c.bf16 %v18938_v59, %v22862_v28  ;;  %v3844_v8 = vrot.slane %v3842_v34, 3  ;;  %v3356_v2 = vrot.slane %v3354_v23, 3  ;;  %14393 = vmatprep.subr.bf16.mxu1 %v16170_v57  ;;  %v16178_v23 = vld [vmem:[%s22287_s4 + $0x1a8] sm:$0xff]   ;;  %v16183_v28 = vld [vmem:[%s22287_s4 + $0x1b8] sm:$0xff]  }
 0x376   :  { %v3359_v35 = vrot.slane %v3357_v18, 4  ;;  %v3831_v26 = vsel %vm22863_vm7, %v3821_v38, %v3830_v51  ;;  %v3847_v37 = vrot.slane %v3845_v49, 4  ;;  %14440 = vmatpush3.bf16.msra.mxu0 %v16176_v6  ;;  %v3351_v17 = vor.u32 %v3350_v52, %v3347_v5  ;;  %v16179_v38 = vld [vmem:[%s22287_s4 + $0x1e8] sm:$0xff]   ;;  %vm22868_vm7 = vmmov %vm22852_vm1 }
 0x377   :  { %v19302_v41 = vsel %vm22864_vm8, %v3333_v24, %v3342_v46  ;;  %v2364_v59 = vpack.c.bf16 %v18998_v54, %v18989_v13  ;;  %14366 = vmatmul.mubr.bf16.gmra.mrb[48].mxu1 %v3831_v26  ;;  %v3840_v9 = vsel %vm22865_vm9, %v3830_v51, %v3839_v32  ;;  %14441 = vmatprep.subr.bf16.mxu0 %v16177_v0  ;;  %v3853_v13 = vrot.slane %v3851_v12, 3  ;;  %v4130_v12 = vld [vmem:[#allocation2 + $0x20] sm:$0xfe]  ;;  %vm22869_vm8 = vmmov %vm22852_vm1 }
 0x378   :  { %v19307_v34 = vor.u32 %v3359_v35, %v3356_v2  ;;  %14369 = vmatprep.mubr.bf16.mxu1 %v3840_v9  ;;  %v19314_v45 = vsel %vm22866_vm10, %v3342_v46, %v3351_v17  ;;  %14394 = vmatpush3.bf16.msra.mxu1 %v16170_v57  ;;  %v3856_v54 = vrot.slane %v3854_v47, 4  ;;  %v3860_v53 = vshrl.u32 %v2361_v39, 16  ;;  %vm22870_vm9 = vmmov %vm22852_vm1 }
 0x379   :  { %14282 = vmatmul.mubr.bf16.gmra.mrb[160].mxu0 %v19254_v44  ;;  %v3863_v60 = vshll.u32 %v2361_v39, 16  ;;  %v3848_v14 = vor.u32 %v3847_v37, %v3844_v8  ;;  %14395 = vmatprep.subr.bf16.mxu1 %v16172_v4  ;;  %v16175_v44 = vld [vmem:[%s22287_s4 + $0x1a0] sm:$0xff]   ;;  %v3869_v15 = vshrl.u32 %v2364_v59, 16  ;;  %v3872_v10 = vshll.u32 %v2364_v59, 16  ;;  %vm22872_vm10 = vmmov %vm22852_vm1 }
 0x37a   :  { %14285 = vmatprep.mubr.bf16.mxu0 %v19260_v63  ;;  %v19319_v7 = vsel %vm22852_vm1, %v3351_v17, %v19307_v34  ;;  %14442 = vmatpush3.bf16.msra.mxu0 %v16177_v0  ;;  %v16180_v63 = vld [vmem:[%s22287_s4 + $0x1f0] sm:$0xff]   ;;  %v3857_v6 = vor.u32 %v3856_v54, %v3853_v13  ;;  %v2367_v56 = vpack.c.bf16 %v19068_v27, %v19012_v1  ;;  %v3862_v19 = vrot.slane %v3860_v53, 3  ;;  %v16182_v1 = vld [vmem:[%s22287_s4 + $0x1f8] sm:$0xff]   ;;  %v19364_v17 = vld [vmem:[#allocation2 + $0x68] sm:$0xff] }
 0x37b   :  { %14443 = vmatprep.subr.bf16.mxu0 %v16179_v38  ;;  %v3849_v42 = vsel %vm22867_vm15, %v3839_v32, %v3848_v14  ;;  %v3865_v36 = vrot.slane %v3863_v60, 4  ;;  %v2370_v18 = vpack.c.bf16 %v19104_v48, %v19092_v31  ;;  %v3871_v61 = vrot.slane %v3869_v15, 3  ;;  %v16181_v31 = vld [vmem:[%s22287_s4 + $0x1b0] sm:$0xff]   ;;  %v4129_v60 = vld [vmem:[#allocation2 + $0x18] sm:$0xfe]  ;;  %vm22873_vm15 = vmmov %vm22852_vm1 }
 0x37c   :  { %14396 = vmatpush3.bf16.msra.mxu1 %v16172_v4  ;;  %v3858_v24 = vsel %vm22868_vm7, %v3848_v14, %v3857_v6  ;;  %v3874_v49 = vrot.slane %v3872_v10, 4  ;;  %v3878_v27 = vshrl.u32 %v2367_v56, 16  ;;  %v3881_v51 = vshll.u32 %v2367_v56, 16  ;;  %v19362_v4 = vld [vmem:[#allocation2 + $0x50] sm:$0xff]  ;;  %vm22874_vm7 = vmmov %vm22852_vm1 }
 0x37d   :  { %14397 = vmatprep.subr.bf16.mxu1 %v16175_v44  ;;  %v3866_v57 = vor.u32 %v3865_v36, %v3862_v19  ;;  %v3887_v48 = vshrl.u32 %v2370_v18, 16  ;;  %v3890_v16 = vshll.u32 %v2370_v18, 16  ;;  %v2373_v5 = vpack.c.bf16 %v19158_v50, %v19130_v20  ;;  %v2334_v54 = vld [vmem:[#allocation2 + $0x2b0] sm:$0x7f] }
 0x37e   :  { %14444 = vmatpush3.bf16.msra.mxu0 %v16179_v38  ;;  %v3875_v32 = vor.u32 %v3874_v49, %v3871_v61  ;;  %v2376_v0 = vpack.c.bf16 %v19197_v43, %v19174_v21  ;;  %v3880_v46 = vrot.slane %v3878_v27, 3  ;;  %v3883_v52 = vrot.slane %v3881_v51, 4  ;;  %v22871_v21 = vld [vmem:[#allocation9_spill] sm:$0xff] }
 0x37f   :  { %14370 = vmatmul.mubr.bf16.gmra.mrb[52].mxu1 %v3849_v42  ;;  %14445 = vmatprep.subr.bf16.mxu0 %v16180_v63  ;;  %v3867_v47 = vsel %vm22869_vm8, %v3857_v6, %v3866_v57  ;;  %v3889_v8 = vrot.slane %v3887_v48, 3  ;;  %v3892_v20 = vrot.slane %v3890_v16, 4  ;;  %v4217_v43 = vpack.c.bf16 %v22871_v21, %v4130_v12  ;;  %v19377_v6 = vld [vmem:[#allocation2 + $0x98] sm:$0xff]  ;;  %v4138_v27 = vld [vmem:[#allocation2 + $0x60] sm:$0xff]  ;;  %v19392_v12 = vld [vmem:[#allocation2 + $0xc8] sm:$0xff] }
 0x380   :  { %14373 = vmatprep.mubr.bf16.mxu1 %v3858_v24  ;;  %14398 = vmatpush3.bf16.msra.mxu1 %v16175_v44  ;;  %v3876_v39 = vsel %vm22870_vm9, %v3866_v57, %v3875_v32  ;;  %v3896_v2 = vshrl.u32 %v2373_v5, 16  ;;  %v3899_v35 = vshll.u32 %v2373_v5, 16  ;;  %v3905_v26 = vshrl.u32 %v2376_v0, 16  ;;  %vm22875_vm9 = vmmov %vm22852_vm1 }
 0x381   :  { %14286 = vmatmul.mubr.bf16.gmra.mrb[164].mxu0 %v19275_v3  ;;  %14399 = vmatprep.subr.bf16.mxu1 %v16178_v23  ;;  %v19347_v3 = vld [vmem:[%s22287_s4 + $0x280] sm:$0xff]   ;;  %v3908_v37 = vshll.u32 %v2376_v0, 16  ;;  %v3884_v59 = vor.u32 %v3883_v52, %v3880_v46  ;;  %v3893_v9 = vor.u32 %v3892_v20, %v3889_v8  ;;  %v19373_v53 = vpack.c.bf16 %v19364_v17, %v19362_v4  ;;  %v19390_v0 = vld [vmem:[#allocation2 + $0xb0] sm:$0xff]  ;;  %v19398_v20 = vld [vmem:[#allocation2 + $0xf8] sm:$0xff] }
 0x382   :  { %14289 = vmatprep.mubr.bf16.mxu0 %v19285_v30  ;;  %14446 = vmatpush3.bf16.msra.mxu0 %v16180_v63  ;;  %v2333_v30 = vld [vmem:[#allocation2 + $0x2a8] sm:$0x7f]  ;;  %v3898_v14 = vrot.slane %v3896_v2, 3  ;;  %v3901_v44 = vrot.slane %v3899_v35, 4  ;;  %v3907_v15 = vrot.slane %v3905_v26, 3  ;;  %v19375_v63 = vld [vmem:[#allocation2 + $0x80] sm:$0xff]  ;;  %v2379_v42 = vpack.c.bf16 %v2334_v54, %v2334_v54 }
 0x383   :  { %14447 = vmatprep.subr.bf16.mxu0 %v16182_v1  ;;  %v2378_v50 = vpack.c.bf16 %v2333_v30, %v2333_v30  ;;  %v3910_v10 = vrot.slane %v3908_v37, 4  ;;  %v3885_v56 = vsel %vm22872_vm10, %v3875_v32, %v3884_v59  ;;  %v3894_v19 = vsel %vm22852_vm1, %v3884_v59, %v3893_v9  ;;  %v4141_v32 = vld [vmem:[#allocation2 + $0x78] sm:$0xff]  ;;  %v19396_v8 = vld [vmem:[#allocation2 + $0xe0] sm:$0xff]  ;;  %vm22876_vm10 = vmmov %vm22852_vm1 }
 0x384   :  { %14400 = vmatpush3.bf16.msra.mxu1 %v16178_v23  ;;  %v4216_v18 = vpack.c.bf16 %v22871_v21, %v4129_v60  ;;  %v4648_v24 = vshrl.u32 %v4217_v43, 16  ;;  %v4655_v49 = vshll.u32 %v19373_v53, 16  ;;  %v4223_v51 = vpack.c.bf16 %v19377_v6, %v19375_v63  ;;  %v4150_v60 = vld [vmem:[#allocation2 + $0xc0] sm:$0xff] }
 0x385   :  { %14401 = vmatprep.subr.bf16.mxu1 %v16181_v31  ;;  %v3363_v38 = vshrl.u32 %v2378_v50, 16  ;;  %v3366_v13 = vshll.u32 %v2378_v50, 16  ;;  %v3902_v57 = vor.u32 %v3901_v44, %v3898_v14  ;;  %v3914_v48 = vshrl.u32 %v2379_v42, 16 }
 0x386   :  { %14448 = vmatpush3.bf16.msra.mxu0 %v16182_v1  ;;  %v4135_v1 = vld [vmem:[#allocation2 + $0x48] sm:$0xff]  ;;  %v3917_v16 = vshll.u32 %v2379_v42, 16  ;;  %v4657_v52 = vrot.slane %v4655_v49, 1  ;;  %vm4278_vm8 = vsmask.f32 7424  ;;  %v4280_v26 = vshrl.u32 %v4216_v18, 16 }
 0x387   :  { %14374 = vmatmul.mubr.bf16.gmra.mrb[56].mxu1 %v3867_v47  ;;  %14565 = vmatprep.subr.bf16.mxu0 %v19347_v3  ;;  %v3365_v36 = vrot.slane %v3363_v38, 3  ;;  %v3368_v23 = vrot.slane %v3366_v13, 4  ;;  %v19388_v5 = vpack.c.bf16 %v4138_v27, %v4135_v1  ;;  %v4144_v47 = vld [vmem:[#allocation2 + $0x90] sm:$0xff]  ;;  %v3916_v50 = vrot.slane %v3914_v48, 3  ;;  %v19420_v1 = vld [vmem:[#allocation2 + $0x140] sm:$0xff]  ;;  %v19422_v27 = vld [vmem:[#allocation2 + $0x158] sm:$0xff] }
 0x388   :  { %14377 = vmatprep.mubr.bf16.mxu1 %v3876_v39  ;;  %14402 = vmatpush3.bf16.msra.mxu1 %v16181_v31  ;;  %v3911_v31 = vor.u32 %v3910_v10, %v3907_v15  ;;  %v3903_v39 = vsel %vm22873_vm15, %v3893_v9, %v3902_v57  ;;  %v3919_v21 = vrot.slane %v3917_v16, 4  ;;  %v4222_v2 = vpack.c.bf16 %v4144_v47, %v4141_v32  ;;  %v4153_v10 = vld [vmem:[#allocation2 + $0xd8] sm:$0xff]  ;;  %v16189_v32 = vld [vmem:[%s22287_s4 + $0x288] sm:$0xff]   ;;  %vm22888_vm15 = vmmov %vm22852_vm1 }
 0x389   :  { %14290 = vmatmul.mubr.bf16.gmra.mrb[168].mxu0 %v19288_v29  ;;  %14403 = vmatprep.subr.bf16.mxu1 %v16183_v28  ;;  %v19369_v29 = vld [vmem:[%s22287_s4 + $0x200] sm:$0xff]   ;;  %v3369_v30 = vor.u32 %v3368_v23, %v3365_v36  ;;  %v4287_v59 = vshll.u32 %v19388_v5, 16  ;;  %v4229_v13 = vpack.c.bf16 %v19398_v20, %v19396_v8  ;;  %v4659_v54 = vshrl.u32 %v19373_v53, 16  ;;  %v19412_v23 = vld [vmem:[#allocation2 + $0x110] sm:$0xff] }
 0x38a   :  { %14293 = vmatprep.mubr.bf16.mxu0 %v19302_v41  ;;  %v4650_v41 = vshll.u32 %v4217_v43, 16  ;;  %v19402_v43 = vpack.c.bf16 %v19392_v12, %v19390_v0  ;;  %v3920_v14 = vor.u32 %v3919_v21, %v3916_v50  ;;  %v4667_v44 = vshrl.u32 %v4223_v51, 16 }
 0x38b   :  { %v3370_v35 = vsel %vm22875_vm9, %v19307_v34, %v3369_v30  ;;  %v4295_v15 = vshll.u32 %v4222_v2, 16  ;;  %v4661_v42 = vor.u32 %v4659_v54, %v4657_v52  ;;  %v4289_v36 = vrot.slane %v4287_v59, 1  ;;  %v4165_v59 = vld [vmem:[#allocation2 + $0x138] sm:$0xff] }
 0x38c   :  { %14404 = vmatpush3.bf16.msra.mxu1 %v16183_v28  ;;  %v4652_v61 = vrot.slane %v4650_v41, 1  ;;  %v4663_v28 = vshll.u32 %v4223_v51, 16  ;;  %v4147_v41 = vld [vmem:[#allocation2 + $0xa8] sm:$0xff]  ;;  %v4671_v34 = vshll.u32 %v19402_v43, 16  ;;  %v4679_v53 = vshll.u32 %v4229_v13, 16 }
 0x38d   :  { %14477 = vmatprep.subr.bf16.mxu1 %v19369_v29  ;;  %v3921_v51 = vsel %vm22876_vm10, %v3911_v31, %v3920_v14  ;;  %v4297_v48 = vrot.slane %v4295_v15, 1  ;;  %v19439_v50 = vpack.c.bf16 %v19422_v27, %v19420_v1  ;;  %v22877_v14 = vld [vmem:[#allocation40_spill] sm:$0xff]  ;;  %vm22901_vm10 = vmmov %vm22852_vm1 }
 0x38e   :  { %v4653_v46 = vor.u32 %v4652_v61, %v4648_v24  ;;  %v4665_v38 = vrot.slane %v4663_v28, 1  ;;  %v19416_v61 = vpack.c.bf16 %v4150_v60, %v4147_v41  ;;  %v4681_v28 = vrot.slane %v4679_v53, 1  ;;  %v19450_v41 = vld [vmem:[#allocation2 + $0x170] sm:$0xff] }
 0x38f   :  { %14378 = vmatmul.mubr.bf16.gmra.mrb[60].mxu1 %v3885_v56  ;;  %v4156_v56 = vld [vmem:[#allocation2 + $0xf0] sm:$0xff] }
 0x390   :  { %14381 = vmatprep.mubr.bf16.mxu1 %v3894_v19  ;;  %v4658_v9 = vsel %vm4278_vm8, %v4653_v46, %v4657_v52  ;;  %v4669_v24 = vor.u32 %v4667_v44, %v4665_v38  ;;  %v19418_v49 = vpack.c.bf16 %v4156_v56, %v4153_v10  ;;  %v4666_v47 = vsel %vm4278_vm8, %v4661_v42, %v4665_v38  ;;  %v4168_v60 = vld [vmem:[#allocation2 + $0x150] sm:$0xff]  ;;  %v19459_v42 = vld [vmem:[#allocation2 + $0x1a0] sm:$0xff] }
 0x391   :  { %14294 = vmatmul.mubr.bf16.gmra.mrb[172].mxu0 %v19314_v45  ;;  %v4282_v45 = vshll.u32 %v4216_v18, 16  ;;  %v19414_v18 = vld [vmem:[#allocation2 + $0x128] sm:$0xff]  ;;  %v4299_v46 = vshrl.u32 %v4222_v2, 16  ;;  %v4303_v52 = vshll.u32 %v19416_v61, 16  ;;  %v4307_v10 = vshrl.u32 %v19416_v61, 16 }
 0x392   :  { %14297 = vmatprep.mubr.bf16.mxu0 %v19319_v7  ;;  %v3912_v7 = vsel %vm22874_vm7, %v3902_v57, %v3911_v31  ;;  %v4673_v57 = vrot.slane %v4671_v34, 1  ;;  %v19427_v16 = vpack.c.bf16 %v19414_v18, %v19412_v23  ;;  %v4695_v34 = vshll.u32 %v19439_v50, 16  ;;  %vm22893_vm7 = vmmov %vm22852_vm1 }
 0x393   :  { %v4284_v37 = vrot.slane %v4282_v45, 1  ;;  %v4291_v45 = vshrl.u32 %v19388_v5, 16  ;;  %v4675_v5 = vshrl.u32 %v19402_v43, 16  ;;  %v4301_v2 = vor.u32 %v4299_v46, %v4297_v48  ;;  %v19452_v43 = vld [vmem:[#allocation2 + $0x188] sm:$0xff] }
 0x394   :  { %v4674_v31 = vsel %vm4278_vm8, %v4669_v24, %v4673_v57  ;;  %v19474_v61 = vpack.c.bf16 %v4168_v60, %v4165_v59  ;;  %v16186_v59 = vld [vmem:[%s22287_s4 + $0x210] sm:$0xff]  }
 0x395   :  { %v4285_v19 = vor.u32 %v4284_v37, %v4280_v26  ;;  %v4293_v21 = vor.u32 %v4291_v45, %v4289_v36  ;;  %v4683_v26 = vshrl.u32 %v4229_v13, 16  ;;  %v4687_v37 = vshll.u32 %v19427_v16, 16  ;;  %v16192_v45 = vld [vmem:[%s22287_s4 + $0x298] sm:$0xff]  }
 0x396   :  { %v4677_v38 = vor.u32 %v4675_v5, %v4673_v57  ;;  %v4305_v13 = vrot.slane %v4303_v52, 1  ;;  %v19472_v57 = vpack.c.bf16 %v19452_v43, %v19450_v41  ;;  %v4691_v5 = vshrl.u32 %v19427_v16, 16 }
 0x397   :  { %14382 = vmatmul.mubr.bf16.gmra.mrb[64].mxu1 %v3903_v39  ;;  %v4290_v30 = vsel %vm4278_vm8, %v4285_v19, %v4289_v36  ;;  %v4159_v39 = vld [vmem:[#allocation2 + $0x108] sm:$0xff]  ;;  %v4685_v44 = vor.u32 %v4683_v26, %v4681_v28  ;;  %v4298_v15 = vsel %vm4278_vm8, %v4293_v21, %v4297_v48  ;;  %v19461_v19 = vld [vmem:[#allocation2 + $0x1b8] sm:$0xff]  ;;  %v4689_v53 = vrot.slane %v4687_v37, 1 }
 0x398   :  { %14385 = vmatprep.mubr.bf16.mxu1 %v3912_v7  ;;  %v4162_v7 = vld [vmem:[#allocation2 + $0x120] sm:$0xff]  ;;  %v4306_v24 = vsel %vm4278_vm8, %v4301_v2, %v4305_v13  ;;  %v4682_v48 = vsel %vm4278_vm8, %v4677_v38, %v4681_v28  ;;  %v19486_v52 = vpack.c.bf16 %v19461_v19, %v19459_v42  ;;  %v22878_v28 = vld [vmem:[#allocation39_spill] sm:$0xff]  ;;  %v4699_v26 = vshrl.u32 %v19439_v50, 16 }
 0x399   :  { %14298 = vmatmul.mubr.bf16.gmra.mrb[176].mxu0 %v3370_v35  ;;  %v4311_v35 = vshll.u32 %v19418_v49, 16  ;;  %v19448_v54 = vpack.c.bf16 %v4162_v7, %v4159_v39  ;;  %v4690_v46 = vsel %vm4278_vm8, %v4685_v44, %v4689_v53  ;;  %v22879_v39 = vld [vmem:[#allocation73_spill] sm:$0xff]  ;;  %v4309_v7 = vor.u32 %v4307_v10, %v4305_v13  ;;  %v22880_v38 = vld [vmem:[#allocation19_spill] sm:$0xff]  ;;  %v19503_v13 = vld [vmem:[#allocation2 + $0x1e8] sm:$0xff] }
 0x39a   :  { %14449 = vmatprep.mubr.bf16.mxu0 %v4658_v9  ;;  %v16190_v9 = vld [vmem:[%s22287_s4 + $0x290] sm:$0xff]   ;;  %v4174_v2 = vld [vmem:[#allocation2 + $0x180] sm:$0xff]  ;;  %v4703_v37 = vshll.u32 %v19472_v57, 16  ;;  %v4177_v10 = vld [vmem:[#allocation2 + $0x198] sm:$0xff] }
 0x39b   :  { %v4313_v56 = vrot.slane %v4311_v35, 1  ;;  %v4171_v35 = vld [vmem:[#allocation2 + $0x168] sm:$0xff]  ;;  %v16193_v50 = vld [vmem:[%s22287_s4 + $0x2a0] sm:$0xff]  }
 0x39f   :  { %14386 = vmatmul.mubr.bf16.gmra.mrb[68].mxu1 %v3921_v51  ;;  %v16185_v51 = vld [vmem:[%s22287_s4 + $0x208] sm:$0xff]  }
 0x3a0   :  { %14405 = vmatprep.mubr.bf16.mxu1 %v4290_v30  ;;  %v4319_v30 = vshll.u32 %v19448_v54, 16 }
 0x3a1   :  { %14450 = vmatmul.mubr.bf16.vlgmr.msra.gmra.mrb[152].mxu0 %v4666_v47 }
 0x3a2   :  { %14453 = vmatprep.mubr.bf16.mxu0 %v4674_v31  ;;  %14566 = vmatpush3.bf16.msra.mxu0 %v19347_v3  ;;  %v1817_v3 = vmul.f32 %v22733_v55, %v22877_v14  ;;  %v4697_v31 = vrot.slane %v4695_v34, 1  ;;  %v4321_v16 = vrot.slane %v4319_v30, 1  ;;  %v4693_v14 = vor.u32 %v4691_v5, %v4689_v53  ;;  %v19512_v53 = vld [vmem:[#allocation2 + $0x200] sm:$0xff]  ;;  %v16188_v5 = vld [vmem:[%s22287_s4 + $0x218] sm:$0xff]  }
 0x3a3   :  { %14567 = vmatprep.subr.bf16.mxu0 %v16189_v32  ;;  %v19508_v34 = vpack.c.bf16 %v4174_v2, %v4171_v35  ;;  %v4183_v35 = vld [vmem:[#allocation2 + $0x1c8] sm:$0xff] }
 0x3a4   :  { %v19464_v36 = vadd.f32 %v18066_v22, %v1817_v3  ;;  %v19501_v3 = vld [vmem:[#allocation2 + $0x1d0] sm:$0xff]  ;;  %v4701_v44 = vor.u32 %v4699_v26, %v4697_v31  ;;  %v16195_v26 = vld [vmem:[%s22287_s4 + $0x2a8] sm:$0xff]  }
 0x3a6   :  { %14568 = vmatpush3.bf16.msra.mxu0 %v16189_v32  ;;  %v4315_v32 = vshrl.u32 %v19418_v49, 16  ;;  %v22462_v47 = vmax.f32 %v19464_v36, 0.0  ;;  %v1816_v49 = vmul.f32 %v22879_v39, %v22878_v28  ;;  %v4210_v39 = vld [vmem:[#allocation2 + $0x2a0] sm:$0xff] }
 0x3a7   :  { %14569 = vmatprep.subr.bf16.mxu0 %v16190_v9  ;;  %14406 = vmatmul.mubr.bf16.vlgmr.msra.gmra.mrb[16].mxu1 %v4298_v15  ;;  %v4711_v15 = vshll.u32 %v19486_v52, 16 }
 0x3a8   :  { %14409 = vmatprep.mubr.bf16.mxu1 %v4306_v24  ;;  %14478 = vmatpush3.bf16.msra.mxu1 %v19369_v29  ;;  %v4317_v21 = vor.u32 %v4315_v32, %v4313_v56  ;;  %2243 = vst [vmem:[#allocation2 + $0x2c0] sm:$0xff] %v22462_v47  ;;  %v4327_v29 = vshll.u32 %v19474_v61, 16  ;;  %v1916_v60 = vadd.f32 %v22880_v38, %v1816_v49  ;;  %v19514_v32 = vld [vmem:[#allocation2 + $0x218] sm:$0xff]  ;;  %v4207_v38 = vld [vmem:[#allocation2 + $0x288] sm:$0xff] }
 0x3a9   :  { %14454 = vmatmul.mubr.bf16.gmra.mrb[156].mxu0 %v4682_v48  ;;  %14479 = vmatprep.subr.bf16.mxu1 %v16185_v51  ;;  %v4314_v48 = vsel %vm4278_vm8, %v4309_v7, %v4313_v56  ;;  %v19519_v49 = vpack.c.bf16 %v19503_v13, %v19501_v3  ;;  %v4186_v56 = vld [vmem:[#allocation2 + $0x1e0] sm:$0xff]  ;;  %v4323_v7 = vshrl.u32 %v19448_v54, 16  ;;  %v4189_v54 = vld [vmem:[#allocation2 + $0x1f8] sm:$0xff] }
 0x3aa   :  { %14457 = vmatprep.mubr.bf16.mxu0 %v4690_v46  ;;  %14570 = vmatpush3.bf16.msra.mxu0 %v16190_v9  ;;  %v4180_v9 = vld [vmem:[#allocation2 + $0x1b0] sm:$0xff]  ;;  %v2000_v24 = vmax.f32 %v1916_v60, 0.0  ;;  %v4322_v30 = vsel %vm4278_vm8, %v4317_v21, %v4321_v16  ;;  %v4705_v46 = vrot.slane %v4703_v37, 1  ;;  %v4329_v28 = vrot.slane %v4327_v29, 1 }
 0x3ab   :  { %14571 = vmatprep.subr.bf16.mxu0 %v16192_v45  ;;  %v4331_v21 = vshrl.u32 %v19474_v61, 16  ;;  %v19527_v2 = vpack.c.bf16 %v4180_v9, %v4177_v10  ;;  %v4713_v29 = vrot.slane %v4711_v15, 1  ;;  %v4192_v61 = vld [vmem:[#allocation2 + $0x210] sm:$0xff]  ;;  %v4707_v60 = vshrl.u32 %v19472_v57, 16  ;;  %v16191_v15 = vld [vmem:[%s22287_s4 + $0x220] sm:$0xff]   ;;  %v19549_v57 = vld [vmem:[#allocation2 + $0x248] sm:$0xff] }
 0x3ac   :  { %14480 = vmatpush3.bf16.msra.mxu1 %v16185_v51  ;;  %2242 = vst [vmem:[#allocation2 + $0x2b8] sm:$0xff] %v2000_v24  ;;  %v4698_v51 = vsel %vm4278_vm8, %v4693_v14, %v4697_v31  ;;  %v4706_v37 = vsel %vm4278_vm8, %v4701_v44, %v4705_v46  ;;  %v19536_v31 = vpack.c.bf16 %v19514_v32, %v19512_v53  ;;  %v4715_v24 = vshrl.u32 %v19486_v52, 16  ;;  %v16196_v52 = vld [vmem:[%s22287_s4 + $0x2b0] sm:$0xff]  }
 0x3ad   :  { %14481 = vmatprep.subr.bf16.mxu1 %v16186_v59  ;;  %v19539_v14 = vpack.c.bf16 %v4186_v56, %v4183_v35  ;;  %v4325_v10 = vor.u32 %v4323_v7, %v4321_v16  ;;  %v4333_v9 = vor.u32 %v4331_v21, %v4329_v28  ;;  %v4719_v44 = vshll.u32 %v19519_v49, 16  ;;  %v19560_v7 = vld [vmem:[#allocation2 + $0x278] sm:$0xff] }
 0x3ae   :  { %14572 = vmatpush3.bf16.msra.mxu0 %v16192_v45  ;;  %v4335_v45 = vshll.u32 %v19508_v34, 16  ;;  %v19551_v35 = vpack.c.bf16 %v4192_v61, %v4189_v54  ;;  %v4717_v56 = vor.u32 %v4715_v24, %v4713_v29  ;;  %v4723_v62 = vshrl.u32 %v19519_v49, 16  ;;  %v19590_v49 = vld [vmem:[#allocation2 + $0x2a8] sm:$0xff] }
 0x3af   :  { %14410 = vmatmul.mubr.bf16.gmra.mrb[20].mxu1 %v4314_v48  ;;  %14573 = vmatprep.subr.bf16.mxu0 %v16193_v50  ;;  %v4709_v48 = vor.u32 %v4707_v60, %v4705_v46  ;;  %v19558_v46 = vld [vmem:[#allocation2 + $0x260] sm:$0xff]  ;;  %v4330_v21 = vsel %vm4278_vm8, %v4325_v10, %v4329_v28  ;;  %v4721_v54 = vrot.slane %v4719_v44, 1  ;;  %v4339_v28 = vshrl.u32 %v19508_v34, 16  ;;  %v16198_v44 = vld [vmem:[%s22287_s4 + $0x2b8] sm:$0xff]  }
 0x3b0   :  { %14413 = vmatprep.mubr.bf16.mxu1 %v4322_v30  ;;  %14482 = vmatpush3.bf16.msra.mxu1 %v16186_v59  ;;  %v4343_v30 = vshll.u32 %v19527_v2, 16  ;;  %v19547_v59 = vld [vmem:[#allocation2 + $0x230] sm:$0xff]  ;;  %v4337_v16 = vrot.slane %v4335_v45, 1  ;;  %v4195_v45 = vld [vmem:[#allocation2 + $0x228] sm:$0xff]  ;;  %v4198_v60 = vld [vmem:[#allocation2 + $0x240] sm:$0xff]  ;;  %v4347_v34 = vshrl.u32 %v19527_v2, 16 }
 0x3b1   :  { %14458 = vmatmul.mubr.bf16.gmra.mrb[160].mxu0 %v4698_v51  ;;  %14483 = vmatprep.subr.bf16.mxu1 %v16188_v5  ;;  %v4727_v51 = vshll.u32 %v19536_v31, 16  ;;  %v19566_v61 = vpack.c.bf16 %v19549_v57, %v19547_v59  ;;  %v4714_v24 = vsel %vm4278_vm8, %v4709_v48, %v4713_v29  ;;  %v4722_v47 = vsel %vm4278_vm8, %v4717_v56, %v4721_v54 }
 0x3b2   :  { %14461 = vmatprep.mubr.bf16.mxu0 %v4706_v37  ;;  %14574 = vmatpush3.bf16.msra.mxu0 %v16193_v50  ;;  %v4351_v50 = vshll.u32 %v19539_v14, 16  ;;  %v4338_v37 = vsel %vm4278_vm8, %v4333_v9, %v4337_v16  ;;  %v4345_v10 = vrot.slane %v4343_v30, 1  ;;  %v4359_v9 = vshll.u32 %v19551_v35, 16 }
 0x3b3   :  { %14575 = vmatprep.subr.bf16.mxu0 %v16195_v26  ;;  %v19581_v29 = vpack.c.bf16 %v19560_v7, %v19558_v46  ;;  %v19584_v30 = vpack.c.bf16 %v4198_v60, %v4195_v45  ;;  %v4725_v25 = vor.u32 %v4723_v62, %v4721_v54  ;;  %v4735_v56 = vshll.u32 %v19566_v61, 16  ;;  %v4204_v62 = vld [vmem:[#allocation2 + $0x270] sm:$0xff]  ;;  %v5367_v45 = vld [vmem:[#allocation2 + $0x38] sm:$0x80] }
 0x3b4   :  { %14484 = vmatpush3.bf16.msra.mxu1 %v16188_v5  ;;  %v16194_v5 = vld [vmem:[%s22287_s4 + $0x228] sm:$0xff]   ;;  %v4353_v48 = vrot.slane %v4351_v50, 1  ;;  %v4349_v2 = vor.u32 %v4347_v34, %v4345_v10 }
 0x3b5   :  { %14485 = vmatprep.subr.bf16.mxu1 %v16191_v15  ;;  %v4743_v54 = vshll.u32 %v19581_v29, 16  ;;  %v4737_v58 = vrot.slane %v4735_v56, 1 }
 0x3b6   :  { %14576 = vmatpush3.bf16.msra.mxu0 %v16195_v26  ;;  %v4729_v26 = vrot.slane %v4727_v51, 1  ;;  %v4361_v51 = vrot.slane %v4359_v9, 1 }
 0x3b7   :  { %14414 = vmatmul.mubr.bf16.gmra.mrb[24].mxu1 %v4330_v21  ;;  %14577 = vmatprep.subr.bf16.mxu0 %v16196_v52  ;;  %v4341_v21 = vor.u32 %v4339_v28, %v4337_v16  ;;  %v4201_v16 = vld [vmem:[#allocation2 + $0x258] sm:$0xff]  ;;  %v4363_v28 = vshrl.u32 %v19551_v35, 16 }
 0x3b8   :  { %14417 = vmatprep.mubr.bf16.mxu1 %v4338_v37  ;;  %14486 = vmatpush3.bf16.msra.mxu1 %v16191_v15  ;;  %v4731_v37 = vshrl.u32 %v19536_v31, 16  ;;  %v4355_v15 = vshrl.u32 %v19539_v14, 16  ;;  %v19599_v31 = vld [vmem:[%s22287_s4 + $0x340] sm:$0xff]   ;;  %v4730_v34 = vsel %vm4278_vm8, %v4725_v25, %v4729_v26  ;;  %v19610_v11 = vpack.c.bf16 %v4204_v62, %v4201_v16  ;;  %v16199_v35 = vld [vmem:[%s22287_s4 + $0x238] sm:$0xff]  }
 0x3b9   :  { %14462 = vmatmul.mubr.bf16.gmra.mrb[164].mxu0 %v4714_v24  ;;  %v19588_v24 = vld [vmem:[#allocation2 + $0x290] sm:$0xff]  ;;  %14487 = vmatprep.subr.bf16.mxu1 %v16194_v5  ;;  %v4346_v9 = vsel %vm4278_vm8, %v4341_v21, %v4345_v10  ;;  %v4739_v10 = vshrl.u32 %v19566_v61, 16  ;;  %v4747_v16 = vshrl.u32 %v19581_v29, 16  ;;  %v4214_v61 = vld [vmem:[#allocation2 + $0x2c0] sm:$0x1] }
 0x3ba   :  { %14465 = vmatprep.mubr.bf16.mxu0 %v4722_v47  ;;  %v16197_v47 = vld [vmem:[%s22287_s4 + $0x230] sm:$0xff]   ;;  %14578 = vmatpush3.bf16.msra.mxu0 %v16196_v52  ;;  %v4733_v50 = vor.u32 %v4731_v37, %v4729_v26  ;;  %v4357_v60 = vor.u32 %v4355_v15, %v4353_v48  ;;  %v4367_v52 = vshll.u32 %v19584_v30, 16  ;;  %v19606_v14 = vpack.c.bf16 %v19590_v49, %v19588_v24 }
 0x3bb   :  { %14579 = vmatprep.subr.bf16.mxu0 %v16198_v44  ;;  %v4354_v37 = vsel %vm4278_vm8, %v4349_v2, %v4353_v48  ;;  %v4365_v15 = vor.u32 %v4363_v28, %v4361_v51  ;;  %v5457_v26 = vpack.c.bf16 %v19375_v63, %v19364_v17  ;;  %v4741_v2 = vor.u32 %v4739_v10, %v4737_v58  ;;  %v19631_v17 = vld [vmem:[%s22287_s4 + $0x240] sm:$0xff]  }
 0x3bc   :  { %14488 = vmatpush3.bf16.msra.mxu1 %v16194_v5  ;;  %v5454_v5 = vpack.c.bf16 %v19362_v4, %v5367_v45  ;;  %v4738_v25 = vsel %vm4278_vm8, %v4733_v50, %v4737_v58  ;;  %v4362_v48 = vsel %vm4278_vm8, %v4357_v60, %v4361_v51  ;;  %v4369_v21 = vrot.slane %v4367_v52, 1  ;;  %v4131_v4 = vld [vmem:[#allocation2 + $0x28] sm:$0xfe]  ;;  %v4137_v58 = vld [vmem:[#allocation2 + $0x58] sm:$0xff]  ;;  %v4140_v45 = vld [vmem:[#allocation2 + $0x70] sm:$0xff] }
 0x3bd   :  { %14489 = vmatprep.subr.bf16.mxu1 %v16197_v47  ;;  %v4751_v56 = vshll.u32 %v19606_v14, 16  ;;  %v4375_v62 = vshll.u32 %v19610_v11, 16  ;;  %v19626_v50 = vpack.c.bf16 %v4210_v39, %v4207_v38  ;;  %v4371_v51 = vshrl.u32 %v19584_v30, 16  ;;  %v16351_v39 = vld [vmem:[#allocation2] sm:$0xff] }
 0x3be   :  { %14580 = vmatpush3.bf16.msra.mxu0 %v16198_v44  ;;  %v4745_v44 = vrot.slane %v4743_v54, 1  ;;  %v4370_v63 = vsel %vm4278_vm8, %v4365_v15, %v4369_v21  ;;  %v5905_v54 = vshll.u32 %v5454_v5, 16  ;;  %v5910_v60 = vshrl.u32 %v5457_v26, 16 }
 0x3bf   :  { %14418 = vmatmul.mubr.bf16.gmra.mrb[28].mxu1 %v4346_v9  ;;  %14697 = vmatprep.subr.bf16.mxu0 %v19599_v31  ;;  %v5913_v28 = vshll.u32 %v5457_v26, 16  ;;  %v19635_v38 = vpack.c.bf16 %v16351_v39, %v4131_v4  ;;  %v4753_v52 = vrot.slane %v4751_v56, 1  ;;  %v4379_v9 = vshrl.u32 %v19610_v11, 16  ;;  %v4143_v4 = vld [vmem:[#allocation2 + $0x88] sm:$0xff] }
 0x3c0   :  { %14421 = vmatprep.mubr.bf16.mxu1 %v4354_v37  ;;  %14490 = vmatpush3.bf16.msra.mxu1 %v16197_v47  ;;  %v5902_v47 = vshrl.u32 %v5454_v5, 16  ;;  %v4749_v29 = vor.u32 %v4747_v16, %v4745_v44  ;;  %v5460_v37 = vpack.c.bf16 %v19390_v0, %v19377_v6  ;;  %v4377_v15 = vrot.slane %v4375_v62, 1 }
 0x3c1   :  { %14466 = vmatmul.mubr.bf16.gmra.mrb[168].mxu0 %v4730_v34  ;;  %14491 = vmatprep.subr.bf16.mxu1 %v16199_v35  ;;  %v4259_v34 = vpack.c.bf16 %v4214_v61, %v4214_v61  ;;  %v4383_v30 = vshll.u32 %v19626_v50, 16  ;;  %v4755_v5 = vshrl.u32 %v19606_v14, 16  ;;  %v4746_v10 = vsel %vm4278_vm8, %v4741_v2, %v4745_v44  ;;  %v4146_v2 = vld [vmem:[#allocation2 + $0xa0] sm:$0xff] }
 0x3c2   :  { %14469 = vmatprep.mubr.bf16.mxu0 %v4738_v25  ;;  %v19642_v25 = vpack.c.bf16 %v4140_v45, %v4137_v58  ;;  %v5904_v26 = vrot.slane %v5902_v47, 3  ;;  %v5907_v56 = vrot.slane %v5905_v54, 4  ;;  %v5463_v11 = vpack.c.bf16 %v19396_v8, %v19392_v12  ;;  %v19651_v8 = vpop.f32.mrb[124].mxu0 }
 0x3c3   :  { %v4754_v6 = vsel %vm4278_vm8, %v4749_v29, %v4753_v52  ;;  %v5912_v0 = vrot.slane %v5910_v60, 3  ;;  %v5018_v14 = vshll.u32 %v19635_v38, 16  ;;  %v4373_v16 = vor.u32 %v4371_v51, %v4369_v21  ;;  %22881 = vst [vmem:[#allocation62_spill] sm:$0xff] %v19651_v8 }
 0x3c4   :  { %14492 = vmatpush3.bf16.msra.mxu1 %v16199_v35  ;;  %v5915_v35 = vrot.slane %v5913_v28, 4  ;;  %v4759_v62 = vshll.u32 %v4259_v34, 16  ;;  %v5919_v61 = vshrl.u32 %v5460_v37, 16  ;;  %v5922_v44 = vshll.u32 %v5460_v37, 16  ;;  %v19654_v28 = vpop.f32.mrb[125].mxu0  ;;  %v4149_v37 = vld [vmem:[#allocation2 + $0xb8] sm:$0xff] }
 0x3c5   :  { %14521 = vmatprep.subr.bf16.mxu1 %v19631_v17  ;;  %v4381_v47 = vor.u32 %v4379_v9, %v4377_v15  ;;  %v4385_v54 = vrot.slane %v4383_v30, 1  ;;  %v4757_v58 = vor.u32 %v4755_v5, %v4753_v52  ;;  %v5023_v12 = vshll.u32 %v19642_v25, 16  ;;  %22882 = vst [vmem:[#allocation64_spill] sm:$0xff] %v19654_v28  ;;  %v4152_v9 = vld [vmem:[#allocation2 + $0xd0] sm:$0xff]  ;;  %v19658_v30 = vpop.f32.mrb[126].mxu0 }
 0x3c6   :  { %v5016_v45 = vshrl.u32 %v19635_v38, 16  ;;  %v5928_v29 = vshrl.u32 %v5463_v11, 16  ;;  %v5931_v60 = vshll.u32 %v5463_v11, 16  ;;  %v5916_v21 = vor.u32 %v5915_v35, %v5912_v0  ;;  %22883 = vst [vmem:[#allocation11_spill] sm:$0xff] %v19658_v30  ;;  %v16234_v30 = vld [vmem:[%s22287_s4 + $0x310] sm:$0xff]  }
 0x3c7   :  { %14422 = vmatmul.mubr.bf16.gmra.mrb[32].mxu1 %v4362_v48  ;;  %v4213_v48 = vld [vmem:[#allocation2 + $0x2b8] sm:$0x1]  ;;  %v5020_v39 = vrot.slane %v5018_v14, 1  ;;  %v19656_v34 = vpack.c.bf16 %v4146_v2, %v4143_v4  ;;  %v4378_v52 = vsel %vm4278_vm8, %v4373_v16, %v4377_v15  ;;  %v4761_v5 = vrot.slane %v4759_v62, 1 }
 0x3c8   :  { %14425 = vmatprep.mubr.bf16.mxu1 %v4370_v63  ;;  %v5908_v63 = vor.u32 %v5907_v56, %v5904_v26  ;;  %v4258_v51 = vpack.c.bf16 %v4213_v48, %v4213_v48  ;;  %v5924_v26 = vrot.slane %v5922_v44, 4  ;;  %v19661_v56 = vpop.f32.mrb[127].mxu0  ;;  %v4386_v38 = vsel %vm4278_vm8, %v4381_v47, %v4385_v54 }
 0x3c9   :  { %14470 = vmatmul.mubr.bf16.gmra.mrb[172].mxu0 %v4746_v10  ;;  %v5921_v10 = vrot.slane %v5919_v61, 3  ;;  %22884 = vst [vmem:[#allocation61_spill] sm:$0xff] %v19661_v56  ;;  %v4387_v11 = vshrl.u32 %v19626_v50, 16  ;;  %v5466_v0 = vpack.c.bf16 %v19412_v23, %v19398_v20  ;;  %v4762_v35 = vsel %vm4278_vm8, %v4757_v58, %v4761_v5  ;;  %v19674_v2 = vpop.f32.mrb[128].mxu0 }
 0x3ca   :  { %14473 = vmatprep.mubr.bf16.mxu0 %v4754_v6  ;;  %v5025_v6 = vrot.slane %v5023_v12, 1  ;;  %v5930_v14 = vrot.slane %v5928_v29, 3  ;;  %v5933_v4 = vrot.slane %v5931_v60, 4  ;;  %v19668_v48 = vpack.c.bf16 %v4152_v9, %v4149_v37  ;;  %22885 = vst [vmem:[#allocation63_spill] sm:$0xff] %v19674_v2  ;;  %v19679_v29 = vpop.f32.mrb[129].mxu0  ;;  %v4158_v37 = vld [vmem:[#allocation2 + $0x100] sm:$0xff] }
 0x3cb   :  { %v5917_v15 = vsel %vm22852_vm1, %v5908_v63, %v5916_v21  ;;  %v4391_v16 = vshll.u32 %v4258_v51, 16  ;;  %v5021_v62 = vor.u32 %v5020_v39, %v5016_v45  ;;  %v5031_v61 = vshll.u32 %v19656_v34, 16  ;;  %22886 = vst [vmem:[#allocation27_spill] sm:$0xff] %v19679_v29  ;;  %v4155_v39 = vld [vmem:[#allocation2 + $0xe8] sm:$0xff] }
 0x3cc   :  { %v5925_v50 = vor.u32 %v5924_v26, %v5921_v10  ;;  %v5469_v20 = vpack.c.bf16 %v19420_v1, %v19414_v18  ;;  %v4389_v23 = vor.u32 %v4387_v11, %v4385_v54  ;;  %v5937_v44 = vshrl.u32 %v5466_v0, 16  ;;  %v19683_v18 = vpop.f32.mrb[130].mxu0  ;;  %v22891_v11 = vld [vmem:[#allocation42_spill] sm:$0xff] }
 0x3cd   :  { %v5027_v47 = vshrl.u32 %v19642_v25, 16  ;;  %v19677_v58 = vor.u32 %v5933_v4, %v5930_v14  ;;  %v5940_v12 = vshll.u32 %v5466_v0, 16  ;;  %v4393_v63 = vrot.slane %v4391_v16, 1  ;;  %22887 = vst [vmem:[#allocation31_spill] sm:$0xff] %v19683_v18  ;;  %v22889_v25 = vld [vmem:[#allocation68_spill] sm:$0xff]  ;;  %v19687_v5 = vpop.f32.mrb[131].mxu0 }
 0x3ce   :  { %v5026_v45 = vsel %vm4278_vm8, %v5021_v62, %v5025_v6  ;;  %v5033_v60 = vrot.slane %v5031_v61, 1  ;;  %v5039_v51 = vshll.u32 %v19668_v48, 16  ;;  %v5926_v1 = vsel %vm22888_vm15, %v5916_v21, %v5925_v50  ;;  %22890 = vst [vmem:[#allocation12_spill] sm:$0xff] %v19687_v5  ;;  %vm22906_vm15 = vmmov %vm22852_vm1 }
 0x3cf   :  { %14426 = vmatmul.mubr.bf16.gmra.mrb[36].mxu1 %v4378_v52  ;;  %v5946_v54 = vshrl.u32 %v5469_v20, 16  ;;  %v5949_v9 = vshll.u32 %v5469_v20, 16  ;;  %v55_v52 = vadd.s32 216, %v22889_v25  ;;  %v4394_v10 = vsel %vm4278_vm8, %v4389_v23, %v4393_v63 }
 0x3d0   :  { %14429 = vmatprep.mubr.bf16.mxu1 %v4386_v38  ;;  %v5939_v26 = vrot.slane %v5937_v44, 3  ;;  %v16205_v38 = vld [vmem:[%s22287_s4 + $0x348] sm:$0xff]   ;;  %v1820_v0 = vmul.f32 %v22733_v55, %v22891_v11  ;;  %v5935_v21 = vsel %vm22893_vm7, %v5925_v50, %v19677_v58  ;;  %v5942_v4 = vrot.slane %v5940_v12, 4  ;;  %v4161_v50 = vld [vmem:[#allocation2 + $0x118] sm:$0xff]  ;;  %v4164_v12 = vld [vmem:[#allocation2 + $0x130] sm:$0xff] }
 0x3d1   :  { %14474 = vmatmul.mubr.bf16.gmra.mrb[176].mxu0 %v4762_v35  ;;  %v22892_v35 = vld [vmem:[#allocation57_spill] sm:$0xff]  ;;  %v83_v16 = vand.u32 15, %v55_v52  ;;  %v5035_v62 = vshrl.u32 %v19656_v34, 16  ;;  %v5472_v61 = vpack.c.bf16 %v19450_v41, %v19422_v27  ;;  %v5948_v23 = vrot.slane %v5946_v54, 3  ;;  %vm22907_vm7 = vmmov %vm22852_vm1 }
 0x3d2   :  { %14581 = vmatprep.mubr.bf16.mxu0 %v5917_v15  ;;  %v1818_v14 = vmul.f32 %v17924_v40, %v22892_v35  ;;  %v19699_v15 = vpack.c.bf16 %v4158_v37, %v4155_v39  ;;  %v19705_v55 = vadd.f32 %v18066_v22, %v1820_v0  ;;  %v5951_v44 = vrot.slane %v5949_v9, 4  ;;  %v16206_v22 = vld [vmem:[%s22287_s4 + $0x350] sm:$0xff]   ;;  %v19719_v37 = vpop.f32.mrb[132].mxu0  ;;  %v4170_v54 = vld [vmem:[#allocation2 + $0x160] sm:$0xff] }
 0x3d3   :  { %v5475_v63 = vpack.c.bf16 %v19459_v42, %v19452_v43  ;;  %vm19711_vm9 = vcmp.lt.s32.totalorder %v83_v16, 14  ;;  %v22894_v34 = vmov 0  ;;  %v5029_v27 = vor.u32 %v5027_v47, %v5025_v6  ;;  %22897 = vst [vmem:[#allocation66_spill] sm:$0xff] %v19719_v37  ;;  %v19722_v9 = vpop.f32.mrb[133].mxu0  ;;  %v20127_v37 = vld [vmem:[#allocation2 + $0x1e8] sm:$0xff] }
 0x3d4   :  { %v1918_v20 = vadd.f32 %v22736_v33, %v1818_v14  ;;  %v22895_v34 = vsel %vm19711_vm9, 4294967295, %v22894_v34  ;;  %v5037_v41 = vor.u32 %v5035_v62, %v5033_v60  ;;  %v5943_v43 = vor.u32 %v5942_v4, %v5939_v26  ;;  %22898 = vst [vmem:[#allocation33_spill] sm:$0xff] %v19722_v9  ;;  %v16201_v26 = vld [vmem:[%s22287_s4 + $0x248] sm:$0xff]  }
 0x3d5   :  { %22896 = vst [vmem:[#allocation13_spill] sm:$0xff] %v22895_v34  ;;  %v5047_v42 = vshll.u32 %v19699_v15, 16  ;;  %v19724_v6 = vpack.c.bf16 %v4164_v12, %v4161_v50  ;;  %v5955_v47 = vshrl.u32 %v5472_v61, 16  ;;  %v5958_v25 = vshll.u32 %v5472_v61, 16  ;;  %v16202_v12 = vld [vmem:[%s22287_s4 + $0x250] sm:$0xff]  }
 0x3d6   :  { %v2002_v39 = vmax.f32 %v1918_v20, 0.0  ;;  %v5964_v11 = vshrl.u32 %v5475_v63, 16  ;;  %v5967_v0 = vshll.u32 %v5475_v63, 16  ;;  %v5034_v14 = vsel %vm4278_vm8, %v5029_v27, %v5033_v60  ;;  %v4173_v63 = vld [vmem:[#allocation2 + $0x178] sm:$0xff] }
 0x3d7   :  { %14430 = vmatmul.mubr.bf16.gmra.mrb[40].mxu1 %v4394_v10  ;;  %v19730_v10 = vpop.f32.mrb[134].mxu0  ;;  %v5944_v16 = vsel %vm22901_vm10, %v19677_v58, %v5943_v43  ;;  %v5043_v62 = vshrl.u32 %v19668_v48, 16  ;;  %v5049_v61 = vrot.slane %v5047_v42, 1  ;;  %v5051_v20 = vshrl.u32 %v19699_v15, 16  ;;  %vm22912_vm10 = vmmov %vm22852_vm1 }
 0x3d8   :  { %14493 = vmatprep.mubr.bf16.mxu1 %v5026_v45  ;;  %v22471_v45 = vmax.f32 %v19705_v55, 0.0  ;;  %2244 = vst [vmem:[#allocation2 + $0x2c8] sm:$0xff] %v2002_v39  ;;  %22899 = vst [vmem:[#allocation14_spill] sm:$0xff] %v19730_v10  ;;  %v19737_v35 = vpop.f32.mrb[135].mxu0  ;;  %v5055_v60 = vshll.u32 %v19724_v6, 16  ;;  %v5478_v50 = vpack.c.bf16 %v19501_v3, %v19461_v19  ;;  %v5966_v58 = vrot.slane %v5964_v11, 3 }
 0x3d9   :  { %14582 = vmatmul.mubr.bf16.vlgmr.msra.gmra.mrb[152].mxu0 %v5926_v1  ;;  %v5041_v1 = vrot.slane %v5039_v51, 1  ;;  %v19732_v51 = vor.u32 %v5951_v44, %v5948_v23  ;;  %22900 = vst [vmem:[#allocation15_spill] sm:$0xff] %v19737_v35  ;;  %v5957_v23 = vrot.slane %v5955_v47, 3  ;;  %v5960_v44 = vrot.slane %v5958_v25, 4  ;;  %v4182_v47 = vld [vmem:[#allocation2 + $0x1c0] sm:$0xff] }
 0x3da   :  { %14585 = vmatprep.mubr.bf16.mxu0 %v5935_v21  ;;  %14698 = vmatpush3.bf16.msra.mxu0 %v19599_v31  ;;  %v4167_v31 = vld [vmem:[#allocation2 + $0x148] sm:$0xff]  ;;  %v2144_v52 = vsel %vm19711_vm9, %v22471_v45, 0.0  ;;  %v5969_v15 = vrot.slane %v5967_v0, 4  ;;  %v5481_v27 = vpack.c.bf16 %v19512_v53, %v19503_v13  ;;  %v19762_v3 = vpop.f32.mrb[136].mxu0  ;;  %v5053_v39 = vor.u32 %v5051_v20, %v5049_v61 }
 0x3db   :  { %14699 = vmatprep.subr.bf16.mxu0 %v16205_v38  ;;  %2246 = vst [vmem:[#allocation2 + $0x2d8] sm:$0xff] %v2144_v52  ;;  %v5042_v21 = vsel %vm4278_vm8, %v5037_v41, %v5041_v1  ;;  %v19741_v4 = vpack.c.bf16 %v4170_v54, %v4167_v31  ;;  %v5953_v48 = vsel %vm22852_vm1, %v5943_v43, %v19732_v51  ;;  %22902 = vst [vmem:[#allocation65_spill] sm:$0xff] %v19762_v3  ;;  %v16209_v43 = vld [vmem:[%s22287_s4 + $0x360] sm:$0xff]   ;;  %v19767_v42 = vpop.f32.mrb[137].mxu0 }
 0x3dc   :  { %v5045_v41 = vor.u32 %v5043_v62, %v5041_v1  ;;  %22903 = vst [vmem:[#allocation67_spill] sm:$0xff] %v19767_v42  ;;  %v5961_v31 = vor.u32 %v5960_v44, %v5957_v23  ;;  %v5973_v13 = vshrl.u32 %v5478_v50, 16  ;;  %v5976_v53 = vshll.u32 %v5478_v50, 16  ;;  %v4179_v1 = vld [vmem:[#allocation2 + $0x1a8] sm:$0xff]  ;;  %v19771_v25 = vpop.f32.mrb[138].mxu0 }
 0x3dd   :  { %v5063_v19 = vshll.u32 %v19741_v4, 16  ;;  %22904 = vst [vmem:[#allocation16_spill] sm:$0xff] %v19771_v25  ;;  %v19773_v52 = vor.u32 %v5969_v15, %v5966_v58  ;;  %v5982_v11 = vshrl.u32 %v5481_v27, 16  ;;  %v5985_v0 = vshll.u32 %v5481_v27, 16  ;;  %v16211_v50 = vld [vmem:[%s22287_s4 + $0x368] sm:$0xff]   ;;  %v4188_v15 = vld [vmem:[#allocation2 + $0x1f0] sm:$0xff] }
 0x3de   :  { %14700 = vmatpush3.bf16.msra.mxu0 %v16205_v38  ;;  %v16208_v38 = vld [vmem:[%s22287_s4 + $0x358] sm:$0xff]   ;;  %v19784_v23 = vpack.c.bf16 %v4182_v47, %v4179_v1  ;;  %v5484_v44 = vpack.c.bf16 %v19547_v59, %v19514_v32  ;;  %v4191_v1 = vld [vmem:[#allocation2 + $0x208] sm:$0xff] }
 0x3df   :  { %14701 = vmatprep.subr.bf16.mxu0 %v16206_v22  ;;  %14494 = vmatmul.mubr.bf16.vlgmr.msra.gmra.mrb[44].mxu1 %v5034_v14  ;;  %v16204_v14 = vld [vmem:[%s22287_s4 + $0x258] sm:$0xff]   ;;  %v5065_v62 = vrot.slane %v5063_v19, 1  ;;  %v5984_v58 = vrot.slane %v5982_v11, 3  ;;  %v5987_v32 = vrot.slane %v5985_v0, 4 }
 0x3e0   :  { %14497 = vmatprep.mubr.bf16.mxu1 %v5042_v21  ;;  %14522 = vmatpush3.bf16.msra.mxu1 %v19631_v17  ;;  %v4176_v17 = vld [vmem:[#allocation2 + $0x190] sm:$0xff]  ;;  %v5050_v21 = vsel %vm4278_vm8, %v5045_v41, %v5049_v61  ;;  %v4185_v59 = vld [vmem:[#allocation2 + $0x1d8] sm:$0xff]  ;;  %v5079_v41 = vshll.u32 %v19784_v23, 16  ;;  %v5991_v19 = vshrl.u32 %v5484_v44, 16 }
 0x3e1   :  { %14586 = vmatmul.mubr.bf16.gmra.mrb[156].mxu0 %v5944_v16  ;;  %14523 = vmatprep.subr.bf16.mxu1 %v16201_v26  ;;  %v19769_v54 = vpack.c.bf16 %v4176_v17, %v4173_v63  ;;  %v5059_v16 = vshrl.u32 %v19724_v6, 16  ;;  %v5962_v6 = vsel %vm22906_vm15, %v19732_v51, %v5961_v31  ;;  %v5487_v63 = vpack.c.bf16 %v19558_v46, %v19549_v57  ;;  %v16207_v51 = vld [vmem:[%s22287_s4 + $0x260] sm:$0xff]   ;;  %vm22918_vm15 = vmmov %vm22852_vm1 }
 0x3e2   :  { %14589 = vmatprep.mubr.bf16.mxu0 %v5953_v48  ;;  %14702 = vmatpush3.bf16.msra.mxu0 %v16206_v22  ;;  %v5057_v22 = vrot.slane %v5055_v60, 1  ;;  %v5067_v60 = vshrl.u32 %v19741_v4, 16  ;;  %v5978_v48 = vrot.slane %v5976_v53, 4  ;;  %v5971_v4 = vsel %vm22907_vm7, %v5961_v31, %v19773_v52  ;;  %v16212_v31 = vld [vmem:[%s22287_s4 + $0x370] sm:$0xff]   ;;  %vm22921_vm7 = vmmov %vm22852_vm1 }
 0x3e3   :  { %14703 = vmatprep.subr.bf16.mxu0 %v16208_v38  ;;  %v5071_v61 = vshll.u32 %v19769_v54, 16  ;;  %v19809_v53 = vpack.c.bf16 %v4188_v15, %v4185_v59  ;;  %v6000_v11 = vshrl.u32 %v5487_v63, 16  ;;  %v6003_v0 = vshll.u32 %v5487_v63, 16 }
 0x3e4   :  { %14524 = vmatpush3.bf16.msra.mxu1 %v16201_v26  ;;  %v19778_v26 = vpop.f32.mrb[139].mxu0  ;;  %v5058_v20 = vsel %vm4278_vm8, %v5053_v39, %v5057_v22  ;;  %v5069_v17 = vor.u32 %v5067_v60, %v5065_v62  ;;  %v5994_v39 = vshll.u32 %v5484_v44, 16  ;;  %v5075_v60 = vshrl.u32 %v19769_v54, 16 }
 0x3e5   :  { %14525 = vmatprep.subr.bf16.mxu1 %v16202_v12  ;;  %22905 = vst [vmem:[#allocation18_spill] sm:$0xff] %v19778_v26  ;;  %v19801_v27 = vpop.f32.mrb[140].mxu0  ;;  %v5073_v46 = vrot.slane %v5071_v61, 1  ;;  %v5081_v44 = vrot.slane %v5079_v41, 1  ;;  %v5087_v54 = vshll.u32 %v19809_v53, 16  ;;  %v6005_v59 = vrot.slane %v6003_v0, 4 }
 0x3e6   :  { %14704 = vmatpush3.bf16.msra.mxu0 %v16208_v38  ;;  %v5975_v38 = vrot.slane %v5973_v13, 3  ;;  %22908 = vst [vmem:[#allocation43_spill] sm:$0xff] %v19801_v27  ;;  %v19807_v57 = vpop.f32.mrb[141].mxu0  ;;  %v5996_v61 = vrot.slane %v5994_v39, 4  ;;  %v22913_v15 = vmax.f32 %v19464_v36, 0.0  ;;  %v4206_v39 = vld [vmem:[#allocation2 + $0x280] sm:$0xff] }
 0x3e7   :  { %14498 = vmatmul.mubr.bf16.gmra.mrb[48].mxu1 %v5050_v21  ;;  %14705 = vmatprep.subr.bf16.mxu0 %v16209_v43  ;;  %22909 = vst [vmem:[#allocation44_spill] sm:$0xff] %v19807_v57  ;;  %v19811_v47 = vpop.f32.mrb[142].mxu0  ;;  %v16210_v21 = vld [vmem:[%s22287_s4 + $0x268] sm:$0xff]   ;;  %v19848_v36 = vld [vmem:[%s22287_s4 + $0x400] sm:$0xff]  }
 0x3e8   :  { %14501 = vmatprep.mubr.bf16.mxu1 %v5058_v20  ;;  %14526 = vmatpush3.bf16.msra.mxu1 %v16202_v12  ;;  %v5061_v12 = vor.u32 %v5059_v16, %v5057_v22  ;;  %v5979_v13 = vor.u32 %v5978_v48, %v5975_v38  ;;  %22910 = vst [vmem:[#allocation20_spill] sm:$0xff] %v19811_v47  ;;  %v19818_v16 = vpop.f32.mrb[143].mxu0  ;;  %v16214_v48 = vld [vmem:[%s22287_s4 + $0x378] sm:$0xff]  }
 0x3e9   :  { %14590 = vmatmul.mubr.bf16.gmra.mrb[160].mxu0 %v5962_v6  ;;  %14527 = vmatprep.subr.bf16.mxu1 %v16204_v14  ;;  %v19813_v22 = vor.u32 %v5987_v32, %v5984_v58  ;;  %22911 = vst [vmem:[#allocation22_spill] sm:$0xff] %v19818_v16  ;;  %v5993_v6 = vrot.slane %v5991_v19, 3  ;;  %v6002_v32 = vrot.slane %v6000_v11, 3  ;;  %v5493_v63 = vpack.c.bf16 %v22913_v15, %v19590_v49  ;;  %v4203_v19 = vld [vmem:[#allocation2 + $0x268] sm:$0xff]  ;;  %v4212_v15 = vld [vmem:[#allocation2 + $0x2b0] sm:$0xff] }
 0x3ea   :  { %14593 = vmatprep.mubr.bf16.mxu0 %v5971_v4  ;;  %14706 = vmatpush3.bf16.msra.mxu0 %v16209_v43  ;;  %v4194_v43 = vld [vmem:[#allocation2 + $0x220] sm:$0xff]  ;;  %v5066_v20 = vsel %vm4278_vm8, %v5061_v12, %v5065_v62  ;;  %v5980_v62 = vsel %vm22912_vm10, %v19773_v52, %v5979_v13  ;;  %v5083_v4 = vshrl.u32 %v19784_v23, 16  ;;  %v16213_v52 = vld [vmem:[%s22287_s4 + $0x270] sm:$0xff]   ;;  %v5077_v23 = vor.u32 %v5075_v60, %v5073_v46  ;;  %v16215_v60 = vld [vmem:[%s22287_s4 + $0x278] sm:$0xff]  }
 0x3eb   :  { %14707 = vmatprep.subr.bf16.mxu0 %v16211_v50  ;;  %v19823_v38 = vpack.c.bf16 %v4194_v43, %v4191_v1  ;;  %v5989_v58 = vsel %vm22852_vm1, %v5979_v13, %v19813_v22  ;;  %v4200_v12 = vld [vmem:[#allocation2 + $0x250] sm:$0xff]  ;;  %v19854_v43 = vor.u32 %v6005_v59, %v6002_v32  ;;  %v6018_v0 = vshrl.u32 %v5493_v63, 16  ;;  %vm22927_vm10 = vmmov %vm22852_vm1 }
 0x3ec   :  { %14528 = vmatpush3.bf16.msra.mxu1 %v16204_v14  ;;  %v5074_v14 = vsel %vm4278_vm8, %v5069_v17, %v5073_v46  ;;  %v5997_v17 = vor.u32 %v5996_v61, %v5993_v6  ;;  %v5089_v46 = vrot.slane %v5087_v54, 1  ;;  %v5082_v61 = vsel %vm4278_vm8, %v5077_v23, %v5081_v44 }
 0x3ed   :  { %14529 = vmatprep.subr.bf16.mxu1 %v16207_v51  ;;  %v5095_v41 = vshll.u32 %v19823_v38, 16 }
 0x3ee   :  { %14708 = vmatpush3.bf16.msra.mxu0 %v16211_v50  ;;  %v5490_v50 = vpack.c.bf16 %v19588_v24, %v19560_v7  ;;  %v19842_v7 = vpop.f32.mrb[144].mxu0  ;;  %v5085_v24 = vor.u32 %v5083_v4, %v5081_v44  ;;  %v5998_v54 = vsel %vm22918_vm15, %v19813_v22, %v5997_v17  ;;  %v4209_v44 = vld [vmem:[#allocation2 + $0x298] sm:$0xff]  ;;  %vm22928_vm15 = vmmov %vm22852_vm1 }
 0x3ef   :  { %14502 = vmatmul.mubr.bf16.gmra.mrb[52].mxu1 %v5066_v20  ;;  %14709 = vmatprep.subr.bf16.mxu0 %v16212_v31  ;;  %22914 = vst [vmem:[#allocation45_spill] sm:$0xff] %v19842_v7  ;;  %v19850_v49 = vpop.f32.mrb[145].mxu0  ;;  %v6021_v20 = vshll.u32 %v5493_v63, 16  ;;  %v22919_v63 = vld [vmem:[#allocation41_spill] sm:$0xff] }
 0x3f0   :  { %14505 = vmatprep.mubr.bf16.mxu1 %v5074_v14  ;;  %14530 = vmatpush3.bf16.msra.mxu1 %v16207_v51  ;;  %v4197_v51 = vld [vmem:[#allocation2 + $0x238] sm:$0xff]  ;;  %22915 = vst [vmem:[#allocation46_spill] sm:$0xff] %v19850_v49  ;;  %v6009_v13 = vshrl.u32 %v5490_v50, 16  ;;  %v6012_v1 = vshll.u32 %v5490_v50, 16  ;;  %v5090_v4 = vsel %vm4278_vm8, %v5085_v24, %v5089_v46  ;;  %v5097_v50 = vrot.slane %v5095_v41, 1  ;;  %v19880_v24 = vld [vmem:[%s22287_s4 + $0x2c0] sm:$0xff]  }
 0x3f1   :  { %14594 = vmatmul.mubr.bf16.gmra.mrb[164].mxu0 %v5980_v62  ;;  %14531 = vmatprep.subr.bf16.mxu1 %v16210_v21  ;;  %v19856_v11 = vpack.c.bf16 %v4200_v12, %v4197_v51  ;;  %v5451_v14 = vld [vmem:[#allocation2 + $0x2d8] sm:$0x7f]  ;;  %v19865_v62 = vpack.c.bf16 %v4206_v39, %v4203_v19  ;;  %v6007_v51 = vsel %vm22921_vm7, %v5997_v17, %v19854_v43  ;;  %v6020_v12 = vrot.slane %v6018_v0, 3  ;;  %v22922_v19 = vld [vmem:[#allocation19_spill] sm:$0xff]  ;;  %v5369_v0 = vld [vmem:[#allocation2 + $0x48] sm:$0xff] }
 0x3f2   :  { %14597 = vmatprep.mubr.bf16.mxu0 %v5989_v58  ;;  %14710 = vmatpush3.bf16.msra.mxu0 %v16212_v31  ;;  %v19852_v31 = vpop.f32.mrb[146].mxu0  ;;  %v5099_v58 = vshrl.u32 %v19823_v38, 16  ;;  %v6011_v32 = vrot.slane %v6009_v13, 3  ;;  %v6014_v59 = vrot.slane %v6012_v1, 4  ;;  %v6023_v38 = vrot.slane %v6021_v20, 4  ;;  %vm22929_vm7 = vmmov %vm22852_vm1 }
 0x3f3   :  { %14711 = vmatprep.subr.bf16.mxu0 %v16214_v48  ;;  %22916 = vst [vmem:[#allocation24_spill] sm:$0xff] %v19852_v31  ;;  %v19861_v6 = vpop.f32.mrb[147].mxu0  ;;  %v5103_v22 = vshll.u32 %v19856_v11, 16  ;;  %v19886_v17 = vpack.c.bf16 %v4212_v15, %v4209_v44  ;;  %v5107_v15 = vshrl.u32 %v19856_v11, 16 }
 0x3f4   :  { %14532 = vmatpush3.bf16.msra.mxu1 %v16210_v21  ;;  %22917 = vst [vmem:[#allocation26_spill] sm:$0xff] %v19861_v6  ;;  %v5091_v21 = vshrl.u32 %v19809_v53, 16  ;;  %v5496_v53 = vpack.c.bf16 %v5451_v14, %v5451_v14  ;;  %v5101_v1 = vor.u32 %v5099_v58, %v5097_v50  ;;  %v5366_v14 = vld [vmem:[#allocation2 + $0x30] sm:$0x80] }
 0x3f5   :  { %14533 = vmatprep.subr.bf16.mxu1 %v16213_v52  ;;  %v19884_v13 = vpop.f32.mrb[148].mxu0 }
 0x3f6   :  { %14712 = vmatpush3.bf16.msra.mxu0 %v16214_v48  ;;  %v22920_v48 = vld [vmem:[#allocation73_spill] sm:$0xff]  ;;  %v5093_v41 = vor.u32 %v5091_v21, %v5089_v46  ;;  %22923 = vst [vmem:[#allocation47_spill] sm:$0xff] %v19884_v13  ;;  %v19888_v20 = vpop.f32.mrb[149].mxu0 }
 0x3f7   :  { %14506 = vmatmul.mubr.bf16.gmra.mrb[56].mxu1 %v5082_v61  ;;  %14829 = vmatprep.subr.bf16.mxu0 %v19848_v36  ;;  %v1819_v23 = vmul.f32 %v22920_v48, %v22919_v63  ;;  %22924 = vst [vmem:[#allocation48_spill] sm:$0xff] %v19888_v20  ;;  %v6015_v61 = vor.u32 %v6014_v59, %v6011_v32  ;;  %v5372_v63 = vld [vmem:[#allocation2 + $0x60] sm:$0xff]  ;;  %v5375_v48 = vld [vmem:[#allocation2 + $0x78] sm:$0xff]  ;;  %v19890_v21 = vpop.f32.mrb[150].mxu0  ;;  %v5115_v59 = vshrl.u32 %v19865_v62, 16 }
 0x3f8   :  { %14509 = vmatprep.mubr.bf16.mxu1 %v5090_v4  ;;  %14534 = vmatpush3.bf16.msra.mxu1 %v16213_v52  ;;  %v5111_v52 = vshll.u32 %v19865_v62, 16  ;;  %v6027_v4 = vshrl.u32 %v5496_v53, 16  ;;  %22925 = vst [vmem:[#allocation28_spill] sm:$0xff] %v19890_v21  ;;  %v19893_v58 = vpop.f32.mrb[151].mxu0  ;;  %v5098_v44 = vsel %vm4278_vm8, %v5093_v41, %v5097_v50  ;;  %v5119_v50 = vshll.u32 %v19886_v17, 16  ;;  %v5381_v62 = vld [vmem:[#allocation2 + $0xa8] sm:$0xff] }
 0x3f9   :  { %14598 = vmatmul.mubr.bf16.gmra.mrb[168].mxu0 %v5998_v54  ;;  %14535 = vmatprep.subr.bf16.mxu1 %v16215_v60  ;;  %v1919_v39 = vadd.f32 %v22922_v19, %v1819_v23  ;;  %v6030_v54 = vshll.u32 %v5496_v53, 16  ;;  %v6024_v23 = vor.u32 %v6023_v38, %v6020_v12  ;;  %22926 = vst [vmem:[#allocation30_spill] sm:$0xff] %v19893_v58  ;;  %v16353_v58 = vld [vmem:[#allocation2 + $0x68] sm:$0xff] }
 0x3fa   :  { %14601 = vmatprep.mubr.bf16.mxu0 %v6007_v51  ;;  %v5105_v51 = vrot.slane %v5103_v22, 1  ;;  %v5113_v19 = vrot.slane %v5111_v52, 1  ;;  %v5453_v53 = vpack.c.bf16 %v5369_v0, %v5366_v14  ;;  %v5456_v22 = vpack.c.bf16 %v5375_v48, %v5372_v63  ;;  %v4215_v52 = vld [vmem:[#allocation2 + $0x2c8] sm:$0x1] }
 0x3fb   :  { %v2003_v46 = vmax.f32 %v1919_v39, 0.0  ;;  %v6016_v12 = vsel %vm22927_vm10, %v19854_v43, %v6015_v61  ;;  %v6029_v38 = vrot.slane %v6027_v4, 3  ;;  %v6032_v11 = vrot.slane %v6030_v54, 4  ;;  %vm22930_vm10 = vmmov %vm22852_vm1 }
 0x3fc   :  { %14536 = vmatpush3.bf16.msra.mxu1 %v16215_v60  ;;  %v5106_v60 = vsel %vm4278_vm8, %v5101_v1, %v5105_v51  ;;  %v6025_v41 = vsel %vm22852_vm1, %v6015_v61, %v6024_v23  ;;  %v5109_v39 = vor.u32 %v5107_v15, %v5105_v51  ;;  %v5117_v1 = vor.u32 %v5115_v59, %v5113_v19 }
 0x3fd   :  { %14609 = vmatprep.subr.bf16.mxu1 %v19880_v24  ;;  %v2143_v32 = vsel %vm19711_vm9, %v2003_v46, 0.0  ;;  %v5378_v46 = vld [vmem:[#allocation2 + $0x90] sm:$0xff]  ;;  %v5516_v14 = vshrl.u32 %v5453_v53, 16  ;;  %v5519_v0 = vshll.u32 %v5453_v53, 16  ;;  %v5524_v63 = vshrl.u32 %v5456_v22, 16 }
 0x3fe   :  { %2245 = vst [vmem:[#allocation2 + $0x2d0] sm:$0xff] %v2143_v32  ;;  %v5527_v48 = vshll.u32 %v5456_v22, 16  ;;  %v5387_v32 = vld [vmem:[#allocation2 + $0xd8] sm:$0xff]  ;;  %v5121_v43 = vrot.slane %v5119_v50, 1  ;;  %v4260_v45 = vpack.c.bf16 %v4215_v52, %v4215_v52  ;;  %v5114_v4 = vsel %vm4278_vm8, %v5109_v39, %v5113_v19  ;;  %v16352_v22 = vld [vmem:[#allocation2 + $0x50] sm:$0xff] }
 0x3ff   :  { %14510 = vmatmul.mubr.bf16.gmra.mrb[60].mxu1 %v5098_v44  ;;  %v5384_v44 = vld [vmem:[#allocation2 + $0xc0] sm:$0xff]  ;;  %v5459_v61 = vpack.c.bf16 %v5381_v62, %v5378_v46  ;;  %v5518_v51 = vrot.slane %v5516_v14, 3  ;;  %v5521_v15 = vrot.slane %v5519_v0, 4  ;;  %v5526_v59 = vrot.slane %v5524_v63, 3  ;;  %v5390_v14 = vld [vmem:[#allocation2 + $0xf0] sm:$0xff]  ;;  %v5393_v0 = vld [vmem:[#allocation2 + $0x108] sm:$0xff] }
 0x400   :  { %14513 = vmatprep.mubr.bf16.mxu1 %v5106_v60  ;;  %v6033_v60 = vor.u32 %v6032_v11, %v6029_v38  ;;  %v5122_v54 = vsel %vm4278_vm8, %v5117_v1, %v5121_v43  ;;  %v6660_v21 = vpack.c.bf16 %v16353_v58, %v16352_v22  ;;  %v5123_v50 = vshrl.u32 %v19886_v17, 16 }
 0x401   :  { %14602 = vmatmul.mubr.bf16.gmra.mrb[172].mxu0 %v6016_v12  ;;  %v5462_v12 = vpack.c.bf16 %v5387_v32, %v5384_v44  ;;  %v5127_v38 = vshll.u32 %v4260_v45, 16  ;;  %v5533_v11 = vshrl.u32 %v5459_v61, 16  ;;  %v5536_v52 = vshll.u32 %v5459_v61, 16  ;;  %v16354_v44 = vld [vmem:[#allocation2 + $0x80] sm:$0xff]  ;;  %v16355_v32 = vld [vmem:[#allocation2 + $0x98] sm:$0xff] }
 0x402   :  { %14605 = vmatprep.mubr.bf16.mxu0 %v6025_v41  ;;  %v5529_v41 = vrot.slane %v5527_v48, 4  ;;  %v6034_v53 = vsel %vm22928_vm15, %v6024_v23, %v6033_v60  ;;  %v5125_v19 = vor.u32 %v5123_v50, %v5121_v43  ;;  %v5522_v39 = vor.u32 %v5521_v15, %v5518_v51  ;;  %v5396_v48 = vld [vmem:[#allocation2 + $0x120] sm:$0xff]  ;;  %v5399_v23 = vld [vmem:[#allocation2 + $0x138] sm:$0xff]  ;;  %v16356_v51 = vld [vmem:[#allocation2 + $0xb0] sm:$0xff] }
 0x403   :  { %v5542_v46 = vshrl.u32 %v5462_v12, 16  ;;  %v5545_v62 = vshll.u32 %v5462_v12, 16  ;;  %v5129_v63 = vrot.slane %v5127_v38, 1  ;;  %v6663_v58 = vpack.c.bf16 %v16355_v32, %v16354_v44  ;;  %v16221_v12 = vld [vmem:[%s22287_s4 + $0x408] sm:$0xff]   ;;  %vm22931_vm15 = vmmov %vm22852_vm1 }
 0x404   :  { %v5530_v1 = vor.u32 %v5529_v41, %v5526_v59  ;;  %v5535_v45 = vrot.slane %v5533_v11, 3  ;;  %v5538_v60 = vrot.slane %v5536_v52, 4  ;;  %v5468_v61 = vpack.c.bf16 %v5399_v23, %v5396_v48  ;;  %v16357_v15 = vld [vmem:[#allocation2 + $0xc8] sm:$0xff]  ;;  %v5402_v11 = vld [vmem:[#allocation2 + $0x150] sm:$0xff] }
 0x405   :  { %v5130_v17 = vsel %vm4278_vm8, %v5125_v19, %v5129_v63  ;;  %v6666_v59 = vpack.c.bf16 %v16357_v15, %v16356_v51  ;;  %v5405_v52 = vld [vmem:[#allocation2 + $0x168] sm:$0xff] }
 0x406   :  { %v5531_v43 = vsel %vm22929_vm7, %v5522_v39, %v5530_v1  ;;  %v5539_v41 = vor.u32 %v5538_v60, %v5535_v45  ;;  %v5560_v38 = vshrl.u32 %v5468_v61, 16  ;;  %v5563_v19 = vshll.u32 %v5468_v61, 16  ;;  %v16222_v39 = vld [vmem:[%s22287_s4 + $0x410] sm:$0xff]   ;;  %v16217_v48 = vld [vmem:[%s22287_s4 + $0x2c8] sm:$0xff]   ;;  %vm22932_vm7 = vmmov %vm22852_vm1 }
 0x407   :  { %14514 = vmatmul.mubr.bf16.gmra.mrb[64].mxu1 %v5114_v4  ;;  %v5544_v4 = vrot.slane %v5542_v46, 3  ;;  %v5408_v46 = vld [vmem:[#allocation2 + $0x180] sm:$0xff]  ;;  %v5471_v32 = vpack.c.bf16 %v5405_v52, %v5402_v11  ;;  %v16363_v52 = vld [vmem:[#allocation2 + $0x158] sm:$0xff] }
 0x408   :  { %14517 = vmatprep.mubr.bf16.mxu1 %v5122_v54  ;;  %v5547_v54 = vrot.slane %v5545_v62, 4  ;;  %v5411_v62 = vld [vmem:[#allocation2 + $0x198] sm:$0xff]  ;;  %v5565_v45 = vrot.slane %v5563_v19, 4  ;;  %v16362_v11 = vld [vmem:[#allocation2 + $0x140] sm:$0xff] }
 0x409   :  { %14606 = vmatmul.mubr.bf16.gmra.mrb[176].mxu0 %v6034_v53  ;;  %v5474_v60 = vpack.c.bf16 %v5411_v62, %v5408_v46  ;;  %v5572_v51 = vshll.u32 %v5471_v32, 16  ;;  %v5423_v19 = vld [vmem:[#allocation2 + $0x1f8] sm:$0xff]  ;;  %v6675_v46 = vpack.c.bf16 %v16363_v52, %v16362_v11 }
 0x40a   :  { %14713 = vmatprep.mubr.bf16.mxu0 %v6660_v21  ;;  %v5465_v21 = vpack.c.bf16 %v5393_v0, %v5390_v14  ;;  %v5548_v50 = vor.u32 %v5547_v54, %v5544_v4  ;;  %v16358_v14 = vld [vmem:[#allocation2 + $0xe0] sm:$0xff]  ;;  %v16359_v0 = vld [vmem:[#allocation2 + $0xf8] sm:$0xff]  ;;  %v16218_v54 = vld [vmem:[%s22287_s4 + $0x2d0] sm:$0xff]  }
 0x40b   :  { %v6669_v63 = vpack.c.bf16 %v16359_v0, %v16358_v14  ;;  %v5574_v0 = vrot.slane %v5572_v51, 4 }
 0x40c   :  { %v5551_v53 = vshrl.u32 %v5465_v21, 16  ;;  %v5554_v22 = vshll.u32 %v5465_v21, 16  ;;  %v16224_v21 = vld [vmem:[%s22287_s4 + $0x418] sm:$0xff]  }
 0x40e   :  { %v5553_v23 = vrot.slane %v5551_v53, 3  ;;  %v5556_v44 = vrot.slane %v5554_v22, 4  ;;  %v5414_v53 = vld [vmem:[#allocation2 + $0x1b0] sm:$0xff]  ;;  %v5417_v22 = vld [vmem:[#allocation2 + $0x1c8] sm:$0xff] }
 0x40f   :  { %14518 = vmatmul.mubr.bf16.gmra.mrb[68].mxu1 %v5130_v17  ;;  %v5562_v17 = vrot.slane %v5560_v38, 3  ;;  %v5420_v38 = vld [vmem:[#allocation2 + $0x1e0] sm:$0xff] }
 0x410   :  { %14537 = vmatprep.mubr.bf16.mxu1 %v5531_v43  ;;  %v16360_v43 = vld [vmem:[#allocation2 + $0x110] sm:$0xff]  ;;  %v5557_v61 = vor.u32 %v5556_v44, %v5553_v23  ;;  %v5480_v44 = vpack.c.bf16 %v5423_v19, %v5420_v38 }
 0x411   :  { %14714 = vmatmul.mubr.bf16.vlgmr.msra.gmra.mrb[152].mxu0 %v6663_v58  ;;  %v5549_v58 = vsel %vm22852_vm1, %v5539_v41, %v5548_v50  ;;  %v5566_v15 = vor.u32 %v5565_v45, %v5562_v17  ;;  %v16365_v17 = vld [vmem:[#allocation2 + $0x188] sm:$0xff] }
 0x412   :  { %14717 = vmatprep.mubr.bf16.mxu0 %v6666_v59  ;;  %14830 = vmatpush3.bf16.msra.mxu0 %v19848_v36  ;;  %v5540_v36 = vsel %vm22930_vm10, %v5530_v1, %v5539_v41  ;;  %v16361_v1 = vld [vmem:[#allocation2 + $0x128] sm:$0xff]  ;;  %v5578_v59 = vshrl.u32 %v5474_v60, 16  ;;  %v5581_v41 = vshll.u32 %v5474_v60, 16  ;;  %v5558_v62 = vsel %vm22931_vm15, %v5548_v50, %v5557_v61  ;;  %v16223_v50 = vld [vmem:[%s22287_s4 + $0x2e0] sm:$0xff]   ;;  %vm22933_vm10 = vmmov %vm22852_vm1 }
 0x413   :  { %14831 = vmatprep.subr.bf16.mxu0 %v16221_v12  ;;  %v6672_v4 = vpack.c.bf16 %v16361_v1, %v16360_v43  ;;  %v5426_v1 = vld [vmem:[#allocation2 + $0x210] sm:$0xff]  ;;  %v5599_v51 = vshll.u32 %v5480_v44, 16  ;;  %vm22936_vm15 = vmmov %vm22852_vm1 }
 0x414   :  { %v5583_v23 = vrot.slane %v5581_v41, 4  ;;  %v5435_v41 = vld [vmem:[#allocation2 + $0x258] sm:$0xff] }
 0x416   :  { %14832 = vmatpush3.bf16.msra.mxu0 %v16221_v12  ;;  %v5569_v12 = vshrl.u32 %v5471_v32, 16  ;;  %v16227_v32 = vld [vmem:[%s22287_s4 + $0x428] sm:$0xff]  }
 0x417   :  { %14538 = vmatmul.mubr.bf16.vlgmr.msra.gmra.mrb[16].mxu1 %v5540_v36  ;;  %14833 = vmatprep.subr.bf16.mxu0 %v16222_v39  ;;  %v5567_v36 = vsel %vm22932_vm7, %v5557_v61, %v5566_v15  ;;  %vm22937_vm7 = vmmov %vm22852_vm1 }
 0x418   :  { %14541 = vmatprep.mubr.bf16.mxu1 %v5549_v58  ;;  %14610 = vmatpush3.bf16.msra.mxu1 %v19880_v24  ;;  %v16225_v24 = vld [vmem:[%s22287_s4 + $0x420] sm:$0xff]   ;;  %v5571_v14 = vrot.slane %v5569_v12, 3  ;;  %v16364_v58 = vld [vmem:[#allocation2 + $0x170] sm:$0xff]  ;;  %v5596_v12 = vshrl.u32 %v5480_v44, 16  ;;  %v5441_v44 = vld [vmem:[#allocation2 + $0x288] sm:$0xff] }
 0x419   :  { %14718 = vmatmul.mubr.bf16.gmra.mrb[156].mxu0 %v6669_v63  ;;  %14611 = vmatprep.subr.bf16.mxu1 %v16217_v48  ;;  %v5477_v63 = vpack.c.bf16 %v5417_v22, %v5414_v53  ;;  %v6678_v45 = vpack.c.bf16 %v16365_v17, %v16364_v58  ;;  %v16226_v22 = vld [vmem:[%s22287_s4 + $0x2e8] sm:$0xff]   ;;  %v16229_v17 = vld [vmem:[%s22287_s4 + $0x2f0] sm:$0xff]  }
 0x41a   :  { %14721 = vmatprep.mubr.bf16.mxu0 %v6672_v4  ;;  %14834 = vmatpush3.bf16.msra.mxu0 %v16222_v39  ;;  %v16220_v39 = vld [vmem:[%s22287_s4 + $0x2d8] sm:$0xff]   ;;  %v5575_v60 = vor.u32 %v5574_v0, %v5571_v14  ;;  %v5429_v4 = vld [vmem:[#allocation2 + $0x228] sm:$0xff]  ;;  %v5598_v0 = vrot.slane %v5596_v12, 3  ;;  %v5444_v12 = vld [vmem:[#allocation2 + $0x2a0] sm:$0xff] }
 0x41b   :  { %14835 = vmatprep.subr.bf16.mxu0 %v16224_v21  ;;  %v5590_v43 = vshll.u32 %v5477_v63, 16  ;;  %v5483_v53 = vpack.c.bf16 %v5429_v4, %v5426_v1 }
 0x41c   :  { %14612 = vmatpush3.bf16.msra.mxu1 %v16217_v48  ;;  %v5580_v48 = vrot.slane %v5578_v59, 3  ;;  %v5432_v59 = vld [vmem:[#allocation2 + $0x240] sm:$0xff]  ;;  %v5576_v38 = vsel %vm22933_vm10, %v5566_v15, %v5575_v60  ;;  %v16369_v15 = vld [vmem:[#allocation2 + $0x1e8] sm:$0xff]  ;;  %vm22938_vm10 = vmmov %vm22852_vm1 }
 0x41d   :  { %14613 = vmatprep.subr.bf16.mxu1 %v16218_v54  ;;  %v5592_v19 = vrot.slane %v5590_v43, 4  ;;  %v5486_v11 = vpack.c.bf16 %v5435_v41, %v5432_v59  ;;  %v5608_v58 = vshll.u32 %v5483_v53, 16  ;;  %v19963_v59 = vld [vmem:[%s22287_s4 + $0x4c0] sm:$0xff]  }
 0x41e   :  { %14836 = vmatpush3.bf16.msra.mxu0 %v16224_v21  ;;  %v5587_v21 = vshrl.u32 %v5477_v63, 16  ;;  %v5584_v61 = vor.u32 %v5583_v23, %v5580_v48  ;;  %v16230_v63 = vld [vmem:[%s22287_s4 + $0x438] sm:$0xff]   ;;  %v5438_v23 = vld [vmem:[#allocation2 + $0x270] sm:$0xff] }
 0x41f   :  { %14542 = vmatmul.mubr.bf16.gmra.mrb[20].mxu1 %v5558_v62  ;;  %14837 = vmatprep.subr.bf16.mxu0 %v16225_v24  ;;  %v16367_v62 = vld [vmem:[#allocation2 + $0x1b8] sm:$0xff]  ;;  %v5614_v43 = vshrl.u32 %v5486_v11, 16  ;;  %v5617_v1 = vshll.u32 %v5486_v11, 16  ;;  %v7419_v11 = vld [vmem:[#allocation2 + $0x68] sm:$0xff] }
 0x420   :  { %14545 = vmatprep.mubr.bf16.mxu1 %v5567_v36  ;;  %14614 = vmatpush3.bf16.msra.mxu1 %v16218_v54  ;;  %v16228_v54 = vld [vmem:[%s22287_s4 + $0x430] sm:$0xff]   ;;  %v5585_v52 = vsel %vm22852_vm1, %v5575_v60, %v5584_v61 }
 0x421   :  { %14722 = vmatmul.mubr.bf16.gmra.mrb[160].mxu0 %v6675_v46  ;;  %14615 = vmatprep.subr.bf16.mxu1 %v16220_v39  ;;  %v16366_v46 = vld [vmem:[#allocation2 + $0x1a0] sm:$0xff]  ;;  %v16368_v36 = vld [vmem:[#allocation2 + $0x1d0] sm:$0xff] }
 0x422   :  { %14725 = vmatprep.mubr.bf16.mxu0 %v6678_v45  ;;  %14838 = vmatpush3.bf16.msra.mxu0 %v16225_v24  ;;  %v5589_v24 = vrot.slane %v5587_v21, 3  ;;  %v6681_v14 = vpack.c.bf16 %v16367_v62, %v16366_v46  ;;  %v6684_v48 = vpack.c.bf16 %v16369_v15, %v16368_v36  ;;  %v22934_v45 = vld [vmem:[#allocation58_spill] sm:$0xff] }
 0x423   :  { %14839 = vmatprep.subr.bf16.mxu0 %v16227_v32  ;;  %v1821_v60 = vmul.f32 %v17924_v40, %v22934_v45  ;;  %v7416_v40 = vld [vmem:[#allocation2 + $0x50] sm:$0xfe]  ;;  %v5371_v45 = vld [vmem:[#allocation2 + $0x58] sm:$0xff] }
 0x424   :  { %14616 = vmatpush3.bf16.msra.mxu1 %v16220_v39  ;;  %v5601_v39 = vrot.slane %v5599_v51, 4  ;;  %v5593_v21 = vor.u32 %v5592_v19, %v5589_v24  ;;  %v5447_v51 = vld [vmem:[#allocation2 + $0x2b8] sm:$0xff] }
 0x425   :  { %14617 = vmatprep.subr.bf16.mxu1 %v16223_v50  ;;  %v19966_v41 = vadd.f32 %v22736_v33, %v1821_v60  ;;  %v5619_v33 = vrot.slane %v5617_v1, 4  ;;  %v19988_v60 = vld [vmem:[%s22287_s4 + $0x300] sm:$0xff]   ;;  %v5374_v1 = vld [vmem:[#allocation2 + $0x70] sm:$0xff] }
 0x426   :  { %14840 = vmatpush3.bf16.msra.mxu0 %v16227_v32  ;;  %v5605_v32 = vshrl.u32 %v5483_v53, 16  ;;  %v5602_v4 = vor.u32 %v5601_v39, %v5598_v0  ;;  %v16370_v53 = vld [vmem:[#allocation2 + $0x200] sm:$0xff]  ;;  %v5594_v62 = vsel %vm22936_vm15, %v5584_v61, %v5593_v21  ;;  %v5492_v0 = vpack.c.bf16 %v5447_v51, %v5444_v12  ;;  %vm22939_vm15 = vmmov %vm22852_vm1 }
 0x427   :  { %14546 = vmatmul.mubr.bf16.gmra.mrb[24].mxu1 %v5576_v38  ;;  %14841 = vmatprep.subr.bf16.mxu0 %v16228_v54  ;;  %22935 = vst [vmem:[#allocation49_spill] sm:$0xff] %v19966_v41  ;;  %v16371_v38 = vld [vmem:[#allocation2 + $0x218] sm:$0xff]  ;;  %v22472_v46 = vmax.f32 %v19966_v41, 0.0 }
 0x428   :  { %14549 = vmatprep.mubr.bf16.mxu1 %v5585_v52  ;;  %14618 = vmatpush3.bf16.msra.mxu1 %v16223_v50  ;;  %v5489_v50 = vpack.c.bf16 %v5441_v44, %v5438_v23  ;;  %v6687_v24 = vpack.c.bf16 %v16371_v38, %v16370_v53  ;;  %v5607_v19 = vrot.slane %v5605_v32, 3  ;;  %v16231_v52 = vld [vmem:[%s22287_s4 + $0x2f8] sm:$0xff]   ;;  %v16373_v23 = vld [vmem:[#allocation2 + $0x248] sm:$0xff]  ;;  %v19979_v44 = vld [vmem:[#allocation2 + $0x80] sm:$0xff]  ;;  %v5635_v53 = vshll.u32 %v5492_v0, 16 }
 0x429   :  { %14726 = vmatmul.mubr.bf16.gmra.mrb[164].mxu0 %v6681_v14  ;;  %14619 = vmatprep.subr.bf16.mxu1 %v16226_v22  ;;  %v5616_v14 = vrot.slane %v5614_v43, 3  ;;  %v2145_v15 = vsel %vm19711_vm9, %v22472_v46, 0.0  ;;  %v19981_v32 = vld [vmem:[#allocation2 + $0x98] sm:$0xff] }
 0x42a   :  { %14729 = vmatprep.mubr.bf16.mxu0 %v6684_v48  ;;  %14842 = vmatpush3.bf16.msra.mxu0 %v16228_v54  ;;  %v5610_v54 = vrot.slane %v5608_v58, 4  ;;  %v5623_v39 = vshrl.u32 %v5489_v50, 16  ;;  %v5626_v36 = vshll.u32 %v5489_v50, 16  ;;  %v16372_v48 = vld [vmem:[#allocation2 + $0x230] sm:$0xff]  ;;  %2247 = vst [vmem:[#allocation2 + $0x2e0] sm:$0xff] %v2145_v15  ;;  %v5377_v50 = vld [vmem:[#allocation2 + $0x88] sm:$0xff]  ;;  %v19992_v38 = vpack.c.bf16 %v19981_v32, %v19979_v44 }
 0x42b   :  { %14843 = vmatprep.subr.bf16.mxu0 %v16230_v63  ;;  %v6690_v61 = vpack.c.bf16 %v16373_v23, %v16372_v48  ;;  %v5368_v58 = vld [vmem:[#allocation2 + $0x40] sm:$0x80]  ;;  %v5620_v43 = vor.u32 %v5619_v33, %v5616_v14  ;;  %v16375_v14 = vld [vmem:[#allocation2 + $0x278] sm:$0xff]  ;;  %v19997_v15 = vld [vmem:[#allocation2 + $0xb0] sm:$0xff] }
 0x42c   :  { %14620 = vmatpush3.bf16.msra.mxu1 %v16226_v22  ;;  %v5603_v22 = vsel %vm22937_vm7, %v5593_v21, %v5602_v4  ;;  %v5611_v21 = vor.u32 %v5610_v54, %v5607_v19  ;;  %v5625_v12 = vrot.slane %v5623_v39, 3  ;;  %v5628_v51 = vrot.slane %v5626_v36, 4  ;;  %v16374_v54 = vld [vmem:[#allocation2 + $0x260] sm:$0xff]  ;;  %v16377_v39 = vld [vmem:[#allocation2 + $0x2a8] sm:$0xff]  ;;  %vm22940_vm7 = vmmov %vm22852_vm1 }
 0x42d   :  { %14621 = vmatprep.subr.bf16.mxu1 %v16229_v17  ;;  %v6693_v33 = vpack.c.bf16 %v16375_v14, %v16374_v54  ;;  %v19999_v48 = vld [vmem:[#allocation2 + $0xc8] sm:$0xff] }
 0x42e   :  { %14844 = vmatpush3.bf16.msra.mxu0 %v16230_v63  ;;  %v19983_v63 = vpack.c.bf16 %v7419_v11, %v7416_v40  ;;  %v5632_v40 = vshrl.u32 %v5492_v0, 16  ;;  %v5455_v11 = vpack.c.bf16 %v5371_v45, %v5368_v58  ;;  %v5612_v19 = vsel %vm22938_vm10, %v5602_v4, %v5611_v21  ;;  %v5380_v45 = vld [vmem:[#allocation2 + $0xa0] sm:$0xff]  ;;  %vm20029_vm10 = vmpackc.low %vm19711_vm9, %vm22707_vm14 }
 0x42f   :  { %14550 = vmatmul.mubr.bf16.gmra.mrb[28].mxu1 %v5594_v62  ;;  %14961 = vmatprep.subr.bf16.mxu0 %v19963_v59  ;;  %v5458_v62 = vpack.c.bf16 %v5377_v50, %v5374_v1  ;;  %v5621_v23 = vsel %vm22852_vm1, %v5611_v21, %v5620_v43  ;;  %v5637_v58 = vrot.slane %v5635_v53, 4  ;;  %v5383_v1 = vld [vmem:[#allocation2 + $0xb8] sm:$0xff]  ;;  %v7940_v50 = vshll.u32 %v19992_v38, 16  ;;  %v20006_v53 = vld [vmem:[#allocation2 + $0xe0] sm:$0xff]  ;;  %vm22945_vm14 = vmmov %vm22852_vm1 }
 0x430   :  { %14553 = vmatprep.mubr.bf16.mxu1 %v5603_v22  ;;  %14622 = vmatpush3.bf16.msra.mxu1 %v16229_v17  ;;  %v5450_v17 = vld [vmem:[#allocation2 + $0x2d0] sm:$0x7f]  ;;  %v6288_v54 = vshrl.u32 %v5455_v11, 16  ;;  %v6291_v14 = vshll.u32 %v5455_v11, 16  ;;  %v7509_v21 = vpack.c.bf16 %v19999_v48, %v19997_v15 }
 0x431   :  { %14730 = vmatmul.mubr.bf16.gmra.mrb[168].mxu0 %v6687_v24  ;;  %14623 = vmatprep.subr.bf16.mxu1 %v16231_v52  ;;  %v7935_v24 = vshll.u32 %v19983_v63, 16  ;;  %v16376_v22 = vld [vmem:[#allocation2 + $0x290] sm:$0xff]  ;;  %v5495_v36 = vpack.c.bf16 %v5450_v17, %v5450_v17  ;;  %v5389_v17 = vld [vmem:[#allocation2 + $0xe8] sm:$0xff]  ;;  %v6296_v46 = vshrl.u32 %v5458_v62, 16  ;;  %v6299_v20 = vshll.u32 %v5458_v62, 16 }
 0x432   :  { %14733 = vmatprep.mubr.bf16.mxu0 %v6690_v61  ;;  %v6696_v0 = vpack.c.bf16 %v16377_v39, %v16376_v22  ;;  %v5634_v61 = vrot.slane %v5632_v40, 3  ;;  %v5386_v22 = vld [vmem:[#allocation2 + $0xd0] sm:$0xff]  ;;  %v16378_v39 = vld [vmem:[#allocation2 + $0x2c0] sm:$0xff]  ;;  %v7942_v6 = vrot.slane %v7940_v50, 1  ;;  %v6290_v31 = vrot.slane %v6288_v54, 3 }
 0x433   :  { %v7937_v4 = vrot.slane %v7935_v24, 1  ;;  %v5644_v40 = vshll.u32 %v5495_v36, 16  ;;  %v20008_v24 = vld [vmem:[#allocation2 + $0xf8] sm:$0xff]  ;;  %v5464_v13 = vpack.c.bf16 %v5389_v17, %v5386_v22  ;;  %v6293_v49 = vrot.slane %v6291_v14, 4  ;;  %v5392_v14 = vld [vmem:[#allocation2 + $0x100] sm:$0xff] }
 0x434   :  { %14624 = vmatpush3.bf16.msra.mxu1 %v16231_v52  ;;  %v5629_v52 = vor.u32 %v5628_v51, %v5625_v12  ;;  %v7933_v12 = vshrl.u32 %v19983_v63, 16  ;;  %v5641_v51 = vshrl.u32 %v5495_v36, 16  ;;  %v20014_v63 = vld [vmem:[#allocation2 + $0x128] sm:$0xff]  ;;  %v6298_v36 = vrot.slane %v6296_v46, 3  ;;  %v5395_v22 = vld [vmem:[#allocation2 + $0x118] sm:$0xff] }
 0x435   :  { %14653 = vmatprep.subr.bf16.mxu1 %v19988_v60  ;;  %v6301_v7 = vrot.slane %v6299_v20, 4  ;;  %v7948_v16 = vshll.u32 %v7509_v21, 16  ;;  %v6317_v50 = vshll.u32 %v5464_v13, 16  ;;  %v22941_v17 = vmov 0 }
 0x436   :  { %v5630_v11 = vsel %vm22939_vm15, %v5620_v43, %v5629_v52  ;;  %v7938_v62 = vor.u32 %v7937_v4, %v7933_v12  ;;  %v5643_v43 = vrot.slane %v5641_v51, 3  ;;  %v6314_v4 = vshrl.u32 %v5464_v13, 16  ;;  %vm22951_vm15 = vmmov %vm22852_vm1 }
 0x437   :  { %14554 = vmatmul.mubr.bf16.gmra.mrb[32].mxu1 %v5612_v19  ;;  %v5461_v19 = vpack.c.bf16 %v5383_v1, %v5380_v45  ;;  %v20018_v45 = vpack.c.bf16 %v20008_v24, %v20006_v53  ;;  %v22942_v17 = vsel %vm20029_vm10, 4294967295, %v22941_v17  ;;  %v6294_v12 = vor.u32 %v6293_v49, %v6290_v31 }
 0x438   :  { %14557 = vmatprep.mubr.bf16.mxu1 %v5621_v23  ;;  %v5638_v23 = vor.u32 %v5637_v58, %v5634_v61  ;;  %v5646_v61 = vrot.slane %v5644_v40, 4  ;;  %v7943_v20 = vsel %vm4278_vm8, %v7938_v62, %v7942_v6  ;;  %22943 = vst [vmem:[#allocation50_spill] sm:$0xff] %v22942_v17  ;;  %v6302_v51 = vor.u32 %v6301_v7, %v6298_v36  ;;  %v20047_v36 = vld [vmem:[#allocation2 + $0x188] sm:$0xff] }
 0x439   :  { %14734 = vmatmul.mubr.bf16.gmra.mrb[172].mxu0 %v6693_v33  ;;  %v7944_v33 = vshrl.u32 %v19992_v38, 16  ;;  %v6305_v58 = vshrl.u32 %v5461_v19, 16  ;;  %v6308_v38 = vshll.u32 %v5461_v19, 16  ;;  %v7950_v40 = vrot.slane %v7948_v16, 1 }
 0x43a   :  { %14737 = vmatprep.mubr.bf16.mxu0 %v6696_v0  ;;  %v20012_v0 = vld [vmem:[#allocation2 + $0x110] sm:$0xff]  ;;  %v5639_v1 = vsel %vm22940_vm7, %v5629_v52, %v5638_v23  ;;  %v22944_v52 = vmax.f32 %v19705_v55, 0.0  ;;  %v7952_v19 = vshrl.u32 %v7509_v21, 16  ;;  %v7956_v62 = vshll.u32 %v20018_v45, 16  ;;  %vm22955_vm7 = vmmov %vm22852_vm1 }
 0x43b   :  { %v20023_v54 = vpack.c.bf16 %v20014_v63, %v20012_v0  ;;  %v7946_v46 = vor.u32 %v7944_v33, %v7942_v6  ;;  %v5398_v6 = vld [vmem:[#allocation2 + $0x130] sm:$0xff]  ;;  %v5647_v33 = vor.u32 %v5646_v61, %v5643_v43  ;;  %v6310_v47 = vrot.slane %v6308_v38, 4 }
 0x43c   :  { %v16590_v13 = vpack.c.bf16 %v22944_v52, %v16378_v39  ;;  %v6316_v57 = vrot.slane %v6314_v4, 3  ;;  %v6319_v27 = vrot.slane %v6317_v50, 4  ;;  %v5467_v39 = vpack.c.bf16 %v5395_v22, %v5392_v14  ;;  %v20039_v52 = vld [vmem:[#allocation2 + $0x140] sm:$0xff]  ;;  %v20045_v21 = vld [vmem:[#allocation2 + $0x170] sm:$0xff]  ;;  %v16237_v14 = vld [vmem:[%s22287_s4 + $0x4c8] sm:$0xff]  }
 0x43d   :  { %v7964_v55 = vshll.u32 %v20023_v54, 16  ;;  %v6303_v16 = vsel %vm22945_vm14, %v6294_v12, %v6302_v51  ;;  %v7954_v49 = vor.u32 %v7952_v19, %v7950_v40  ;;  %v7960_v31 = vshrl.u32 %v20018_v45, 16  ;;  %v20070_v12 = vld [vmem:[#allocation2 + $0x160] sm:$0xff]  ;;  %v20074_v19 = vld [vmem:[#allocation2 + $0x190] sm:$0xff]  ;;  %vm22962_vm14 = vmmov %vm22852_vm1 }
 0x43e   :  { %v5648_v43 = vsel %vm22852_vm1, %v5638_v23, %v5647_v33  ;;  %v7951_v61 = vsel %vm4278_vm8, %v7946_v46, %v7950_v40  ;;  %v20051_v4 = vor.u32 %v6319_v27, %v6316_v57  ;;  %v6323_v45 = vshrl.u32 %v5467_v39, 16  ;;  %v20066_v27 = vld [vmem:[#allocation2 + $0x1a0] sm:$0xff]  ;;  %v20068_v57 = vld [vmem:[#allocation2 + $0x1b8] sm:$0xff]  ;;  %v20078_v33 = vld [vmem:[#allocation2 + $0x1a8] sm:$0xff] }
 0x43f   :  { %14558 = vmatmul.mubr.bf16.gmra.mrb[36].mxu1 %v5630_v11  ;;  %v5401_v11 = vld [vmem:[#allocation2 + $0x148] sm:$0xff]  ;;  %v20053_v50 = vrot.slane %v7964_v55, 1  ;;  %v6326_v23 = vshll.u32 %v5467_v39, 16  ;;  %v20072_v40 = vld [vmem:[#allocation2 + $0x178] sm:$0xff]  ;;  %22946 = vst [vmem:[#allocation32_spill] sm:$0xff] %v20078_v33  ;;  %v20084_v55 = vld [vmem:[#allocation2 + $0x1f0] sm:$0xff]  ;;  %v20117_v10 = vpack.c.bf16 %v20068_v57, %v20066_v27 }
 0x440   :  { %14561 = vmatprep.mubr.bf16.mxu1 %v5639_v1  ;;  %v6307_v1 = vrot.slane %v6305_v58, 3  ;;  %v5470_v7 = vpack.c.bf16 %v5401_v11, %v5398_v6  ;;  %v7958_v58 = vrot.slane %v7956_v62, 1  ;;  %v7968_v11 = vshrl.u32 %v20023_v54, 16  ;;  %v20080_v62 = vld [vmem:[#allocation2 + $0x1c0] sm:$0xff]  ;;  %22949 = vst [vmem:[#allocation52_spill] sm:$0xff] %v20084_v55  ;;  %v20086_v39 = vld [vmem:[#allocation2 + $0x208] sm:$0xff] }
 0x441   :  { %16591 = vmatmul.mubr.msk.bf16.gmra.mrb[176].mxu0 %vm20029_vm10, %v16590_v13  ;;  %v20041_v13 = vld [vmem:[#allocation2 + $0x158] sm:$0xff]  ;;  %22947 = vst [vmem:[#allocation34_spill] sm:$0xff] %v20080_v62  ;;  %22950 = vst [vmem:[#allocation36_spill] sm:$0xff] %v20086_v39  ;;  %v20094_v54 = vld [vmem:[#allocation2 + $0x250] sm:$0xff]  ;;  %v6325_v42 = vrot.slane %v6323_v45, 3  ;;  %v5473_v9 = vpack.c.bf16 %v20072_v40, %v20070_v12 }
 0x442   :  { %14845 = vmatprep.mubr.bf16.mxu0 %v7943_v20  ;;  %v6311_v38 = vor.u32 %v6310_v47, %v6307_v1  ;;  %v20057_v20 = vpack.c.bf16 %v20041_v13, %v20039_v52  ;;  %v6332_v22 = vshrl.u32 %v5470_v7, 16  ;;  %v6335_v46 = vshll.u32 %v5470_v7, 16  ;;  %v20082_v1 = vld [vmem:[#allocation2 + $0x1d8] sm:$0xff]  ;;  %22954 = vst [vmem:[#allocation54_spill] sm:$0xff] %v20094_v54  ;;  %v16233_v45 = vld [vmem:[%s22287_s4 + $0x308] sm:$0xff]  }
 0x443   :  { %v20064_v47 = vpack.c.bf16 %v20047_v36, %v20045_v21  ;;  %v7959_v6 = vsel %vm4278_vm8, %v7954_v49, %v7958_v58  ;;  %22948 = vst [vmem:[#allocation51_spill] sm:$0xff] %v20082_v1  ;;  %v20092_v49 = vld [vmem:[#allocation2 + $0x238] sm:$0xff]  ;;  %v7970_v26 = vor.u32 %v7968_v11, %v20053_v50  ;;  %v20110_v11 = vld [vmem:[#allocation2 + $0x2b0] sm:$0xff] }
 0x444   :  { %v6312_v7 = vsel %vm22951_vm15, %v6302_v51, %v6311_v38  ;;  %22953 = vst [vmem:[#allocation53_spill] sm:$0xff] %v20092_v49  ;;  %v7972_v25 = vshll.u32 %v20057_v20, 16  ;;  %v16238_v51 = vld [vmem:[%s22287_s4 + $0x4d0] sm:$0xff]   ;;  %v6337_v3 = vrot.slane %v6335_v46, 4  ;;  %22959 = vst [vmem:[#allocation23_spill] sm:$0xff] %v20110_v11 }
 0x445   :  { %v7980_v35 = vshll.u32 %v20064_v47, 16  ;;  %v20125_v46 = vld [vmem:[#allocation2 + $0x1d0] sm:$0xff]  ;;  %vm22965_vm15 = vmmov %vm22852_vm1 }
 0x446   :  { %v7974_v56 = vrot.slane %v7972_v25, 1  ;;  %v20155_v5 = vpack.c.bf16 %v20127_v37, %v20125_v46 }
 0x447   :  { %14562 = vmatmul.mubr.bf16.gmra.mrb[40].mxu1 %v5648_v43  ;;  %v20090_v43 = vld [vmem:[#allocation2 + $0x220] sm:$0xff]  ;;  %v7982_v29 = vrot.slane %v7980_v35, 1  ;;  %v7984_v35 = vshrl.u32 %v20064_v47, 16 }
 0x448   :  { %14625 = vmatprep.mubr.bf16.mxu1 %v6303_v16  ;;  %v7962_v16 = vor.u32 %v7960_v31, %v7958_v58  ;;  %22952 = vst [vmem:[#allocation38_spill] sm:$0xff] %v20090_v43  ;;  %v20105_v31 = vld [vmem:[#allocation2 + $0x280] sm:$0xff]  ;;  %v6328_v58 = vrot.slane %v6326_v23, 4  ;;  %v20121_v23 = vld [vmem:[#allocation2 + $0x2c8] sm:$0xff]  ;;  %22961 = vst [vmem:[#allocation74_spill] sm:$0xff] %v20155_v5 }
 0x449   :  { %14846 = vmatmul.mubr.bf16.vlgmr.msra.gmra.mrb[152].mxu0 %v7951_v61  ;;  %v6321_v61 = vsel %vm22955_vm7, %v6311_v38, %v20051_v4  ;;  %22957 = vst [vmem:[#allocation7_spill] sm:$0xff] %v20105_v31  ;;  %v20108_v38 = vld [vmem:[#allocation2 + $0x298] sm:$0xff]  ;;  %22960 = vst [vmem:[#allocation56_spill] sm:$0xff] %v20121_v23 }
 0x44a   :  { %14849 = vmatprep.mubr.bf16.mxu0 %v7959_v6  ;;  %14962 = vmatpush3.bf16.msra.mxu0 %v19963_v59  ;;  %v20103_v59 = vld [vmem:[#allocation2 + $0x268] sm:$0xff]  ;;  %v6334_v6 = vrot.slane %v6332_v22, 3  ;;  %22958 = vst [vmem:[#allocation55_spill] sm:$0xff] %v20108_v38  ;;  %v5476_v22 = vpack.c.bf16 %v20078_v33, %v20074_v19  ;;  %v7967_v25 = vsel %vm4278_vm8, %v7962_v16, %v20053_v50  ;;  %v6341_v50 = vshrl.u32 %v5473_v9, 16  ;;  %vm22967_vm7 = vmmov %vm22852_vm1 }
 0x44b   :  { %14963 = vmatprep.subr.bf16.mxu0 %v16237_v14  ;;  %22956 = vst [vmem:[#allocation8_spill] sm:$0xff] %v20103_v59  ;;  %v6329_v2 = vor.u32 %v6328_v58, %v6325_v42  ;;  %v6344_v16 = vshll.u32 %v5473_v9, 16  ;;  %v7988_v42 = vshll.u32 %v20117_v10, 16  ;;  %v5482_v33 = vpack.c.bf16 %v20086_v39, %v20084_v55  ;;  %v20206_v39 = vld [vmem:[#allocation2 + $0x260] sm:$0xff]  ;;  %v16242_v55 = vld [vmem:[%s22287_s4 + $0x328] sm:$0xff]  }
 0x44c   :  { %v6350_v58 = vshrl.u32 %v5476_v22, 16  ;;  %v6353_v18 = vshll.u32 %v5476_v22, 16  ;;  %v16236_v22 = vld [vmem:[%s22287_s4 + $0x318] sm:$0xff]  }
 0x44d   :  { %v6330_v9 = vsel %vm22962_vm14, %v20051_v4, %v6329_v2  ;;  %v5479_v4 = vpack.c.bf16 %v20082_v1, %v20080_v62  ;;  %v7990_v34 = vrot.slane %v7988_v42, 1  ;;  %v20208_v1 = vld [vmem:[#allocation2 + $0x278] sm:$0xff]  ;;  %v5488_v62 = vpack.c.bf16 %v20103_v59, %v20094_v54  ;;  %v8652_v54 = vld [vmem:[#allocation2 + $0x68] sm:$0x80]  ;;  %vm22969_vm14 = vmmov %vm22852_vm1 }
 0x44e   :  { %14964 = vmatpush3.bf16.msra.mxu0 %v16237_v14  ;;  %v16240_v14 = vld [vmem:[%s22287_s4 + $0x4d8] sm:$0xff]   ;;  %v6352_v17 = vrot.slane %v6350_v58, 3  ;;  %v6355_v41 = vrot.slane %v6353_v18, 4  ;;  %v16239_v58 = vld [vmem:[%s22287_s4 + $0x320] sm:$0xff]  }
 0x44f   :  { %14626 = vmatmul.mubr.bf16.vlgmr.msra.gmra.mrb[44].mxu1 %v6312_v7  ;;  %14965 = vmatprep.subr.bf16.mxu0 %v16238_v51  ;;  %v7975_v7 = vsel %vm4278_vm8, %v7970_v26, %v7974_v56  ;;  %v20162_v26 = vld [vmem:[#allocation2 + $0x218] sm:$0xff]  ;;  %v6386_v59 = vshrl.u32 %v5488_v62, 16 }
 0x450   :  { %14629 = vmatprep.mubr.bf16.mxu1 %v6321_v61  ;;  %14654 = vmatpush3.bf16.msra.mxu1 %v19988_v60  ;;  %v20157_v61 = vor.u32 %v6337_v3, %v6334_v6  ;;  %v7976_v60 = vshrl.u32 %v20057_v20, 16  ;;  %v16241_v3 = vld [vmem:[%s22287_s4 + $0x4e0] sm:$0xff]  }
 0x451   :  { %14850 = vmatmul.mubr.bf16.gmra.mrb[156].mxu0 %v7967_v25  ;;  %14655 = vmatprep.subr.bf16.mxu1 %v16233_v45  ;;  %v20160_v25 = vld [vmem:[#allocation2 + $0x200] sm:$0xff] }
 0x452   :  { %14853 = vmatprep.mubr.bf16.mxu0 %v7975_v7  ;;  %14966 = vmatpush3.bf16.msra.mxu0 %v16238_v51  ;;  %v7978_v6 = vor.u32 %v7976_v60, %v7974_v56  ;;  %v7986_v7 = vor.u32 %v7984_v35, %v7982_v29  ;;  %v7996_v51 = vshll.u32 %v20155_v5, 16  ;;  %v20174_v28 = vpack.c.bf16 %v20162_v26, %v20160_v25  ;;  %v20183_v60 = vld [vmem:[#allocation2 + $0x230] sm:$0xff]  ;;  %v20185_v35 = vld [vmem:[#allocation2 + $0x248] sm:$0xff] }
 0x453   :  { %14967 = vmatprep.subr.bf16.mxu0 %v16240_v14  ;;  %v6339_v8 = vsel %vm22852_vm1, %v6329_v2, %v20157_v61  ;;  %v6346_v56 = vrot.slane %v6344_v16, 4  ;;  %v16243_v2 = vld [vmem:[%s22287_s4 + $0x4e8] sm:$0xff]   ;;  %v20197_v18 = vpack.c.bf16 %v20185_v35, %v20183_v60 }
 0x454   :  { %14656 = vmatpush3.bf16.msra.mxu1 %v16233_v45  ;;  %22963 = vst [vmem:[#allocation59_spill] sm:$0xff] %v20174_v28  ;;  %v6343_v45 = vrot.slane %v6341_v50, 3  ;;  %v7983_v50 = vsel %vm4278_vm8, %v7978_v6, %v7982_v29  ;;  %v7991_v16 = vsel %vm4278_vm8, %v7986_v7, %v7990_v34  ;;  %v8004_v42 = vshll.u32 %v20174_v28, 16 }
 0x455   :  { %14657 = vmatprep.subr.bf16.mxu1 %v16234_v30  ;;  %22964 = vst [vmem:[#allocation10_spill] sm:$0xff] %v20197_v18  ;;  %v7992_v29 = vshrl.u32 %v20117_v10, 16  ;;  %v6362_v6 = vshll.u32 %v5479_v4, 16  ;;  %v8000_v7 = vshrl.u32 %v20155_v5, 16 }
 0x456   :  { %14968 = vmatpush3.bf16.msra.mxu0 %v16240_v14  ;;  %v7998_v14 = vrot.slane %v7996_v51, 1  ;;  %v6368_v51 = vshrl.u32 %v5482_v33, 16 }
 0x457   :  { %14630 = vmatmul.mubr.bf16.gmra.mrb[48].mxu1 %v6330_v9  ;;  %14969 = vmatprep.subr.bf16.mxu0 %v16241_v3  ;;  %v20203_v9 = vor.u32 %v6355_v41, %v6352_v17  ;;  %v8012_v41 = vshll.u32 %v20197_v18, 16  ;;  %v5485_v17 = vpack.c.bf16 %v20092_v49, %v20090_v43 }
 0x458   :  { %14633 = vmatprep.mubr.bf16.mxu1 %v6339_v8  ;;  %14658 = vmatpush3.bf16.msra.mxu1 %v16234_v30  ;;  %v6347_v8 = vor.u32 %v6346_v56, %v6343_v45  ;;  %v6359_v30 = vshrl.u32 %v5479_v4, 16  ;;  %v16244_v45 = vld [vmem:[%s22287_s4 + $0x4f0] sm:$0xff]   ;;  %v7994_v56 = vor.u32 %v7992_v29, %v7990_v34  ;;  %v8006_v4 = vrot.slane %v8004_v42, 1 }
 0x459   :  { %14854 = vmatmul.mubr.bf16.gmra.mrb[160].mxu0 %v7983_v50  ;;  %14659 = vmatprep.subr.bf16.mxu1 %v16236_v22  ;;  %v6371_v50 = vshll.u32 %v5482_v33, 16  ;;  %v20216_v33 = vld [vmem:[#allocation2 + $0x290] sm:$0xff]  ;;  %v6364_v29 = vrot.slane %v6362_v6, 4  ;;  %v20227_v42 = vpack.c.bf16 %v20208_v1, %v20206_v39  ;;  %v6370_v49 = vrot.slane %v6368_v51, 3 }
 0x45a   :  { %14857 = vmatprep.mubr.bf16.mxu0 %v7991_v16  ;;  %14970 = vmatpush3.bf16.msra.mxu0 %v16241_v3  ;;  %v8002_v16 = vor.u32 %v8000_v7, %v7998_v14  ;;  %v20218_v3 = vld [vmem:[#allocation2 + $0x2a8] sm:$0xff]  ;;  %v6348_v34 = vsel %vm22965_vm15, %v20157_v61, %v6347_v8  ;;  %v6357_v7 = vsel %vm22967_vm7, %v6347_v8, %v20203_v9  ;;  %v16246_v61 = vld [vmem:[%s22287_s4 + $0x4f8] sm:$0xff]   ;;  %v8014_v6 = vrot.slane %v8012_v41, 1  ;;  %v20248_v41 = vld [vmem:[#allocation2 + $0x2c0] sm:$0xff] }
 0x45b   :  { %14971 = vmatprep.subr.bf16.mxu0 %v16243_v2  ;;  %22966 = vst [vmem:[#allocation21_spill] sm:$0xff] %v20227_v42  ;;  %v6373_v43 = vrot.slane %v6371_v50, 4  ;;  %v6377_v51 = vshrl.u32 %v5485_v17, 16  ;;  %v6380_v50 = vshll.u32 %v5485_v17, 16  ;;  %v20250_v17 = vld [vmem:[#allocation2 + $0x2d8] sm:$0xff]  ;;  %vm22970_vm15 = vmmov %vm22852_vm1 }
 0x45c   :  { %14660 = vmatpush3.bf16.msra.mxu1 %v16236_v22  ;;  %v6361_v22 = vrot.slane %v6359_v30, 3  ;;  %v7999_v30 = vsel %vm4278_vm8, %v7994_v56, %v7998_v14  ;;  %v8007_v8 = vsel %vm4278_vm8, %v8002_v16, %v8006_v4  ;;  %v8008_v14 = vshrl.u32 %v20174_v28, 16  ;;  %vm22971_vm7 = vmmov %vm22852_vm1 }
 0x45d   :  { %14661 = vmatprep.subr.bf16.mxu1 %v16239_v58  ;;  %v6374_v56 = vor.u32 %v6373_v43, %v6370_v49  ;;  %v6389_v16 = vshll.u32 %v5488_v62, 16  ;;  %v6379_v43 = vrot.slane %v6377_v51, 3  ;;  %v6382_v49 = vrot.slane %v6380_v50, 4  ;;  %v16247_v62 = vld [vmem:[%s22287_s4 + $0x338] sm:$0xff]  }
 0x45e   :  { %14972 = vmatpush3.bf16.msra.mxu0 %v16243_v2  ;;  %v20239_v2 = vpack.c.bf16 %v20218_v3, %v20216_v33  ;;  %v20265_v5 = vpack.c.bf16 %v20250_v17, %v20248_v41  ;;  %v6388_v51 = vrot.slane %v6386_v59, 3  ;;  %v7500_v59 = vld [vmem:[#allocation2 + $0x2f0] sm:$0x1] }
 0x45f   :  { %14634 = vmatmul.mubr.bf16.gmra.mrb[52].mxu1 %v6348_v34  ;;  %14973 = vmatprep.subr.bf16.mxu0 %v16244_v45  ;;  %v16245_v34 = vld [vmem:[%s22287_s4 + $0x330] sm:$0xff]   ;;  %v6391_v50 = vrot.slane %v6389_v16, 4  ;;  %v8742_v16 = vpack.c.bf16 %v19997_v15, %v19981_v32  ;;  %v7545_v32 = vpack.c.bf16 %v7500_v59, %v7500_v59 }
 0x460   :  { %14637 = vmatprep.mubr.bf16.mxu1 %v6357_v7  ;;  %14662 = vmatpush3.bf16.msra.mxu1 %v16239_v58  ;;  %22968 = vst [vmem:[#allocation60_spill] sm:$0xff] %v20239_v2  ;;  %v6365_v7 = vor.u32 %v6364_v29, %v6361_v22  ;;  %v8020_v58 = vshll.u32 %v20227_v42, 16  ;;  %v8010_v22 = vor.u32 %v8008_v14, %v8006_v4  ;;  %v8028_v29 = vshll.u32 %v20239_v2, 16 }
 0x461   :  { %14858 = vmatmul.mubr.bf16.gmra.mrb[164].mxu0 %v7999_v30  ;;  %14663 = vmatprep.subr.bf16.mxu1 %v16242_v55  ;;  %v8016_v30 = vshrl.u32 %v20197_v18, 16  ;;  %v5494_v14 = vpack.c.bf16 %v20121_v23, %v20110_v11  ;;  %v9195_v11 = vshrl.u32 %v8742_v16, 16 }
 0x462   :  { %14861 = vmatprep.mubr.bf16.mxu0 %v8007_v8  ;;  %14974 = vmatpush3.bf16.msra.mxu0 %v16244_v45  ;;  %v20255_v8 = vld [vmem:[%s22287_s4 + $0x580] sm:$0xff]   ;;  %v6366_v18 = vsel %vm22969_vm14, %v20203_v9, %v6365_v7  ;;  %v8022_v28 = vrot.slane %v8020_v58, 1  ;;  %v6375_v4 = vsel %vm22852_vm1, %v6365_v7, %v6374_v56  ;;  %v8015_v9 = vsel %vm4278_vm8, %v8010_v22, %v8014_v6  ;;  %vm22972_vm14 = vmmov %vm22852_vm1 }
 0x463   :  { %14975 = vmatprep.subr.bf16.mxu0 %v16246_v61  ;;  %v8018_v45 = vor.u32 %v8016_v30, %v8014_v6  ;;  %v8030_v58 = vrot.slane %v8028_v29, 1  ;;  %v8739_v30 = vpack.c.bf16 %v19979_v44, %v8652_v54  ;;  %v8024_v7 = vshrl.u32 %v20227_v42, 16 }
 0x464   :  { %14664 = vmatpush3.bf16.msra.mxu1 %v16242_v55  ;;  %v5491_v55 = vpack.c.bf16 %v20108_v38, %v20105_v31  ;;  %v8032_v44 = vshrl.u32 %v20239_v2, 16  ;;  %v8036_v54 = vshll.u32 %v20265_v5, 16  ;;  %v6392_v22 = vor.u32 %v6391_v50, %v6388_v51 }
 0x465   :  { %14665 = vmatprep.subr.bf16.mxu1 %v16245_v34  ;;  %v8026_v29 = vor.u32 %v8024_v7, %v8022_v28  ;;  %v9187_v15 = vshrl.u32 %v8739_v30, 16  ;;  %v9190_v38 = vshll.u32 %v8739_v30, 16  ;;  %v8745_v7 = vpack.c.bf16 %v20006_v53, %v19999_v48 }
 0x466   :  { %14976 = vmatpush3.bf16.msra.mxu0 %v16246_v61  ;;  %v8023_v61 = vsel %vm4278_vm8, %v8018_v45, %v8022_v28  ;;  %v6395_v6 = vshrl.u32 %v5491_v55, 16  ;;  %v6404_v45 = vshrl.u32 %v5494_v14, 16  ;;  %v8038_v31 = vrot.slane %v8036_v54, 1 }
 0x467   :  { %14638 = vmatmul.mubr.bf16.gmra.mrb[56].mxu1 %v6366_v18  ;;  %15093 = vmatprep.subr.bf16.mxu0 %v20255_v8  ;;  %v6383_v18 = vor.u32 %v6382_v49, %v6379_v43  ;;  %v6407_v43 = vshll.u32 %v5494_v14, 16  ;;  %v5452_v49 = vld [vmem:[#allocation2 + $0x2e0] sm:$0x7f]  ;;  %v8031_v51 = vsel %vm4278_vm8, %v8026_v29, %v8030_v58  ;;  %v9189_v30 = vrot.slane %v9187_v15, 3 }
 0x468   :  { %14641 = vmatprep.mubr.bf16.mxu1 %v6375_v4  ;;  %14666 = vmatpush3.bf16.msra.mxu1 %v16245_v34  ;;  %v20282_v4 = vld [vmem:[%s22287_s4 + $0x380] sm:$0xff]   ;;  %v6398_v34 = vshll.u32 %v5491_v55, 16  ;;  %v6397_v2 = vrot.slane %v6395_v6, 3  ;;  %v5497_v55 = vpack.c.bf16 %v5452_v49, %v5452_v49  ;;  %v6406_v50 = vrot.slane %v6404_v45, 3 }
 0x469   :  { %14862 = vmatmul.mubr.bf16.gmra.mrb[168].mxu0 %v8015_v9  ;;  %14667 = vmatprep.subr.bf16.mxu1 %v16247_v62  ;;  %v8034_v9 = vor.u32 %v8032_v44, %v8030_v58  ;;  %v6384_v23 = vsel %vm22970_vm15, %v6374_v56, %v6383_v18  ;;  %v6393_v28 = vsel %vm22971_vm7, %v6383_v18, %v6392_v22  ;;  %v6409_v14 = vrot.slane %v6407_v43, 4  ;;  %vm22973_vm15 = vmmov %vm22852_vm1 }
 0x46a   :  { %14865 = vmatprep.mubr.bf16.mxu0 %v8023_v61  ;;  %v9198_v61 = vshll.u32 %v8742_v16, 16  ;;  %v6400_v42 = vrot.slane %v6398_v34, 4  ;;  %v8044_v56 = vshll.u32 %v7545_v32, 16  ;;  %v9192_v59 = vrot.slane %v9190_v38, 4  ;;  %vm22974_vm7 = vmmov %vm22852_vm1 }
 0x46b   :  { %v9197_v16 = vrot.slane %v9195_v11, 3  ;;  %v8040_v58 = vshrl.u32 %v20265_v5, 16  ;;  %v6413_v54 = vshrl.u32 %v5497_v55, 16  ;;  %v6416_v6 = vshll.u32 %v5497_v55, 16 }
 0x46c   :  { %14668 = vmatpush3.bf16.msra.mxu1 %v16247_v62  ;;  %v8039_v62 = vsel %vm4278_vm8, %v8034_v9, %v8038_v31  ;;  %v9200_v44 = vrot.slane %v9198_v61, 4  ;;  %v6401_v18 = vor.u32 %v6400_v42, %v6397_v2  ;;  %v6410_v34 = vor.u32 %v6409_v14, %v6406_v50 }
 0x46d   :  { %14741 = vmatprep.subr.bf16.mxu1 %v20282_v4  ;;  %v8042_v29 = vor.u32 %v8040_v58, %v8038_v31  ;;  %v8046_v45 = vrot.slane %v8044_v56, 1  ;;  %v9204_v43 = vshrl.u32 %v8745_v7, 16  ;;  %v9207_v49 = vshll.u32 %v8745_v7, 16 }
 0x46e   :  { %v9193_v9 = vor.u32 %v9192_v59, %v9189_v30  ;;  %v9201_v48 = vor.u32 %v9200_v44, %v9197_v16  ;;  %v6402_v11 = vsel %vm22972_vm14, %v6392_v22, %v6401_v18  ;;  %v6415_v32 = vrot.slane %v6413_v54, 3  ;;  %v16379_v16 = vld [vmem:[#allocation2 + $0x48] sm:$0xff]  ;;  %vm22975_vm14 = vmmov %vm22852_vm1 }
 0x46f   :  { %14642 = vmatmul.mubr.bf16.gmra.mrb[60].mxu1 %v6384_v23  ;;  %v8748_v23 = vpack.c.bf16 %v20012_v0, %v20008_v24  ;;  %v6418_v15 = vrot.slane %v6416_v6, 4  ;;  %v6411_v24 = vsel %vm22852_vm1, %v6401_v18, %v6410_v34  ;;  %v8047_v0 = vsel %vm4278_vm8, %v8042_v29, %v8046_v45  ;;  %v16253_v44 = vld [vmem:[%s22287_s4 + $0x588] sm:$0xff]   ;;  %v16254_v29 = vld [vmem:[%s22287_s4 + $0x590] sm:$0xff]  }
 0x470   :  { %14645 = vmatprep.mubr.bf16.mxu1 %v6393_v28  ;;  %v9206_v42 = vrot.slane %v9204_v43, 3  ;;  %v9209_v2 = vrot.slane %v9207_v49, 4  ;;  %v8751_v31 = vpack.c.bf16 %v20039_v52, %v20014_v63  ;;  %v9202_v61 = vsel %vm22973_vm15, %v9193_v9, %v9201_v48  ;;  %v16380_v63 = vld [vmem:[#allocation2 + $0x60] sm:$0xff]  ;;  %vm22976_vm15 = vmmov %vm22852_vm1 }
 0x471   :  { %14866 = vmatmul.mubr.bf16.gmra.mrb[172].mxu0 %v8031_v51  ;;  %v9213_v53 = vshrl.u32 %v8748_v23, 16  ;;  %v9216_v38 = vshll.u32 %v8748_v23, 16  ;;  %v8754_v22 = vpack.c.bf16 %v20045_v21, %v20041_v13  ;;  %v6419_v51 = vor.u32 %v6418_v15, %v6415_v32  ;;  %v16256_v32 = vld [vmem:[%s22287_s4 + $0x598] sm:$0xff]  }
 0x472   :  { %14869 = vmatprep.mubr.bf16.mxu0 %v8039_v62  ;;  %v9210_v50 = vor.u32 %v9209_v2, %v9206_v42  ;;  %v9222_v14 = vshrl.u32 %v8751_v31, 16  ;;  %v9225_v62 = vshll.u32 %v8751_v31, 16  ;;  %v6659_v52 = vpack.c.bf16 %v16380_v63, %v16379_v16  ;;  %v16259_v16 = vld [vmem:[%s22287_s4 + $0x5a8] sm:$0xff]  }
 0x473   :  { %v9215_v55 = vrot.slane %v9213_v53, 3  ;;  %v9218_v28 = vrot.slane %v9216_v38, 4  ;;  %v9231_v30 = vshrl.u32 %v8754_v22, 16  ;;  %v9234_v7 = vshll.u32 %v8754_v22, 16  ;;  %v16249_v53 = vld [vmem:[%s22287_s4 + $0x388] sm:$0xff]  }
 0x474   :  { %v6420_v59 = vsel %vm22974_vm7, %v6410_v34, %v6419_v51  ;;  %v9211_v13 = vsel %vm22975_vm14, %v9201_v48, %v9210_v50  ;;  %v9224_v21 = vrot.slane %v9222_v14, 3  ;;  %v9227_v23 = vrot.slane %v9225_v62, 4  ;;  %v16383_v38 = vld [vmem:[#allocation2 + $0xa8] sm:$0xff]  ;;  %vm22977_vm7 = vmmov %vm22852_vm1  ;;  %v16385_v51 = vld [vmem:[#allocation2 + $0xd8] sm:$0xff] }
 0x475   :  { %v9219_v56 = vor.u32 %v9218_v28, %v9215_v55  ;;  %v8757_v18 = vpack.c.bf16 %v20066_v27, %v20047_v36  ;;  %v9233_v54 = vrot.slane %v9231_v30, 3  ;;  %v9236_v6 = vrot.slane %v9234_v7, 4  ;;  %v16381_v36 = vld [vmem:[#allocation2 + $0x78] sm:$0xff]  ;;  %v16382_v27 = vld [vmem:[#allocation2 + $0x90] sm:$0xff]  ;;  %v16388_v7 = vld [vmem:[#allocation2 + $0x120] sm:$0xff] }
 0x476   :  { %v8760_v34 = vpack.c.bf16 %v20125_v46, %v20068_v57  ;;  %v9228_v45 = vor.u32 %v9227_v23, %v9224_v21  ;;  %v6662_v9 = vpack.c.bf16 %v16382_v27, %v16381_v36  ;;  %v8763_v42 = vpack.c.bf16 %v20160_v25, %v20127_v37  ;;  %v16250_v55 = vld [vmem:[%s22287_s4 + $0x390] sm:$0xff]   ;;  %v16257_v37 = vld [vmem:[%s22287_s4 + $0x5a0] sm:$0xff]   ;;  %vm22978_vm14 = vmmov %vm22852_vm1 }
 0x477   :  { %14646 = vmatmul.mubr.bf16.gmra.mrb[64].mxu1 %v6402_v11  ;;  %v9220_v58 = vsel %vm22852_vm1, %v9210_v50, %v9219_v56  ;;  %v9240_v43 = vshrl.u32 %v8757_v18, 16  ;;  %v9243_v49 = vshll.u32 %v8757_v18, 16  ;;  %v9237_v48 = vor.u32 %v9236_v6, %v9233_v54  ;;  %v16386_v50 = vld [vmem:[#allocation2 + $0xf0] sm:$0xff]  ;;  %v16255_v54 = vld [vmem:[%s22287_s4 + $0x3a0] sm:$0xff]   ;;  %v16258_v36 = vld [vmem:[%s22287_s4 + $0x3a8] sm:$0xff]  }
 0x478   :  { %14649 = vmatprep.mubr.bf16.mxu1 %v6411_v24  ;;  %v9249_v57 = vshrl.u32 %v8760_v34, 16  ;;  %v9252_v46 = vshll.u32 %v8760_v34, 16  ;;  %v9229_v15 = vsel %vm22976_vm15, %v9219_v56, %v9228_v45  ;;  %v9258_v28 = vshrl.u32 %v8763_v42, 16  ;;  %v16391_v27 = vld [vmem:[#allocation2 + $0x168] sm:$0xff]  ;;  %vm22979_vm15 = vmmov %vm22852_vm1 }
 0x479   :  { %14870 = vmatmul.mubr.bf16.gmra.mrb[176].mxu0 %v8047_v0  ;;  %v9242_v24 = vrot.slane %v9240_v43, 3  ;;  %v9245_v0 = vrot.slane %v9243_v49, 4  ;;  %v9238_v2 = vsel %vm22977_vm7, %v9228_v45, %v9237_v48  ;;  %v9261_v22 = vshll.u32 %v8763_v42, 16  ;;  %v16390_v45 = vld [vmem:[#allocation2 + $0x150] sm:$0xff]  ;;  %vm22980_vm7 = vmmov %vm22852_vm1 }
 0x47a   :  { %14977 = vmatprep.mubr.bf16.mxu0 %v9202_v61  ;;  %v9251_v31 = vrot.slane %v9249_v57, 3  ;;  %v9254_v61 = vrot.slane %v9252_v46, 4  ;;  %v6668_v14 = vpack.c.bf16 %v16386_v50, %v16385_v51  ;;  %v16261_v42 = vld [vmem:[%s22287_s4 + $0x3b0] sm:$0xff]   ;;  %v16396_v51 = vld [vmem:[#allocation2 + $0x1c8] sm:$0xff]  ;;  %v16397_v50 = vld [vmem:[#allocation2 + $0x1e0] sm:$0xff] }
 0x47b   :  { %v9246_v25 = vor.u32 %v9245_v0, %v9242_v24  ;;  %v20365_v24 = vld [vmem:[#allocation2] sm:$0xff] }
 0x47c   :  { %v9255_v62 = vor.u32 %v9254_v61, %v9251_v31  ;;  %v8778_v0 = vpack.c.bf16 %v20365_v24, %v20250_v17  ;;  %v16394_v61 = vld [vmem:[#allocation2 + $0x198] sm:$0xff] }
 0x47d   :  { %v9247_v63 = vsel %vm22978_vm14, %v9237_v48, %v9246_v25  ;;  %vm22981_vm14 = vmmov %vm22852_vm1 }
 0x47e   :  { %v9256_v21 = vsel %vm22852_vm1, %v9246_v25, %v9255_v62  ;;  %v9306_v25 = vshll.u32 %v8778_v0, 16 }
 0x47f   :  { %14650 = vmatmul.mubr.bf16.gmra.mrb[68].mxu1 %v6420_v59 }
 0x480   :  { %14669 = vmatprep.mubr.bf16.mxu1 %v6659_v52  ;;  %v9260_v52 = vrot.slane %v9258_v28, 3  ;;  %v8736_v28 = vld [vmem:[#allocation2 + $0x308] sm:$0x7f] }
 0x481   :  { %14978 = vmatmul.mubr.bf16.vlgmr.msra.gmra.mrb[152].mxu0 %v9211_v13  ;;  %v8769_v13 = vpack.c.bf16 %v20206_v39, %v20185_v35  ;;  %v16260_v39 = vld [vmem:[%s22287_s4 + $0x5b0] sm:$0xff]  }
 0x482   :  { %14981 = vmatprep.mubr.bf16.mxu0 %v9220_v58  ;;  %15094 = vmatpush3.bf16.msra.mxu0 %v20255_v8  ;;  %v16384_v8 = vld [vmem:[#allocation2 + $0xc0] sm:$0xff]  ;;  %v8772_v58 = vpack.c.bf16 %v20216_v33, %v20208_v1 }
 0x483   :  { %15095 = vmatprep.subr.bf16.mxu0 %v16253_v44  ;;  %v6665_v11 = vpack.c.bf16 %v16384_v8, %v16383_v38  ;;  %v9276_v6 = vshrl.u32 %v8769_v13, 16  ;;  %v9279_v34 = vshll.u32 %v8769_v13, 16  ;;  %v8775_v8 = vpack.c.bf16 %v20248_v41, %v20218_v3  ;;  %v20375_v3 = vld [vmem:[%s22287_s4 + $0x640] sm:$0xff]   ;;  %v16398_v13 = vld [vmem:[#allocation2 + $0x1f8] sm:$0xff] }
 0x484   :  { %v9285_v1 = vshrl.u32 %v8772_v58, 16  ;;  %v9288_v33 = vshll.u32 %v8772_v58, 16  ;;  %v16400_v58 = vld [vmem:[#allocation2 + $0x228] sm:$0xff] }
 0x485   :  { %v9278_v46 = vrot.slane %v9276_v6, 3  ;;  %v9281_v38 = vrot.slane %v9279_v34, 4  ;;  %v9297_v31 = vshll.u32 %v8775_v8, 16 }
 0x486   :  { %15096 = vmatpush3.bf16.msra.mxu0 %v16253_v44  ;;  %v9263_v44 = vrot.slane %v9261_v22, 4  ;;  %v16263_v22 = vld [vmem:[%s22287_s4 + $0x3b8] sm:$0xff]  }
 0x487   :  { %14670 = vmatmul.mubr.bf16.vlgmr.msra.gmra.mrb[16].mxu1 %v6662_v9  ;;  %15097 = vmatprep.subr.bf16.mxu0 %v16254_v29  ;;  %v16392_v9 = vld [vmem:[#allocation2 + $0x180] sm:$0xff]  ;;  %v9282_v41 = vor.u32 %v9281_v38, %v9278_v46  ;;  %v20392_v46 = vld [vmem:[#allocation2 + $0x2d0] sm:$0xff]  ;;  %v16408_v38 = vld [vmem:[#allocation2 + $0x2b8] sm:$0xff] }
 0x488   :  { %14673 = vmatprep.mubr.bf16.mxu1 %v6665_v11  ;;  %14742 = vmatpush3.bf16.msra.mxu1 %v20282_v4  ;;  %v8766_v4 = vpack.c.bf16 %v20183_v60, %v20162_v26  ;;  %v16252_v26 = vld [vmem:[%s22287_s4 + $0x398] sm:$0xff]   ;;  %v16387_v60 = vld [vmem:[#allocation2 + $0x108] sm:$0xff]  ;;  %v9264_v35 = vor.u32 %v9263_v44, %v9260_v52  ;;  %v6677_v48 = vpack.c.bf16 %v16392_v9, %v16391_v27 }
 0x489   :  { %14982 = vmatmul.mubr.bf16.gmra.mrb[156].mxu0 %v9229_v15  ;;  %14743 = vmatprep.subr.bf16.mxu1 %v16249_v53  ;;  %v6671_v59 = vpack.c.bf16 %v16388_v7, %v16387_v60  ;;  %v9290_v15 = vrot.slane %v9288_v33, 4  ;;  %v16404_v33 = vld [vmem:[#allocation2 + $0x288] sm:$0xff] }
 0x48a   :  { %14985 = vmatprep.mubr.bf16.mxu0 %v9238_v2  ;;  %15098 = vmatpush3.bf16.msra.mxu0 %v16254_v29  ;;  %v9267_v56 = vshrl.u32 %v8766_v4, 16  ;;  %v9270_v30 = vshll.u32 %v8766_v4, 16  ;;  %v16389_v29 = vld [vmem:[#allocation2 + $0x138] sm:$0xff]  ;;  %v9265_v57 = vsel %vm22979_vm15, %v9255_v62, %v9264_v35  ;;  %v9294_v2 = vshrl.u32 %v8775_v8, 16  ;;  %vm22982_vm15 = vmmov %vm22852_vm1 }
 0x48b   :  { %15099 = vmatprep.subr.bf16.mxu0 %v16256_v32  ;;  %v6674_v43 = vpack.c.bf16 %v16390_v45, %v16389_v29  ;;  %v6698_v8 = vpack.c.bf16 %v20392_v46, %v16408_v38 }
 0x48c   :  { %14744 = vmatpush3.bf16.msra.mxu1 %v16249_v53  ;;  %v9269_v23 = vrot.slane %v9267_v56, 3  ;;  %v9272_v18 = vrot.slane %v9270_v30, 4  ;;  %v16262_v53 = vld [vmem:[%s22287_s4 + $0x5b8] sm:$0xff]   ;;  %v9296_v56 = vrot.slane %v9294_v2, 3  ;;  %v9299_v30 = vrot.slane %v9297_v31, 4  ;;  %v16269_v2 = vld [vmem:[%s22287_s4 + $0x648] sm:$0xff]  }
 0x48d   :  { %14745 = vmatprep.subr.bf16.mxu1 %v16250_v55  ;;  %v16413_v31 = vld [vmem:[#allocation2 + $0xe0] sm:$0xff] }
 0x48e   :  { %15100 = vmatpush3.bf16.msra.mxu0 %v16256_v32  ;;  %v9273_v49 = vor.u32 %v9272_v18, %v9269_v23  ;;  %v9287_v32 = vrot.slane %v9285_v1, 3 }
 0x48f   :  { %14674 = vmatmul.mubr.bf16.gmra.mrb[20].mxu1 %v6668_v14  ;;  %15101 = vmatprep.subr.bf16.mxu0 %v16257_v37  ;;  %v6683_v14 = vpack.c.bf16 %v16397_v50, %v16396_v51  ;;  %v16418_v51 = vld [vmem:[#allocation2 + $0xd0] sm:$0xff] }
 0x490   :  { %14677 = vmatprep.mubr.bf16.mxu1 %v6671_v59  ;;  %14746 = vmatpush3.bf16.msra.mxu1 %v16250_v55  ;;  %v9274_v11 = vsel %vm22980_vm7, %v9264_v35, %v9273_v49  ;;  %v16395_v55 = vld [vmem:[#allocation2 + $0x1b0] sm:$0xff]  ;;  %v9291_v4 = vor.u32 %v9290_v15, %v9287_v32  ;;  %v9283_v62 = vsel %vm22981_vm14, %v9273_v49, %v9282_v41  ;;  %v9308_v59 = vrot.slane %v9306_v25, 4  ;;  %vm22983_vm7 = vmmov %vm22852_vm1 }
 0x491   :  { %14986 = vmatmul.mubr.bf16.gmra.mrb[160].mxu0 %v9247_v63  ;;  %14747 = vmatprep.subr.bf16.mxu1 %v16252_v26  ;;  %v6680_v17 = vpack.c.bf16 %v16395_v55, %v16394_v61  ;;  %v9300_v63 = vor.u32 %v9299_v30, %v9296_v56  ;;  %v16403_v49 = vld [vmem:[#allocation2 + $0x270] sm:$0xff]  ;;  %vm22984_vm14 = vmmov %vm22852_vm1  ;;  %v16414_v61 = vld [vmem:[#allocation2 + $0xf8] sm:$0xff] }
 0x492   :  { %14989 = vmatprep.mubr.bf16.mxu0 %v9256_v21  ;;  %15102 = vmatpush3.bf16.msra.mxu0 %v16257_v37  ;;  %v9303_v37 = vshrl.u32 %v8778_v0, 16  ;;  %v9292_v60 = vsel %vm22852_vm1, %v9282_v41, %v9291_v4  ;;  %v16399_v21 = vld [vmem:[#allocation2 + $0x210] sm:$0xff]  ;;  %v9951_v55 = vpack.c.bf16 %v16414_v61, %v16413_v31  ;;  %v16272_v56 = vld [vmem:[%s22287_s4 + $0x658] sm:$0xff]   ;;  %v23000_v31 = vld [vmem:[#allocation53_spill] sm:$0xff] }
 0x493   :  { %15103 = vmatprep.subr.bf16.mxu0 %v16259_v16  ;;  %v6686_v23 = vpack.c.bf16 %v16399_v21, %v16398_v13  ;;  %v9301_v35 = vsel %vm22982_vm15, %v9291_v4, %v9300_v63  ;;  %v16410_v32 = vld [vmem:[#allocation2 + $0x70] sm:$0xff]  ;;  %v16415_v4 = vld [vmem:[#allocation2 + $0x88] sm:$0xff]  ;;  %v16271_v13 = vld [vmem:[%s22287_s4 + $0x3e0] sm:$0xff]  }
 0x494   :  { %14748 = vmatpush3.bf16.msra.mxu1 %v16252_v26  ;;  %v8781_v26 = vpack.c.bf16 %v8736_v28, %v8736_v28  ;;  %v9305_v7 = vrot.slane %v9303_v37, 3  ;;  %v16411_v0 = vld [vmem:[#allocation2 + $0xb0] sm:$0xff]  ;;  %v16416_v37 = vld [vmem:[#allocation2 + $0xa0] sm:$0xff]  ;;  %v16265_v28 = vld [vmem:[%s22287_s4 + $0x3c8] sm:$0xff]  }
 0x495   :  { %14749 = vmatprep.subr.bf16.mxu1 %v16255_v54  ;;  %v6664_v25 = vpack.c.bf16 %v16416_v37, %v16415_v4  ;;  %v16266_v30 = vld [vmem:[%s22287_s4 + $0x3d0] sm:$0xff]   ;;  %v20470_v37 = vld [vmem:[#allocation2 + $0x78] sm:$0xff]  ;;  %vm23026_vm15 = vmmov %vm22852_vm1 }
 0x496   :  { %15104 = vmatpush3.bf16.msra.mxu0 %v16259_v16  ;;  %v20386_v16 = vld [vmem:[%s22287_s4 + $0x3c0] sm:$0xff]   ;;  %v9312_v52 = vshrl.u32 %v8781_v26, 16  ;;  %v9315_v44 = vshll.u32 %v8781_v26, 16  ;;  %v9309_v18 = vor.u32 %v9308_v59, %v9305_v7  ;;  %v16276_v21 = vld [vmem:[%s22287_s4 + $0x670] sm:$0xff]  }
 0x497   :  { %14678 = vmatmul.mubr.bf16.gmra.mrb[24].mxu1 %v6674_v43  ;;  %15105 = vmatprep.subr.bf16.mxu0 %v16260_v39  ;;  %v16402_v43 = vld [vmem:[#allocation2 + $0x258] sm:$0xff]  ;;  %v16273_v26 = vld [vmem:[%s22287_s4 + $0x660] sm:$0xff]  }
 0x498   :  { %14681 = vmatprep.mubr.bf16.mxu1 %v6677_v48  ;;  %14750 = vmatpush3.bf16.msra.mxu1 %v16255_v54  ;;  %v16401_v54 = vld [vmem:[#allocation2 + $0x240] sm:$0xff]  ;;  %v9314_v6 = vrot.slane %v9312_v52, 3  ;;  %v9317_v34 = vrot.slane %v9315_v44, 4  ;;  %v9310_v29 = vsel %vm22983_vm7, %v9300_v63, %v9309_v18  ;;  %v6692_v1 = vpack.c.bf16 %v16403_v49, %v16402_v43  ;;  %v16423_v63 = vld [vmem:[#allocation2 + $0x118] sm:$0xff]  ;;  %v16424_v52 = vld [vmem:[#allocation2 + $0x130] sm:$0xff] }
 0x499   :  { %14990 = vmatmul.mubr.bf16.gmra.mrb[164].mxu0 %v9265_v57  ;;  %14751 = vmatprep.subr.bf16.mxu1 %v16258_v36  ;;  %v16406_v48 = vld [vmem:[#allocation2 + $0x80] sm:$0xff]  ;;  %v6673_v44 = vpack.c.bf16 %v16424_v52, %v16423_v63  ;;  %v22992_v43 = vld [vmem:[#allocation51_spill] sm:$0xff]  ;;  %v20487_v52 = vpack.c.bf16 %v20365_v24, %v20365_v24  ;;  %vm23027_vm7 = vmmov %vm22852_vm1 }
 0x49a   :  { %14993 = vmatprep.mubr.bf16.mxu0 %v9274_v11  ;;  %15106 = vmatpush3.bf16.msra.mxu0 %v16260_v39  ;;  %v6689_v39 = vpack.c.bf16 %v16401_v54, %v16400_v58  ;;  %v9318_v45 = vor.u32 %v9317_v34, %v9314_v6  ;;  %v16409_v11 = vld [vmem:[#allocation2 + $0x58] sm:$0xff]  ;;  %v16422_v7 = vld [vmem:[#allocation2 + $0x100] sm:$0xff]  ;;  %v22985_v58 = vpack.c.bf16 %v20074_v19, %v20072_v40  ;;  %v22986_v54 = vld [vmem:[#allocation74_spill] sm:$0xff] }
 0x49b   :  { %15107 = vmatprep.subr.bf16.mxu0 %v16262_v53  ;;  %v6661_v15 = vpack.c.bf16 %v16410_v32, %v16409_v11  ;;  %v10701_v40 = vld [vmem:[#allocation2 + $0x80] sm:$0xfe]  ;;  %v10704_v19 = vld [vmem:[#allocation2 + $0x98] sm:$0xff]  ;;  %v22988_v6 = vld [vmem:[#allocation34_spill] sm:$0xff] }
 0x49c   :  { %14752 = vmatpush3.bf16.msra.mxu1 %v16258_v36  ;;  %v16405_v36 = vld [vmem:[#allocation2 + $0x2a0] sm:$0xff]  ;;  %v9319_v9 = vsel %vm22984_vm14, %v9309_v18, %v9318_v45  ;;  %v22989_v34 = vld [vmem:[#allocation32_spill] sm:$0xff]  ;;  %v22996_v32 = vld [vmem:[#allocation38_spill] sm:$0xff] }
 0x49d   :  { %14753 = vmatprep.subr.bf16.mxu1 %v16261_v42  ;;  %v6695_v27 = vpack.c.bf16 %v16405_v36, %v16404_v33  ;;  %v22991_v45 = vld [vmem:[#allocation52_spill] sm:$0xff]  ;;  %v10788_v33 = vpack.c.bf16 %v10704_v19, %v10701_v40  ;;  %v20458_v36 = vld [vmem:[%s22287_s4 + $0x440] sm:$0xff]   ;;  %vm23028_vm14 = vmmov %vm22852_vm1 }
 0x49e   :  { %15108 = vmatpush3.bf16.msra.mxu0 %v16262_v53  ;;  %v16407_v53 = vld [vmem:[#allocation2 + $0x98] sm:$0xff]  ;;  %v22993_v49 = vpack.c.bf16 %v22991_v45, %v22992_v43 }
 0x49f   :  { %14682 = vmatmul.mubr.bf16.gmra.mrb[28].mxu1 %v6680_v17  ;;  %15225 = vmatprep.subr.bf16.mxu0 %v20375_v3  ;;  %v9945_v57 = vpack.c.bf16 %v16407_v53, %v16406_v48  ;;  %v16270_v17 = vld [vmem:[%s22287_s4 + $0x650] sm:$0xff]   ;;  %v10710_v48 = vld [vmem:[#allocation2 + $0xc8] sm:$0xff]  ;;  %v11220_v38 = vshll.u32 %v10788_v33, 16  ;;  %v10716_v11 = vld [vmem:[#allocation2 + $0xf8] sm:$0xff] }
 0x4a0   :  { %14685 = vmatprep.mubr.bf16.mxu1 %v6683_v14  ;;  %14754 = vmatpush3.bf16.msra.mxu1 %v16261_v42  ;;  %v16412_v42 = vld [vmem:[#allocation2 + $0xc8] sm:$0xff]  ;;  %v16419_v14 = vld [vmem:[#allocation2 + $0x110] sm:$0xff] }
 0x4a1   :  { %14994 = vmatmul.mubr.bf16.gmra.mrb[168].mxu0 %v9283_v62  ;;  %14755 = vmatprep.subr.bf16.mxu1 %v16263_v22  ;;  %v9948_v41 = vpack.c.bf16 %v16412_v42, %v16411_v0  ;;  %v16420_v62 = vld [vmem:[#allocation2 + $0x128] sm:$0xff] }
 0x4a2   :  { %14997 = vmatprep.mubr.bf16.mxu0 %v9292_v60  ;;  %v16421_v60 = vld [vmem:[#allocation2 + $0xe8] sm:$0xff] }
 0x4a3   :  { %v6670_v59 = vpack.c.bf16 %v16422_v7, %v16421_v60  ;;  %v7415_v53 = vld [vmem:[#allocation2 + $0x48] sm:$0xfe]  ;;  %v10725_v60 = vld [vmem:[#allocation2 + $0x140] sm:$0xff]  ;;  %v10728_v7 = vld [vmem:[#allocation2 + $0x158] sm:$0xff] }
 0x4a4   :  { %14756 = vmatpush3.bf16.msra.mxu1 %v16263_v22  ;;  %v16417_v22 = vld [vmem:[#allocation2 + $0xb8] sm:$0xff]  ;;  %v10800_v24 = vpack.c.bf16 %v10728_v7, %v10725_v60  ;;  %v20521_v60 = vld [vmem:[#allocation2 + $0x150] sm:$0xff] }
 0x4a5   :  { %14785 = vmatprep.subr.bf16.mxu1 %v20386_v16  ;;  %v6667_v50 = vpack.c.bf16 %v16418_v51, %v16417_v22 }
 0x4a7   :  { %14686 = vmatmul.mubr.bf16.gmra.mrb[32].mxu1 %v6686_v23  ;;  %v16425_v23 = vld [vmem:[#allocation2 + $0x148] sm:$0xff] }
 0x4a8   :  { %14689 = vmatprep.mubr.bf16.mxu1 %v6689_v39  ;;  %v6676_v18 = vpack.c.bf16 %v20070_v12, %v16425_v23  ;;  %v16277_v12 = vld [vmem:[%s22287_s4 + $0x3f0] sm:$0xff]  }
 0x4a9   :  { %14998 = vmatmul.mubr.bf16.gmra.mrb[172].mxu0 %v9301_v35  ;;  %v22987_v39 = vld [vmem:[#allocation59_spill] sm:$0xff]  ;;  %v16279_v35 = vld [vmem:[%s22287_s4 + $0x3f8] sm:$0xff]  }
 0x4aa   :  { %15001 = vmatprep.mubr.bf16.mxu0 %v9310_v29  ;;  %v22990_v29 = vpack.c.bf16 %v22988_v6, %v22989_v34  ;;  %v23007_v23 = vld [vmem:[#allocation55_spill] sm:$0xff] }
 0x4af   :  { %14690 = vmatmul.mubr.bf16.gmra.mrb[36].mxu1 %v6692_v1  ;;  %v22994_v1 = vld [vmem:[#allocation10_spill] sm:$0xff] }
 0x4b0   :  { %14693 = vmatprep.mubr.bf16.mxu1 %v6695_v27  ;;  %v22995_v27 = vld [vmem:[#allocation21_spill] sm:$0xff] }
 0x4b1   :  { %15002 = vmatmul.mubr.bf16.gmra.mrb[176].mxu0 %v9319_v9  ;;  %v10707_v9 = vld [vmem:[#allocation2 + $0xb0] sm:$0xff] }
 0x4b2   :  { %15109 = vmatprep.mubr.bf16.mxu0 %v9945_v57  ;;  %v7418_v57 = vld [vmem:[#allocation2 + $0x60] sm:$0xff]  ;;  %v10791_v42 = vpack.c.bf16 %v10710_v48, %v10707_v9  ;;  %v11249_v48 = vshll.u32 %v10800_v24, 16 }
 0x4b4   :  { %v11225_v22 = vshll.u32 %v10791_v42, 16 }
 0x4b7   :  { %14694 = vmatmul.mubr.bf16.gmra.mrb[40].mxu1 %v6698_v8  ;;  %v10713_v8 = vld [vmem:[#allocation2 + $0xe0] sm:$0xff] }
 0x4b8   :  { %14757 = vmatprep.mubr.bf16.mxu1 %v6661_v15  ;;  %v22997_v15 = vld [vmem:[#allocation36_spill] sm:$0xff]  ;;  %v10794_v4 = vpack.c.bf16 %v10716_v11, %v10713_v8  ;;  %v23010_v11 = vld [vmem:[#allocation49_spill] sm:$0xff] }
 0x4b9   :  { %15110 = vmatmul.mubr.bf16.vlgmr.msra.gmra.mrb[152].mxu0 %v9948_v41  ;;  %v22998_v0 = vpack.c.bf16 %v22996_v32, %v22997_v15  ;;  %v7502_v41 = vpack.c.bf16 %v7418_v57, %v7415_v53  ;;  %v10737_v57 = vld [vmem:[#allocation2 + $0x1a0] sm:$0xff]  ;;  %v23009_v8 = vld [vmem:[#allocation56_spill] sm:$0xff]  ;;  %v23011_v32 = vmax.f32 %v23010_v11, 0.0 }
 0x4ba   :  { %15113 = vmatprep.mubr.bf16.mxu0 %v9951_v55  ;;  %15226 = vmatpush3.bf16.msra.mxu0 %v20375_v3  ;;  %v9954_v3 = vpack.c.bf16 %v16420_v62, %v16419_v14  ;;  %v23002_v55 = vld [vmem:[#allocation60_spill] sm:$0xff]  ;;  %v20476_v14 = vld [vmem:[#allocation2 + $0xc0] sm:$0xff]  ;;  %v10719_v62 = vld [vmem:[#allocation2 + $0x110] sm:$0xff]  ;;  %v11237_v6 = vshrl.u32 %v10794_v4, 16 }
 0x4bb   :  { %15227 = vmatprep.subr.bf16.mxu0 %v16269_v2  ;;  %v7567_v51 = vshll.u32 %v7502_v41, 16  ;;  %v16593_v15 = vpack.c.bf16 %v23011_v32, %v23009_v8 }
 0x4be   :  { %15228 = vmatpush3.bf16.msra.mxu0 %v16269_v2  ;;  %v22999_v2 = vld [vmem:[#allocation54_spill] sm:$0xff] }
 0x4bf   :  { %14758 = vmatmul.mubr.bf16.vlgmr.msra.gmra.mrb[44].mxu1 %v6664_v25  ;;  %15229 = vmatprep.subr.bf16.mxu0 %v16270_v17  ;;  %v23001_v61 = vpack.c.bf16 %v22999_v2, %v23000_v31  ;;  %v20472_v25 = vld [vmem:[#allocation2 + $0x90] sm:$0xff] }
 0x4c0   :  { %14761 = vmatprep.mubr.bf16.mxu1 %v6667_v50  ;;  %14786 = vmatpush3.bf16.msra.mxu1 %v20386_v16  ;;  %v16268_v16 = vld [vmem:[%s22287_s4 + $0x3d8] sm:$0xff]   ;;  %v20474_v50 = vld [vmem:[#allocation2 + $0xa8] sm:$0xff] }
 0x4c1   :  { %15114 = vmatmul.mubr.bf16.gmra.mrb[156].mxu0 %v9954_v3  ;;  %14787 = vmatprep.subr.bf16.mxu1 %v16265_v28  ;;  %v10722_v3 = vld [vmem:[#allocation2 + $0x128] sm:$0xff] }
 0x4c2   :  { %15117 = vmatprep.mubr.bf16.mxu0 %v20057_v20  ;;  %15230 = vmatpush3.bf16.msra.mxu0 %v16270_v17  ;;  %v16275_v20 = vld [vmem:[%s22287_s4 + $0x668] sm:$0xff]   ;;  %v11222_v17 = vrot.slane %v11220_v38, 1  ;;  %v10740_v38 = vld [vmem:[#allocation2 + $0x1b8] sm:$0xff] }
 0x4c3   :  { %15231 = vmatprep.subr.bf16.mxu0 %v16272_v56 }
 0x4c4   :  { %14788 = vmatpush3.bf16.msra.mxu1 %v16265_v28  ;;  %v11218_v28 = vshrl.u32 %v10788_v33, 16  ;;  %v20504_v33 = vld [vmem:[#allocation2 + $0x120] sm:$0xff] }
 0x4c5   :  { %14789 = vmatprep.subr.bf16.mxu1 %v16266_v30 }
 0x4c6   :  { %15232 = vmatpush3.bf16.msra.mxu0 %v16272_v56  ;;  %v11223_v56 = vor.u32 %v11222_v17, %v11218_v28 }
 0x4c7   :  { %14762 = vmatmul.mubr.bf16.gmra.mrb[48].mxu1 %v6670_v59  ;;  %15233 = vmatprep.subr.bf16.mxu0 %v16273_v26  ;;  %v23003_v59 = vld [vmem:[#allocation7_spill] sm:$0xff] }
 0x4c8   :  { %14765 = vmatprep.mubr.bf16.mxu1 %v6673_v44  ;;  %14790 = vmatpush3.bf16.msra.mxu1 %v16266_v30  ;;  %v7505_v30 = vpack.c.bf16 %v20472_v25, %v20470_v37  ;;  %v11227_v44 = vrot.slane %v11225_v22, 1  ;;  %v11251_v22 = vrot.slane %v11249_v48, 1  ;;  %v16282_v48 = vld [vmem:[%s22287_s4 + $0x450] sm:$0xff]  }
 0x4c9   :  { %15118 = vmatmul.mubr.bf16.gmra.mrb[160].mxu0 %v20064_v47  ;;  %14791 = vmatprep.subr.bf16.mxu1 %v16268_v16  ;;  %v16274_v47 = vld [vmem:[%s22287_s4 + $0x3e8] sm:$0xff]  }
 0x4ca   :  { %15121 = vmatprep.mubr.bf16.mxu0 %v20117_v10  ;;  %15234 = vmatpush3.bf16.msra.mxu0 %v16273_v26  ;;  %v16278_v10 = vld [vmem:[%s22287_s4 + $0x678] sm:$0xff]   ;;  %v11233_v26 = vshll.u32 %v10794_v4, 16 }
 0x4cb   :  { %15235 = vmatprep.subr.bf16.mxu0 %v16275_v20 }
 0x4cc   :  { %14792 = vmatpush3.bf16.msra.mxu1 %v16268_v16  ;;  %v23004_v16 = vld [vmem:[#allocation8_spill] sm:$0xff] }
 0x4cd   :  { %14793 = vmatprep.subr.bf16.mxu1 %v16271_v13  ;;  %v23005_v63 = vpack.c.bf16 %v23003_v59, %v23004_v16 }
 0x4ce   :  { %15236 = vmatpush3.bf16.msra.mxu0 %v16275_v20  ;;  %v7569_v20 = vrot.slane %v7567_v51, 1  ;;  %v10806_v51 = vpack.c.bf16 %v10740_v38, %v10737_v57  ;;  %v20550_v38 = vld [vmem:[#allocation2 + $0x198] sm:$0xff] }
 0x4cf   :  { %14766 = vmatmul.mubr.bf16.gmra.mrb[52].mxu1 %v6676_v18  ;;  %15237 = vmatprep.subr.bf16.mxu0 %v16276_v21 }
 0x4d0   :  { %14769 = vmatprep.mubr.bf16.mxu1 %v22985_v58  ;;  %14794 = vmatpush3.bf16.msra.mxu1 %v16271_v13  ;;  %v10797_v13 = vpack.c.bf16 %v10722_v3, %v10719_v62  ;;  %v7572_v58 = vshll.u32 %v7505_v30, 16  ;;  %v11269_v11 = vshrl.u32 %v10806_v51, 16 }
 0x4d1   :  { %15122 = vmatmul.mubr.bf16.gmra.mrb[164].mxu0 %v22986_v54  ;;  %14795 = vmatprep.subr.bf16.mxu1 %v16274_v47  ;;  %v11235_v54 = vrot.slane %v11233_v26, 1  ;;  %v20519_v26 = vld [vmem:[#allocation2 + $0x138] sm:$0xff] }
 0x4d2   :  { %15125 = vmatprep.mubr.bf16.mxu0 %v22987_v39  ;;  %15238 = vmatpush3.bf16.msra.mxu0 %v16276_v21  ;;  %v23006_v21 = vld [vmem:[#allocation23_spill] sm:$0xff]  ;;  %v11241_v34 = vshll.u32 %v10797_v13, 16 }
 0x4d3   :  { %15239 = vmatprep.subr.bf16.mxu0 %v16278_v10  ;;  %v23008_v18 = vpack.c.bf16 %v23006_v21, %v23007_v23  ;;  %v20496_v39 = vld [vmem:[#allocation2 + $0xf0] sm:$0xff]  ;;  %v11239_v9 = vor.u32 %v11237_v6, %v11235_v54  ;;  %v20526_v21 = vld [vmem:[#allocation2 + $0x180] sm:$0xff] }
 0x4d4   :  { %14796 = vmatpush3.bf16.msra.mxu1 %v16274_v47  ;;  %v7565_v47 = vshrl.u32 %v7502_v41, 16  ;;  %v11243_v41 = vrot.slane %v11241_v34, 1 }
 0x4d5   :  { %14797 = vmatprep.subr.bf16.mxu1 %v16277_v12 }
 0x4d6   :  { %15240 = vmatpush3.bf16.msra.mxu0 %v16278_v10  ;;  %v11228_v10 = vsel %vm4278_vm8, %v11223_v56, %v11227_v44  ;;  %v7570_v19 = vor.u32 %v7569_v20, %v7565_v47  ;;  %v11244_v28 = vsel %vm4278_vm8, %v11239_v9, %v11243_v41  ;;  %v11245_v56 = vshrl.u32 %v10797_v13, 16  ;;  %v20524_v20 = vld [vmem:[#allocation2 + $0x168] sm:$0xff] }
 0x4d7   :  { %14770 = vmatmul.mubr.bf16.gmra.mrb[56].mxu1 %v22990_v29  ;;  %v10731_v29 = vld [vmem:[#allocation2 + $0x170] sm:$0xff]  ;;  %v16281_v13 = vld [vmem:[%s22287_s4 + $0x448] sm:$0xff]   ;;  %v11265_v47 = vshll.u32 %v10806_v51, 16  ;;  %v7520_v6 = vpack.c.bf16 %v20526_v21, %v20524_v20 }
 0x4d8   :  { %14773 = vmatprep.mubr.bf16.mxu1 %v22993_v49  ;;  %14798 = vmatpush3.bf16.msra.mxu1 %v16277_v12  ;;  %v20494_v12 = vld [vmem:[#allocation2 + $0xd8] sm:$0xff]  ;;  %v10734_v49 = vld [vmem:[#allocation2 + $0x188] sm:$0xff] }
 0x4d9   :  { %15126 = vmatmul.mubr.bf16.gmra.mrb[168].mxu0 %v22994_v1  ;;  %14799 = vmatprep.subr.bf16.mxu1 %v16279_v35  ;;  %v20500_v43 = vpack.c.bf16 %v20496_v39, %v20494_v12  ;;  %v20502_v1 = vld [vmem:[#allocation2 + $0x108] sm:$0xff]  ;;  %v20512_v2 = vpack.c.bf16 %v10734_v49, %v10731_v29  ;;  %v11267_v9 = vrot.slane %v11265_v47, 1 }
 0x4da   :  { %15129 = vmatprep.mubr.bf16.mxu0 %v22995_v27  ;;  %v7574_v27 = vrot.slane %v7572_v58, 1  ;;  %v7514_v31 = vpack.c.bf16 %v20504_v33, %v20502_v1 }
 0x4db   :  { %v7588_v4 = vshll.u32 %v20500_v43, 16  ;;  %v11257_v7 = vshll.u32 %v20512_v2, 16  ;;  %v7592_v29 = vshrl.u32 %v20500_v43, 16  ;;  %v20552_v43 = vld [vmem:[#allocation2 + $0x1b0] sm:$0xff] }
 0x4dc   :  { %14800 = vmatpush3.bf16.msra.mxu1 %v16279_v35  ;;  %v11229_v35 = vshrl.u32 %v10791_v42, 16  ;;  %v7575_v42 = vsel %vm4278_vm8, %v7570_v19, %v7574_v27  ;;  %v7596_v59 = vshll.u32 %v7514_v31, 16 }
 0x4dd   :  { %14873 = vmatprep.subr.bf16.mxu1 %v20458_v36  ;;  %v7590_v16 = vrot.slane %v7588_v4, 1 }
 0x4de   :  { %v11231_v45 = vor.u32 %v11229_v35, %v11227_v44  ;;  %v10746_v44 = vld [vmem:[#allocation2 + $0x1e8] sm:$0xff]  ;;  %v11259_v35 = vrot.slane %v11257_v7, 1 }
 0x4df   :  { %14774 = vmatmul.mubr.bf16.gmra.mrb[60].mxu1 %v22998_v0  ;;  %v7594_v57 = vor.u32 %v7592_v29, %v7590_v16  ;;  %v10755_v0 = vld [vmem:[#allocation2 + $0x230] sm:$0xff] }
 0x4e0   :  { %14777 = vmatprep.mubr.bf16.mxu1 %v23001_v61  ;;  %v7576_v61 = vshrl.u32 %v7505_v30, 16  ;;  %v11253_v30 = vshrl.u32 %v10800_v24, 16  ;;  %v10752_v24 = vld [vmem:[#allocation2 + $0x218] sm:$0xff]  ;;  %v10767_v29 = vld [vmem:[#allocation2 + $0x290] sm:$0xff] }
 0x4e1   :  { %15130 = vmatmul.mubr.bf16.gmra.mrb[172].mxu0 %v23002_v55  ;;  %v11236_v55 = vsel %vm4278_vm8, %v11231_v45, %v11235_v54  ;;  %v10749_v54 = vld [vmem:[#allocation2 + $0x200] sm:$0xff]  ;;  %v7600_v45 = vshrl.u32 %v7514_v31, 16  ;;  %v20555_v31 = vld [vmem:[#allocation2 + $0x1c8] sm:$0xff] }
 0x4e2   :  { %15133 = vmatprep.mubr.bf16.mxu0 %v20265_v5  ;;  %v7508_v5 = vpack.c.bf16 %v20476_v14, %v20474_v50  ;;  %v7578_v62 = vor.u32 %v7576_v61, %v7574_v27  ;;  %v11255_v23 = vor.u32 %v11253_v30, %v11251_v22  ;;  %v20557_v61 = vld [vmem:[#allocation2 + $0x1e0] sm:$0xff] }
 0x4e4   :  { %v7580_v40 = vshll.u32 %v7508_v5, 16  ;;  %v7584_v17 = vshrl.u32 %v7508_v5, 16  ;;  %v10743_v5 = vld [vmem:[#allocation2 + $0x1d0] sm:$0xff]  ;;  %v11260_v49 = vsel %vm4278_vm8, %v11255_v23, %v11259_v35 }
 0x4e5   :  { %v20537_v19 = vpack.c.bf16 %v10746_v44, %v10743_v5 }
 0x4e6   :  { %v7582_v53 = vrot.slane %v7580_v40, 1  ;;  %v7598_v40 = vrot.slane %v7596_v59, 1  ;;  %v7526_v59 = vpack.c.bf16 %v20557_v61, %v20555_v31 }
 0x4e7   :  { %14778 = vmatmul.mubr.bf16.gmra.mrb[64].mxu1 %v23005_v63  ;;  %v11247_v63 = vor.u32 %v11245_v56, %v11243_v41  ;;  %v11273_v32 = vshll.u32 %v20537_v19, 16 }
 0x4e8   :  { %14781 = vmatprep.mubr.bf16.mxu1 %v23008_v18  ;;  %v7586_v3 = vor.u32 %v7584_v17, %v7582_v53  ;;  %v20533_v18 = vpack.c.bf16 %v20521_v60, %v20519_v26  ;;  %v7602_v8 = vor.u32 %v7600_v45, %v7598_v40  ;;  %v11271_v17 = vor.u32 %v11269_v11, %v11267_v9 }
 0x4e9   :  { %15134 = vmatmul.mubr.bf16.gmra.mrb[176].mxu0 %v20487_v52  ;;  %v11252_v34 = vsel %vm4278_vm8, %v11247_v63, %v11251_v22  ;;  %v7599_v22 = vsel %vm4278_vm8, %v7594_v57, %v7598_v40  ;;  %v11275_v30 = vrot.slane %v11273_v32, 1  ;;  %v7616_v63 = vshrl.u32 %v7520_v6, 16  ;;  %v10773_v32 = vld [vmem:[#allocation2 + $0x2c0] sm:$0xff] }
 0x4ea   :  { %15241 = vmatprep.mubr.bf16.mxu0 %v11228_v10  ;;  %v7583_v10 = vsel %vm4278_vm8, %v7578_v62, %v7582_v53  ;;  %v7591_v58 = vsel %vm4278_vm8, %v7586_v3, %v7590_v16  ;;  %v7604_v27 = vshll.u32 %v20533_v18, 16  ;;  %v10812_v53 = vpack.c.bf16 %v10752_v24, %v10749_v54  ;;  %v10761_v62 = vld [vmem:[#allocation2 + $0x260] sm:$0xff]  ;;  %v10764_v3 = vld [vmem:[#allocation2 + $0x278] sm:$0xff] }
 0x4eb   :  { %v7608_v16 = vshrl.u32 %v20533_v18, 16  ;;  %v11276_v44 = vsel %vm4278_vm8, %v11271_v17, %v11275_v30  ;;  %v10818_v47 = vpack.c.bf16 %v10764_v3, %v10761_v62  ;;  %v11277_v54 = vshrl.u32 %v20537_v19, 16  ;;  %v20581_v18 = vld [vmem:[#allocation2 + $0x1f8] sm:$0xff] }
 0x4ec   :  { %v11281_v4 = vshll.u32 %v10812_v53, 16 }
 0x4ed   :  { %v11279_v45 = vor.u32 %v11277_v54, %v11275_v30  ;;  %v16286_v30 = vld [vmem:[%s22287_s4 + $0x470] sm:$0xff]  }
 0x4ef   :  { %16594 = vmatmul.mubr.msk.bf16.gmra.mrb[68].mxu1 %vm20029_vm10, %v16593_v15  ;;  %v7612_v15 = vshll.u32 %v7520_v6, 16  ;;  %v11285_v6 = vshrl.u32 %v10812_v53, 16  ;;  %v16285_v53 = vld [vmem:[%s22287_s4 + $0x468] sm:$0xff]   ;;  %vm23025_vm10 = vmmov %vm22852_vm1 }
 0x4f0   :  { %14801 = vmatprep.mubr.bf16.mxu1 %v7575_v42  ;;  %v10758_v42 = vld [vmem:[#allocation2 + $0x248] sm:$0xff] }
 0x4f1   :  { %15242 = vmatmul.mubr.bf16.vlgmr.msra.gmra.mrb[152].mxu0 %v11236_v55  ;;  %v7606_v55 = vrot.slane %v7604_v27, 1  ;;  %v20567_v51 = vpack.c.bf16 %v10758_v42, %v10755_v0  ;;  %v7614_v7 = vrot.slane %v7612_v15, 1  ;;  %v20585_v27 = vld [vmem:[#allocation2 + $0x228] sm:$0xff]  ;;  %v10776_v15 = vld [vmem:[#allocation2 + $0x2d8] sm:$0xff] }
 0x4f2   :  { %15245 = vmatprep.mubr.bf16.mxu0 %v11244_v28  ;;  %v16283_v28 = vld [vmem:[%s22287_s4 + $0x458] sm:$0xff]  }
 0x4f3   :  { %v7607_v56 = vsel %vm4278_vm8, %v7602_v8, %v7606_v55  ;;  %v11289_v24 = vshll.u32 %v20567_v51, 16  ;;  %v7618_v40 = vor.u32 %v7616_v63, %v7614_v7  ;;  %v11301_v63 = vshrl.u32 %v10818_v47, 16 }
 0x4f5   :  { %v11291_v11 = vrot.slane %v11289_v24, 1 }
 0x4f7   :  { %14802 = vmatmul.mubr.bf16.vlgmr.msra.gmra.mrb[16].mxu1 %v7583_v10  ;;  %v16284_v10 = vld [vmem:[%s22287_s4 + $0x460] sm:$0xff]  }
 0x4f8   :  { %14805 = vmatprep.mubr.bf16.mxu1 %v7591_v58  ;;  %14874 = vmatpush3.bf16.msra.mxu1 %v20458_v36  ;;  %v11261_v36 = vshrl.u32 %v20512_v2, 16  ;;  %v20561_v2 = vpack.c.bf16 %v20552_v43, %v20550_v38  ;;  %v7610_v58 = vor.u32 %v7608_v16, %v7606_v55  ;;  %v20608_v16 = vld [vmem:[#allocation2 + $0x258] sm:$0xff] }
 0x4f9   :  { %15246 = vmatmul.mubr.bf16.gmra.mrb[156].mxu0 %v11252_v34  ;;  %14875 = vmatprep.subr.bf16.mxu1 %v16281_v13  ;;  %v7628_v34 = vshll.u32 %v7526_v59, 16 }
 0x4fa   :  { %15249 = vmatprep.mubr.bf16.mxu0 %v11260_v49  ;;  %v11263_v41 = vor.u32 %v11261_v36, %v11259_v35  ;;  %v7620_v23 = vshll.u32 %v20561_v2, 16  ;;  %v20583_v35 = vld [vmem:[#allocation2 + $0x210] sm:$0xff]  ;;  %v10770_v49 = vld [vmem:[#allocation2 + $0x2a8] sm:$0xff]  ;;  %v11297_v36 = vshll.u32 %v10818_v47, 16  ;;  %v7615_v8 = vsel %vm4278_vm8, %v7610_v58, %v7614_v7  ;;  %v20614_v58 = vld [vmem:[#allocation2 + $0x2a0] sm:$0xff] }
 0x4fb   :  { %v20591_v19 = vpack.c.bf16 %v20583_v35, %v20581_v18  ;;  %v7630_v42 = vrot.slane %v7628_v34, 1 }
 0x4fc   :  { %14876 = vmatpush3.bf16.msra.mxu1 %v16281_v13  ;;  %v11268_v5 = vsel %vm4278_vm8, %v11263_v41, %v11267_v9  ;;  %v11283_v13 = vrot.slane %v11281_v4, 1  ;;  %v20587_v9 = vld [vmem:[#allocation2 + $0x240] sm:$0xff]  ;;  %v10821_v41 = vpack.c.bf16 %v10770_v49, %v10767_v29  ;;  %v7624_v4 = vshrl.u32 %v20561_v2, 16  ;;  %v20610_v2 = vld [vmem:[#allocation2 + $0x270] sm:$0xff] }
 0x4fd   :  { %14877 = vmatprep.subr.bf16.mxu1 %v16282_v48  ;;  %v7532_v55 = vpack.c.bf16 %v20587_v9, %v20585_v27  ;;  %v7636_v62 = vshll.u32 %v20591_v19, 16  ;;  %v11299_v3 = vrot.slane %v11297_v36, 1  ;;  %v7640_v36 = vshrl.u32 %v20591_v19, 16 }
 0x4fe   :  { %v11287_v57 = vor.u32 %v11285_v6, %v11283_v13  ;;  %v11284_v17 = vsel %vm4278_vm8, %v11279_v45, %v11283_v13  ;;  %v16287_v6 = vld [vmem:[%s22287_s4 + $0x478] sm:$0xff]  }
 0x4ff   :  { %14806 = vmatmul.mubr.bf16.gmra.mrb[20].mxu1 %v7599_v22  ;;  %v7638_v54 = vrot.slane %v7636_v62, 1  ;;  %v11303_v24 = vor.u32 %v11301_v63, %v11299_v3 }
 0x500   :  { %14809 = vmatprep.mubr.bf16.mxu1 %v7607_v56  ;;  %14878 = vmatpush3.bf16.msra.mxu1 %v16282_v48  ;;  %v7622_v48 = vrot.slane %v7620_v23, 1  ;;  %v11292_v22 = vsel %vm4278_vm8, %v11287_v57, %v11291_v11  ;;  %v10824_v56 = vpack.c.bf16 %v10776_v15, %v10773_v32  ;;  %v7644_v23 = vshll.u32 %v7532_v55, 16 }
 0x501   :  { %15250 = vmatmul.mubr.bf16.gmra.mrb[160].mxu0 %v11268_v5  ;;  %14879 = vmatprep.subr.bf16.mxu1 %v16283_v28  ;;  %v11293_v5 = vshrl.u32 %v20567_v51, 16 }
 0x502   :  { %15253 = vmatprep.mubr.bf16.mxu0 %v11276_v44  ;;  %v7623_v0 = vsel %vm4278_vm8, %v7618_v40, %v7622_v48  ;;  %v7626_v7 = vor.u32 %v7624_v4, %v7622_v48  ;;  %v11305_v44 = vshll.u32 %v10821_v41, 16  ;;  %v7535_v40 = vpack.c.bf16 %v20610_v2, %v20608_v16  ;;  %v10785_v48 = vld [vmem:[#allocation2 + $0x320] sm:$0x1]  ;;  %v20634_v4 = vld [vmem:[#allocation2 + $0x2b8] sm:$0xff] }
 0x503   :  { %v11295_v13 = vor.u32 %v11293_v5, %v11291_v11  ;;  %v11313_v51 = vshll.u32 %v10824_v56, 16  ;;  %v7646_v45 = vrot.slane %v7644_v23, 1  ;;  %v7648_v11 = vshrl.u32 %v7532_v55, 16  ;;  %v7420_v55 = vld [vmem:[#allocation2 + $0x70] sm:$0xff] }
 0x504   :  { %14880 = vmatpush3.bf16.msra.mxu1 %v16283_v28  ;;  %v7632_v28 = vshrl.u32 %v7526_v59, 16  ;;  %v7631_v47 = vsel %vm4278_vm8, %v7626_v7, %v7630_v42  ;;  %v11307_v29 = vrot.slane %v11305_v44, 1  ;;  %v7652_v32 = vshll.u32 %v7535_v40, 16 }
 0x505   :  { %14881 = vmatprep.subr.bf16.mxu1 %v16284_v10  ;;  %v11300_v57 = vsel %vm4278_vm8, %v11295_v13, %v11299_v3  ;;  %v11315_v15 = vrot.slane %v11313_v51, 1  ;;  %v10830_v19 = vpack.c.bf16 %v10785_v48, %v10785_v48  ;;  %v7541_v63 = vpack.c.bf16 %v20392_v46, %v20634_v4 }
 0x506   :  { %v7634_v59 = vor.u32 %v7632_v28, %v7630_v42  ;;  %v7642_v42 = vor.u32 %v7640_v36, %v7638_v54  ;;  %v7650_v28 = vor.u32 %v7648_v11, %v7646_v45  ;;  %v7654_v7 = vrot.slane %v7652_v32, 1  ;;  %v20646_v36 = vld [vmem:[#allocation2 + $0xa0] sm:$0xff]  ;;  %v20648_v11 = vld [vmem:[#allocation2 + $0xb8] sm:$0xff]  ;;  %v20650_v32 = vld [vmem:[#allocation2 + $0xd0] sm:$0xff] }
 0x507   :  { %14810 = vmatmul.mubr.bf16.gmra.mrb[24].mxu1 %v7615_v8  ;;  %v11308_v8 = vsel %vm4278_vm8, %v11303_v24, %v11307_v29  ;;  %v11325_v44 = vshrl.u32 %v20487_v52, 16  ;;  %v11329_v23 = vshll.u32 %v10830_v19, 16 }
 0x508   :  { %14813 = vmatprep.mubr.bf16.mxu1 %v7623_v0  ;;  %14882 = vmatpush3.bf16.msra.mxu1 %v16284_v10  ;;  %v20612_v10 = vld [vmem:[#allocation2 + $0x288] sm:$0xff]  ;;  %v7639_v34 = vsel %vm4278_vm8, %v7634_v59, %v7638_v54  ;;  %v20632_v0 = vld [vmem:[%s22287_s4 + $0x480] sm:$0xff]  }
 0x509   :  { %15254 = vmatmul.mubr.bf16.gmra.mrb[164].mxu0 %v11284_v17  ;;  %14883 = vmatprep.subr.bf16.mxu1 %v16285_v53  ;;  %v7538_v49 = vpack.c.bf16 %v20614_v58, %v20612_v10  ;;  %v11309_v17 = vshrl.u32 %v10821_v41, 16  ;;  %v7647_v41 = vsel %vm4278_vm8, %v7642_v42, %v7646_v45  ;;  %v7499_v54 = vld [vmem:[#allocation2 + $0x2e8] sm:$0x1] }
 0x50a   :  { %15257 = vmatprep.mubr.bf16.mxu0 %v11292_v22  ;;  %v11317_v22 = vshrl.u32 %v10824_v56, 16  ;;  %v7655_v56 = vsel %vm4278_vm8, %v7650_v28, %v7654_v7  ;;  %v7544_v48 = vpack.c.bf16 %v7499_v54, %v7499_v54 }
 0x50b   :  { %v7660_v62 = vshll.u32 %v7538_v49, 16  ;;  %v11311_v3 = vor.u32 %v11309_v17, %v11307_v29 }
 0x50c   :  { %14884 = vmatpush3.bf16.msra.mxu1 %v16285_v53  ;;  %v11321_v53 = vshll.u32 %v20487_v52, 16  ;;  %v11319_v5 = vor.u32 %v11317_v22, %v11315_v15  ;;  %v11331_v52 = vrot.slane %v11329_v23, 1  ;;  %v7676_v17 = vshll.u32 %v7544_v48, 16  ;;  %v20663_v23 = vld [vmem:[#allocation2 + $0x118] sm:$0xff] }
 0x50d   :  { %14885 = vmatprep.subr.bf16.mxu1 %v16286_v30  ;;  %v7662_v13 = vrot.slane %v7660_v62, 1  ;;  %v11316_v51 = vsel %vm4278_vm8, %v11311_v3, %v11315_v15  ;;  %v7510_v22 = vpack.c.bf16 %v20650_v32, %v20648_v11  ;;  %v7672_v62 = vshrl.u32 %v7541_v63, 16 }
 0x50e   :  { %v11323_v59 = vrot.slane %v11321_v53, 1 }
 0x50f   :  { %14814 = vmatmul.mubr.bf16.gmra.mrb[28].mxu1 %v7631_v47  ;;  %v7664_v47 = vshrl.u32 %v7538_v49, 16 }
 0x510   :  { %14817 = vmatprep.mubr.bf16.mxu1 %v7639_v34  ;;  %14886 = vmatpush3.bf16.msra.mxu1 %v16286_v30  ;;  %v7417_v30 = vld [vmem:[#allocation2 + $0x58] sm:$0xfe]  ;;  %v11324_v46 = vsel %vm4278_vm8, %v11319_v5, %v11323_v59  ;;  %v7668_v34 = vshll.u32 %v7541_v63, 16  ;;  %v11327_v45 = vor.u32 %v11325_v44, %v11323_v59  ;;  %v20659_v5 = vld [vmem:[#allocation2 + $0xe8] sm:$0xff]  ;;  %v20661_v59 = vld [vmem:[#allocation2 + $0x100] sm:$0xff]  ;;  %v8316_v44 = vshll.u32 %v7510_v22, 16 }
 0x511   :  { %15258 = vmatmul.mubr.bf16.gmra.mrb[168].mxu0 %v11300_v57  ;;  %14887 = vmatprep.subr.bf16.mxu1 %v16287_v6  ;;  %v7504_v24 = vpack.c.bf16 %v7420_v55, %v7417_v30  ;;  %v20644_v57 = vld [vmem:[#allocation2 + $0x88] sm:$0xff]  ;;  %v7666_v53 = vor.u32 %v7664_v47, %v7662_v13  ;;  %v7513_v54 = vpack.c.bf16 %v20661_v59, %v20659_v5  ;;  %v8320_v47 = vshrl.u32 %v7510_v22, 16 }
 0x512   :  { %15261 = vmatprep.mubr.bf16.mxu0 %v11308_v8  ;;  %v7507_v49 = vpack.c.bf16 %v20646_v36, %v20644_v57  ;;  %v11332_v42 = vsel %vm4278_vm8, %v11327_v45, %v11331_v52  ;;  %v20673_v45 = vld [vmem:[#allocation2 + $0x148] sm:$0xff]  ;;  %v20675_v52 = vld [vmem:[#allocation2 + $0x160] sm:$0xff] }
 0x513   :  { %v8303_v8 = vshll.u32 %v7504_v24, 16  ;;  %v8301_v3 = vshrl.u32 %v7504_v24, 16 }
 0x514   :  { %14888 = vmatpush3.bf16.msra.mxu1 %v16287_v6  ;;  %v7656_v6 = vshrl.u32 %v7535_v40, 16  ;;  %v7670_v40 = vrot.slane %v7668_v34, 1  ;;  %v8308_v30 = vshll.u32 %v7507_v49, 16  ;;  %v8324_v34 = vshll.u32 %v7513_v54, 16 }
 0x515   :  { %14917 = vmatprep.subr.bf16.mxu1 %v20632_v0  ;;  %v8305_v28 = vrot.slane %v8303_v8, 1  ;;  %v20677_v8 = vld [vmem:[#allocation2 + $0x178] sm:$0xff] }
 0x516   :  { %v7658_v29 = vor.u32 %v7656_v6, %v7654_v7  ;;  %v7671_v19 = vsel %vm4278_vm8, %v7666_v53, %v7670_v40  ;;  %v7674_v55 = vor.u32 %v7672_v62, %v7670_v40  ;;  %v7678_v7 = vrot.slane %v7676_v17, 1  ;;  %v20679_v40 = vld [vmem:[#allocation2 + $0x190] sm:$0xff] }
 0x517   :  { %14818 = vmatmul.mubr.bf16.gmra.mrb[32].mxu1 %v7647_v41  ;;  %v8306_v41 = vor.u32 %v8305_v28, %v8301_v3  ;;  %v7522_v22 = vpack.c.bf16 %v20679_v40, %v20677_v8  ;;  %v8328_v62 = vshrl.u32 %v7513_v54, 16 }
 0x518   :  { %14821 = vmatprep.mubr.bf16.mxu1 %v7655_v56  ;;  %v7663_v15 = vsel %vm4278_vm8, %v7658_v29, %v7662_v13  ;;  %v20665_v56 = vld [vmem:[#allocation2 + $0x130] sm:$0xff]  ;;  %v8310_v13 = vrot.slane %v8308_v30, 1  ;;  %v7679_v63 = vsel %vm4278_vm8, %v7674_v55, %v7678_v7 }
 0x519   :  { %15262 = vmatmul.mubr.bf16.gmra.mrb[172].mxu0 %v11316_v51  ;;  %v8318_v51 = vrot.slane %v8316_v44, 1  ;;  %v7516_v6 = vpack.c.bf16 %v20665_v56, %v20663_v23  ;;  %v16290_v55 = vld [vmem:[%s22287_s4 + $0x490] sm:$0xff]   ;;  %v20696_v44 = vld [vmem:[#allocation2 + $0x1c0] sm:$0xff] }
 0x51a   :  { %15265 = vmatprep.mubr.bf16.mxu0 %v11324_v46  ;;  %v8311_v24 = vsel %vm4278_vm8, %v8306_v41, %v8310_v13  ;;  %v8312_v46 = vshrl.u32 %v7507_v49, 16  ;;  %v7519_v49 = vpack.c.bf16 %v20675_v52, %v20673_v45  ;;  %v20694_v41 = vld [vmem:[#allocation2 + $0x1a8] sm:$0xff] }
 0x51b   :  { %v8322_v48 = vor.u32 %v8320_v47, %v8318_v51  ;;  %v8332_v53 = vshll.u32 %v7516_v6, 16  ;;  %v8336_v3 = vshrl.u32 %v7516_v6, 16  ;;  %v7525_v54 = vpack.c.bf16 %v20696_v44, %v20694_v41  ;;  %v16291_v6 = vld [vmem:[%s22287_s4 + $0x498] sm:$0xff]  }
 0x51c   :  { %v8314_v29 = vor.u32 %v8312_v46, %v8310_v13  ;;  %v8340_v30 = vshll.u32 %v7519_v49, 16 }
 0x51d   :  { %v8334_v28 = vrot.slane %v8332_v53, 1  ;;  %v8352_v53 = vshrl.u32 %v7522_v22, 16 }
 0x51e   :  { %v8319_v17 = vsel %vm4278_vm8, %v8314_v29, %v8318_v51  ;;  %v20700_v51 = vld [vmem:[#allocation2 + $0x1f0] sm:$0xff] }
 0x51f   :  { %14822 = vmatmul.mubr.bf16.gmra.mrb[36].mxu1 %v7663_v15  ;;  %v8326_v15 = vrot.slane %v8324_v34, 1  ;;  %v8338_v13 = vor.u32 %v8336_v3, %v8334_v28  ;;  %23014 = vst [vmem:[#allocation40_spill] sm:$0xff] %v20700_v51 }
 0x520   :  { %14825 = vmatprep.mubr.bf16.mxu1 %v7671_v19 }
 0x521   :  { %15266 = vmatmul.mubr.bf16.gmra.mrb[176].mxu0 %v11332_v42  ;;  %v16289_v42 = vld [vmem:[%s22287_s4 + $0x488] sm:$0xff]   ;;  %v8327_v19 = vsel %vm4278_vm8, %v8322_v48, %v8326_v15  ;;  %v8330_v7 = vor.u32 %v8328_v62, %v8326_v15  ;;  %v8344_v48 = vshrl.u32 %v7519_v49, 16  ;;  %v8356_v15 = vshll.u32 %v7525_v54, 16 }
 0x523   :  { %v8335_v46 = vsel %vm4278_vm8, %v8330_v7, %v8334_v28  ;;  %v20716_v28 = vld [vmem:[#allocation2 + $0x220] sm:$0xff]  ;;  %v20720_v7 = vld [vmem:[#allocation2 + $0x250] sm:$0xff]  ;;  %v8358_v49 = vrot.slane %v8356_v15, 1 }
 0x524   :  { %23016 = vst [vmem:[#allocation68_spill] sm:$0xff] %v20716_v28  ;;  %23018 = vst [vmem:[#allocation57_spill] sm:$0xff] %v20720_v7 }
 0x527   :  { %14826 = vmatmul.mubr.bf16.gmra.mrb[40].mxu1 %v7679_v63  ;;  %v8348_v63 = vshll.u32 %v7522_v22, 16 }
 0x528   :  { %14889 = vmatprep.mubr.bf16.mxu1 %v8311_v24  ;;  %v20698_v24 = vld [vmem:[#allocation2 + $0x1d8] sm:$0xff] }
 0x529   :  { %23013 = vst [vmem:[#allocation9_spill] sm:$0xff] %v20698_v24  ;;  %v8350_v34 = vrot.slane %v8348_v63, 1  ;;  %v7528_v29 = vpack.c.bf16 %v20700_v51, %v20698_v24 }
 0x52b   :  { %v8354_v62 = vor.u32 %v8352_v53, %v8350_v34  ;;  %v8364_v3 = vshll.u32 %v7528_v29, 16  ;;  %v16294_v53 = vld [vmem:[%s22287_s4 + $0x4b0] sm:$0xff]  }
 0x52d   :  { %v8359_v63 = vsel %vm4278_vm8, %v8354_v62, %v8358_v49 }
 0x52f   :  { %14890 = vmatmul.mubr.bf16.vlgmr.msra.gmra.mrb[44].mxu1 %v8319_v17 }
 0x530   :  { %14893 = vmatprep.mubr.bf16.mxu1 %v8327_v19  ;;  %14918 = vmatpush3.bf16.msra.mxu1 %v20632_v0  ;;  %v8342_v0 = vrot.slane %v8340_v30, 1  ;;  %v20714_v19 = vld [vmem:[#allocation2 + $0x208] sm:$0xff]  ;;  %v20718_v30 = vld [vmem:[#allocation2 + $0x238] sm:$0xff] }
 0x531   :  { %14919 = vmatprep.subr.bf16.mxu1 %v16289_v42  ;;  %23015 = vst [vmem:[#allocation39_spill] sm:$0xff] %v20714_v19  ;;  %23017 = vst [vmem:[#allocation42_spill] sm:$0xff] %v20718_v30  ;;  %v7531_v22 = vpack.c.bf16 %v20716_v28, %v20714_v19  ;;  %v20734_v28 = vld [vmem:[#allocation2 + $0x268] sm:$0xff] }
 0x532   :  { %v8343_v47 = vsel %vm4278_vm8, %v8338_v13, %v8342_v0  ;;  %v8346_v17 = vor.u32 %v8344_v48, %v8342_v0  ;;  %v8366_v0 = vrot.slane %v8364_v3, 1  ;;  %23019 = vst [vmem:[#allocation41_spill] sm:$0xff] %v20734_v28  ;;  %v20738_v3 = vld [vmem:[#allocation2 + $0x298] sm:$0xff] }
 0x533   :  { %v8372_v48 = vshll.u32 %v7531_v22, 16  ;;  %23021 = vst [vmem:[#allocation19_spill] sm:$0xff] %v20738_v3 }
 0x534   :  { %14920 = vmatpush3.bf16.msra.mxu1 %v16289_v42  ;;  %v16292_v42 = vld [vmem:[%s22287_s4 + $0x4a0] sm:$0xff]   ;;  %v8351_v13 = vsel %vm4278_vm8, %v8346_v17, %v8350_v34 }
 0x535   :  { %14921 = vmatprep.subr.bf16.mxu1 %v16290_v55  ;;  %v20736_v34 = vld [vmem:[#allocation2 + $0x280] sm:$0xff] }
 0x536   :  { %23020 = vst [vmem:[#allocation73_spill] sm:$0xff] %v20736_v34 }
 0x537   :  { %14894 = vmatmul.mubr.bf16.gmra.mrb[48].mxu1 %v8335_v46  ;;  %v8360_v46 = vshrl.u32 %v7525_v54, 16  ;;  %v8374_v54 = vrot.slane %v8372_v48, 1 }
 0x538   :  { %14897 = vmatprep.mubr.bf16.mxu1 %v8343_v47  ;;  %14922 = vmatpush3.bf16.msra.mxu1 %v16290_v55  ;;  %v16293_v55 = vld [vmem:[%s22287_s4 + $0x4a8] sm:$0xff]   ;;  %v8368_v47 = vshrl.u32 %v7528_v29, 16  ;;  %v7537_v29 = vpack.c.bf16 %v20736_v34, %v20734_v28  ;;  %v20753_v28 = vld [vmem:[#allocation2 + $0x2e0] sm:$0xff] }
 0x539   :  { %14923 = vmatprep.subr.bf16.mxu1 %v16291_v6  ;;  %v8362_v15 = vor.u32 %v8360_v46, %v8358_v49  ;;  %v20751_v34 = vld [vmem:[#allocation2 + $0x2c8] sm:$0xff]  ;;  %23024 = vst [vmem:[#allocation59_spill] sm:$0xff] %v20753_v28 }
 0x53a   :  { %v8370_v17 = vor.u32 %v8368_v47, %v8366_v0  ;;  %23023 = vst [vmem:[#allocation74_spill] sm:$0xff] %v20751_v34 }
 0x53b   :  { %v8367_v49 = vsel %vm4278_vm8, %v8362_v15, %v8366_v0  ;;  %v20758_v0 = vld [vmem:[%s22287_s4 + $0x500] sm:$0xff]  }
 0x53c   :  { %14924 = vmatpush3.bf16.msra.mxu1 %v16291_v6  ;;  %v7534_v6 = vpack.c.bf16 %v20720_v7, %v20718_v30  ;;  %v8375_v46 = vsel %vm4278_vm8, %v8370_v17, %v8374_v54  ;;  %v8388_v7 = vshll.u32 %v7537_v29, 16  ;;  %v8651_v17 = vld [vmem:[#allocation2 + $0x60] sm:$0x80] }
 0x53d   :  { %14925 = vmatprep.subr.bf16.mxu1 %v16292_v42 }
 0x53e   :  { %v8380_v62 = vshll.u32 %v7534_v6, 16  ;;  %v8384_v48 = vshrl.u32 %v7534_v6, 16  ;;  %v8390_v6 = vrot.slane %v8388_v7, 1 }
 0x53f   :  { %14898 = vmatmul.mubr.bf16.gmra.mrb[52].mxu1 %v8351_v13  ;;  %v20740_v13 = vld [vmem:[#allocation2 + $0x2b0] sm:$0xff] }
 0x540   :  { %14901 = vmatprep.mubr.bf16.mxu1 %v8359_v63  ;;  %14926 = vmatpush3.bf16.msra.mxu1 %v16292_v42  ;;  %23022 = vst [vmem:[#allocation58_spill] sm:$0xff] %v20740_v13  ;;  %v16295_v42 = vld [vmem:[%s22287_s4 + $0x4b8] sm:$0xff]   ;;  %v7540_v63 = vpack.c.bf16 %v20740_v13, %v20738_v3  ;;  %v8382_v47 = vrot.slane %v8380_v62, 1  ;;  %v8738_v3 = vpack.c.bf16 %v20470_v37, %v8651_v17 }
 0x541   :  { %14927 = vmatprep.subr.bf16.mxu1 %v16293_v55 }
 0x542   :  { %v8386_v13 = vor.u32 %v8384_v48, %v8382_v47  ;;  %v8400_v48 = vshrl.u32 %v7540_v63, 16  ;;  %v8801_v19 = vshrl.u32 %v8738_v3, 16  ;;  %v8804_v51 = vshll.u32 %v8738_v3, 16 }
 0x544   :  { %14928 = vmatpush3.bf16.msra.mxu1 %v16293_v55  ;;  %v8376_v55 = vshrl.u32 %v7531_v22, 16  ;;  %v7543_v22 = vpack.c.bf16 %v20753_v28, %v20751_v34  ;;  %v8391_v30 = vsel %vm4278_vm8, %v8386_v13, %v8390_v6  ;;  %v8803_v17 = vrot.slane %v8801_v19, 3 }
 0x545   :  { %14929 = vmatprep.subr.bf16.mxu1 %v16294_v53 }
 0x546   :  { %v8378_v15 = vor.u32 %v8376_v55, %v8374_v54  ;;  %v8741_v54 = vpack.c.bf16 %v20474_v50, %v20472_v25  ;;  %v8392_v55 = vshrl.u32 %v7537_v29, 16  ;;  %v8404_v28 = vshll.u32 %v7543_v22, 16 }
 0x547   :  { %14902 = vmatmul.mubr.bf16.gmra.mrb[56].mxu1 %v8367_v49  ;;  %v8396_v49 = vshll.u32 %v7540_v63, 16  ;;  %v8744_v25 = vpack.c.bf16 %v20494_v12, %v20476_v14  ;;  %v8806_v50 = vrot.slane %v8804_v51, 4  ;;  %v8747_v63 = vpack.c.bf16 %v20502_v1, %v20496_v39 }
 0x548   :  { %14905 = vmatprep.mubr.bf16.mxu1 %v8375_v46  ;;  %14930 = vmatpush3.bf16.msra.mxu1 %v16294_v53  ;;  %v8383_v53 = vsel %vm4278_vm8, %v8378_v15, %v8382_v47  ;;  %v7501_v46 = vld [vmem:[#allocation2 + $0x2f8] sm:$0x1]  ;;  %v8394_v7 = vor.u32 %v8392_v55, %v8390_v6  ;;  %v8809_v47 = vshrl.u32 %v8741_v54, 16  ;;  %v8812_v15 = vshll.u32 %v8741_v54, 16 }
 0x549   :  { %14931 = vmatprep.subr.bf16.mxu1 %v16295_v42  ;;  %v8398_v62 = vrot.slane %v8396_v49, 1  ;;  %v8406_v49 = vrot.slane %v8404_v28, 1  ;;  %v8408_v3 = vshrl.u32 %v7543_v22, 16  ;;  %v8830_v19 = vshll.u32 %v8747_v63, 16 }
 0x54a   :  { %v8814_v29 = vrot.slane %v8812_v15, 4  ;;  %v8750_v51 = vpack.c.bf16 %v20519_v26, %v20504_v33 }
 0x54b   :  { %v8402_v34 = vor.u32 %v8400_v48, %v8398_v62  ;;  %v8399_v37 = vsel %vm4278_vm8, %v8394_v7, %v8398_v62  ;;  %v8410_v6 = vor.u32 %v8408_v3, %v8406_v49  ;;  %v8807_v62 = vor.u32 %v8806_v50, %v8803_v17 }
 0x54c   :  { %14932 = vmatpush3.bf16.msra.mxu1 %v16295_v42  ;;  %v7546_v42 = vpack.c.bf16 %v7501_v46, %v7501_v46  ;;  %v8821_v46 = vshll.u32 %v8744_v25, 16  ;;  %v8832_v22 = vrot.slane %v8830_v19, 4  ;;  %v8839_v7 = vshll.u32 %v8750_v51, 16  ;;  %v16300_v19 = vld [vmem:[%s22287_s4 + $0x520] sm:$0xff]  }
 0x54d   :  { %15005 = vmatprep.subr.bf16.mxu1 %v20758_v0  ;;  %v8407_v13 = vsel %vm4278_vm8, %v8402_v34, %v8406_v49  ;;  %v8827_v34 = vshrl.u32 %v8747_v63, 16  ;;  %v8756_v17 = vpack.c.bf16 %v20550_v38, %v20526_v21  ;;  %v8759_v50 = vpack.c.bf16 %v20555_v31, %v20552_v43  ;;  %v16299_v43 = vld [vmem:[%s22287_s4 + $0x518] sm:$0xff]  }
 0x54e   :  { %v8412_v24 = vshll.u32 %v7546_v42, 16  ;;  %v8823_v12 = vrot.slane %v8821_v46, 4  ;;  %v8836_v42 = vshrl.u32 %v8750_v51, 16 }
 0x54f   :  { %14906 = vmatmul.mubr.bf16.gmra.mrb[60].mxu1 %v8383_v53  ;;  %v8818_v53 = vshrl.u32 %v8744_v25, 16  ;;  %v8829_v1 = vrot.slane %v8827_v34, 3  ;;  %v8854_v63 = vshrl.u32 %v8756_v17, 16  ;;  %v8857_v3 = vshll.u32 %v8756_v17, 16 }
 0x550   :  { %14909 = vmatprep.mubr.bf16.mxu1 %v8391_v30  ;;  %v8811_v30 = vrot.slane %v8809_v47, 3  ;;  %v8414_v28 = vrot.slane %v8412_v24, 1  ;;  %v8753_v24 = vpack.c.bf16 %v20524_v20, %v20521_v60  ;;  %v8838_v26 = vrot.slane %v8836_v42, 3 }
 0x551   :  { %v8820_v14 = vrot.slane %v8818_v53, 3  ;;  %v8833_v47 = vor.u32 %v8832_v22, %v8829_v1  ;;  %v8863_v38 = vshrl.u32 %v8759_v50, 16  ;;  %v8762_v53 = vpack.c.bf16 %v20581_v18, %v20557_v61 }
 0x552   :  { %v8815_v54 = vor.u32 %v8814_v29, %v8811_v30  ;;  %v8415_v55 = vsel %vm4278_vm8, %v8410_v6, %v8414_v28  ;;  %v8845_v15 = vshrl.u32 %v8753_v24, 16  ;;  %v8848_v49 = vshll.u32 %v8753_v24, 16  ;;  %v16298_v30 = vld [vmem:[%s22287_s4 + $0x510] sm:$0xff]  }
 0x553   :  { %v8824_v48 = vor.u32 %v8823_v12, %v8820_v14  ;;  %v8866_v6 = vshll.u32 %v8759_v50, 16  ;;  %v8859_v28 = vrot.slane %v8857_v3, 4  ;;  %v8765_v34 = vpack.c.bf16 %v20585_v27, %v20583_v35 }
 0x554   :  { %v8816_v39 = vsel %vm23025_vm10, %v8807_v62, %v8815_v54  ;;  %v8847_v20 = vrot.slane %v8845_v15, 3  ;;  %v8850_v25 = vrot.slane %v8848_v49, 4  ;;  %v8865_v62 = vrot.slane %v8863_v38, 3  ;;  %vm23029_vm10 = vmmov %vm22852_vm1 }
 0x555   :  { %v8825_v33 = vsel %vm22852_vm1, %v8815_v54, %v8824_v48  ;;  %v8834_v60 = vsel %vm23026_vm15, %v8824_v48, %v8833_v47  ;;  %v8868_v54 = vrot.slane %v8866_v6, 4  ;;  %v8872_v14 = vshrl.u32 %v8762_v53, 16  ;;  %vm23030_vm15 = vmmov %vm22852_vm1 }
 0x556   :  { %v8851_v21 = vor.u32 %v8850_v25, %v8847_v20  ;;  %v8875_v12 = vshll.u32 %v8762_v53, 16  ;;  %v8881_v61 = vshrl.u32 %v8765_v34, 16  ;;  %v8884_v18 = vshll.u32 %v8765_v34, 16 }
 0x557   :  { %14910 = vmatmul.mubr.bf16.gmra.mrb[64].mxu1 %v8399_v37  ;;  %v16297_v37 = vld [vmem:[%s22287_s4 + $0x508] sm:$0xff]   ;;  %v8869_v51 = vor.u32 %v8868_v54, %v8865_v62  ;;  %v8874_v27 = vrot.slane %v8872_v14, 3  ;;  %v8768_v22 = vpack.c.bf16 %v20608_v16, %v20587_v9 }
 0x558   :  { %14913 = vmatprep.mubr.bf16.mxu1 %v8407_v13  ;;  %v8841_v13 = vrot.slane %v8839_v7, 4  ;;  %v8877_v1 = vrot.slane %v8875_v12, 4  ;;  %v8883_v48 = vrot.slane %v8881_v61, 3  ;;  %v8886_v42 = vrot.slane %v8884_v18, 4 }
 0x559   :  { %v8771_v7 = vpack.c.bf16 %v20612_v10, %v20610_v2  ;;  %v8890_v49 = vshrl.u32 %v8768_v22, 16  ;;  %v16303_v2 = vld [vmem:[%s22287_s4 + $0x538] sm:$0xff]  }
 0x55a   :  { %v8842_v29 = vor.u32 %v8841_v13, %v8838_v26  ;;  %v8878_v15 = vor.u32 %v8877_v1, %v8874_v27  ;;  %v20817_v26 = vld [vmem:[#allocation2 + $0x2d0] sm:$0xff]  ;;  %v8774_v13 = vpack.c.bf16 %v20634_v4, %v20614_v58 }
 0x55b   :  { %v8899_v9 = vshrl.u32 %v8771_v7, 16  ;;  %v8902_v16 = vshll.u32 %v8771_v7, 16  ;;  %v8892_v17 = vrot.slane %v8890_v49, 3 }
 0x55c   :  { %v8843_v31 = vsel %vm23027_vm7, %v8833_v47, %v8842_v29  ;;  %v8852_v46 = vsel %vm23028_vm14, %v8842_v29, %v8851_v21  ;;  %v16302_v47 = vld [vmem:[%s22287_s4 + $0x530] sm:$0xff]   ;;  %v8879_v10 = vsel %vm23030_vm15, %v8869_v51, %v8878_v15  ;;  %vm23031_vm7 = vmmov %vm22852_vm1  ;;  %v8908_v58 = vshrl.u32 %v8774_v13, 16 }
 0x55d   :  { %v8901_v25 = vrot.slane %v8899_v9, 3  ;;  %v8904_v50 = vrot.slane %v8902_v16, 4  ;;  %v8911_v4 = vshll.u32 %v8774_v13, 16  ;;  %vm23032_vm14 = vmmov %vm22852_vm1 }
 0x55e   :  { %vm23034_vm15 = vmmov %vm22852_vm1 }
 0x55f   :  { %14914 = vmatmul.mubr.bf16.gmra.mrb[68].mxu1 %v8415_v55  ;;  %v8905_v38 = vor.u32 %v8904_v50, %v8901_v25 }
 0x560   :  { %14933 = vmatprep.mubr.bf16.mxu1 %v8816_v39  ;;  %v16301_v39 = vld [vmem:[%s22287_s4 + $0x528] sm:$0xff]  }
 0x567   :  { %14934 = vmatmul.mubr.bf16.vlgmr.msra.gmra.mrb[16].mxu1 %v8825_v33  ;;  %v8887_v33 = vor.u32 %v8886_v42, %v8883_v48  ;;  %v8746_v42 = vpack.c.bf16 %v20659_v5, %v20650_v32  ;;  %v8752_v5 = vpack.c.bf16 %v20673_v45, %v20665_v56 }
 0x568   :  { %14937 = vmatprep.mubr.bf16.mxu1 %v8834_v60  ;;  %15006 = vmatpush3.bf16.msra.mxu1 %v20758_v0  ;;  %v8856_v0 = vrot.slane %v8854_v63, 3  ;;  %v20833_v63 = vld [vmem:[%s22287_s4 + $0x540] sm:$0xff]  }
 0x569   :  { %15007 = vmatprep.subr.bf16.mxu1 %v16297_v37  ;;  %v8888_v20 = vsel %vm23031_vm7, %v8878_v15, %v8887_v33  ;;  %v9590_v49 = vshrl.u32 %v8746_v42, 16  ;;  %vm23035_vm7 = vmmov %vm22852_vm1  ;;  %v9608_v25 = vshrl.u32 %v8752_v5, 16  ;;  %v9611_v50 = vshll.u32 %v8752_v5, 16 }
 0x56a   :  { %v8860_v55 = vor.u32 %v8859_v28, %v8856_v0  ;;  %v8910_v0 = vrot.slane %v8908_v58, 3  ;;  %v8913_v28 = vrot.slane %v8911_v4, 4 }
 0x56b   :  { %v9610_v45 = vrot.slane %v9608_v25, 3  ;;  %v16311_v25 = vld [vmem:[%s22287_s4 + $0x578] sm:$0xff]  }
 0x56c   :  { %15008 = vmatpush3.bf16.msra.mxu1 %v16297_v37  ;;  %v8861_v35 = vsel %vm23029_vm10, %v8851_v21, %v8860_v55  ;;  %v8870_v24 = vsel %vm22852_vm1, %v8860_v55, %v8869_v51  ;;  %v8893_v37 = vshll.u32 %v8768_v22, 16  ;;  %v8735_v21 = vld [vmem:[#allocation2 + $0x300] sm:$0x7f]  ;;  %vm23033_vm10 = vmmov %vm22852_vm1  ;;  %v8743_v55 = vpack.c.bf16 %v20648_v11, %v20646_v36 }
 0x56d   :  { %15009 = vmatprep.subr.bf16.mxu1 %v16298_v30  ;;  %v8780_v53 = vpack.c.bf16 %v8735_v21, %v8735_v21  ;;  %v8914_v14 = vor.u32 %v8913_v28, %v8910_v0  ;;  %v9613_v21 = vrot.slane %v9611_v50, 4  ;;  %v16306_v0 = vld [vmem:[%s22287_s4 + $0x550] sm:$0xff]  }
 0x56e   :  { %v8895_v60 = vrot.slane %v8893_v37, 4  ;;  %v9584_v27 = vshll.u32 %v8743_v55, 16  ;;  %v9593_v37 = vshll.u32 %v8746_v42, 16 }
 0x56f   :  { %14938 = vmatmul.mubr.bf16.gmra.mrb[20].mxu1 %v8843_v31  ;;  %v8653_v31 = vld [vmem:[#allocation2 + $0x70] sm:$0x80]  ;;  %v8926_v12 = vshrl.u32 %v8780_v53, 16  ;;  %v8929_v51 = vshll.u32 %v8780_v53, 16  ;;  %v8915_v1 = vsel %vm22852_vm1, %v8905_v38, %v8914_v14  ;;  %v9614_v28 = vor.u32 %v9613_v21, %v9610_v45 }
 0x570   :  { %14941 = vmatprep.mubr.bf16.mxu1 %v8852_v46  ;;  %15010 = vmatpush3.bf16.msra.mxu1 %v16298_v30  ;;  %v20826_v30 = vld [vmem:[#allocation2] sm:$0xff]  ;;  %v8896_v3 = vor.u32 %v8895_v60, %v8892_v17  ;;  %v8740_v62 = vpack.c.bf16 %v20644_v57, %v8653_v31  ;;  %v9586_v7 = vrot.slane %v9584_v27, 4  ;;  %v9595_v32 = vrot.slane %v9593_v37, 4 }
 0x571   :  { %15011 = vmatprep.subr.bf16.mxu1 %v16299_v43  ;;  %v8777_v29 = vpack.c.bf16 %v20826_v30, %v20817_v26  ;;  %v8928_v57 = vrot.slane %v8926_v12, 3  ;;  %v8931_v22 = vrot.slane %v8929_v51, 4  ;;  %v16308_v27 = vld [vmem:[%s22287_s4 + $0x560] sm:$0xff]  }
 0x572   :  { %v8897_v46 = vsel %vm23032_vm14, %v8887_v33, %v8896_v3  ;;  %v8906_v54 = vsel %vm23033_vm10, %v8896_v3, %v8905_v38  ;;  %v9573_v61 = vshrl.u32 %v8740_v62, 16  ;;  %v9576_v18 = vshll.u32 %v8740_v62, 16  ;;  %vm23036_vm14 = vmmov %vm22852_vm1  ;;  %v16305_v3 = vld [vmem:[%s22287_s4 + $0x548] sm:$0xff]  }
 0x573   :  { %v8917_v6 = vshrl.u32 %v8777_v29, 16  ;;  %v8932_v15 = vor.u32 %v8931_v22, %v8928_v57  ;;  %vm23037_vm10 = vmmov %vm22852_vm1  ;;  %v8758_v38 = vpack.c.bf16 %v20694_v41, %v20679_v40 }
 0x574   :  { %15012 = vmatpush3.bf16.msra.mxu1 %v16299_v43  ;;  %v8920_v43 = vshll.u32 %v8777_v29, 16  ;;  %v9578_v48 = vrot.slane %v9576_v18, 4  ;;  %v23043_v18 = vld [vmem:[#allocation68_spill] sm:$0xff] }
 0x575   :  { %15013 = vmatprep.subr.bf16.mxu1 %v16300_v19  ;;  %v8919_v34 = vrot.slane %v8917_v6, 3  ;;  %v9626_v53 = vshrl.u32 %v8758_v38, 16 }
 0x577   :  { %14942 = vmatmul.mubr.bf16.gmra.mrb[24].mxu1 %v8861_v35  ;;  %v9581_v35 = vshrl.u32 %v8743_v55, 16  ;;  %v23041_v55 = vld [vmem:[#allocation39_spill] sm:$0xff] }
 0x578   :  { %14945 = vmatprep.mubr.bf16.mxu1 %v8870_v24  ;;  %15014 = vmatpush3.bf16.msra.mxu1 %v16300_v19  ;;  %v8922_v19 = vrot.slane %v8920_v43, 4  ;;  %v9575_v24 = vrot.slane %v9573_v61, 3  ;;  %v23038_v43 = vld [vmem:[#allocation9_spill] sm:$0xff] }
 0x579   :  { %15015 = vmatprep.subr.bf16.mxu1 %v16301_v39  ;;  %v9583_v11 = vrot.slane %v9581_v35, 3  ;;  %v8761_v31 = vpack.c.bf16 %v23038_v43, %v20696_v44  ;;  %v16307_v44 = vld [vmem:[%s22287_s4 + $0x558] sm:$0xff]  }
 0x57a   :  { %v9579_v33 = vor.u32 %v9578_v48, %v9575_v24 }
 0x57b   :  { %v9587_v9 = vor.u32 %v9586_v7, %v9583_v11  ;;  %v9635_v41 = vshrl.u32 %v8761_v31, 16  ;;  %v9638_v62 = vshll.u32 %v8761_v31, 16 }
 0x57c   :  { %15016 = vmatpush3.bf16.msra.mxu1 %v16301_v39  ;;  %v8923_v39 = vor.u32 %v8922_v19, %v8919_v34  ;;  %v23040_v19 = vld [vmem:[#allocation40_spill] sm:$0xff] }
 0x57d   :  { %15017 = vmatprep.subr.bf16.mxu1 %v16302_v47  ;;  %v9588_v17 = vsel %vm23036_vm14, %v9579_v33, %v9587_v9  ;;  %v9637_v51 = vrot.slane %v9635_v41, 3  ;;  %v9640_v61 = vrot.slane %v9638_v62, 4  ;;  %vm23045_vm14 = vmmov %vm22852_vm1 }
 0x57e   :  { %v8924_v36 = vsel %vm23034_vm15, %v8914_v14, %v8923_v39  ;;  %vm23039_vm15 = vmmov %vm22852_vm1  ;;  %v8764_v14 = vpack.c.bf16 %v23041_v55, %v23040_v19 }
 0x57f   :  { %14946 = vmatmul.mubr.bf16.gmra.mrb[28].mxu1 %v8879_v10  ;;  %v9592_v10 = vrot.slane %v9590_v49, 3  ;;  %v9641_v24 = vor.u32 %v9640_v61, %v9637_v51  ;;  %v23047_v49 = vld [vmem:[#allocation41_spill] sm:$0xff] }
 0x580   :  { %14949 = vmatprep.mubr.bf16.mxu1 %v8888_v20  ;;  %15018 = vmatpush3.bf16.msra.mxu1 %v16302_v47  ;;  %v8749_v47 = vpack.c.bf16 %v20663_v23, %v20661_v59  ;;  %v8755_v23 = vpack.c.bf16 %v20677_v8, %v20675_v52  ;;  %v9644_v57 = vshrl.u32 %v8764_v14, 16  ;;  %v9647_v22 = vshll.u32 %v8764_v14, 16 }
 0x581   :  { %15019 = vmatprep.subr.bf16.mxu1 %v16303_v2  ;;  %v9596_v20 = vor.u32 %v9595_v32, %v9592_v10  ;;  %v16310_v32 = vld [vmem:[%s22287_s4 + $0x570] sm:$0xff]  }
 0x582   :  { %v9599_v16 = vshrl.u32 %v8749_v47, 16  ;;  %v9602_v13 = vshll.u32 %v8749_v47, 16  ;;  %v9617_v58 = vshrl.u32 %v8755_v23, 16  ;;  %v9620_v4 = vshll.u32 %v8755_v23, 16 }
 0x583   :  { %v9597_v56 = vsel %vm23037_vm10, %v9587_v9, %v9596_v20  ;;  %v9646_v7 = vrot.slane %v9644_v57, 3  ;;  %v9649_v47 = vrot.slane %v9647_v22, 4  ;;  %vm23048_vm10 = vmmov %vm22852_vm1 }
 0x584   :  { %15020 = vmatpush3.bf16.msra.mxu1 %v16303_v2  ;;  %v8933_v2 = vsel %vm23035_vm7, %v8923_v39, %v8932_v15  ;;  %v9601_v60 = vrot.slane %v9599_v16, 3  ;;  %v9604_v59 = vrot.slane %v9602_v13, 4  ;;  %v9619_v8 = vrot.slane %v9617_v58, 3  ;;  %vm23042_vm7 = vmmov %vm22852_vm1  ;;  %v23044_v39 = vld [vmem:[#allocation42_spill] sm:$0xff]  ;;  %v23046_v15 = vld [vmem:[#allocation57_spill] sm:$0xff] }
 0x585   :  { %15049 = vmatprep.subr.bf16.mxu1 %v20833_v63  ;;  %v9622_v6 = vrot.slane %v9620_v4, 4  ;;  %v8767_v35 = vpack.c.bf16 %v23044_v39, %v23043_v18  ;;  %v8770_v37 = vpack.c.bf16 %v23047_v49, %v23046_v15  ;;  %v23049_v13 = vld [vmem:[#allocation73_spill] sm:$0xff]  ;;  %v9650_v5 = vor.u32 %v9649_v47, %v9646_v7  ;;  %v23051_v4 = vld [vmem:[#allocation58_spill] sm:$0xff] }
 0x586   :  { %v9605_v29 = vor.u32 %v9604_v59, %v9601_v60  ;;  %v23059_v7 = vld [vmem:[#allocation77_spill] sm:$0xff] }
 0x587   :  { %14950 = vmatmul.mubr.bf16.gmra.mrb[32].mxu1 %v8897_v46  ;;  %v9629_v46 = vshll.u32 %v8758_v38, 16  ;;  %v9623_v40 = vor.u32 %v9622_v6, %v9619_v8  ;;  %v9653_v48 = vshrl.u32 %v8767_v35, 16  ;;  %v9656_v42 = vshll.u32 %v8767_v35, 16  ;;  %v20902_v6 = vld [vmem:[%s22287_s4 + $0x5c0] sm:$0xff]  }
 0x588   :  { %14953 = vmatprep.mubr.bf16.mxu1 %v8906_v54  ;;  %v9606_v52 = vsel %vm22852_vm1, %v9596_v20, %v9605_v29  ;;  %v9615_v54 = vsel %vm23039_vm15, %v9605_v29, %v9614_v28  ;;  %v9665_v60 = vshll.u32 %v8770_v37, 16  ;;  %v9651_v50 = vsel %vm22852_vm1, %v9641_v24, %v9650_v5  ;;  %vm23053_vm15 = vmmov %vm22852_vm1 }
 0x589   :  { %v9631_v34 = vrot.slane %v9629_v46, 4  ;;  %v9624_v12 = vsel %vm23042_vm7, %v9614_v28, %v9623_v40  ;;  %v9655_v9 = vrot.slane %v9653_v48, 3  ;;  %v9658_v16 = vrot.slane %v9656_v42, 4  ;;  %vm23055_vm7 = vmmov %vm22852_vm1 }
 0x58a   :  { %v9667_v58 = vrot.slane %v9665_v60, 4  ;;  %v16427_v60 = vld [vmem:[#allocation2 + $0x78] sm:$0xff] }
 0x58b   :  { %v9659_v59 = vor.u32 %v9658_v16, %v9655_v9 }
 0x58d   :  { %v9660_v45 = vsel %vm23053_vm15, %v9650_v5, %v9659_v59  ;;  %vm23060_vm15 = vnez %v23059_v7 }
 0x58f   :  { %14954 = vmatmul.mubr.bf16.gmra.mrb[36].mxu1 %v8915_v1 }
 0x590   :  { %14957 = vmatprep.mubr.bf16.mxu1 %v8924_v36  ;;  %v16309_v36 = vld [vmem:[%s22287_s4 + $0x568] sm:$0xff]  }
 0x597   :  { %14958 = vmatmul.mubr.bf16.gmra.mrb[40].mxu1 %v8933_v2  ;;  %v23050_v2 = vld [vmem:[#allocation19_spill] sm:$0xff] }
 0x598   :  { %15021 = vmatprep.mubr.bf16.mxu1 %v9588_v17  ;;  %v8773_v10 = vpack.c.bf16 %v23050_v2, %v23049_v13  ;;  %v9662_v17 = vshrl.u32 %v8770_v37, 16 }
 0x59a   :  { %v9671_v23 = vshrl.u32 %v8773_v10, 16  ;;  %v9674_v20 = vshll.u32 %v8773_v10, 16  ;;  %v9664_v29 = vrot.slane %v9662_v17, 3 }
 0x59c   :  { %v9673_v21 = vrot.slane %v9671_v23, 3  ;;  %v9676_v38 = vrot.slane %v9674_v20, 4  ;;  %v9668_v43 = vor.u32 %v9667_v58, %v9664_v29 }
 0x59e   :  { %v9677_v28 = vor.u32 %v9676_v38, %v9673_v21  ;;  %v9669_v41 = vsel %vm23055_vm7, %v9659_v59, %v9668_v43  ;;  %vm23061_vm7 = vmmov %vm22852_vm1  ;;  %v16428_v59 = vld [vmem:[#allocation2 + $0x90] sm:$0xff] }
 0x59f   :  { %15022 = vmatmul.mubr.bf16.vlgmr.msra.gmra.mrb[44].mxu1 %v9597_v56  ;;  %v9944_v23 = vpack.c.bf16 %v16428_v59, %v16427_v60 }
 0x5a0   :  { %15025 = vmatprep.mubr.bf16.mxu1 %v9606_v52  ;;  %15050 = vmatpush3.bf16.msra.mxu1 %v20833_v63  ;;  %v9628_v63 = vrot.slane %v9626_v53, 3  ;;  %v23054_v52 = vld [vmem:[#allocation59_spill] sm:$0xff] }
 0x5a1   :  { %15051 = vmatprep.subr.bf16.mxu1 %v16305_v3  ;;  %v8779_v8 = vpack.c.bf16 %v20826_v30, %v23054_v52 }
 0x5a2   :  { %v9632_v1 = vor.u32 %v9631_v34, %v9628_v63 }
 0x5a3   :  { %v9689_v53 = vshrl.u32 %v8779_v8, 16  ;;  %v9692_v46 = vshll.u32 %v8779_v8, 16 }
 0x5a4   :  { %15052 = vmatpush3.bf16.msra.mxu1 %v16305_v3  ;;  %v9633_v11 = vsel %vm23045_vm14, %v9623_v40, %v9632_v1  ;;  %v9642_v33 = vsel %vm23048_vm10, %v9632_v1, %v9641_v24  ;;  %v23052_v3 = vld [vmem:[#allocation74_spill] sm:$0xff]  ;;  %v8737_v40 = vld [vmem:[#allocation2 + $0x310] sm:$0x7f]  ;;  %vm23056_vm14 = vmmov %vm22852_vm1 }
 0x5a5   :  { %15053 = vmatprep.subr.bf16.mxu1 %v16306_v0  ;;  %v8776_v56 = vpack.c.bf16 %v23052_v3, %v23051_v4  ;;  %v9678_v63 = vsel %vm23056_vm14, %v9668_v43, %v9677_v28  ;;  %v9691_v34 = vrot.slane %v9689_v53, 3  ;;  %v9694_v19 = vrot.slane %v9692_v46, 4  ;;  %vm23057_vm10 = vmmov %vm22852_vm1  ;;  %v16429_v46 = vld [vmem:[#allocation2 + $0xa8] sm:$0xff] }
 0x5a7   :  { %15026 = vmatmul.mubr.bf16.gmra.mrb[48].mxu1 %v9615_v54  ;;  %v9680_v31 = vshrl.u32 %v8776_v56, 16  ;;  %v8782_v54 = vpack.c.bf16 %v8737_v40, %v8737_v40  ;;  %v9695_v51 = vor.u32 %v9694_v19, %v9691_v34  ;;  %v16430_v40 = vld [vmem:[#allocation2 + $0xc0] sm:$0xff]  ;;  %v16432_v34 = vld [vmem:[#allocation2 + $0xf0] sm:$0xff] }
 0x5a8   :  { %15029 = vmatprep.mubr.bf16.mxu1 %v9624_v12  ;;  %15054 = vmatpush3.bf16.msra.mxu1 %v16306_v0  ;;  %v9683_v0 = vshll.u32 %v8776_v56, 16 }
 0x5a9   :  { %15055 = vmatprep.subr.bf16.mxu1 %v16307_v44  ;;  %v9682_v62 = vrot.slane %v9680_v31, 3  ;;  %v9698_v14 = vshrl.u32 %v8782_v54, 16  ;;  %v9701_v12 = vshll.u32 %v8782_v54, 16 }
 0x5ab   :  { %v9703_v1 = vrot.slane %v9701_v12, 4 }
 0x5ac   :  { %15056 = vmatpush3.bf16.msra.mxu1 %v16307_v44  ;;  %v9685_v44 = vrot.slane %v9683_v0, 4 }
 0x5ad   :  { %15057 = vmatprep.subr.bf16.mxu1 %v16308_v27 }
 0x5ae   :  { %v9686_v55 = vor.u32 %v9685_v44, %v9682_v62  ;;  %v16313_v62 = vld [vmem:[%s22287_s4 + $0x5c8] sm:$0xff]  }
 0x5af   :  { %15030 = vmatmul.mubr.bf16.gmra.mrb[52].mxu1 %v9633_v11 }
 0x5b0   :  { %15033 = vmatprep.mubr.bf16.mxu1 %v9642_v33  ;;  %15058 = vmatpush3.bf16.msra.mxu1 %v16308_v27  ;;  %v9687_v35 = vsel %vm23057_vm10, %v9677_v28, %v9686_v55  ;;  %v9700_v27 = vrot.slane %v9698_v14, 3  ;;  %v9696_v22 = vsel %vm22852_vm1, %v9686_v55, %v9695_v51 }
 0x5b1   :  { %15059 = vmatprep.subr.bf16.mxu1 %v16309_v36 }
 0x5b2   :  { %v9704_v15 = vor.u32 %v9703_v1, %v9700_v27 }
 0x5b4   :  { %15060 = vmatpush3.bf16.msra.mxu1 %v16309_v36  ;;  %v9705_v17 = vsel %vm23061_vm7, %v9695_v51, %v9704_v15  ;;  %v23067_v51 = vld [vmem:[#allocation75_spill] sm:$0xff] }
 0x5b5   :  { %15061 = vmatprep.subr.bf16.mxu1 %v16310_v32  ;;  %vm23068_vm10 = vnez %v23067_v51 }
 0x5b7   :  { %15034 = vmatmul.mubr.bf16.gmra.mrb[56].mxu1 %v9651_v50 }
 0x5b8   :  { %15037 = vmatprep.mubr.bf16.mxu1 %v9660_v45  ;;  %15062 = vmatpush3.bf16.msra.mxu1 %v16310_v32  ;;  %v23063_v45 = vld [vmem:[#allocation25_spill] sm:$0xff] }
 0x5b9   :  { %15063 = vmatprep.subr.bf16.mxu1 %v16311_v25  ;;  %vm23064_vm14 = vnez %v23063_v45 }
 0x5bc   :  { %15064 = vmatpush3.bf16.msra.mxu1 %v16311_v25 }
 0x5bd   :  { %15137 = vmatprep.subr.bf16.mxu1 %v20902_v6 }
 0x5bf   :  { %15038 = vmatmul.mubr.bf16.gmra.mrb[60].mxu1 %v9669_v41  ;;  %v9947_v41 = vpack.c.bf16 %v16430_v40, %v16429_v46 }
 0x5c0   :  { %15041 = vmatprep.mubr.bf16.mxu1 %v9678_v63  ;;  %v16431_v63 = vld [vmem:[#allocation2 + $0xd8] sm:$0xff] }
 0x5c1   :  { %v9950_v19 = vpack.c.bf16 %v16432_v34, %v16431_v63 }
 0x5c4   :  { %v20907_v61 = vpop.f32.mrb[152].mxu0 }
 0x5c5   :  { %v20909_v18 = vpop.f32.mrb[153].mxu0  ;;  %v12129_v49 = vmul.f32 %v20907_v61, %v20907_v61 }
 0x5c6   :  { %v20911_v39 = vpop.f32.mrb[154].mxu0  ;;  %v12123_v42 = vmul.f32 %v20909_v18, %v20909_v18 }
 0x5c7   :  { %v20914_v57 = vpop.f32.mrb[155].mxu0  ;;  %15042 = vmatmul.mubr.bf16.gmra.mrb[64].mxu1 %v9687_v35  ;;  %v11946_v47 = vsel %vm23060_vm15, %v20911_v39, 0.0 }
 0x5c8   :  { %v11940_v48 = vsel %vm17990_vm2, %v20914_v57, 0.0  ;;  %15045 = vmatprep.mubr.bf16.mxu1 %v9696_v22  ;;  %v12132_v16 = vmul.f32 %v11946_v47, %v11946_v47 }
 0x5c9   :  { %v12053_v36 = vadd.f32 %v11940_v48, %v20909_v18  ;;  %v12126_v11 = vmul.f32 %v11940_v48, %v11940_v48  ;;  %v16314_v48 = vld [vmem:[%s22287_s4 + $0x5d0] sm:$0xff]  }
 0x5cb   :  { %v12054_v37 = vadd.f32 %v20907_v61, %v12053_v36  ;;  %v12239_v33 = vadd.f32 %v12126_v11, %v12123_v42 }
 0x5cc   :  { %v20929_v9 = vpop.f32.mrb[156].mxu0 }
 0x5cd   :  { %v12240_v13 = vadd.f32 %v12239_v33, %v12129_v49  ;;  %v20931_v2 = vpop.f32.mrb[157].mxu0  ;;  %v12055_v10 = vadd.f32 %v12054_v37, %v11946_v47  ;;  %v12141_v38 = vmul.f32 %v20929_v9, %v20929_v9 }
 0x5ce   :  { %v12135_v32 = vmul.f32 %v20931_v2, %v20931_v2  ;;  %v20935_v5 = vpop.f32.mrb[158].mxu0 }
 0x5cf   :  { %v12056_v20 = vadd.f32 %v12055_v10, %v20931_v2  ;;  %v12241_v25 = vadd.f32 %v12240_v13, %v12132_v16  ;;  %v20939_v50 = vpop.f32.mrb[159].mxu0  ;;  %15046 = vmatmul.mubr.bf16.gmra.mrb[68].mxu1 %v9705_v17  ;;  %v11958_v21 = vsel %vm23064_vm14, %v20935_v5, 0.0  ;;  %v16433_v13 = vld [vmem:[#allocation2 + $0x108] sm:$0xff]  ;;  %v16434_v10 = vld [vmem:[#allocation2 + $0x120] sm:$0xff]  ;;  %v16315_v17 = vld [vmem:[%s22287_s4 + $0x5d8] sm:$0xff]  }
 0x5d0   :  { %v11952_v58 = vsel %vm18030_vm4, %v20939_v50, 0.0  ;;  %15065 = vmatprep.mubr.bf16.mxu1 %v9944_v23  ;;  %v12144_v31 = vmul.f32 %v11958_v21, %v11958_v21  ;;  %v16435_v23 = vld [vmem:[#allocation2 + $0x138] sm:$0xff] }
 0x5d1   :  { %v12242_v4 = vadd.f32 %v12241_v25, %v12135_v32  ;;  %v12057_v3 = vadd.f32 %v12056_v20, %v11952_v58  ;;  %v12138_v56 = vmul.f32 %v11952_v58, %v11952_v58  ;;  %v9953_v32 = vpack.c.bf16 %v16434_v10, %v16433_v13  ;;  %v16436_v20 = vld [vmem:[#allocation2 + $0x150] sm:$0xff] }
 0x5d2   :  { %v9956_v25 = vpack.c.bf16 %v16436_v20, %v16435_v23 }
 0x5d3   :  { %v12058_v52 = vadd.f32 %v20929_v9, %v12057_v3  ;;  %v12243_v8 = vadd.f32 %v12242_v4, %v12138_v56 }
 0x5d4   :  { %v20950_v43 = vpop.f32.mrb[160].mxu0 }
 0x5d5   :  { %23065 = vst [vmem:[#allocation34_spill] sm:$0xff] %v20950_v43  ;;  %v12244_v0 = vadd.f32 %v12243_v8, %v12141_v38  ;;  %v20952_v28 = vpop.f32.mrb[161].mxu0  ;;  %v12059_v53 = vadd.f32 %v12058_v52, %v11958_v21  ;;  %v12153_v11 = vmul.f32 %v20950_v43, %v20950_v43 }
 0x5d6   :  { %v12147_v44 = vmul.f32 %v20952_v28, %v20952_v28  ;;  %v20959_v54 = vpop.f32.mrb[162].mxu0 }
 0x5d7   :  { %23066 = vst [vmem:[#allocation32_spill] sm:$0xff] %v20959_v54  ;;  %v12060_v55 = vadd.f32 %v12059_v53, %v20952_v28  ;;  %v12245_v14 = vadd.f32 %v12244_v0, %v12144_v31  ;;  %v20962_v12 = vpop.f32.mrb[163].mxu0  ;;  %15066 = vmatmul.mubr.bf16.vlgmr.msra.gmra.mrb[16].mxu1 %v9947_v41  ;;  %v11970_v36 = vsel %vm22770_vm3, %v20959_v54, 0.0  ;;  %v16316_v31 = vld [vmem:[%s22287_s4 + $0x5e0] sm:$0xff]  }
 0x5d8   :  { %v11964_v35 = vsel %vm23068_vm10, %v20962_v12, 0.0  ;;  %15069 = vmatprep.mubr.bf16.mxu1 %v9950_v19  ;;  %15138 = vmatpush3.bf16.msra.mxu1 %v20902_v6  ;;  %v12156_v6 = vmul.f32 %v11970_v36, %v11970_v36 }
 0x5d9   :  { %v12246_v27 = vadd.f32 %v12245_v14, %v12147_v44  ;;  %v12061_v1 = vadd.f32 %v12060_v55, %v11964_v35  ;;  %v12150_v22 = vmul.f32 %v11964_v35, %v11964_v35  ;;  %15139 = vmatprep.subr.bf16.mxu1 %v16313_v62  ;;  %v16437_v55 = vld [vmem:[#allocation2 + $0x168] sm:$0xff]  ;;  %v16438_v14 = vld [vmem:[#allocation2 + $0x180] sm:$0xff] }
 0x5da   :  { %v9959_v35 = vpack.c.bf16 %v16438_v14, %v16437_v55 }
 0x5db   :  { %v12062_v47 = vadd.f32 %v20950_v43, %v12061_v1  ;;  %v12247_v15 = vadd.f32 %v12246_v27, %v12150_v22  ;;  %v16317_v27 = vld [vmem:[%s22287_s4 + $0x5e8] sm:$0xff]  }
 0x5dc   :  { %v20977_v49 = vpop.f32.mrb[164].mxu0  ;;  %15140 = vmatpush3.bf16.msra.mxu1 %v16313_v62 }
 0x5dd   :  { %23070 = vst [vmem:[#allocation52_spill] sm:$0xff] %v20977_v49  ;;  %v12248_v37 = vadd.f32 %v12247_v15, %v12153_v11  ;;  %v20979_v33 = vpop.f32.mrb[165].mxu0  ;;  %v12063_v16 = vadd.f32 %v12062_v47, %v11970_v36  ;;  %15141 = vmatprep.subr.bf16.mxu1 %v16314_v48  ;;  %v12165_v46 = vmul.f32 %v20977_v49, %v20977_v49  ;;  %v16440_v36 = vld [vmem:[#allocation2 + $0x1b0] sm:$0xff] }
 0x5de   :  { %23071 = vst [vmem:[#allocation51_spill] sm:$0xff] %v20979_v33  ;;  %v12159_v60 = vmul.f32 %v20979_v33, %v20979_v33  ;;  %v20986_v59 = vpop.f32.mrb[166].mxu0 }
 0x5df   :  { %23072 = vst [vmem:[#allocation10_spill] sm:$0xff] %v20986_v59  ;;  %v12064_v58 = vadd.f32 %v12063_v16, %v20979_v33  ;;  %v12249_v4 = vadd.f32 %v12248_v37, %v12156_v6  ;;  %v20989_v3 = vpop.f32.mrb[167].mxu0  ;;  %15070 = vmatmul.mubr.bf16.gmra.mrb[20].mxu1 %v9953_v32  ;;  %v11982_v53 = vsel %vm18201_vm12, %v20986_v59, 0.0  ;;  %v23080_v37 = vld [vmem:[#allocation3_spill] sm:$0xff] }
 0x5e0   :  { %23073 = vst [vmem:[#allocation21_spill] sm:$0xff] %v20989_v3  ;;  %v11976_v21 = vsel %vm18177_vm11, %v20989_v3, 0.0  ;;  %15073 = vmatprep.mubr.bf16.mxu1 %v9956_v25  ;;  %15142 = vmatpush3.bf16.msra.mxu1 %v16314_v48  ;;  %v12168_v44 = vmul.f32 %v11982_v53, %v11982_v53  ;;  %v16439_v48 = vld [vmem:[#allocation2 + $0x198] sm:$0xff]  ;;  %vm23081_vm1 = vnez %v23080_v37 }
 0x5e1   :  { %v12250_v38 = vadd.f32 %v12249_v4, %v12159_v60  ;;  %v12065_v52 = vadd.f32 %v12064_v58, %v11976_v21  ;;  %v12162_v8 = vmul.f32 %v11976_v21, %v11976_v21  ;;  %15143 = vmatprep.subr.bf16.mxu1 %v16315_v17  ;;  %v9962_v11 = vpack.c.bf16 %v16440_v36, %v16439_v48 }
 0x5e3   :  { %v12066_v40 = vadd.f32 %v20977_v49, %v12065_v52  ;;  %v12251_v41 = vadd.f32 %v12250_v38, %v12162_v8 }
 0x5e4   :  { %v21003_v62 = vpop.f32.mrb[168].mxu0  ;;  %15144 = vmatpush3.bf16.msra.mxu1 %v16315_v17  ;;  %v16318_v17 = vld [vmem:[%s22287_s4 + $0x5f0] sm:$0xff]  }
 0x5e5   :  { %23076 = vst [vmem:[#allocation38_spill] sm:$0xff] %v21003_v62  ;;  %v12252_v63 = vadd.f32 %v12251_v41, %v12165_v46  ;;  %v21005_v34 = vpop.f32.mrb[169].mxu0  ;;  %v12067_v19 = vadd.f32 %v12066_v40, %v11982_v53  ;;  %15145 = vmatprep.subr.bf16.mxu1 %v16316_v31  ;;  %v12177_v20 = vmul.f32 %v21003_v62, %v21003_v62  ;;  %v16442_v53 = vld [vmem:[#allocation2 + $0x1e0] sm:$0xff]  ;;  %v16319_v40 = vld [vmem:[%s22287_s4 + $0x5f8] sm:$0xff]  }
 0x5e6   :  { %23077 = vst [vmem:[#allocation36_spill] sm:$0xff] %v21005_v34  ;;  %v12171_v1 = vmul.f32 %v21005_v34, %v21005_v34  ;;  %v21012_v22 = vpop.f32.mrb[170].mxu0 }
 0x5e7   :  { %23078 = vst [vmem:[#allocation54_spill] sm:$0xff] %v21012_v22  ;;  %v12068_v47 = vadd.f32 %v12067_v19, %v21005_v34  ;;  %v12253_v15 = vadd.f32 %v12252_v63, %v12168_v44  ;;  %v21015_v6 = vpop.f32.mrb[171].mxu0  ;;  %15074 = vmatmul.mubr.bf16.gmra.mrb[24].mxu1 %v9959_v35  ;;  %v11994_v23 = vsel %vm18277_vm0, %v21012_v22, 0.0  ;;  %v16443_v63 = vld [vmem:[#allocation2 + $0x1f8] sm:$0xff]  ;;  %v16444_v19 = vld [vmem:[#allocation2 + $0x210] sm:$0xff] }
 0x5e8   :  { %23079 = vst [vmem:[#allocation53_spill] sm:$0xff] %v21015_v6  ;;  %v11988_v16 = vsel %vm23081_vm1, %v21015_v6, 0.0  ;;  %15077 = vmatprep.mubr.bf16.mxu1 %v9962_v11  ;;  %15146 = vmatpush3.bf16.msra.mxu1 %v16316_v31  ;;  %v12180_v21 = vmul.f32 %v11994_v23, %v11994_v23  ;;  %v16441_v31 = vld [vmem:[#allocation2 + $0x1c8] sm:$0xff]  ;;  %v9968_v55 = vpack.c.bf16 %v16444_v19, %v16443_v63  ;;  %v16448_v63 = vld [vmem:[#allocation2 + $0x270] sm:$0xff]  ;;  %v23116_v6 = vld [vmem:[#allocation16_spill] sm:$0xff] }
 0x5e9   :  { %v12254_v13 = vadd.f32 %v12253_v15, %v12171_v1  ;;  %v12069_v10 = vadd.f32 %v12068_v47, %v11988_v16  ;;  %v12174_v32 = vmul.f32 %v11988_v16, %v11988_v16  ;;  %15147 = vmatprep.subr.bf16.mxu1 %v16317_v27  ;;  %v9965_v46 = vpack.c.bf16 %v16442_v53, %v16441_v31  ;;  %v21049_v15 = vld [vmem:[%s22287_s4 + $0x600] sm:$0xff]  }
 0x5eb   :  { %v12070_v25 = vadd.f32 %v21003_v62, %v12069_v10  ;;  %v12255_v58 = vadd.f32 %v12254_v13, %v12174_v32 }
 0x5ec   :  { %v21029_v4 = vpop.f32.mrb[172].mxu0  ;;  %15148 = vmatpush3.bf16.msra.mxu1 %v16317_v27 }
 0x5ed   :  { %23083 = vst [vmem:[#allocation60_spill] sm:$0xff] %v21029_v4  ;;  %v12256_v38 = vadd.f32 %v12255_v58, %v12177_v20  ;;  %v21031_v52 = vpop.f32.mrb[173].mxu0  ;;  %v12071_v8 = vadd.f32 %v12070_v25, %v11994_v23  ;;  %15149 = vmatprep.subr.bf16.mxu1 %v16318_v17  ;;  %v12189_v10 = vmul.f32 %v21029_v4, %v21029_v4 }
 0x5ee   :  { %23084 = vst [vmem:[#allocation7_spill] sm:$0xff] %v21031_v52  ;;  %v12183_v41 = vmul.f32 %v21031_v52, %v21031_v52  ;;  %v21038_v44 = vpop.f32.mrb[174].mxu0 }
 0x5ef   :  { %23085 = vst [vmem:[#allocation8_spill] sm:$0xff] %v21038_v44  ;;  %v12072_v14 = vadd.f32 %v12071_v8, %v21031_v52  ;;  %v12257_v35 = vadd.f32 %v12256_v38, %v12180_v21  ;;  %v21041_v27 = vpop.f32.mrb[175].mxu0  ;;  %15078 = vmatmul.mubr.bf16.gmra.mrb[28].mxu1 %v9965_v46  ;;  %v12006_v13 = vsel %vm18338_vm13, %v21038_v44, 0.0  ;;  %v16445_v38 = vld [vmem:[#allocation2 + $0x228] sm:$0xff]  ;;  %v16446_v8 = vld [vmem:[#allocation2 + $0x240] sm:$0xff]  ;;  %v10724_v44 = vld [vmem:[#allocation2 + $0x138] sm:$0xff] }
 0x5f0   :  { %23086 = vst [vmem:[#allocation23_spill] sm:$0xff] %v21041_v27  ;;  %v12000_v48 = vsel %vm22812_vm6, %v21041_v27, 0.0  ;;  %15081 = vmatprep.mubr.bf16.mxu1 %v9968_v55  ;;  %15150 = vmatpush3.bf16.msra.mxu1 %v16318_v17  ;;  %v12192_v20 = vmul.f32 %v12006_v13, %v12006_v13  ;;  %v9971_v31 = vpack.c.bf16 %v16446_v8, %v16445_v38  ;;  %v16449_v8 = vld [vmem:[#allocation2 + $0x288] sm:$0xff] }
 0x5f1   :  { %v12258_v36 = vadd.f32 %v12257_v35, %v12183_v41  ;;  %v12073_v11 = vadd.f32 %v12072_v14, %v12000_v48  ;;  %v12186_v47 = vmul.f32 %v12000_v48, %v12000_v48  ;;  %15151 = vmatprep.subr.bf16.mxu1 %v16319_v40  ;;  %v16447_v41 = vld [vmem:[#allocation2 + $0x258] sm:$0xff] }
 0x5f2   :  { %v9974_v19 = vpack.c.bf16 %v16448_v63, %v16447_v41  ;;  %v16451_v63 = vld [vmem:[#allocation2 + $0x2b8] sm:$0xff] }
 0x5f3   :  { %v12074_v32 = vadd.f32 %v21029_v4, %v12073_v11  ;;  %v12259_v23 = vadd.f32 %v12258_v36, %v12186_v47  ;;  %v10727_v4 = vld [vmem:[#allocation2 + $0x150] sm:$0xff] }
 0x5f4   :  { %v21057_v17 = vpop.f32.mrb[176].mxu0  ;;  %15152 = vmatpush3.bf16.msra.mxu1 %v16319_v40 }
 0x5f5   :  { %23089 = vst [vmem:[#allocation55_spill] sm:$0xff] %v21057_v17  ;;  %v12260_v25 = vadd.f32 %v12259_v23, %v12189_v10  ;;  %v21059_v58 = vpop.f32.mrb[177].mxu0  ;;  %v12075_v21 = vadd.f32 %v12074_v32, %v12006_v13  ;;  %15181 = vmatprep.subr.bf16.mxu1 %v21049_v15  ;;  %v12201_v32 = vmul.f32 %v21057_v17, %v21057_v17 }
 0x5f6   :  { %23090 = vst [vmem:[#allocation56_spill] sm:$0xff] %v21059_v58  ;;  %v12195_v53 = vmul.f32 %v21059_v58, %v21059_v58  ;;  %v21064_v46 = vpop.f32.mrb[178].mxu0 }
 0x5f7   :  { %23091 = vst [vmem:[#allocation49_spill] sm:$0xff] %v21064_v46  ;;  %v21066_v55 = vpop.f32.mrb[179].mxu0  ;;  %v12076_v40 = vadd.f32 %v12075_v21, %v21059_v58  ;;  %v12261_v14 = vadd.f32 %v12260_v25, %v12192_v20  ;;  %15082 = vmatmul.mubr.bf16.gmra.mrb[32].mxu1 %v9971_v31  ;;  %v12018_v10 = vsel %vm19711_vm9, %v21064_v46, 0.0  ;;  %v16450_v31 = vld [vmem:[#allocation2 + $0x2a0] sm:$0xff] }
 0x5f8   :  { %23092 = vst [vmem:[#allocation50_spill] sm:$0xff] %v21066_v55  ;;  %v12012_v48 = vsel %vm18376_vm5, %v21066_v55, 0.0  ;;  %15085 = vmatprep.mubr.bf16.mxu1 %v9974_v19  ;;  %v12204_v20 = vmul.f32 %v12018_v10, %v12018_v10  ;;  %v9977_v41 = vpack.c.bf16 %v16450_v31, %v16449_v8  ;;  %v9980_v19 = vpack.c.bf16 %v20817_v26, %v16451_v63  ;;  %v16455_v31 = vld [vmem:[#allocation2 + $0xd0] sm:$0xff]  ;;  %v16456_v63 = vld [vmem:[#allocation2 + $0xe8] sm:$0xff] }
 0x5f9   :  { %v12077_v36 = vadd.f32 %v12076_v40, %v12012_v48  ;;  %v12198_v11 = vmul.f32 %v12012_v48, %v12012_v48  ;;  %v12262_v47 = vadd.f32 %v12261_v14, %v12195_v53 }
 0x5fb   :  { %v12078_v23 = vadd.f32 %v21057_v17, %v12077_v36  ;;  %v12263_v21 = vadd.f32 %v12262_v47, %v12198_v11  ;;  %v21081_v11 = vpack.c.bf16 %v20826_v30, %v20826_v30  ;;  %v16452_v47 = vld [vmem:[#allocation2 + $0x88] sm:$0xff]  ;;  %v16454_v30 = vld [vmem:[#allocation2 + $0xb8] sm:$0xff] }
 0x5fd   :  { %v12079_v25 = vadd.f32 %v12078_v23, %v12018_v10  ;;  %v12264_v38 = vadd.f32 %v12263_v21, %v12201_v32  ;;  %v16453_v10 = vld [vmem:[#allocation2 + $0xa0] sm:$0xff] }
 0x5fe   :  { %v9946_v32 = vpack.c.bf16 %v16453_v10, %v16452_v47  ;;  %v16323_v47 = vld [vmem:[%s22287_s4 + $0x618] sm:$0xff]   ;;  %v16460_v10 = vld [vmem:[#allocation2 + $0x148] sm:$0xff] }
 0x5ff   :  { %v12080_v53 = vrot.slane %v12079_v25, 4  ;;  %v12265_v40 = vadd.f32 %v12264_v38, %v12204_v20  ;;  %15086 = vmatmul.mubr.bf16.gmra.mrb[36].mxu1 %v9977_v41  ;;  %v9949_v41 = vpack.c.bf16 %v16455_v31, %v16454_v30  ;;  %v16464_v30 = vld [vmem:[#allocation2 + $0x1a8] sm:$0xff]  ;;  %v16465_v31 = vld [vmem:[#allocation2 + $0x1c0] sm:$0xff] }
 0x600   :  { %15089 = vmatprep.mubr.bf16.mxu1 %v9980_v19  ;;  %v16457_v19 = vld [vmem:[#allocation2 + $0x100] sm:$0xff] }
 0x601   :  { %v12081_v14 = vadd.f32 %v12080_v53, %v12079_v25  ;;  %v12266_v48 = vrot.slane %v12265_v40, 4  ;;  %v16477_v53 = vld [vmem:[#allocation2 + $0x2e0] sm:$0xff] }
 0x603   :  { %v12082_v46 = vrot.slane %v12081_v14, 2  ;;  %v12267_v55 = vadd.f32 %v12266_v48, %v12265_v40  ;;  %v16322_v40 = vld [vmem:[%s22287_s4 + $0x610] sm:$0xff]  }
 0x604   :  { %v16459_v48 = vld [vmem:[#allocation2 + $0x130] sm:$0xff] }
 0x605   :  { %v12083_v58 = vadd.f32 %v12082_v46, %v12081_v14  ;;  %v12268_v36 = vrot.slane %v12267_v55, 2  ;;  %v16458_v14 = vld [vmem:[#allocation2 + $0x118] sm:$0xff] }
 0x607   :  { %v12084_v23 = vrot.slane %v12083_v58, 1  ;;  %v12269_v21 = vadd.f32 %v12268_v36, %v12267_v55  ;;  %15090 = vmatmul.mubr.bf16.gmra.mrb[40].mxu1 %v21081_v11  ;;  %v16321_v55 = vld [vmem:[%s22287_s4 + $0x608] sm:$0xff]   ;;  %v9955_v36 = vpack.c.bf16 %v16459_v48, %v16458_v14  ;;  %v16469_v48 = vld [vmem:[#allocation2 + $0x220] sm:$0xff] }
 0x608   :  { %15153 = vmatprep.mubr.bf16.mxu1 %v9946_v32  ;;  %v16461_v32 = vld [vmem:[#allocation2 + $0x160] sm:$0xff]  ;;  %v16468_v14 = vld [vmem:[#allocation2 + $0x208] sm:$0xff] }
 0x609   :  { %v12085_v26 = vadd.f32 %v12084_v23, %v12083_v58  ;;  %v12270_v20 = vrot.slane %v12269_v21, 1  ;;  %v9952_v58 = vpack.c.bf16 %v16457_v19, %v16456_v63  ;;  %v9958_v23 = vpack.c.bf16 %v16461_v32, %v16460_v10  ;;  %v16466_v63 = vld [vmem:[#allocation2 + $0x1d8] sm:$0xff]  ;;  %v16467_v19 = vld [vmem:[#allocation2 + $0x1f0] sm:$0xff] }
 0x60a   :  { %v10700_v10 = vld [vmem:[#allocation2 + $0x78] sm:$0xfe]  ;;  %v10703_v32 = vld [vmem:[#allocation2 + $0x90] sm:$0xff] }
 0x60b   :  { %v21084_v25 = vmul.f32 0.0051020407, %v12085_v26  ;;  %v12271_v38 = vadd.f32 %v12270_v20, %v12269_v21  ;;  %v16462_v21 = vld [vmem:[#allocation2 + $0x178] sm:$0xff]  ;;  %v16463_v26 = vld [vmem:[#allocation2 + $0x190] sm:$0xff] }
 0x60c   :  { %v9961_v20 = vpack.c.bf16 %v16463_v26, %v16462_v21  ;;  %v16472_v26 = vld [vmem:[#allocation2 + $0x268] sm:$0xff] }
 0x60d   :  { %v21086_v8 = vmul.f32 0.0051020407, %v12271_v38  ;;  %v21090_v46 = vmul.f32 %v21084_v25, %v21084_v25  ;;  %v16325_v38 = vld [vmem:[%s22287_s4 + $0x628] sm:$0xff]  }
 0x60f   :  { %15154 = vmatmul.mubr.bf16.vlgmr.msra.gmra.mrb[44].mxu1 %v9949_v41  ;;  %v9964_v41 = vpack.c.bf16 %v16465_v31, %v16464_v30  ;;  %v10787_v30 = vpack.c.bf16 %v10703_v32, %v10700_v10  ;;  %v10706_v31 = vld [vmem:[#allocation2 + $0xa8] sm:$0xff]  ;;  %v10721_v32 = vld [vmem:[#allocation2 + $0x120] sm:$0xff] }
 0x610   :  { %15157 = vmatprep.mubr.bf16.mxu1 %v9952_v58  ;;  %15182 = vmatpush3.bf16.msra.mxu1 %v21049_v15  ;;  %v16324_v15 = vld [vmem:[%s22287_s4 + $0x620] sm:$0xff]   ;;  %v9967_v58 = vpack.c.bf16 %v16467_v19, %v16466_v63  ;;  %v10712_v63 = vld [vmem:[#allocation2 + $0xd8] sm:$0xff]  ;;  %v10715_v19 = vld [vmem:[#allocation2 + $0xf0] sm:$0xff] }
 0x611   :  { %15183 = vmatprep.subr.bf16.mxu1 %v16321_v55  ;;  %v10793_v17 = vpack.c.bf16 %v10715_v19, %v10712_v63  ;;  %v10718_v10 = vld [vmem:[#allocation2 + $0x108] sm:$0xff] }
 0x612   :  { %v10796_v52 = vpack.c.bf16 %v10721_v32, %v10718_v10  ;;  %v10730_v19 = vld [vmem:[#allocation2 + $0x168] sm:$0xff] }
 0x614   :  { %15184 = vmatpush3.bf16.msra.mxu1 %v16321_v55  ;;  %v16326_v55 = vld [vmem:[%s22287_s4 + $0x630] sm:$0xff]   ;;  %v10873_v63 = vshll.u32 %v10796_v52, 16 }
 0x615   :  { %15185 = vmatprep.subr.bf16.mxu1 %v16322_v40 }
 0x617   :  { %15158 = vmatmul.mubr.bf16.gmra.mrb[48].mxu1 %v9955_v36  ;;  %v9970_v36 = vpack.c.bf16 %v16469_v48, %v16468_v14  ;;  %v16475_v14 = vld [vmem:[#allocation2 + $0x2b0] sm:$0xff] }
 0x618   :  { %15161 = vmatprep.mubr.bf16.mxu1 %v9958_v23  ;;  %15186 = vmatpush3.bf16.msra.mxu1 %v16322_v40  ;;  %v16327_v40 = vld [vmem:[%s22287_s4 + $0x638] sm:$0xff]  }
 0x619   :  { %15187 = vmatprep.subr.bf16.mxu1 %v16323_v47  ;;  %v16470_v23 = vld [vmem:[#allocation2 + $0x238] sm:$0xff] }
 0x61c   :  { %15188 = vmatpush3.bf16.msra.mxu1 %v16323_v47  ;;  %v21119_v47 = vld [vmem:[%s22287_s4 + $0x680] sm:$0xff]  }
 0x61d   :  { %15189 = vmatprep.subr.bf16.mxu1 %v16324_v15 }
 0x61f   :  { %15162 = vmatmul.mubr.bf16.gmra.mrb[52].mxu1 %v9961_v20  ;;  %v16473_v20 = vld [vmem:[#allocation2 + $0x280] sm:$0xff] }
 0x620   :  { %15165 = vmatprep.mubr.bf16.mxu1 %v9964_v41  ;;  %15190 = vmatpush3.bf16.msra.mxu1 %v16324_v15  ;;  %v16471_v15 = vld [vmem:[#allocation2 + $0x250] sm:$0xff]  ;;  %v10709_v41 = vld [vmem:[#allocation2 + $0xc0] sm:$0xff] }
 0x621   :  { %15191 = vmatprep.subr.bf16.mxu1 %v16325_v38  ;;  %v9973_v21 = vpack.c.bf16 %v16471_v15, %v16470_v23 }
 0x624   :  { %15192 = vmatpush3.bf16.msra.mxu1 %v16325_v38  ;;  %v9976_v38 = vpack.c.bf16 %v16473_v20, %v16472_v26  ;;  %v10850_v26 = vshrl.u32 %v10787_v30, 16 }
 0x625   :  { %15193 = vmatprep.subr.bf16.mxu1 %v16326_v55 }
 0x627   :  { %15166 = vmatmul.mubr.bf16.gmra.mrb[56].mxu1 %v9967_v58  ;;  %v16474_v58 = vld [vmem:[#allocation2 + $0x298] sm:$0xff] }
 0x628   :  { %15169 = vmatprep.mubr.bf16.mxu1 %v9970_v36  ;;  %15194 = vmatpush3.bf16.msra.mxu1 %v16326_v55  ;;  %v10852_v55 = vshll.u32 %v10787_v30, 16  ;;  %v9979_v48 = vpack.c.bf16 %v16475_v14, %v16474_v58  ;;  %v16476_v36 = vld [vmem:[#allocation2 + $0x2c8] sm:$0xff]  ;;  %v10733_v14 = vld [vmem:[#allocation2 + $0x180] sm:$0xff] }
 0x629   :  { %15195 = vmatprep.subr.bf16.mxu1 %v16327_v40  ;;  %v9982_v23 = vpack.c.bf16 %v16477_v53, %v16476_v36  ;;  %v10799_v53 = vpack.c.bf16 %v10727_v4, %v10724_v44  ;;  %v10802_v10 = vpack.c.bf16 %v10733_v14, %v10730_v19  ;;  %v10751_v19 = vld [vmem:[#allocation2 + $0x210] sm:$0xff] }
 0x62a   :  { %v10854_v15 = vrot.slane %v10852_v55, 1  ;;  %v10869_v55 = vshrl.u32 %v10793_v17, 16 }
 0x62b   :  { %v10881_v36 = vshll.u32 %v10799_v53, 16 }
 0x62c   :  { %15196 = vmatpush3.bf16.msra.mxu1 %v16327_v40  ;;  %v10790_v40 = vpack.c.bf16 %v10709_v41, %v10706_v31  ;;  %v10855_v20 = vor.u32 %v10854_v15, %v10850_v26  ;;  %v10739_v15 = vld [vmem:[#allocation2 + $0x1b0] sm:$0xff]  ;;  %v10875_v26 = vrot.slane %v10873_v63, 1 }
 0x62d   :  { %15269 = vmatprep.subr.bf16.mxu1 %v21119_v47  ;;  %v10883_v44 = vrot.slane %v10881_v36, 1 }
 0x62e   :  { %v10861_v58 = vshrl.u32 %v10790_v40, 16 }
 0x62f   :  { %15170 = vmatmul.mubr.bf16.gmra.mrb[60].mxu1 %v9973_v21  ;;  %v10857_v21 = vshll.u32 %v10790_v40, 16  ;;  %v10885_v40 = vshrl.u32 %v10799_v53, 16 }
 0x630   :  { %15173 = vmatprep.mubr.bf16.mxu1 %v9976_v38  ;;  %v10865_v38 = vshll.u32 %v10793_v17, 16 }
 0x631   :  { %v10859_v27 = vrot.slane %v10857_v21, 1  ;;  %v16329_v21 = vld [vmem:[%s22287_s4 + $0x688] sm:$0xff]  }
 0x632   :  { %v10867_v41 = vrot.slane %v10865_v38, 1  ;;  %v16330_v38 = vld [vmem:[%s22287_s4 + $0x690] sm:$0xff]  }
 0x633   :  { %v10860_v31 = vsel %vm4278_vm8, %v10855_v20, %v10859_v27  ;;  %v10863_v30 = vor.u32 %v10861_v58, %v10859_v27  ;;  %v10877_v27 = vshrl.u32 %v10796_v52, 16  ;;  %v10889_v20 = vshll.u32 %v10802_v10, 16  ;;  %v10742_v58 = vld [vmem:[#allocation2 + $0x1c8] sm:$0xff]  ;;  %v16331_v52 = vld [vmem:[%s22287_s4 + $0x698] sm:$0xff]  }
 0x635   :  { %v10868_v32 = vsel %vm4278_vm8, %v10863_v30, %v10867_v41  ;;  %v10748_v30 = vld [vmem:[#allocation2 + $0x1f8] sm:$0xff]  ;;  %v10891_v14 = vrot.slane %v10889_v20, 1 }
 0x637   :  { %15174 = vmatmul.mubr.bf16.gmra.mrb[64].mxu1 %v9979_v48  ;;  %v10871_v48 = vor.u32 %v10869_v55, %v10867_v41  ;;  %v10745_v55 = vld [vmem:[#allocation2 + $0x1e0] sm:$0xff]  ;;  %v10887_v41 = vor.u32 %v10885_v40, %v10883_v44 }
 0x638   :  { %15177 = vmatprep.mubr.bf16.mxu1 %v9982_v23  ;;  %v10736_v23 = vld [vmem:[#allocation2 + $0x198] sm:$0xff]  ;;  %v10757_v40 = vld [vmem:[#allocation2 + $0x240] sm:$0xff] }
 0x639   :  { %v10876_v4 = vsel %vm4278_vm8, %v10871_v48, %v10875_v26  ;;  %v10805_v17 = vpack.c.bf16 %v10739_v15, %v10736_v23  ;;  %v10808_v48 = vpack.c.bf16 %v10745_v55, %v10742_v58  ;;  %v10892_v53 = vsel %vm4278_vm8, %v10887_v41, %v10891_v14  ;;  %v10763_v58 = vld [vmem:[#allocation2 + $0x270] sm:$0xff] }
 0x63a   :  { %v10811_v23 = vpack.c.bf16 %v10751_v19, %v10748_v30  ;;  %v10893_v15 = vshrl.u32 %v10802_v10, 16  ;;  %v16333_v10 = vld [vmem:[%s22287_s4 + $0x6a8] sm:$0xff]  }
 0x63b   :  { %v10897_v63 = vshll.u32 %v10805_v17, 16  ;;  %v10909_v19 = vshrl.u32 %v10808_v48, 16 }
 0x63d   :  { %v10899_v36 = vrot.slane %v10897_v63, 1 }
 0x63f   :  { %15178 = vmatmul.mubr.bf16.gmra.mrb[68].mxu1 %v21081_v11 }
 0x640   :  { %15197 = vmatprep.mubr.bf16.mxu1 %v10860_v31  ;;  %v10879_v31 = vor.u32 %v10877_v27, %v10875_v26  ;;  %v10901_v26 = vshrl.u32 %v10805_v17, 16  ;;  %v10754_v27 = vld [vmem:[#allocation2 + $0x228] sm:$0xff] }
 0x641   :  { %v10814_v41 = vpack.c.bf16 %v10757_v40, %v10754_v27  ;;  %v10775_v27 = vld [vmem:[#allocation2 + $0x2d0] sm:$0xff] }
 0x642   :  { %v10903_v20 = vor.u32 %v10901_v26, %v10899_v36  ;;  %v10769_v26 = vld [vmem:[#allocation2 + $0x2a0] sm:$0xff] }
 0x647   :  { %15198 = vmatmul.mubr.bf16.vlgmr.msra.gmra.mrb[16].mxu1 %v10868_v32  ;;  %v16332_v32 = vld [vmem:[%s22287_s4 + $0x6a0] sm:$0xff]  }
 0x648   :  { %15201 = vmatprep.mubr.bf16.mxu1 %v10876_v4  ;;  %15270 = vmatpush3.bf16.msra.mxu1 %v21119_v47  ;;  %v10884_v47 = vsel %vm4278_vm8, %v10879_v31, %v10883_v44  ;;  %v10895_v4 = vor.u32 %v10893_v15, %v10891_v14  ;;  %v10913_v44 = vshll.u32 %v10811_v23, 16  ;;  %v10760_v31 = vld [vmem:[#allocation2 + $0x258] sm:$0xff]  ;;  %v10917_v14 = vshrl.u32 %v10811_v23, 16  ;;  %v10766_v15 = vld [vmem:[#allocation2 + $0x288] sm:$0xff] }
 0x649   :  { %15271 = vmatprep.subr.bf16.mxu1 %v16329_v21  ;;  %v10817_v30 = vpack.c.bf16 %v10763_v58, %v10760_v31  ;;  %v10925_v58 = vshrl.u32 %v10814_v41, 16 }
 0x64a   :  { %v10900_v17 = vsel %vm4278_vm8, %v10895_v4, %v10899_v36  ;;  %v10915_v63 = vrot.slane %v10913_v44, 1  ;;  %v10772_v4 = vld [vmem:[#allocation2 + $0x2b8] sm:$0xff] }
 0x64b   :  { %v10929_v36 = vshll.u32 %v10817_v30, 16  ;;  %v10823_v31 = vpack.c.bf16 %v10775_v27, %v10772_v4 }
 0x64c   :  { %15272 = vmatpush3.bf16.msra.mxu1 %v16329_v21  ;;  %v10905_v21 = vshll.u32 %v10808_v48, 16  ;;  %v16335_v48 = vld [vmem:[%s22287_s4 + $0x6b8] sm:$0xff]  }
 0x64d   :  { %15273 = vmatprep.subr.bf16.mxu1 %v16330_v38  ;;  %v10931_v44 = vrot.slane %v10929_v36, 1  ;;  %v10949_v4 = vshrl.u32 %v10823_v31, 16 }
 0x64e   :  { %v10907_v55 = vrot.slane %v10905_v21, 1  ;;  %v10919_v21 = vor.u32 %v10917_v14, %v10915_v63  ;;  %v10702_v14 = vld [vmem:[#allocation2 + $0x88] sm:$0xfe] }
 0x64f   :  { %15202 = vmatmul.mubr.bf16.gmra.mrb[20].mxu1 %v10884_v47  ;;  %v16334_v47 = vld [vmem:[%s22287_s4 + $0x6b0] sm:$0xff]  }
 0x650   :  { %15205 = vmatprep.mubr.bf16.mxu1 %v10892_v53  ;;  %15274 = vmatpush3.bf16.msra.mxu1 %v16330_v38  ;;  %v10908_v38 = vsel %vm4278_vm8, %v10903_v20, %v10907_v55  ;;  %v10911_v53 = vor.u32 %v10909_v19, %v10907_v55  ;;  %v10820_v20 = vpack.c.bf16 %v10769_v26, %v10766_v15  ;;  %v10933_v55 = vshrl.u32 %v10817_v30, 16  ;;  %v10784_v26 = vld [vmem:[#allocation2 + $0x318] sm:$0x1] }
 0x651   :  { %15275 = vmatprep.subr.bf16.mxu1 %v16331_v52  ;;  %v10945_v19 = vshll.u32 %v10823_v31, 16  ;;  %v10829_v36 = vpack.c.bf16 %v10784_v26, %v10784_v26 }
 0x652   :  { %v10916_v23 = vsel %vm4278_vm8, %v10911_v53, %v10915_v63  ;;  %v10941_v30 = vshrl.u32 %v10820_v20, 16 }
 0x654   :  { %15276 = vmatpush3.bf16.msra.mxu1 %v16331_v52  ;;  %v10921_v52 = vshll.u32 %v10814_v41, 16  ;;  %v10953_v41 = vshll.u32 %v21081_v11, 16 }
 0x655   :  { %15277 = vmatprep.subr.bf16.mxu1 %v16332_v32 }
 0x656   :  { %v10923_v40 = vrot.slane %v10921_v52, 1  ;;  %v10705_v52 = vld [vmem:[#allocation2 + $0xa0] sm:$0xff] }
 0x657   :  { %15206 = vmatmul.mubr.bf16.gmra.mrb[24].mxu1 %v10900_v17 }
 0x658   :  { %15209 = vmatprep.mubr.bf16.mxu1 %v10908_v38  ;;  %15278 = vmatpush3.bf16.msra.mxu1 %v16332_v32  ;;  %v10924_v32 = vsel %vm4278_vm8, %v10919_v21, %v10923_v40  ;;  %v10927_v17 = vor.u32 %v10925_v58, %v10923_v40  ;;  %v10935_v38 = vor.u32 %v10933_v55, %v10931_v44  ;;  %v10947_v21 = vrot.slane %v10945_v19, 1  ;;  %v10708_v40 = vld [vmem:[#allocation2 + $0xb8] sm:$0xff] }
 0x659   :  { %15279 = vmatprep.subr.bf16.mxu1 %v16333_v10  ;;  %v10961_v55 = vshll.u32 %v10829_v36, 16  ;;  %v10726_v36 = vld [vmem:[#allocation2 + $0x148] sm:$0xff] }
 0x65a   :  { %v10932_v63 = vsel %vm4278_vm8, %v10927_v17, %v10931_v44  ;;  %v10957_v44 = vshrl.u32 %v21081_v11, 16  ;;  %v10717_v17 = vld [vmem:[#allocation2 + $0x100] sm:$0xff]  ;;  %v10720_v11 = vld [vmem:[#allocation2 + $0x118] sm:$0xff] }
 0x65c   :  { %15280 = vmatpush3.bf16.msra.mxu1 %v16333_v10  ;;  %v10937_v10 = vshll.u32 %v10820_v20, 16 }
 0x65d   :  { %15281 = vmatprep.subr.bf16.mxu1 %v16334_v47 }
 0x65e   :  { %v10939_v15 = vrot.slane %v10937_v10, 1  ;;  %v10714_v10 = vld [vmem:[#allocation2 + $0xe8] sm:$0xff] }
 0x65f   :  { %15210 = vmatmul.mubr.bf16.gmra.mrb[28].mxu1 %v10916_v23  ;;  %v10711_v23 = vld [vmem:[#allocation2 + $0xd0] sm:$0xff] }
 0x660   :  { %15213 = vmatprep.mubr.bf16.mxu1 %v10924_v32  ;;  %15282 = vmatpush3.bf16.msra.mxu1 %v16334_v47  ;;  %v10940_v53 = vsel %vm4278_vm8, %v10935_v38, %v10939_v15  ;;  %v10789_v47 = vpack.c.bf16 %v10705_v52, %v10702_v14  ;;  %v10943_v27 = vor.u32 %v10941_v30, %v10939_v15  ;;  %v10963_v15 = vrot.slane %v10961_v55, 1 }
 0x661   :  { %15283 = vmatprep.subr.bf16.mxu1 %v16335_v48  ;;  %v10951_v32 = vor.u32 %v10949_v4, %v10947_v21  ;;  %v10792_v38 = vpack.c.bf16 %v10711_v23, %v10708_v40  ;;  %v10795_v14 = vpack.c.bf16 %v10717_v17, %v10714_v10  ;;  %v10729_v4 = vld [vmem:[#allocation2 + $0x160] sm:$0xff]  ;;  %v10732_v17 = vld [vmem:[#allocation2 + $0x178] sm:$0xff] }
 0x662   :  { %v11588_v58 = vshll.u32 %v10789_v47, 16  ;;  %v10948_v19 = vsel %vm4278_vm8, %v10943_v27, %v10947_v21  ;;  %v11586_v26 = vshrl.u32 %v10789_v47, 16 }
 0x663   :  { %v11601_v30 = vshll.u32 %v10795_v14, 16  ;;  %v11605_v47 = vshrl.u32 %v10795_v14, 16 }
 0x664   :  { %15284 = vmatpush3.bf16.msra.mxu1 %v16335_v48  ;;  %v21157_v48 = vrot.slane %v10953_v41, 1  ;;  %v11590_v31 = vrot.slane %v11588_v58, 1  ;;  %v10801_v58 = vpack.c.bf16 %v10729_v4, %v10726_v36  ;;  %v10744_v36 = vld [vmem:[#allocation2 + $0x1d8] sm:$0xff]  ;;  %v10747_v4 = vld [vmem:[#allocation2 + $0x1f0] sm:$0xff] }
 0x666   :  { %v10956_v20 = vsel %vm4278_vm8, %v10951_v32, %v21157_v48  ;;  %v21164_v52 = vor.u32 %v10957_v44, %v21157_v48  ;;  %v11591_v41 = vor.u32 %v11590_v31, %v11586_v26  ;;  %v11603_v32 = vrot.slane %v11601_v30, 1  ;;  %v10738_v26 = vld [vmem:[#allocation2 + $0x1a8] sm:$0xff] }
 0x667   :  { %15214 = vmatmul.mubr.bf16.gmra.mrb[32].mxu1 %v10932_v63  ;;  %v11593_v63 = vshll.u32 %v10792_v38, 16  ;;  %v11597_v44 = vshrl.u32 %v10792_v38, 16  ;;  %v11617_v31 = vshll.u32 %v10801_v58, 16  ;;  %v11621_v14 = vshrl.u32 %v10801_v58, 16 }
 0x668   :  { %15217 = vmatprep.mubr.bf16.mxu1 %v10940_v53  ;;  %v10723_v53 = vld [vmem:[#allocation2 + $0x130] sm:$0xff]  ;;  %v10964_v21 = vsel %vm4278_vm8, %v21164_v52, %v10963_v15  ;;  %v10741_v15 = vld [vmem:[#allocation2 + $0x1c0] sm:$0xff] }
 0x669   :  { %v11595_v27 = vrot.slane %v11593_v63, 1  ;;  %v10798_v40 = vpack.c.bf16 %v10723_v53, %v10720_v11  ;;  %v11619_v53 = vrot.slane %v11617_v31, 1 }
 0x66b   :  { %v11596_v23 = vsel %vm4278_vm8, %v11591_v41, %v11595_v27  ;;  %v11609_v55 = vshll.u32 %v10798_v40, 16  ;;  %v11599_v10 = vor.u32 %v11597_v44, %v11595_v27  ;;  %v10807_v41 = vpack.c.bf16 %v10741_v15, %v10738_v26  ;;  %v10750_v44 = vld [vmem:[#allocation2 + $0x208] sm:$0xff]  ;;  %v10756_v26 = vld [vmem:[#allocation2 + $0x238] sm:$0xff]  ;;  %v10759_v15 = vld [vmem:[#allocation2 + $0x250] sm:$0xff] }
 0x66c   :  { %v11613_v38 = vshrl.u32 %v10798_v40, 16  ;;  %v11623_v27 = vor.u32 %v11621_v14, %v11619_v53  ;;  %v10765_v14 = vld [vmem:[#allocation2 + $0x280] sm:$0xff] }
 0x66d   :  { %v11611_v22 = vrot.slane %v11609_v55, 1  ;;  %v11604_v63 = vsel %vm4278_vm8, %v11599_v10, %v11603_v32  ;;  %v11637_v58 = vshrl.u32 %v10807_v41, 16 }
 0x66f   :  { %15218 = vmatmul.mubr.bf16.gmra.mrb[36].mxu1 %v10948_v19  ;;  %v10735_v19 = vld [vmem:[#allocation2 + $0x190] sm:$0xff] }
 0x670   :  { %15221 = vmatprep.mubr.bf16.mxu1 %v10956_v20  ;;  %v11607_v20 = vor.u32 %v11605_v47, %v11603_v32  ;;  %v10804_v62 = vpack.c.bf16 %v10735_v19, %v10732_v17  ;;  %v10753_v47 = vld [vmem:[#allocation2 + $0x220] sm:$0xff]  ;;  %v10810_v17 = vpack.c.bf16 %v10747_v4, %v10744_v36  ;;  %v10816_v36 = vpack.c.bf16 %v10759_v15, %v10756_v26 }
 0x672   :  { %v11612_v11 = vsel %vm4278_vm8, %v11607_v20, %v11611_v22  ;;  %v11625_v30 = vshll.u32 %v10804_v62, 16  ;;  %v10813_v20 = vpack.c.bf16 %v10753_v47, %v10750_v44  ;;  %v11629_v40 = vshrl.u32 %v10804_v62, 16  ;;  %v10768_v47 = vld [vmem:[#allocation2 + $0x298] sm:$0xff] }
 0x673   :  { %v11641_v31 = vshll.u32 %v10810_v17, 16  ;;  %v11645_v62 = vshrl.u32 %v10810_v17, 16  ;;  %v11661_v17 = vshrl.u32 %v10816_v36, 16 }
 0x674   :  { %v11627_v55 = vrot.slane %v11625_v30, 1 }
 0x675   :  { %v11643_v30 = vrot.slane %v11641_v31, 1 }
 0x676   :  { %v11628_v10 = vsel %vm4278_vm8, %v11623_v27, %v11627_v55 }
 0x677   :  { %15222 = vmatmul.mubr.bf16.gmra.mrb[40].mxu1 %v10964_v21  ;;  %v11615_v21 = vor.u32 %v11613_v38, %v11611_v22  ;;  %v11631_v22 = vor.u32 %v11629_v40, %v11627_v55  ;;  %v10762_v38 = vld [vmem:[#allocation2 + $0x268] sm:$0xff]  ;;  %v11647_v44 = vor.u32 %v11645_v62, %v11643_v30  ;;  %v10771_v55 = vld [vmem:[#allocation2 + $0x2b0] sm:$0xff] }
 0x678   :  { %15285 = vmatprep.mubr.bf16.mxu1 %v11596_v23  ;;  %v11633_v23 = vshll.u32 %v10807_v41, 16  ;;  %v10819_v27 = vpack.c.bf16 %v10765_v14, %v10762_v38  ;;  %v11653_v41 = vshrl.u32 %v10813_v20, 16  ;;  %v10774_v40 = vld [vmem:[#allocation2 + $0x2c8] sm:$0xff]  ;;  %v10822_v26 = vpack.c.bf16 %v10771_v55, %v10768_v47 }
 0x679   :  { %v11620_v32 = vsel %vm4278_vm8, %v11615_v21, %v11619_v53 }
 0x67a   :  { %v11635_v19 = vrot.slane %v11633_v23, 1  ;;  %v11657_v23 = vshll.u32 %v10816_v36, 16 }
 0x67c   :  { %v11636_v53 = vsel %vm4278_vm8, %v11631_v22, %v11635_v19  ;;  %v11659_v31 = vrot.slane %v11657_v23, 1  ;;  %v11677_v23 = vshrl.u32 %v10822_v26, 16 }
 0x67e   :  { %v11663_v38 = vor.u32 %v11661_v17, %v11659_v31 }
 0x67f   :  { %15286 = vmatmul.mubr.bf16.vlgmr.msra.gmra.mrb[44].mxu1 %v11604_v63  ;;  %v11639_v63 = vor.u32 %v11637_v58, %v11635_v19  ;;  %v10777_v58 = vld [vmem:[#allocation2 + $0x2e0] sm:$0xff] }
 0x680   :  { %15289 = vmatprep.mubr.bf16.mxu1 %v11612_v11  ;;  %v11649_v11 = vshll.u32 %v10813_v20, 16  ;;  %v11669_v20 = vshrl.u32 %v10819_v27, 16 }
 0x681   :  { %v11644_v21 = vsel %vm4278_vm8, %v11639_v63, %v11643_v30  ;;  %v10825_v63 = vpack.c.bf16 %v10777_v58, %v10774_v40 }
 0x682   :  { %v11651_v4 = vrot.slane %v11649_v11, 1  ;;  %v11673_v11 = vshll.u32 %v10822_v26, 16 }
 0x683   :  { %v11681_v30 = vshll.u32 %v10825_v63, 16  ;;  %v11685_v47 = vshrl.u32 %v10825_v63, 16 }
 0x684   :  { %v11652_v19 = vsel %vm4278_vm8, %v11647_v44, %v11651_v4 }
 0x687   :  { %15290 = vmatmul.mubr.bf16.gmra.mrb[48].mxu1 %v11620_v32  ;;  %v11655_v32 = vor.u32 %v11653_v41, %v11651_v4  ;;  %v11683_v4 = vrot.slane %v11681_v30, 1 }
 0x688   :  { %15293 = vmatprep.mubr.bf16.mxu1 %v11628_v10  ;;  %v11665_v10 = vshll.u32 %v10819_v27, 16 }
 0x689   :  { %v11660_v22 = vsel %vm4278_vm8, %v11655_v32, %v11659_v31  ;;  %v11687_v32 = vor.u32 %v11685_v47, %v11683_v4  ;;  %v23099_v47 = vld [vmem:[#allocation63_spill] sm:$0xff] }
 0x68a   :  { %v11667_v15 = vrot.slane %v11665_v10, 1 }
 0x68b   :  { %v11692_v10 = vsel %vm4278_vm8, %v11687_v32, %v21157_v48  ;;  %v23098_v48 = vld [vmem:[#allocation61_spill] sm:$0xff] }
 0x68c   :  { %v11671_v14 = vor.u32 %v11669_v20, %v11667_v15  ;;  %v11668_v62 = vsel %vm4278_vm8, %v11663_v38, %v11667_v15  ;;  %v23096_v15 = vld [vmem:[#allocation64_spill] sm:$0xff]  ;;  %v23097_v20 = vld [vmem:[#allocation11_spill] sm:$0xff] }
 0x68f   :  { %15294 = vmatmul.mubr.bf16.gmra.mrb[52].mxu1 %v11636_v53  ;;  %v11675_v53 = vrot.slane %v11673_v11, 1 }
 0x690   :  { %15297 = vmatprep.mubr.bf16.mxu1 %v11644_v21  ;;  %v10786_v21 = vld [vmem:[#allocation2 + $0x328] sm:$0x1] }
 0x691   :  { %v11676_v41 = vsel %vm4278_vm8, %v11671_v14, %v11675_v53  ;;  %v10831_v44 = vpack.c.bf16 %v10786_v21, %v10786_v21  ;;  %v11679_v55 = vor.u32 %v11677_v23, %v11675_v53 }
 0x693   :  { %v11697_v36 = vshll.u32 %v10831_v44, 16  ;;  %v11684_v27 = vsel %vm4278_vm8, %v11679_v55, %v11683_v4 }
 0x695   :  { %v11699_v40 = vrot.slane %v11697_v36, 1  ;;  %v23100_v36 = vld [vmem:[#allocation27_spill] sm:$0xff] }
 0x697   :  { %15298 = vmatmul.mubr.bf16.gmra.mrb[56].mxu1 %v11652_v19  ;;  %v11700_v58 = vsel %vm4278_vm8, %v21164_v52, %v11699_v40  ;;  %v23095_v19 = vld [vmem:[#allocation62_spill] sm:$0xff] }
 0x698   :  { %15301 = vmatprep.mubr.bf16.mxu1 %v11660_v22 }
 0x69f   :  { %15302 = vmatmul.mubr.bf16.gmra.mrb[60].mxu1 %v11668_v62 }
 0x6a0   :  { %15305 = vmatprep.mubr.bf16.mxu1 %v11676_v41 }
 0x6a7   :  { %15306 = vmatmul.mubr.bf16.gmra.mrb[64].mxu1 %v11684_v27 }
 0x6a8   :  { %15309 = vmatprep.mubr.bf16.mxu1 %v11692_v10 }
 0x6af   :  { %15310 = vmatmul.mubr.bf16.gmra.mrb[68].mxu1 %v11700_v58 }
 0x71a   :  { %v15199_v31 = vpop.f32.mrb[16].mxu1 }
 0x71b   :  { %v21185_v26 = vadd.f32 %v15199_v31, %v23095_v19  ;;  %v11061_v22 = vpop.f32.mrb[17].mxu1  ;;  %v23101_v19 = vld [vmem:[#allocation31_spill] sm:$0xff] }
 0x71c   :  { %v21188_v63 = vadd.f32 %v11061_v22, %v23096_v15  ;;  %v15200_v17 = vpop.f32.mrb[18].mxu1 }
 0x71d   :  { %v21191_v11 = vadd.f32 %v15200_v17, %v23097_v20  ;;  %v11064_v38 = vpop.f32.mrb[19].mxu1  ;;  %v12128_v4 = vmul.f32 %v21185_v26, %v21185_v26  ;;  %v23103_v20 = vld [vmem:[#allocation12_spill] sm:$0xff] }
 0x71e   :  { %v21194_v14 = vadd.f32 %v11064_v38, %v23098_v48  ;;  %v12122_v30 = vmul.f32 %v21188_v63, %v21188_v63 }
 0x71f   :  { %v11945_v62 = vsel %vm23060_vm15, %v21191_v11, 0.0 }
 0x720   :  { %v11939_v52 = vsel %vm17990_vm2, %v21194_v14, 0.0  ;;  %v12131_v40 = vmul.f32 %v11945_v62, %v11945_v62 }
 0x721   :  { %v12020_v53 = vadd.f32 %v21188_v63, %v11939_v52  ;;  %v12125_v21 = vmul.f32 %v11939_v52, %v11939_v52 }
 0x722   :  { %v15203_v41 = vpop.f32.mrb[20].mxu1 }
 0x723   :  { %v12021_v23 = vadd.f32 %v21185_v26, %v12020_v53  ;;  %v12206_v44 = vadd.f32 %v12125_v21, %v12122_v30  ;;  %v21209_v55 = vadd.f32 %v15203_v41, %v23099_v47  ;;  %v11077_v32 = vpop.f32.mrb[21].mxu1 }
 0x724   :  { %v21212_v27 = vadd.f32 %v11077_v32, %v23100_v36  ;;  %v15204_v10 = vpop.f32.mrb[22].mxu1  ;;  %v23104_v32 = vld [vmem:[#allocation66_spill] sm:$0xff] }
 0x725   :  { %v12207_v58 = vadd.f32 %v12206_v44, %v12128_v4  ;;  %v12022_v31 = vadd.f32 %v12021_v23, %v11945_v62  ;;  %v21215_v22 = vadd.f32 %v15204_v10, %v23101_v19  ;;  %v11080_v15 = vpop.f32.mrb[23].mxu1  ;;  %v12140_v23 = vmul.f32 %v21209_v55, %v21209_v55 }
 0x726   :  { %v12134_v17 = vmul.f32 %v21212_v27, %v21212_v27  ;;  %v21220_v38 = vadd.f32 %v11080_v15, %v23103_v20  ;;  %v23108_v20 = vld [vmem:[#allocation14_spill] sm:$0xff] }
 0x727   :  { %23102 = vst [vmem:[#allocation9_spill] sm:$0xff] %v21215_v22  ;;  %v12023_v48 = vadd.f32 %v21212_v27, %v12022_v31  ;;  %v12208_v52 = vadd.f32 %v12207_v58, %v12131_v40  ;;  %v11957_v41 = vsel %vm23064_vm14, %v21215_v22, 0.0  ;;  %v23106_v40 = vld [vmem:[#allocation33_spill] sm:$0xff] }
 0x728   :  { %v11951_v30 = vsel %vm18030_vm4, %v21220_v38, 0.0  ;;  %v12143_v19 = vmul.f32 %v11957_v41, %v11957_v41 }
 0x729   :  { %v12209_v53 = vadd.f32 %v12208_v52, %v12134_v17  ;;  %v12024_v21 = vadd.f32 %v12023_v48, %v11951_v30  ;;  %v12137_v62 = vmul.f32 %v11951_v30, %v11951_v30 }
 0x72a   :  { %v15207_v4 = vpop.f32.mrb[24].mxu1 }
 0x72b   :  { %v12025_v44 = vadd.f32 %v21209_v55, %v12024_v21  ;;  %v12210_v47 = vadd.f32 %v12209_v53, %v12137_v62  ;;  %v21233_v36 = vadd.f32 %v15207_v4, %v23104_v32  ;;  %v11093_v10 = vpop.f32.mrb[25].mxu1  ;;  %v23110_v21 = vld [vmem:[#allocation15_spill] sm:$0xff] }
 0x72c   :  { %v21236_v58 = vadd.f32 %v11093_v10, %v23106_v40  ;;  %v15208_v31 = vpop.f32.mrb[26].mxu1 }
 0x72d   :  { %23105 = vst [vmem:[#allocation40_spill] sm:$0xff] %v21233_v36  ;;  %v12211_v15 = vadd.f32 %v12210_v47, %v12140_v23  ;;  %v12026_v17 = vadd.f32 %v12025_v44, %v11957_v41  ;;  %v21239_v48 = vadd.f32 %v15208_v31, %v23108_v20  ;;  %v11096_v52 = vpop.f32.mrb[27].mxu1  ;;  %v12152_v40 = vmul.f32 %v21233_v36, %v21233_v36 }
 0x72e   :  { %23107 = vst [vmem:[#allocation39_spill] sm:$0xff] %v21236_v58  ;;  %v12146_v30 = vmul.f32 %v21236_v58, %v21236_v58  ;;  %v21244_v53 = vadd.f32 %v11096_v52, %v23110_v21  ;;  %v23114_v52 = vld [vmem:[#allocation67_spill] sm:$0xff] }
 0x72f   :  { %23109 = vst [vmem:[#allocation68_spill] sm:$0xff] %v21239_v48  ;;  %v12027_v62 = vadd.f32 %v21236_v58, %v12026_v17  ;;  %v12212_v4 = vadd.f32 %v12211_v15, %v12143_v19  ;;  %v11969_v44 = vsel %vm22770_vm3, %v21239_v48, 0.0  ;;  %v23112_v17 = vld [vmem:[#allocation65_spill] sm:$0xff]  ;;  %v23134_v48 = vld [vmem:[#allocation26_spill] sm:$0xff] }
 0x730   :  { %23111 = vst [vmem:[#allocation42_spill] sm:$0xff] %v21244_v53  ;;  %v11963_v32 = vsel %vm23068_vm10, %v21244_v53, 0.0 }
 0x731   :  { %v12213_v10 = vadd.f32 %v12212_v4, %v12146_v30  ;;  %v12028_v23 = vadd.f32 %v12027_v62, %v11963_v32  ;;  %v12149_v41 = vmul.f32 %v11963_v32, %v11963_v32  ;;  %v12155_v62 = vmul.f32 %v11969_v44, %v11969_v44 }
 0x732   :  { %v15211_v47 = vpop.f32.mrb[28].mxu1 }
 0x733   :  { %v12029_v31 = vadd.f32 %v21233_v36, %v12028_v23  ;;  %v12214_v20 = vadd.f32 %v12213_v10, %v12149_v41  ;;  %v21257_v19 = vadd.f32 %v15211_v47, %v23112_v17  ;;  %v11109_v15 = vpop.f32.mrb[29].mxu1  ;;  %v23118_v23 = vld [vmem:[#allocation18_spill] sm:$0xff] }
 0x734   :  { %v21260_v21 = vadd.f32 %v11109_v15, %v23114_v52  ;;  %v15212_v30 = vpop.f32.mrb[30].mxu1 }
 0x735   :  { %23113 = vst [vmem:[#allocation57_spill] sm:$0xff] %v21257_v19  ;;  %v12215_v4 = vadd.f32 %v12214_v20, %v12152_v40  ;;  %v12030_v32 = vadd.f32 %v12029_v31, %v11969_v44  ;;  %v21263_v34 = vadd.f32 %v15212_v30, %v23116_v6  ;;  %v11112_v59 = vpop.f32.mrb[31].mxu1  ;;  %v23120_v20 = vld [vmem:[#allocation43_spill] sm:$0xff] }
 0x736   :  { %23115 = vst [vmem:[#allocation41_spill] sm:$0xff] %v21260_v21  ;;  %v12158_v49 = vmul.f32 %v21260_v21, %v21260_v21  ;;  %v21268_v10 = vadd.f32 %v11112_v59, %v23118_v23  ;;  %v12164_v59 = vmul.f32 %v21257_v19, %v21257_v19 }
 0x737   :  { %23117 = vst [vmem:[#allocation73_spill] sm:$0xff] %v21263_v34  ;;  %v12031_v41 = vadd.f32 %v21260_v21, %v12030_v32  ;;  %v12216_v47 = vadd.f32 %v12215_v4, %v12155_v62  ;;  %v23122_v32 = vld [vmem:[#allocation44_spill] sm:$0xff] }
 0x738   :  { %23119 = vst [vmem:[#allocation19_spill] sm:$0xff] %v21268_v10  ;;  %v11975_v17 = vsel %vm18177_vm11, %v21268_v10, 0.0 }
 0x739   :  { %v12217_v15 = vadd.f32 %v12216_v47, %v12158_v49  ;;  %v12032_v40 = vadd.f32 %v12031_v41, %v11975_v17  ;;  %v12161_v44 = vmul.f32 %v11975_v17, %v11975_v17  ;;  %v11981_v49 = vsel %vm18201_vm12, %v21263_v34, 0.0  ;;  %v23124_v41 = vld [vmem:[#allocation20_spill] sm:$0xff]  ;;  %v23128_v34 = vld [vmem:[#allocation45_spill] sm:$0xff] }
 0x73a   :  { %v15215_v31 = vpop.f32.mrb[32].mxu1 }
 0x73b   :  { %v12218_v6 = vadd.f32 %v12217_v15, %v12161_v44  ;;  %v21275_v52 = vadd.f32 %v15215_v31, %v23120_v20  ;;  %v11125_v30 = vpop.f32.mrb[33].mxu1  ;;  %v12033_v23 = vadd.f32 %v21257_v19, %v12032_v40  ;;  %v23126_v44 = vld [vmem:[#allocation22_spill] sm:$0xff]  ;;  %v12167_v20 = vmul.f32 %v11981_v49, %v11981_v49 }
 0x73c   :  { %v21281_v62 = vadd.f32 %v11125_v30, %v23122_v32  ;;  %v15216_v4 = vpop.f32.mrb[34].mxu1 }
 0x73d   :  { %23121 = vst [vmem:[#allocation58_spill] sm:$0xff] %v21275_v52  ;;  %v21287_v47 = vadd.f32 %v15216_v4, %v23124_v41  ;;  %v11128_v17 = vpop.f32.mrb[35].mxu1  ;;  %v12219_v15 = vadd.f32 %v12218_v6, %v12164_v59  ;;  %v12034_v10 = vadd.f32 %v12033_v23, %v11981_v49  ;;  %v23130_v59 = vld [vmem:[#allocation46_spill] sm:$0xff]  ;;  %v23132_v23 = vld [vmem:[#allocation24_spill] sm:$0xff] }
 0x73e   :  { %23123 = vst [vmem:[#allocation74_spill] sm:$0xff] %v21281_v62  ;;  %v21290_v31 = vadd.f32 %v11128_v17, %v23126_v44  ;;  %v12170_v40 = vmul.f32 %v21281_v62, %v21281_v62 }
 0x73f   :  { %23125 = vst [vmem:[#allocation59_spill] sm:$0xff] %v21287_v47  ;;  %v12220_v30 = vadd.f32 %v12219_v15, %v12167_v20  ;;  %v12035_v6 = vadd.f32 %v21281_v62, %v12034_v10 }
 0x740   :  { %23127 = vst [vmem:[#allocation76_spill] sm:$0xff] %v21290_v31  ;;  %v11987_v19 = vsel %vm23081_vm1, %v21290_v31, 0.0 }
 0x741   :  { %v12221_v15 = vadd.f32 %v12220_v30, %v12170_v40  ;;  %v12173_v20 = vmul.f32 %v11987_v19, %v11987_v19  ;;  %v12036_v31 = vadd.f32 %v12035_v6, %v11987_v19  ;;  %v23140_v19 = vld [vmem:[#allocation28_spill] sm:$0xff] }
 0x742   :  { %v15219_v32 = vpop.f32.mrb[36].mxu1 }
 0x743   :  { %v21298_v21 = vadd.f32 %v15219_v32, %v23128_v34  ;;  %v11141_v4 = vpop.f32.mrb[37].mxu1  ;;  %v12222_v36 = vadd.f32 %v12221_v15, %v12173_v20  ;;  %v23136_v32 = vld [vmem:[#allocation47_spill] sm:$0xff]  ;;  %v23142_v15 = vld [vmem:[#allocation30_spill] sm:$0xff] }
 0x744   :  { %v21302_v41 = vadd.f32 %v11141_v4, %v23130_v59  ;;  %v15220_v17 = vpop.f32.mrb[38].mxu1  ;;  %v12176_v4 = vmul.f32 %v21275_v52, %v21275_v52  ;;  %v12037_v59 = vadd.f32 %v21275_v52, %v12036_v31 }
 0x745   :  { %23129 = vst [vmem:[#allocation77_spill] sm:$0xff] %v21298_v21  ;;  %v21305_v49 = vadd.f32 %v15220_v17, %v23132_v23  ;;  %v11144_v44 = vpop.f32.mrb[39].mxu1  ;;  %v23138_v17 = vld [vmem:[#allocation48_spill] sm:$0xff]  ;;  %v12188_v58 = vmul.f32 %v21298_v21, %v21298_v21 }
 0x746   :  { %23131 = vst [vmem:[#allocation17_spill] sm:$0xff] %v21302_v41  ;;  %v21308_v3 = vadd.f32 %v11144_v44, %v23134_v48  ;;  %v11993_v48 = vsel %vm18277_vm0, %v21287_v47, 0.0  ;;  %v12223_v44 = vadd.f32 %v12222_v36, %v12176_v4  ;;  %v12182_v31 = vmul.f32 %v21302_v41, %v21302_v41 }
 0x747   :  { %23133 = vst [vmem:[#allocation25_spill] sm:$0xff] %v21305_v49 }
 0x748   :  { %23135 = vst [vmem:[#allocation75_spill] sm:$0xff] %v21308_v3 }
 0x74a   :  { %v15223_v34 = vpop.f32.mrb[40].mxu1 }
 0x74b   :  { %v21311_v33 = vadd.f32 %v15223_v34, %v23136_v32  ;;  %v11157_v10 = vpop.f32.mrb[41].mxu1  ;;  %v12179_v34 = vmul.f32 %v11993_v48, %v11993_v48  ;;  %v12038_v32 = vadd.f32 %v12037_v59, %v11993_v48 }
 0x74c   :  { %v21317_v23 = vadd.f32 %v11157_v10, %v23138_v17  ;;  %v15224_v40 = vpop.f32.mrb[42].mxu1 }
 0x74d   :  { %23137 = vst [vmem:[#allocation29_spill] sm:$0xff] %v21311_v33  ;;  %v21323_v30 = vadd.f32 %v15224_v40, %v23140_v19  ;;  %v11160_v6 = vpop.f32.mrb[43].mxu1  ;;  %v12224_v10 = vadd.f32 %v12223_v44, %v12179_v34  ;;  %v12039_v47 = vadd.f32 %v21302_v41, %v12038_v32  ;;  %v11999_v40 = vsel %vm22812_vm6, %v21308_v3, 0.0 }
 0x74e   :  { %23139 = vst [vmem:[#allocation35_spill] sm:$0xff] %v21317_v23  ;;  %v21326_v20 = vadd.f32 %v11160_v6, %v23142_v15  ;;  %v12185_v48 = vmul.f32 %v11999_v40, %v11999_v40  ;;  %v12194_v29 = vmul.f32 %v21317_v23, %v21317_v23 }
 0x74f   :  { %23141 = vst [vmem:[#allocation37_spill] sm:$0xff] %v21323_v30  ;;  %v12225_v19 = vadd.f32 %v12224_v10, %v12182_v31  ;;  %v12040_v34 = vadd.f32 %v12039_v47, %v11999_v40 }
 0x750   :  { %23143 = vst [vmem:[#allocation3_spill] sm:$0xff] %v21326_v20 }
 0x751   :  { %v12226_v41 = vadd.f32 %v12225_v19, %v12185_v48 }
 0x752   :  { %v21330_v17 = vpop.f32.mrb[44].mxu1 }
 0x753   :  { %v21332_v52 = vpop.f32.mrb[45].mxu1  ;;  %v12130_v3 = vmul.f32 %v21330_v17, %v21330_v17 }
 0x754   :  { %v21338_v36 = vpop.f32.mrb[46].mxu1  ;;  %v12124_v6 = vmul.f32 %v21332_v52, %v21332_v52 }
 0x755   :  { %v21340_v4 = vpop.f32.mrb[47].mxu1  ;;  %v11947_v32 = vsel %vm23060_vm15, %v21338_v36, 0.0 }
 0x756   :  { %v11941_v59 = vsel %vm17990_vm2, %v21340_v4, 0.0  ;;  %v12133_v62 = vmul.f32 %v11947_v32, %v11947_v32 }
 0x757   :  { %v12086_v44 = vadd.f32 %v11941_v59, %v21332_v52  ;;  %v12127_v15 = vmul.f32 %v11941_v59, %v11941_v59  ;;  %v12041_v59 = vadd.f32 %v21298_v21, %v12040_v34 }
 0x759   :  { %v12087_v31 = vadd.f32 %v21330_v17, %v12086_v44  ;;  %v12272_v10 = vadd.f32 %v12127_v15, %v12124_v6  ;;  %v12227_v15 = vadd.f32 %v12226_v41, %v12188_v58 }
 0x75a   :  { %v21354_v24 = vpop.f32.mrb[48].mxu1 }
 0x75b   :  { %v12273_v53 = vadd.f32 %v12272_v10, %v12130_v3  ;;  %v21356_v54 = vpop.f32.mrb[49].mxu1  ;;  %v12088_v47 = vadd.f32 %v12087_v31, %v11947_v32  ;;  %v12005_v3 = vsel %vm18338_vm13, %v21305_v49, 0.0  ;;  %v12142_v21 = vmul.f32 %v21354_v24, %v21354_v24 }
 0x75c   :  { %v12136_v7 = vmul.f32 %v21356_v54, %v21356_v54  ;;  %v21361_v40 = vpop.f32.mrb[50].mxu1  ;;  %v12042_v31 = vadd.f32 %v12041_v59, %v12005_v3  ;;  %v12191_v10 = vmul.f32 %v12005_v3, %v12005_v3 }
 0x75d   :  { %v12274_v44 = vadd.f32 %v12273_v53, %v12133_v62  ;;  %v21365_v6 = vpop.f32.mrb[51].mxu1  ;;  %v12089_v19 = vadd.f32 %v12088_v47, %v21356_v54  ;;  %v11959_v53 = vsel %vm23064_vm14, %v21361_v40, 0.0 }
 0x75e   :  { %v11953_v48 = vsel %vm18030_vm4, %v21365_v6, 0.0  ;;  %v12228_v58 = vadd.f32 %v12227_v15, %v12191_v10  ;;  %v12145_v41 = vmul.f32 %v11959_v53, %v11959_v53  ;;  %v12043_v45 = vadd.f32 %v21317_v23, %v12042_v31 }
 0x75f   :  { %v12275_v34 = vadd.f32 %v12274_v44, %v12136_v7  ;;  %v12139_v32 = vmul.f32 %v11953_v48, %v11953_v48  ;;  %v12090_v62 = vadd.f32 %v12089_v19, %v11953_v48  ;;  %v12011_v48 = vsel %vm18376_vm5, %v21326_v20, 0.0 }
 0x760   :  { %v12197_v10 = vmul.f32 %v12011_v48, %v12011_v48 }
 0x761   :  { %v12276_v49 = vadd.f32 %v12275_v34, %v12139_v32  ;;  %v12091_v47 = vadd.f32 %v21354_v24, %v12090_v62  ;;  %v12044_v62 = vadd.f32 %v12043_v45, %v12011_v48 }
 0x762   :  { %v21380_v22 = vpop.f32.mrb[52].mxu1 }
 0x763   :  { %v12277_v59 = vadd.f32 %v12276_v49, %v12142_v21  ;;  %v21384_v7 = vpop.f32.mrb[53].mxu1  ;;  %v12092_v44 = vadd.f32 %v12091_v47, %v11959_v53  ;;  %v12229_v49 = vadd.f32 %v12228_v58, %v12194_v29  ;;  %v12045_v58 = vadd.f32 %v21311_v33, %v12044_v62 }
 0x764   :  { %v12148_v3 = vmul.f32 %v21384_v7, %v21384_v7  ;;  %v21389_v19 = vpop.f32.mrb[54].mxu1 }
 0x765   :  { %v12278_v34 = vadd.f32 %v12277_v59, %v12145_v41  ;;  %v21394_v32 = vpop.f32.mrb[55].mxu1  ;;  %v12093_v15 = vadd.f32 %v12092_v44, %v21384_v7  ;;  %v11971_v47 = vsel %vm22770_vm3, %v21389_v19, 0.0  ;;  %v12154_v41 = vmul.f32 %v21380_v22, %v21380_v22 }
 0x766   :  { %v11965_v21 = vsel %vm23068_vm10, %v21394_v32, 0.0  ;;  %v12157_v51 = vmul.f32 %v11971_v47, %v11971_v47  ;;  %v12230_v45 = vadd.f32 %v12229_v49, %v12197_v10  ;;  %v12017_v49 = vsel %vm19711_vm9, %v21323_v30, 0.0 }
 0x767   :  { %v12279_v31 = vadd.f32 %v12278_v34, %v12148_v3  ;;  %v12151_v53 = vmul.f32 %v11965_v21, %v11965_v21  ;;  %v12094_v23 = vadd.f32 %v12093_v15, %v11965_v21  ;;  %v12046_v10 = vadd.f32 %v12045_v58, %v12017_v49 }
 0x769   :  { %v12280_v59 = vadd.f32 %v12279_v31, %v12151_v53  ;;  %v12095_v44 = vadd.f32 %v21380_v22, %v12094_v23  ;;  %v12200_v23 = vmul.f32 %v21311_v33, %v21311_v33  ;;  %v12047_v58 = vrot.slane %v12046_v10, 4 }
 0x76a   :  { %v21406_v20 = vpop.f32.mrb[56].mxu1 }
 0x76b   :  { %v12281_v43 = vadd.f32 %v12280_v59, %v12154_v41  ;;  %v21408_v29 = vpop.f32.mrb[57].mxu1  ;;  %v12096_v3 = vadd.f32 %v12095_v44, %v11971_v47  ;;  %v12231_v47 = vadd.f32 %v12230_v45, %v12200_v23  ;;  %v12166_v59 = vmul.f32 %v21406_v20, %v21406_v20 }
 0x76c   :  { %v12160_v42 = vmul.f32 %v21408_v29, %v21408_v29  ;;  %v21413_v48 = vpop.f32.mrb[58].mxu1 }
 0x76d   :  { %v12282_v34 = vadd.f32 %v12281_v43, %v12157_v51  ;;  %v21415_v15 = vpop.f32.mrb[59].mxu1  ;;  %v12097_v21 = vadd.f32 %v12096_v3, %v21408_v29  ;;  %v11983_v43 = vsel %vm18201_vm12, %v21413_v48, 0.0  ;;  %v12203_v51 = vmul.f32 %v12017_v49, %v12017_v49 }
 0x76e   :  { %v11977_v31 = vsel %vm18177_vm11, %v21415_v15, 0.0  ;;  %v12169_v33 = vmul.f32 %v11983_v43, %v11983_v43 }
 0x76f   :  { %v12283_v53 = vadd.f32 %v12282_v34, %v12160_v42  ;;  %v12163_v62 = vmul.f32 %v11977_v31, %v11977_v31  ;;  %v12098_v41 = vadd.f32 %v12097_v21, %v11977_v31  ;;  %v12232_v45 = vadd.f32 %v12231_v47, %v12203_v51 }
 0x771   :  { %v12284_v44 = vadd.f32 %v12283_v53, %v12163_v62  ;;  %v12099_v56 = vadd.f32 %v21406_v20, %v12098_v41 }
 0x772   :  { %v21432_v3 = vpop.f32.mrb[60].mxu1 }
 0x773   :  { %23144 = vst [vmem:[#allocation4_spill] sm:$0xff] %v21432_v3  ;;  %v12285_v30 = vadd.f32 %v12284_v44, %v12166_v59  ;;  %v21434_v42 = vpop.f32.mrb[61].mxu1  ;;  %v12100_v34 = vadd.f32 %v12099_v56, %v11983_v43  ;;  %v12048_v59 = vadd.f32 %v12047_v58, %v12046_v10  ;;  %v12233_v44 = vrot.slane %v12232_v45, 4 }
 0x774   :  { %23145 = vst [vmem:[#allocation5_spill] sm:$0xff] %v21434_v42  ;;  %v12172_v0 = vmul.f32 %v21434_v42, %v21434_v42  ;;  %v21438_v23 = vpop.f32.mrb[62].mxu1 }
 0x775   :  { %23146 = vst [vmem:[#allocation6_spill] sm:$0xff] %v21438_v23  ;;  %v12286_v21 = vadd.f32 %v12285_v30, %v12169_v33  ;;  %v21440_v31 = vpop.f32.mrb[63].mxu1  ;;  %v12101_v49 = vadd.f32 %v12100_v34, %v21434_v42  ;;  %v11995_v47 = vsel %vm18277_vm0, %v21438_v23, 0.0  ;;  %v12178_v33 = vmul.f32 %v21432_v3, %v21432_v3 }
 0x776   :  { %23147 = vst [vmem:[#allocation78_spill] sm:$0xff] %v21440_v31  ;;  %v11989_v53 = vsel %vm23081_vm1, %v21440_v31, 0.0  ;;  %v12181_v34 = vmul.f32 %v11995_v47, %v11995_v47  ;;  %v12234_v10 = vadd.f32 %v12233_v44, %v12232_v45 }
 0x777   :  { %v12287_v62 = vadd.f32 %v12286_v21, %v12172_v0  ;;  %v12175_v41 = vmul.f32 %v11989_v53, %v11989_v53  ;;  %v12102_v43 = vadd.f32 %v12101_v49, %v11989_v53  ;;  %v12049_v0 = vrot.slane %v12048_v59, 2 }
 0x778   :  { %v12235_v23 = vrot.slane %v12234_v10, 2 }
 0x779   :  { %v12288_v30 = vadd.f32 %v12287_v62, %v12175_v41  ;;  %v12103_v51 = vadd.f32 %v21432_v3, %v12102_v43 }
 0x77a   :  { %v21452_v56 = vpop.f32.mrb[64].mxu1 }
 0x77b   :  { %23148 = vst [vmem:[#allocation13_spill] sm:$0xff] %v21452_v56  ;;  %v12289_v37 = vadd.f32 %v12288_v30, %v12178_v33  ;;  %v21454_v31 = vpop.f32.mrb[65].mxu1  ;;  %v12104_v58 = vadd.f32 %v12103_v51, %v11995_v47  ;;  %v12050_v30 = vadd.f32 %v12049_v0, %v12048_v59  ;;  %v12190_v47 = vmul.f32 %v21452_v56, %v21452_v56 }
 0x77c   :  { %23149 = vst [vmem:[#allocation62_spill] sm:$0xff] %v21454_v31  ;;  %v12184_v60 = vmul.f32 %v21454_v31, %v21454_v31  ;;  %v21458_v21 = vpop.f32.mrb[66].mxu1  ;;  %v12236_v59 = vadd.f32 %v12235_v23, %v12234_v10 }
 0x77d   :  { %23150 = vst [vmem:[#allocation64_spill] sm:$0xff] %v21458_v21  ;;  %v12290_v49 = vadd.f32 %v12289_v37, %v12181_v34  ;;  %v21460_v53 = vpop.f32.mrb[67].mxu1  ;;  %v12105_v62 = vadd.f32 %v12104_v58, %v21454_v31  ;;  %v12007_v45 = vsel %vm18338_vm13, %v21458_v21, 0.0 }
 0x77e   :  { %23151 = vst [vmem:[#allocation11_spill] sm:$0xff] %v21460_v53  ;;  %v12001_v41 = vsel %vm22812_vm6, %v21460_v53, 0.0  ;;  %v12193_v58 = vmul.f32 %v12007_v45, %v12007_v45  ;;  %v12237_v21 = vrot.slane %v12236_v59, 1 }
 0x77f   :  { %v12291_v43 = vadd.f32 %v12290_v49, %v12184_v60  ;;  %v12187_v33 = vmul.f32 %v12001_v41, %v12001_v41  ;;  %v12106_v44 = vadd.f32 %v12105_v62, %v12001_v41  ;;  %v12051_v60 = vrot.slane %v12050_v30, 1 }
 0x781   :  { %v12292_v51 = vadd.f32 %v12291_v43, %v12187_v33  ;;  %v12107_v34 = vadd.f32 %v21452_v56, %v12106_v44  ;;  %v12238_v56 = vadd.f32 %v12237_v21, %v12236_v59  ;;  %v23156_v21 = vsub.f32 %v21086_v8, %v21090_v46  ;;  %v12314_v8 = vld [vmem:[%s22290_s5] sm:$0x7] }
 0x782   :  { %v21472_v37 = vpop.f32.mrb[68].mxu1 }
 0x783   :  { %23152 = vst [vmem:[#allocation61_spill] sm:$0xff] %v21472_v37  ;;  %v12293_v1 = vadd.f32 %v12292_v51, %v12190_v47  ;;  %v21474_v53 = vpop.f32.mrb[69].mxu1  ;;  %v12108_v49 = vadd.f32 %v12107_v34, %v12007_v45  ;;  %v12052_v51 = vadd.f32 %v12051_v60, %v12050_v30  ;;  %v12202_v45 = vmul.f32 %v21472_v37, %v21472_v37 }
 0x784   :  { %23153 = vst [vmem:[#allocation63_spill] sm:$0xff] %v21474_v53  ;;  %v12196_v0 = vmul.f32 %v21474_v53, %v21474_v53  ;;  %v21478_v16 = vpop.f32.mrb[70].mxu1  ;;  %v12305_v60 = vmul.f32 0.0051020407, %v12238_v56  ;;  %v12316_v59 = vadd.f32 1e-05, %v23156_v21 }
 0x785   :  { %23154 = vst [vmem:[#allocation27_spill] sm:$0xff] %v21478_v16  ;;  %v21480_v62 = vpop.f32.mrb[71].mxu1  ;;  %v12294_v41 = vadd.f32 %v12293_v1, %v12193_v58  ;;  %v12109_v33 = vadd.f32 %v12108_v49, %v21474_v53  ;;  %v12019_v23 = vsel %vm19711_vm9, %v21478_v16, 0.0 }
 0x786   :  { %23155 = vst [vmem:[#allocation31_spill] sm:$0xff] %v21480_v62  ;;  %v12013_v43 = vsel %vm18376_vm5, %v21480_v62, 0.0  ;;  %v12205_v1 = vmul.f32 %v12019_v23, %v12019_v23  ;;  %v12119_v62 = vmul.f32 0.0051020407, %v12052_v51 }
 0x787   :  { %v12199_v44 = vmul.f32 %v12013_v43, %v12013_v43  ;;  %v12295_v47 = vadd.f32 %v12294_v41, %v12196_v0  ;;  %v12110_v10 = vadd.f32 %v12109_v33, %v12013_v43 }
 0x788   :  { %v12308_v41 = vmul.f32 %v12119_v62, %v12119_v62 }
 0x789   :  { %v12296_v34 = vadd.f32 %v12295_v47, %v12199_v44  ;;  %v12111_v58 = vadd.f32 %v21472_v37, %v12110_v10 }
 0x78a   :  { %v12311_v33 = vsub.f32 %v12305_v60, %v12308_v41  ;;  %v23159_v60 = vld [vmem:[#allocation70_spill] sm:$0xff] }
 0x78b   :  { %v12297_v35 = vadd.f32 %v12296_v34, %v12202_v45  ;;  %v12112_v49 = vadd.f32 %v12111_v58, %v12019_v23 }
 0x78c   :  { %v12315_v10 = vadd.f32 1e-05, %v12311_v33 }
 0x78d   :  { %v12298_v53 = vadd.f32 %v12297_v35, %v12205_v1  ;;  %v12113_v0 = vrot.slane %v12112_v49, 4  ;;  %v23157_v35 = vld [vmem:[#allocation72_spill] sm:$0xff] }
 0x78e   :  { %16342 = vrsqrt.f32 %v12315_v10 }
 0x78f   :  { %v12299_v30 = vrot.slane %v12298_v53, 4  ;;  %v12114_v31 = vadd.f32 %v12113_v0, %v12112_v49  ;;  %16344 = vrsqrt.f32 %v12316_v59  ;;  %v23158_v0 = vld [vmem:[#allocation69_spill] sm:$0xff] }
 0x791   :  { %v12300_v13 = vadd.f32 %v12299_v30, %v12298_v53  ;;  %v12115_v16 = vrot.slane %v12114_v31, 2 }
 0x793   :  { %v12301_v43 = vrot.slane %v12300_v13, 2  ;;  %v12116_v3 = vadd.f32 %v12115_v16, %v12114_v31 }
 0x795   :  { %v12302_v42 = vadd.f32 %v12301_v43, %v12300_v13  ;;  %v12117_v44 = vrot.slane %v12116_v3, 1  ;;  %v23160_v13 = vld [vmem:[#allocation71_spill] sm:$0xff] }
 0x797   :  { %v12303_v47 = vrot.slane %v12302_v42, 1  ;;  %v12118_v37 = vadd.f32 %v12117_v44, %v12116_v3 }
 0x798   :  { %v16343_v58 = vpop.eup %16342 }
 0x799   :  { %v12304_v45 = vadd.f32 %v12303_v47, %v12302_v42  ;;  %v12121_v51 = vmul.f32 0.0051020407, %v12118_v37  ;;  %v16345_v31 = vpop.eup %16344 }
 0x79a   :  { %v12324_v16 = vcombine.low %v16343_v58, %v16345_v31  ;;  %v23162_v58 = vld [vmem:[#allocation9_spill] sm:$0xff] }
 0x79b   :  { %v12307_v23 = vmul.f32 0.0051020407, %v12304_v45  ;;  %v12310_v56 = vmul.f32 %v12121_v51, %v12121_v51 }
 0x79c   :  { %v12331_v49 = vrot.slane %v12324_v16, %v23157_v35  ;;  %v23163_v16 = vld [vmem:[#allocation39_spill] sm:$0xff] }
 0x79d   :  { %v12313_v53 = vsub.f32 %v12307_v23, %v12310_v56 }
 0x79f   :  { %v12317_v34 = vadd.f32 1e-05, %v12313_v53 }
 0x7a1   :  { %16346 = vrsqrt.f32 %v12317_v34  ;;  %v23161_v34 = vld [vmem:[#allocation34_spill] sm:$0xff] }
 0x7ab   :  { %v16347_v1 = vpop.eup %16346 }
 0x7ac   :  { %v12338_v3 = vrot.slane %v16347_v1, %v23157_v35  ;;  %v23164_v1 = vld [vmem:[#allocation32_spill] sm:$0xff] }
 0x7ae   :  { %v12339_v42 = vcombine.low %v12331_v49, %v12338_v3 }
 0x7b0   :  { %v12346_v46 = vrot.slane %v12339_v42, %v23157_v35  ;;  %v23166_v42 = vld [vmem:[#allocation51_spill] sm:$0xff] }
 0x7b2   :  { %v12348_v37 = vmul.f32 %v12346_v46, %v12314_v8 }
 0x7b4   :  { %v21502_v30 = vrot.slane %v12348_v37, %v23158_v0  ;;  %v21505_v41 = vrot.slane %v12348_v37, %v23159_v60  ;;  %v21508_v43 = vrot.slane %v12348_v37, %v23160_v13  ;;  %v23167_v37 = vld [vmem:[#allocation40_spill] sm:$0xff] }
 0x7b6   :  { %v12366_v33 = vmul.f32 %v21502_v30, %v12119_v62  ;;  %v12367_v44 = vmul.f32 %v21505_v41, %v21084_v25  ;;  %v12368_v47 = vmul.f32 %v21508_v43, %v12121_v51  ;;  %v21516_v10 = vmul.f32 %v21505_v41, %v20909_v18 }
 0x7b7   :  { %v21520_v45 = vmul.f32 %v21508_v43, %v21332_v52  ;;  %v21524_v21 = vmul.f32 %v21505_v41, %v20914_v57  ;;  %v21528_v62 = vmul.f32 %v21508_v43, %v21340_v4  ;;  %v21532_v25 = vmul.f32 %v21188_v63, %v21502_v30 }
 0x7b8   :  { %v12372_v59 = vcombine.low %v12366_v33, %v12367_v44  ;;  %v21536_v18 = vmul.f32 %v20907_v61, %v21505_v41  ;;  %v21540_v52 = vmul.f32 %v21330_v17, %v21508_v43  ;;  %v21544_v57 = vmul.f32 %v20911_v39, %v21505_v41  ;;  %v23168_v44 = vld [vmem:[#allocation21_spill] sm:$0xff] }
 0x7b9   :  { %v12386_v4 = vrot.slane %v12368_v47, %v23157_v35  ;;  %v21550_v63 = vmul.f32 %v21338_v36, %v21508_v43  ;;  %v21554_v61 = vmul.f32 %v21505_v41, %v20931_v2  ;;  %v21558_v17 = vmul.f32 %v21194_v14, %v21502_v30 }
 0x7ba   :  { %v12379_v51 = vrot.slane %v12372_v59, %v23157_v35  ;;  %v21562_v39 = vmul.f32 %v21508_v43, %v21356_v54  ;;  %v21566_v23 = vmul.f32 %v21505_v41, %v20939_v50  ;;  %v21570_v36 = vmul.f32 %v21508_v43, %v21365_v6  ;;  %v23169_v59 = vld [vmem:[#allocation68_spill] sm:$0xff] }
 0x7bb   :  { %v21574_v2 = vmul.f32 %v21185_v26, %v21502_v30  ;;  %v21578_v14 = vmul.f32 %v20929_v9, %v21505_v41  ;;  %v21582_v54 = vmul.f32 %v21354_v24, %v21508_v43  ;;  %v21586_v50 = vmul.f32 %v21191_v11, %v21502_v30 }
 0x7bc   :  { %v12387_v56 = vcombine.low %v12379_v51, %v12386_v4  ;;  %v21590_v6 = vmul.f32 %v21212_v27, %v21502_v30  ;;  %v21594_v26 = vmul.f32 %v20935_v5, %v21505_v41  ;;  %v21598_v9 = vmul.f32 %v21361_v40, %v21508_v43  ;;  %v12349_v5 = vld [vmem:[%s22291_s6] sm:$0x7] }
 0x7bd   :  { %v21603_v24 = vmul.f32 %v21220_v38, %v21502_v30  ;;  %v21607_v11 = vmul.f32 %v21505_v41, %v20952_v28  ;;  %v21611_v27 = vmul.f32 %v21508_v43, %v21384_v7  ;;  %v21618_v40 = vmul.f32 %v21209_v55, %v21502_v30 }
 0x7be   :  { %v12394_v53 = vrot.slane %v12387_v56, %v23157_v35  ;;  %v21622_v38 = vmul.f32 %v21505_v41, %v20962_v12  ;;  %v21626_v28 = vmul.f32 %v21508_v43, %v21394_v32  ;;  %v21630_v7 = vmul.f32 %v23161_v34, %v21505_v41  ;;  %v23165_v35 = vld [vmem:[#allocation42_spill] sm:$0xff]  ;;  %v23173_v34 = vld [vmem:[#allocation41_spill] sm:$0xff] }
 0x7bf   :  { %v21634_v31 = vmul.f32 %v23162_v58, %v21502_v30  ;;  %v21638_v55 = vmul.f32 %v23163_v16, %v21502_v30  ;;  %v21642_v12 = vmul.f32 %v21380_v22, %v21508_v43  ;;  %v21646_v32 = vmul.f32 %v23164_v1, %v21505_v41  ;;  %v23175_v16 = vld [vmem:[#allocation36_spill] sm:$0xff] }
 0x7c0   :  { %v21650_v49 = vmul.f32 %v23165_v35, %v21502_v30  ;;  %v21654_v3 = vmul.f32 %v21389_v19, %v21508_v43  ;;  %v21658_v8 = vmul.f32 %v21505_v41, %v23166_v42  ;;  %v21662_v22 = vmul.f32 %v21508_v43, %v21408_v29  ;;  %v23170_v29 = vld [vmem:[#allocation52_spill] sm:$0xff]  ;;  %v23177_v35 = vld [vmem:[#allocation5_spill] sm:$0xff]  ;;  %v23179_v42 = vld [vmem:[#allocation19_spill] sm:$0xff] }
 0x7c1   :  { %v12396_v46 = vsub.f32 %v12349_v5, %v12394_v53  ;;  %v21666_v33 = vmul.f32 %v23167_v37, %v21502_v30  ;;  %v21670_v47 = vmul.f32 %v21505_v41, %v23168_v44  ;;  %v21674_v19 = vmul.f32 %v21508_v43, %v21415_v15  ;;  %v23171_v53 = vld [vmem:[#allocation10_spill] sm:$0xff]  ;;  %v23180_v44 = vld [vmem:[#allocation57_spill] sm:$0xff] }
 0x7c2   :  { %v21678_v51 = vmul.f32 %v23169_v59, %v21502_v30  ;;  %v21682_v4 = vmul.f32 %v23170_v29, %v21505_v41  ;;  %v21686_v56 = vmul.f32 %v21406_v20, %v21508_v43  ;;  %v21690_v5 = vmul.f32 %v23171_v53, %v21505_v41  ;;  %v23181_v29 = vld [vmem:[#allocation53_spill] sm:$0xff]  ;;  %v23183_v53 = vld [vmem:[#allocation78_spill] sm:$0xff] }
 0x7c3   :  { %v21694_v15 = vmul.f32 %v23173_v34, %v21502_v30  ;;  %v21698_v58 = vmul.f32 %v21413_v48, %v21508_v43  ;;  %v21702_v1 = vmul.f32 %v21505_v41, %v23175_v16  ;;  %v21706_v20 = vmul.f32 %v21508_v43, %v23177_v35  ;;  %v23185_v16 = vld [vmem:[#allocation73_spill] sm:$0xff] }
 0x7c4   :  { %23172 = vst [vmem:[#allocation12_spill] sm:$0xff] %v21690_v5  ;;  %v21710_v37 = vmul.f32 %v23179_v42, %v21502_v30  ;;  %v21714_v59 = vmul.f32 %v23180_v44, %v21502_v30  ;;  %v21718_v48 = vmul.f32 %v21505_v41, %v23181_v29  ;;  %v21722_v34 = vmul.f32 %v21508_v43, %v23183_v53  ;;  %v23196_v5 = vld [vmem:[#allocation7_spill] sm:$0xff] }
 0x7c5   :  { %23174 = vst [vmem:[#allocation66_spill] sm:$0xff] %v21698_v58  ;;  %23176 = vst [vmem:[#allocation33_spill] sm:$0xff] %v21702_v1  ;;  %v21726_v35 = vmul.f32 %v23185_v16, %v21502_v30  ;;  %v23188_v1 = vld [vmem:[#allocation4_spill] sm:$0xff]  ;;  %v23190_v58 = vld [vmem:[#allocation54_spill] sm:$0xff] }
 0x7c6   :  { %23178 = vst [vmem:[#allocation14_spill] sm:$0xff] %v21706_v20  ;;  %23182 = vst [vmem:[#allocation15_spill] sm:$0xff] %v21718_v48  ;;  %v23186_v20 = vld [vmem:[#allocation38_spill] sm:$0xff]  ;;  %v21734_v44 = vmul.f32 %v23188_v1, %v21508_v43  ;;  %v21738_v29 = vmul.f32 %v23190_v58, %v21505_v41 }
 0x7c7   :  { %23184 = vst [vmem:[#allocation65_spill] sm:$0xff] %v21722_v34  ;;  %v21730_v42 = vmul.f32 %v23186_v20, %v21505_v41  ;;  %v23192_v48 = vld [vmem:[#allocation74_spill] sm:$0xff]  ;;  %v21750_v20 = vmul.f32 %v21505_v41, %v23196_v5 }
 0x7c8   :  { %23189 = vst [vmem:[#allocation16_spill] sm:$0xff] %v21734_v44  ;;  %23191 = vst [vmem:[#allocation18_spill] sm:$0xff] %v21738_v29  ;;  %v21742_v53 = vmul.f32 %v23192_v48, %v21502_v30  ;;  %v23194_v34 = vld [vmem:[#allocation6_spill] sm:$0xff]  ;;  %v23200_v44 = vld [vmem:[#allocation76_spill] sm:$0xff] }
 0x7c9   :  { %23187 = vst [vmem:[#allocation67_spill] sm:$0xff] %v21730_v42  ;;  %v21746_v16 = vmul.f32 %v23194_v34, %v21508_v43  ;;  %23197 = vst [vmem:[#allocation20_spill] sm:$0xff] %v21750_v20  ;;  %v23198_v42 = vld [vmem:[#allocation62_spill] sm:$0xff]  ;;  %v21758_v58 = vmul.f32 %v23200_v44, %v21502_v30  ;;  %v23208_v20 = vld [vmem:[#allocation59_spill] sm:$0xff] }
 0x7ca   :  { %23193 = vst [vmem:[#allocation43_spill] sm:$0xff] %v21742_v53  ;;  %v21754_v1 = vmul.f32 %v21508_v43, %v23198_v42  ;;  %v23202_v29 = vld [vmem:[#allocation58_spill] sm:$0xff]  ;;  %v23204_v53 = vld [vmem:[#allocation23_spill] sm:$0xff]  ;;  %v21774_v42 = vmul.f32 %v23208_v20, %v21502_v30 }
 0x7cb   :  { %23195 = vst [vmem:[#allocation44_spill] sm:$0xff] %v21746_v16  ;;  %23201 = vst [vmem:[#allocation45_spill] sm:$0xff] %v21758_v58  ;;  %v21762_v48 = vmul.f32 %v23202_v29, %v21502_v30  ;;  %v21766_v34 = vmul.f32 %v21505_v41, %v23204_v53  ;;  %v23206_v16 = vld [vmem:[#allocation11_spill] sm:$0xff]  ;;  %v23212_v58 = vld [vmem:[#allocation13_spill] sm:$0xff] }
 0x7cc   :  { %23199 = vst [vmem:[#allocation22_spill] sm:$0xff] %v21754_v1  ;;  %v21770_v5 = vmul.f32 %v21508_v43, %v23206_v16  ;;  %23209 = vst [vmem:[#allocation47_spill] sm:$0xff] %v21774_v42  ;;  %v23210_v1 = vld [vmem:[#allocation60_spill] sm:$0xff]  ;;  %v21782_v29 = vmul.f32 %v23212_v58, %v21508_v43 }
 0x7cd   :  { %23203 = vst [vmem:[#allocation46_spill] sm:$0xff] %v21762_v48  ;;  %23205 = vst [vmem:[#allocation24_spill] sm:$0xff] %v21766_v34  ;;  %v21778_v44 = vmul.f32 %v23210_v1, %v21505_v41  ;;  %v23214_v48 = vld [vmem:[#allocation8_spill] sm:$0xff]  ;;  %v23216_v34 = vld [vmem:[#allocation17_spill] sm:$0xff] }
 0x7ce   :  { %23207 = vst [vmem:[#allocation26_spill] sm:$0xff] %v21770_v5  ;;  %23213 = vst [vmem:[#allocation28_spill] sm:$0xff] %v21782_v29  ;;  %v21786_v53 = vmul.f32 %v23214_v48, %v21505_v41  ;;  %v21790_v16 = vmul.f32 %v23216_v34, %v21502_v30  ;;  %v23218_v5 = vld [vmem:[#allocation64_spill] sm:$0xff]  ;;  %v23224_v29 = vld [vmem:[#allocation75_spill] sm:$0xff] }
 0x7cf   :  { %23211 = vst [vmem:[#allocation48_spill] sm:$0xff] %v21778_v44  ;;  %v21794_v20 = vmul.f32 %v23218_v5, %v21508_v43  ;;  %v23220_v42 = vld [vmem:[#allocation56_spill] sm:$0xff]  ;;  %v23222_v44 = vld [vmem:[#allocation63_spill] sm:$0xff]  ;;  %v21806_v48 = vmul.f32 %v23224_v29, %v21502_v30 }
 0x7d0   :  { %23215 = vst [vmem:[#allocation30_spill] sm:$0xff] %v21786_v53  ;;  %23217 = vst [vmem:[#allocation72_spill] sm:$0xff] %v21790_v16  ;;  %v21798_v1 = vmul.f32 %v21505_v41, %v23220_v42  ;;  %v21802_v58 = vmul.f32 %v21508_v43, %v23222_v44  ;;  %v23226_v53 = vld [vmem:[#allocation77_spill] sm:$0xff]  ;;  %v23228_v16 = vld [vmem:[#allocation50_spill] sm:$0xff] }
 0x7d1   :  { %23219 = vst [vmem:[#allocation69_spill] sm:$0xff] %v21794_v20  ;;  %23225 = vst [vmem:[#allocation34_spill] sm:$0xff] %v21806_v48  ;;  %v21810_v34 = vmul.f32 %v23226_v53, %v21502_v30  ;;  %v21814_v5 = vmul.f32 %v21505_v41, %v23228_v16  ;;  %v23230_v20 = vld [vmem:[#allocation31_spill] sm:$0xff]  ;;  %v23234_v48 = vld [vmem:[#allocation61_spill] sm:$0xff] }
 0x7d2   :  { %23221 = vst [vmem:[#allocation70_spill] sm:$0xff] %v21798_v1  ;;  %23223 = vst [vmem:[#allocation71_spill] sm:$0xff] %v21802_v58  ;;  %v21818_v42 = vmul.f32 %v21508_v43, %v23230_v20  ;;  %v23232_v1 = vld [vmem:[#allocation25_spill] sm:$0xff]  ;;  %v23233_v58 = vld [vmem:[#allocation55_spill] sm:$0xff]  ;;  %v21830_v53 = vmul.f32 %v23234_v48, %v21508_v43 }
 0x7d3   :  { %23227 = vst [vmem:[#allocation9_spill] sm:$0xff] %v21810_v34  ;;  %23229 = vst [vmem:[#allocation39_spill] sm:$0xff] %v21814_v5  ;;  %v21822_v44 = vmul.f32 %v23232_v1, %v21502_v30  ;;  %v21826_v29 = vmul.f32 %v23233_v58, %v21505_v41  ;;  %v23236_v34 = vld [vmem:[#allocation49_spill] sm:$0xff]  ;;  %v23237_v5 = vld [vmem:[#allocation27_spill] sm:$0xff]  ;;  %v21844_v1 = vrot.slane %v12396_v46, %v23159_v60 }
 0x7d4   :  { %23231 = vst [vmem:[#allocation32_spill] sm:$0xff] %v21818_v42  ;;  %23235 = vst [vmem:[#allocation42_spill] sm:$0xff] %v21830_v53  ;;  %v21834_v16 = vmul.f32 %v23236_v34, %v21505_v41  ;;  %v21838_v20 = vmul.f32 %v23237_v5, %v21508_v43  ;;  %v21841_v42 = vrot.slane %v12396_v46, %v23158_v0  ;;  %v23239_v48 = vld [vmem:[#allocation35_spill] sm:$0xff]  ;;  %v23241_v43 = vld [vmem:[#allocation29_spill] sm:$0xff] }
 0x7d5   :  { %v21847_v58 = vrot.slane %v12396_v46, %v23160_v13  ;;  %v21851_v53 = vmul.f32 %v23239_v48, %v21502_v30  ;;  %v23240_v41 = vld [vmem:[#allocation3_spill] sm:$0xff]  ;;  %v21859_v5 = vmul.f32 %v23241_v43, %v21502_v30  ;;  %v23242_v0 = vld [vmem:[#allocation37_spill] sm:$0xff]  ;;  %v12498_v13 = vadd.f32 %v21844_v1, %v21516_v10 }
 0x7d6   :  { %23238 = vst [vmem:[#allocation51_spill] sm:$0xff] %v21838_v20  ;;  %v21855_v34 = vmul.f32 %v23240_v41, %v21502_v30  ;;  %v21863_v20 = vmul.f32 %v23242_v0, %v21502_v30  ;;  %v12497_v60 = vadd.f32 %v21841_v42, %v21532_v25  ;;  %v12500_v48 = vadd.f32 %v21841_v42, %v21558_v17 }
 0x7d7   :  { %v12499_v46 = vadd.f32 %v21847_v58, %v21520_v45  ;;  %v12501_v41 = vadd.f32 %v21844_v1, %v21524_v21  ;;  %v12502_v43 = vadd.f32 %v21847_v58, %v21528_v62  ;;  %v12503_v30 = vadd.f32 %v21841_v42, %v21574_v2  ;;  %12582 = vst [vmem:[%s22292_s7 + $0x8] sm:$0xff] %v12498_v13 }
 0x7d8   :  { %v12504_v25 = vadd.f32 %v21844_v1, %v21536_v18  ;;  %v12505_v10 = vadd.f32 %v21847_v58, %v21540_v52  ;;  %v12506_v45 = vadd.f32 %v21841_v42, %v21586_v50  ;;  %v12507_v17 = vadd.f32 %v21844_v1, %v21544_v57  ;;  %12581 = vst [vmem:[%s22292_s7] sm:$0xff] %v12497_v60  ;;  %v23247_v60 = vld [vmem:[#allocation14_spill] sm:$0xff] }
 0x7d9   :  { %v12508_v21 = vadd.f32 %v21847_v58, %v21550_v63  ;;  %12583 = vst [vmem:[%s22292_s7 + $0x10] sm:$0xff] %v12499_v46  ;;  %12584 = vst [vmem:[%s22292_s7 + $0x18] sm:$0xff] %v12500_v48  ;;  %v12509_v62 = vadd.f32 %v21841_v42, %v21590_v6  ;;  %v12510_v18 = vadd.f32 %v21844_v1, %v21554_v61  ;;  %v23248_v46 = vld [vmem:[#allocation45_spill] sm:$0xff] }
 0x7da   :  { %v12511_v52 = vadd.f32 %v21847_v58, %v21562_v39  ;;  %v12512_v57 = vadd.f32 %v21841_v42, %v21603_v24  ;;  %12585 = vst [vmem:[%s22292_s7 + $0x20] sm:$0xff] %v12501_v41  ;;  %12586 = vst [vmem:[%s22292_s7 + $0x28] sm:$0xff] %v12502_v43  ;;  %v12513_v63 = vadd.f32 %v21844_v1, %v21566_v23  ;;  %v23249_v41 = vld [vmem:[#allocation15_spill] sm:$0xff] }
 0x7db   :  { %12587 = vst [vmem:[%s22292_s7 + $0x30] sm:$0xff] %v12503_v30  ;;  %12588 = vst [vmem:[%s22292_s7 + $0x38] sm:$0xff] %v12504_v25  ;;  %v12514_v61 = vadd.f32 %v21847_v58, %v21570_v36  ;;  %v12515_v39 = vadd.f32 %v21841_v42, %v21618_v40  ;;  %v12516_v2 = vadd.f32 %v21844_v1, %v21578_v14  ;;  %v23250_v30 = vld [vmem:[#allocation65_spill] sm:$0xff] }
 0x7dc   :  { %12589 = vst [vmem:[%s22292_s7 + $0x40] sm:$0xff] %v12505_v10  ;;  %12590 = vst [vmem:[%s22292_s7 + $0x48] sm:$0xff] %v12506_v45  ;;  %v12517_v23 = vadd.f32 %v21847_v58, %v21582_v54  ;;  %v12518_v36 = vadd.f32 %v21841_v42, %v21634_v31  ;;  %v12519_v14 = vadd.f32 %v21844_v1, %v21594_v26  ;;  %v23251_v10 = vld [vmem:[#allocation46_spill] sm:$0xff] }
 0x7dd   :  { %12591 = vst [vmem:[%s22292_s7 + $0x50] sm:$0xff] %v12507_v17  ;;  %12592 = vst [vmem:[%s22292_s7 + $0x58] sm:$0xff] %v12508_v21  ;;  %v12520_v50 = vadd.f32 %v21847_v58, %v21598_v9  ;;  %v12521_v54 = vadd.f32 %v21841_v42, %v21638_v55  ;;  %v12522_v6 = vadd.f32 %v21844_v1, %v21607_v11  ;;  %v23252_v17 = vld [vmem:[#allocation67_spill] sm:$0xff] }
 0x7de   :  { %12593 = vst [vmem:[%s22292_s7 + $0x60] sm:$0xff] %v12509_v62  ;;  %12594 = vst [vmem:[%s22292_s7 + $0x68] sm:$0xff] %v12510_v18  ;;  %v12523_v26 = vadd.f32 %v21847_v58, %v21611_v27  ;;  %v12524_v9 = vadd.f32 %v21841_v42, %v21650_v49  ;;  %v12525_v24 = vadd.f32 %v21844_v1, %v21622_v38  ;;  %v23253_v62 = vld [vmem:[#allocation16_spill] sm:$0xff] }
 0x7df   :  { %12595 = vst [vmem:[%s22292_s7 + $0x70] sm:$0xff] %v12511_v52  ;;  %12596 = vst [vmem:[%s22292_s7 + $0x78] sm:$0xff] %v12512_v57  ;;  %v12526_v11 = vadd.f32 %v21847_v58, %v21626_v28  ;;  %v12527_v27 = vadd.f32 %v21841_v42, %v21666_v33  ;;  %v12528_v40 = vadd.f32 %v21844_v1, %v21630_v7  ;;  %v23254_v52 = vld [vmem:[#allocation47_spill] sm:$0xff] }
 0x7e0   :  { %12597 = vst [vmem:[%s22292_s7 + $0x80] sm:$0xff] %v12513_v63  ;;  %12598 = vst [vmem:[%s22292_s7 + $0x88] sm:$0xff] %v12514_v61  ;;  %v12529_v38 = vadd.f32 %v21847_v58, %v21642_v12  ;;  %v12530_v28 = vadd.f32 %v21841_v42, %v21678_v51  ;;  %v12531_v7 = vadd.f32 %v21844_v1, %v21646_v32  ;;  %v23243_v51 = vld [vmem:[#allocation12_spill] sm:$0xff]  ;;  %v23255_v63 = vld [vmem:[#allocation18_spill] sm:$0xff] }
 0x7e1   :  { %12599 = vst [vmem:[%s22292_s7 + $0x90] sm:$0xff] %v12515_v39  ;;  %12600 = vst [vmem:[%s22292_s7 + $0x98] sm:$0xff] %v12516_v2  ;;  %v12532_v31 = vadd.f32 %v21847_v58, %v21654_v3  ;;  %v12533_v55 = vadd.f32 %v21841_v42, %v21694_v15  ;;  %v12534_v12 = vadd.f32 %v21844_v1, %v21658_v8  ;;  %v23244_v15 = vld [vmem:[#allocation66_spill] sm:$0xff]  ;;  %v23256_v39 = vld [vmem:[#allocation44_spill] sm:$0xff] }
 0x7e2   :  { %12601 = vst [vmem:[%s22292_s7 + $0xa0] sm:$0xff] %v12517_v23  ;;  %12602 = vst [vmem:[%s22292_s7 + $0xa8] sm:$0xff] %v12518_v36  ;;  %v12535_v32 = vadd.f32 %v21847_v58, %v21662_v22  ;;  %v12536_v49 = vadd.f32 %v21841_v42, %v21710_v37  ;;  %v12537_v3 = vadd.f32 %v21844_v1, %v21670_v47  ;;  %v23257_v23 = vld [vmem:[#allocation72_spill] sm:$0xff] }
 0x7e3   :  { %12603 = vst [vmem:[%s22292_s7 + $0xb0] sm:$0xff] %v12519_v14  ;;  %12604 = vst [vmem:[%s22292_s7 + $0xb8] sm:$0xff] %v12520_v50  ;;  %v12538_v8 = vadd.f32 %v21847_v58, %v21674_v19  ;;  %v12539_v22 = vadd.f32 %v21841_v42, %v21714_v59  ;;  %v12540_v33 = vadd.f32 %v21844_v1, %v21682_v4  ;;  %v23258_v14 = vld [vmem:[#allocation20_spill] sm:$0xff] }
 0x7e4   :  { %12605 = vst [vmem:[%s22292_s7 + $0xc0] sm:$0xff] %v12521_v54  ;;  %12606 = vst [vmem:[%s22292_s7 + $0xc8] sm:$0xff] %v12522_v6  ;;  %v12541_v47 = vadd.f32 %v21847_v58, %v21686_v56  ;;  %v12542_v19 = vadd.f32 %v21841_v42, %v21726_v35  ;;  %v12543_v4 = vadd.f32 %v21844_v1, %v23243_v51  ;;  %v23245_v56 = vld [vmem:[#allocation43_spill] sm:$0xff]  ;;  %v23246_v35 = vld [vmem:[#allocation33_spill] sm:$0xff] }
 0x7e5   :  { %12607 = vst [vmem:[%s22292_s7 + $0xd0] sm:$0xff] %v12523_v26  ;;  %12608 = vst [vmem:[%s22292_s7 + $0xd8] sm:$0xff] %v12524_v9  ;;  %v12544_v37 = vadd.f32 %v21847_v58, %v23244_v15  ;;  %v12545_v59 = vadd.f32 %v21841_v42, %v23245_v56  ;;  %v12546_v0 = vadd.f32 %v21844_v1, %v23246_v35  ;;  %v23259_v54 = vld [vmem:[#allocation22_spill] sm:$0xff] }
 0x7e6   :  { %12609 = vst [vmem:[%s22292_s7 + $0xe0] sm:$0xff] %v12525_v24  ;;  %12610 = vst [vmem:[%s22292_s7 + $0xe8] sm:$0xff] %v12526_v11  ;;  %v12547_v13 = vadd.f32 %v21847_v58, %v23247_v60  ;;  %v12548_v48 = vadd.f32 %v21841_v42, %v23248_v46  ;;  %v12549_v43 = vadd.f32 %v21844_v1, %v23249_v41  ;;  %v23260_v26 = vld [vmem:[#allocation34_spill] sm:$0xff]  ;;  %v23261_v24 = vld [vmem:[#allocation24_spill] sm:$0xff] }
 0x7e7   :  { %12611 = vst [vmem:[%s22292_s7 + $0xf0] sm:$0xff] %v12527_v27  ;;  %12612 = vst [vmem:[%s22292_s7 + $0xf8] sm:$0xff] %v12528_v40  ;;  %v12550_v25 = vadd.f32 %v21847_v58, %v23250_v30  ;;  %v12551_v45 = vadd.f32 %v21841_v42, %v23251_v10  ;;  %v12552_v21 = vadd.f32 %v21844_v1, %v23252_v17  ;;  %v23262_v27 = vld [vmem:[#allocation26_spill] sm:$0xff]  ;;  %v23273_v60 = vld [vmem:[#allocation51_spill] sm:$0xff] }
 0x7e8   :  { %12613 = vst [vmem:[%s22292_s7 + $0x100] sm:$0xff] %v12529_v38  ;;  %12614 = vst [vmem:[%s22292_s7 + $0x108] sm:$0xff] %v12530_v28  ;;  %v12553_v18 = vadd.f32 %v21847_v58, %v23253_v62  ;;  %v12554_v57 = vadd.f32 %v21841_v42, %v23254_v52  ;;  %v12555_v61 = vadd.f32 %v21844_v1, %v23255_v63  ;;  %v23263_v38 = vld [vmem:[#allocation9_spill] sm:$0xff] }
 0x7e9   :  { %12615 = vst [vmem:[%s22292_s7 + $0x110] sm:$0xff] %v12531_v7  ;;  %12616 = vst [vmem:[%s22292_s7 + $0x118] sm:$0xff] %v12532_v31  ;;  %v12556_v2 = vadd.f32 %v21847_v58, %v23256_v39  ;;  %v12557_v36 = vadd.f32 %v21841_v42, %v23257_v23  ;;  %v12558_v50 = vadd.f32 %v21844_v1, %v23258_v14  ;;  %v23264_v7 = vld [vmem:[#allocation48_spill] sm:$0xff] }
 0x7ea   :  { %12617 = vst [vmem:[%s22292_s7 + $0x120] sm:$0xff] %v12533_v55  ;;  %12618 = vst [vmem:[%s22292_s7 + $0x128] sm:$0xff] %v12534_v12  ;;  %v12559_v6 = vadd.f32 %v21847_v58, %v23259_v54  ;;  %v12560_v9 = vadd.f32 %v21841_v42, %v23260_v26  ;;  %v12561_v11 = vadd.f32 %v21844_v1, %v23261_v24  ;;  %v23265_v55 = vld [vmem:[#allocation28_spill] sm:$0xff] }
 0x7eb   :  { %12619 = vst [vmem:[%s22292_s7 + $0x130] sm:$0xff] %v12535_v32  ;;  %12620 = vst [vmem:[%s22292_s7 + $0x138] sm:$0xff] %v12536_v49  ;;  %v12562_v40 = vadd.f32 %v21847_v58, %v23262_v27  ;;  %v12563_v28 = vadd.f32 %v21841_v42, %v23263_v38  ;;  %v12564_v31 = vadd.f32 %v21844_v1, %v23264_v7  ;;  %v23266_v49 = vld [vmem:[#allocation30_spill] sm:$0xff] }
 0x7ec   :  { %12621 = vst [vmem:[%s22292_s7 + $0x140] sm:$0xff] %v12537_v3  ;;  %12622 = vst [vmem:[%s22292_s7 + $0x148] sm:$0xff] %v12538_v8  ;;  %v12565_v12 = vadd.f32 %v21847_v58, %v23265_v55  ;;  %v12566_v32 = vadd.f32 %v21841_v42, %v21822_v44  ;;  %v12567_v3 = vadd.f32 %v21844_v1, %v23266_v49  ;;  %v23267_v8 = vld [vmem:[#allocation69_spill] sm:$0xff] }
 0x7ed   :  { %12623 = vst [vmem:[%s22292_s7 + $0x150] sm:$0xff] %v12539_v22  ;;  %12624 = vst [vmem:[%s22292_s7 + $0x158] sm:$0xff] %v12540_v33  ;;  %v12568_v22 = vadd.f32 %v21847_v58, %v23267_v8  ;;  %v12569_v44 = vadd.f32 %v21841_v42, %v21851_v53  ;;  %v23268_v33 = vld [vmem:[#allocation70_spill] sm:$0xff]  ;;  %v23270_v53 = vld [vmem:[#allocation39_spill] sm:$0xff]  ;;  %v12575_v56 = vadd.f32 %v21841_v42, %v21859_v5 }
 0x7ee   :  { %12625 = vst [vmem:[%s22292_s7 + $0x160] sm:$0xff] %v12541_v47  ;;  %12626 = vst [vmem:[%s22292_s7 + $0x168] sm:$0xff] %v12542_v19  ;;  %v12570_v47 = vadd.f32 %v21844_v1, %v23268_v33  ;;  %v23269_v19 = vld [vmem:[#allocation71_spill] sm:$0xff]  ;;  %v12573_v15 = vadd.f32 %v21844_v1, %v23270_v53  ;;  %v23272_v5 = vld [vmem:[#allocation42_spill] sm:$0xff] }
 0x7ef   :  { %12627 = vst [vmem:[%s22292_s7 + $0x170] sm:$0xff] %v12543_v4  ;;  %12628 = vst [vmem:[%s22292_s7 + $0x178] sm:$0xff] %v12544_v37  ;;  %v12571_v51 = vadd.f32 %v21847_v58, %v23269_v19  ;;  %v12572_v4 = vadd.f32 %v21841_v42, %v21855_v34  ;;  %v23271_v34 = vld [vmem:[#allocation32_spill] sm:$0xff]  ;;  %v12577_v35 = vadd.f32 %v21847_v58, %v23272_v5 }
 0x7f0   :  { %12629 = vst [vmem:[%s22292_s7 + $0x180] sm:$0xff] %v12545_v59  ;;  %12630 = vst [vmem:[%s22292_s7 + $0x188] sm:$0xff] %v12546_v0  ;;  %v12574_v37 = vadd.f32 %v21847_v58, %v23271_v34  ;;  %v12576_v59 = vadd.f32 %v21844_v1, %v21826_v29  ;;  %v12578_v29 = vadd.f32 %v21841_v42, %v21863_v20 }
 0x7f1   :  { %12631 = vst [vmem:[%s22292_s7 + $0x190] sm:$0xff] %v12547_v13  ;;  %12632 = vst [vmem:[%s22292_s7 + $0x198] sm:$0xff] %v12548_v48  ;;  %v12579_v0 = vadd.f32 %v21844_v1, %v21834_v16  ;;  %v12580_v13 = vadd.f32 %v21847_v58, %v23273_v60 }
 0x7f2   :  { %12633 = vst [vmem:[%s22292_s7 + $0x1a0] sm:$0xff] %v12549_v43  ;;  %12634 = vst [vmem:[%s22292_s7 + $0x1a8] sm:$0xff] %v12550_v25 }
 0x7f3   :  { %12635 = vst [vmem:[%s22292_s7 + $0x1b0] sm:$0xff] %v12551_v45  ;;  %12636 = vst [vmem:[%s22292_s7 + $0x1b8] sm:$0xff] %v12552_v21 }
 0x7f4   :  { %12637 = vst [vmem:[%s22292_s7 + $0x1c0] sm:$0xff] %v12553_v18  ;;  %12638 = vst [vmem:[%s22292_s7 + $0x1c8] sm:$0xff] %v12554_v57 }
 0x7f5   :  { %12639 = vst [vmem:[%s22292_s7 + $0x1d0] sm:$0xff] %v12555_v61  ;;  %12640 = vst [vmem:[%s22292_s7 + $0x1d8] sm:$0xff] %v12556_v2 }
 0x7f6   :  { %12641 = vst [vmem:[%s22292_s7 + $0x1e0] sm:$0xff] %v12557_v36  ;;  %12642 = vst [vmem:[%s22292_s7 + $0x1e8] sm:$0xff] %v12558_v50 }
 0x7f7   :  { %12643 = vst [vmem:[%s22292_s7 + $0x1f0] sm:$0xff] %v12559_v6  ;;  %12644 = vst [vmem:[%s22292_s7 + $0x1f8] sm:$0xff] %v12560_v9 }
 0x7f8   :  { %12645 = vst [vmem:[%s22292_s7 + $0x200] sm:$0xff] %v12561_v11  ;;  %12646 = vst [vmem:[%s22292_s7 + $0x208] sm:$0xff] %v12562_v40 }
 0x7f9   :  { %12647 = vst [vmem:[%s22292_s7 + $0x210] sm:$0xff] %v12563_v28  ;;  %12648 = vst [vmem:[%s22292_s7 + $0x218] sm:$0xff] %v12564_v31 }
 0x7fa   :  { %12649 = vst [vmem:[%s22292_s7 + $0x220] sm:$0xff] %v12565_v12  ;;  %12650 = vst [vmem:[%s22292_s7 + $0x228] sm:$0xff] %v12566_v32 }
 0x7fb   :  { %12651 = vst [vmem:[%s22292_s7 + $0x230] sm:$0xff] %v12567_v3  ;;  %12652 = vst [vmem:[%s22292_s7 + $0x238] sm:$0xff] %v12568_v22 }
 0x7fc   :  { %12653 = vst [vmem:[%s22292_s7 + $0x240] sm:$0xff] %v12569_v44  ;;  %12654 = vst [vmem:[%s22292_s7 + $0x248] sm:$0xff] %v12570_v47 }
 0x7fd   :  { %12655 = vst [vmem:[%s22292_s7 + $0x250] sm:$0xff] %v12571_v51  ;;  %12656 = vst [vmem:[%s22292_s7 + $0x258] sm:$0xff] %v12572_v4 }
 0x7fe   :  { %12657 = vst [vmem:[%s22292_s7 + $0x260] sm:$0xff] %v12573_v15  ;;  %12658 = vst [vmem:[%s22292_s7 + $0x268] sm:$0xff] %v12574_v37 }
 0x7ff   :  { %12659 = vst [vmem:[%s22292_s7 + $0x270] sm:$0xff] %v12575_v56  ;;  %12660 = vst [vmem:[%s22292_s7 + $0x278] sm:$0xff] %v12576_v59 }
 0x800   :  { %12661 = vst [vmem:[%s22292_s7 + $0x280] sm:$0xff] %v12577_v35  ;;  %12662 = vst [vmem:[%s22292_s7 + $0x288] sm:$0xff] %v12578_v29 }
 0x801   :  { %12663 = vst [vmem:[%s22292_s7 + $0x290] sm:$0xff] %v12579_v0  ;;  %12664 = vst [vmem:[%s22292_s7 + $0x298] sm:$0xff] %v12580_v13 }

</bundles_post_ra>
